<compile_context>
chip_gen: v5e
topology: v5e:2x2
jax: 0.10.0
libtpu: 0.0.40
codegen_flags: <defaults>
</compile_context>

<pallas_src>
import functools

import jax
import jax.numpy as jnp
from jax.experimental import pallas as pl
from jax.experimental.pallas import tpu as pltpu

BN_EPS = 1e-5
LANE = 128
VMEM_LIMIT = 48 * 1024 * 1024


def _rup(v, m):
    return (v + m - 1) // m * m


def _pad_to(a, shape):
    return jnp.pad(a, [(0, t - s) for s, t in zip(a.shape, shape)])


def _choose_tm(m):
    for tm in (1024, 512, 256):
        if m >= 2 * tm:              # at least 2 grid steps -> pipelining +
            return tm                # megacore sharding on v7x
    return 256


# ---------------------------------------------------------------------------
# Kernel 1: 1x1-conv statistics pass.
# Each M-tile computes y = x @ w (bf16 MXU, f32 accum) and emits an 8-row
# block [sum; sum_sq; 0...] so the wrapper can form global batch statistics.
# Grid over M tiles is fully independent -> "parallel".
# ---------------------------------------------------------------------------
def _pw_stats_kernel(x_ref, w_ref, o_ref):
    y = jnp.dot(x_ref[...], w_ref[...], preferred_element_type=jnp.float32)
    c = y.shape[1]
    s = jnp.sum(y, axis=0, keepdims=True)
    ss = jnp.sum(y * y, axis=0, keepdims=True)
    row = jax.lax.broadcasted_iota(jnp.int32, (8, c), 0)
    o_ref[...] = jnp.where(row == 0, jnp.broadcast_to(s, (8, c)),
                           jnp.where(row == 1, jnp.broadcast_to(ss, (8, c)),
                                     0.0))


def pw_stats(x2d, w, *, tm):
    mp, cin = x2d.shape
    cout = w.shape[1]
    nt = mp // tm
    cost = pl.CostEstimate(
        flops=2 * mp * cin * cout,
        transcendentals=0,
        bytes_accessed=mp * cin * 2 + cin * cout * 2 + nt * 8 * cout * 4)
    return pl.pallas_call(
        _pw_stats_kernel,
        out_shape=jax.ShapeDtypeStruct((nt * 8, cout), jnp.float32),
        grid=(nt,),
        in_specs=[pl.BlockSpec((tm, cin), lambda i: (i, 0)),
                  pl.BlockSpec((cin, cout), lambda i: (0, 0))],
        out_specs=pl.BlockSpec((8, cout), lambda i: (i, 0)),
        compiler_params=pltpu.CompilerParams(
            dimension_semantics=("parallel",),
            vmem_limit_bytes=VMEM_LIMIT),
        cost_estimate=cost,
    )(x2d, w)


def _finalize_bn(stats, m_real, gamma, beta):
    # Tiny (num_tiles, 8, C) reduction + per-channel affine -> plain JAX glue.
    st = stats.reshape(-1, 8, stats.shape[-1])
    s = jnp.sum(st[:, 0, :], axis=0)
    ss = jnp.sum(st[:, 1, :], axis=0)
    mu = s / m_real
    var = jnp.maximum(ss / m_real - mu * mu, 0.0)
    scale = gamma.reshape(-1) * jax.lax.rsqrt(var + BN_EPS)
    shift = beta.reshape(-1) - mu * scale
    return scale.reshape(1, -1), shift.reshape(1, -1)


# ---------------------------------------------------------------------------
# Kernel 2: fused  [1x1 expand -> BN(scale,shift) -> swish] -> dense KxK conv
# (+bias) -> Squeeze-Excite (pool / FC / ReLU / FC / sigmoid / rescale).
# One image per grid step ('parallel' over N -> both v7x cores busy).  The
# expanded activation lives only in VMEM: no HBM round trip, no HBM jnp.pad of
# the wide tensor (the input is spatially padded at Cin width only and the
# border is masked back to zero after BN+swish).
# TODO(synk): row-strip (halo) tiling over H for very large H*W*Cexp, and the
# stride-2 downsize path, are not implemented.
# ---------------------------------------------------------------------------
def _fused_conv_se_kernel(x_ref, w1_ref, s1_ref, t1_ref, wk_ref, bk_ref,
                          f1w_ref, f1b_ref, f2w_ref, f2b_ref, o_ref,
                          *, k, H, W, use_se):
    p = k // 2
    Hp, Wp = H + 2 * p, W + 2 * p
    C = wk_ref.shape[-1]
    cin = x_ref.shape[-1]

    # 1x1 expand conv (recompute; global batch stats precomputed by pw_stats),
    # BN affine + swish in f32, computed over the padded image then masked so
    # the KxK conv sees true zero padding.
    xp = x_ref[0].reshape(Hp * Wp, cin)
    y = jnp.dot(xp, w1_ref[...], preferred_element_type=jnp.float32)
    y = y * s1_ref[...] + t1_ref[...]
    y = y * jax.nn.sigmoid(y)
    y = y.reshape(Hp, Wp, C)
    rows = jax.lax.broadcasted_iota(jnp.int32, (Hp, Wp, C), 0)
    cols = jax.lax.broadcasted_iota(jnp.int32, (Hp, Wp, C), 1)
    inside = (rows >= p) & (rows < p + H) & (cols >= p) & (cols < p + W)
    yp = jnp.where(inside, y, 0.0).astype(jnp.bfloat16)   # bf16 MXU feed

    # Dense KxK conv (stride 1, "same") as k*k shifted matmuls, f32 accum.
    acc = jnp.zeros((H * W, C), jnp.float32)
    for kh in range(k):
        for kw in range(k):
            patch = yp[kh:kh + H, kw:kw + W, :].reshape(H * W, C)
            acc = acc + jnp.dot(patch, wk_ref[kh, kw],
                                preferred_element_type=jnp.float32)
    acc = acc + bk_ref[...]

    if use_se:
        pooled = jnp.mean(acc, axis=0, keepdims=True)          # (1, C)
        h = jnp.maximum(
            jnp.dot(pooled, f1w_ref[...],
                    preferred_element_type=jnp.float32) + f1b_ref[...], 0.0)
        r = jax.nn.sigmoid(
            jnp.dot(h, f2w_ref[...],
                    preferred_element_type=jnp.float32) + f2b_ref[...])
        acc = acc * r                                          # rescale

    o_ref[0] = acc.reshape(H, W, C).astype(o_ref.dtype)


def fused_conv_se(x_sp, w1, s1, t1, wk, bk, f1w, f1b, f2w, f2b, *, k, use_se):
    N, Hp, Wp, cin = x_sp.shape
    p = k // 2
    H, W = Hp - 2 * p, Wp - 2 * p
    C = wk.shape[-1]
    cr = f1w.shape[1]
    kernel = functools.partial(_fused_conv_se_kernel, k=k, H=H, W=W,
                               use_se=use_se)
    cost = pl.CostEstimate(
        flops=2 * N * (Hp * Wp * cin * C + k * k * H * W * C * C
                       + 2 * C * cr),
        transcendentals=N * (Hp * Wp * C + C),
        bytes_accessed=(N * (Hp * Wp * cin + H * W * C) * 2
                        + (cin * C + k * k * C * C) * 2
                        + 2 * C * cr * 4 + 6 * C * 4))
    return pl.pallas_call(
        kernel,
        out_shape=jax.ShapeDtypeStruct((N, H, W, C), jnp.bfloat16),
        grid=(N,),
        in_specs=[
            pl.BlockSpec((1, Hp, Wp, cin), lambda n: (n, 0, 0, 0)),
            pl.BlockSpec((cin, C), lambda n: (0, 0)),
            pl.BlockSpec((1, C), lambda n: (0, 0)),
            pl.BlockSpec((1, C), lambda n: (0, 0)),
            pl.BlockSpec((k, k, C, C), lambda n: (0, 0, 0, 0)),
            pl.BlockSpec((1, C), lambda n: (0, 0)),
            pl.BlockSpec((C, cr), lambda n: (0, 0)),
            pl.BlockSpec((1, cr), lambda n: (0, 0)),
            pl.BlockSpec((cr, C), lambda n: (0, 0)),
            pl.BlockSpec((1, C), lambda n: (0, 0)),
        ],
        out_specs=pl.BlockSpec((1, H, W, C), lambda n: (n, 0, 0, 0)),
        compiler_params=pltpu.CompilerParams(
            dimension_semantics=("parallel",),
            vmem_limit_bytes=VMEM_LIMIT),
        cost_estimate=cost,
    )(x_sp, w1, s1, t1, wk, bk, f1w, f1b, f2w, f2b)


# ---------------------------------------------------------------------------
# Kernel 3: 1x1 conv + BN apply (+ optional swish / residual), tiled over M.
# ---------------------------------------------------------------------------
def _pw_apply_kernel(x_ref, w_ref, s_ref, t_ref, o_ref, *, swish):
    y = jnp.dot(x_ref[...], w_ref[...], preferred_element_type=jnp.float32)
    y = y * s_ref[...] + t_ref[...]
    if swish:
        y = y * jax.nn.sigmoid(y)
    o_ref[...] = y.astype(o_ref.dtype)


def _pw_apply_res_kernel(x_ref, w_ref, s_ref, t_ref, r_ref, o_ref):
    y = jnp.dot(x_ref[...], w_ref[...], preferred_element_type=jnp.float32)
    y = y * s_ref[...] + t_ref[...] + r_ref[...].astype(jnp.float32)
    o_ref[...] = y.astype(o_ref.dtype)


def pw_apply(x2d, w, scale, shift, *, tm, swish=False, res2d=None,
             out_dtype=jnp.float32):
    mp, cin = x2d.shape
    cout = w.shape[1]
    nt = mp // tm
    vec_spec = pl.BlockSpec((1, cout), lambda i: (0, 0))
    in_specs = [pl.BlockSpec((tm, cin), lambda i: (i, 0)),
                pl.BlockSpec((cin, cout), lambda i: (0, 0)),
                vec_spec, vec_spec]
    args = [x2d, w, scale, shift]
    bytes_accessed = mp * cin * 2 + cin * cout * 2 + mp * cout * 4
    if res2d is None:
        kernel = functools.partial(_pw_apply_kernel, swish=swish)
    else:
        kernel = _pw_apply_res_kernel
        in_specs.append(pl.BlockSpec((tm, cout), lambda i: (i, 0)))
        args.append(res2d)
        bytes_accessed += mp * cout * 4
    cost = pl.CostEstimate(flops=2 * mp * cin * cout,
                           transcendentals=(mp * cout if swish else 0),
                           bytes_accessed=bytes_accessed)
    return pl.pallas_call(
        kernel,
        out_shape=jax.ShapeDtypeStruct((mp, cout), out_dtype),
        grid=(nt,),
        in_specs=in_specs,
        out_specs=pl.BlockSpec((tm, cout), lambda i: (i, 0)),
        compiler_params=pltpu.CompilerParams(
            dimension_semantics=("parallel",),
            vmem_limit_bytes=VMEM_LIMIT),
        cost_estimate=cost,
    )(*args)


# ---------------------------------------------------------------------------
# MBConv forward
# ---------------------------------------------------------------------------
def mbconv_forward(x_nchw, params, *, expand_ratio, kernel_size,
                   downsize=False, se=True):
    # TODO(synk): stride-2 (downsize=True) dw_conv path not implemented.
    assert not downsize, "downsize (stride-2) path not implemented"
    N, cin, H, W = x_nchw.shape
    cexp = cin * expand_ratio
    cout = params["w2"].shape[1]
    k = kernel_size
    p = k // 2
    Hp, Wp = H + 2 * p, W + 2 * p

    cin_p, cexp_p, cout_p = _rup(cin, LANE), _rup(cexp, LANE), _rup(cout, LANE)

    # ---- pad parameters to lane-dense shapes (zero padding -> exact) ----
    w1 = _pad_to(params["w1"], (cin_p, cexp_p)).astype(jnp.bfloat16)
    g1 = _pad_to(params["bn1_gamma"], (1, cexp_p))
    b1 = _pad_to(params["bn1_beta"], (1, cexp_p))
    wk = _pad_to(params["wk"], (k, k, cexp_p, cexp_p)).astype(jnp.bfloat16)
    bk = _pad_to(params["bk"], (1, cexp_p))
    w2 = _pad_to(params["w2"], (cexp_p, cout_p)).astype(jnp.bfloat16)
    g2 = _pad_to(params["bn2_gamma"], (1, cout_p))
    b2 = _pad_to(params["bn2_beta"], (1, cout_p))
    if se:
        cr_p = _rup(params["fc1_w"].shape[1], LANE)
        f1w = _pad_to(params["fc1_w"], (cexp_p, cr_p))
        f1b = _pad_to(params["fc1_b"], (1, cr_p))
        f2w = _pad_to(params["fc2_w"], (cr_p, cexp_p))
        f2b = _pad_to(params["fc2_b"], (1, cexp_p))
    else:
        cr_p = LANE
        f1w = jnp.zeros((cexp_p, cr_p), jnp.float32)
        f1b = jnp.zeros((1, cr_p), jnp.float32)
        f2w = jnp.zeros((cr_p, cexp_p), jnp.float32)
        f2b = jnp.zeros((1, cexp_p), jnp.float32)

    # ---- activations: NHWC, channel- and spatially-padded, bf16 ----
    x_nhwc = jnp.transpose(x_nchw, (0, 2, 3, 1))
    x_sp = jnp.pad(x_nhwc, ((0, 0), (p, p), (p, p), (0, cin_p - cin))
                   ).astype(jnp.bfloat16)                    # (N,Hp,Wp,cin_p)

    M = N * H * W

    # block1 stats (zero-padded border/rows contribute nothing to the sums).
    m1 = N * Hp * Wp
    tm1 = _choose_tm(m1)
    x1_2d = _pad_to(x_sp.reshape(m1, cin_p), (_rup(m1, tm1), cin_p))
    s1, t1 = _finalize_bn(pw_stats(x1_2d, w1, tm=tm1), M, g1, b1)

    # fused: 1x1 expand + BN + swish -> dense KxK conv(+bias) -> SE.
    y3 = fused_conv_se(x_sp, w1, s1, t1, wk, bk, f1w, f1b, f2w, f2b,
                       k=k, use_se=se)                       # (N,H,W,cexp_p)

    # block2: 1x1 conv + BN (batch stats), then residual if applicable.
    tm2 = _choose_tm(M)
    mp2 = _rup(M, tm2)
    y3_2d = _pad_to(y3.reshape(M, cexp_p), (mp2, cexp_p))
    s2, t2 = _finalize_bn(pw_stats(y3_2d, w2, tm=tm2), M, g2, b2)

    use_res = (cin == cout) and (not downsize)
    res2d = None
    if use_res:
        x_res = jnp.pad(x_nhwc, ((0, 0), (0, 0), (0, 0), (0, cout_p - cin)))
        res2d = _pad_to(x_res.reshape(M, cout_p), (mp2, cout_p))
    z2d = pw_apply(y3_2d, w2, s2, t2, tm=tm2, swish=False, res2d=res2d,
                   out_dtype=x_nchw.dtype)

    z = z2d[:M, :cout].reshape(N, H, W, cout)
    return jnp.transpose(z, (0, 3, 1, 2))                    # back to NCHW


def init_params(key, inc, outc, expand_ratio, kernel_size):
    cexp = inc * expand_ratio
    cr = cexp // 4
    ks = jax.random.split(key, 10)

    def nrm(k, shape, scale=0.1):
        return scale * jax.random.normal(k, shape, jnp.float32)

    return dict(
        # block1: conv1x1 weight stored as [Cin, Cexp] (matmul layout)
        w1=nrm(ks[0], (inc, cexp)),
        bn1_gamma=1.0 + nrm(ks[1], (1, cexp)),
        bn1_beta=nrm(ks[2], (1, cexp)),
        # dw_conv (dense in the reference module): [k, k, Cexp, Cexp], bias [1, Cexp]
        wk=nrm(ks[3], (kernel_size, kernel_size, cexp, cexp)),
        bk=nrm(ks[4], (1, cexp)),
        # SE: fc weights stored as [in, out]
        fc1_w=nrm(ks[5], (cexp, cr)),
        fc1_b=nrm(ks[6], (1, cr)),
        fc2_w=nrm(ks[7], (cr, cexp)),
        fc2_b=nrm(ks[8], (1, cexp)),
        # block2: conv1x1 weight [Cexp, Cout], BN at PyTorch defaults
        w2=nrm(ks[9], (cexp, outc)),
        bn2_gamma=jnp.ones((1, outc), jnp.float32),
        bn2_beta=jnp.zeros((1, outc), jnp.float32),
    )


if __name__ == "__main__":
    key = jax.random.PRNGKey(0)
    kx, kp = jax.random.split(key)

    N, inc, H, W = 2, 4, 16, 16
    outc, expand_ratio, kernel_size = 4, 2, 3

    x = jax.random.uniform(kx, (N, inc, H, W), jnp.float32)   # NCHW like PyTorch
    params = init_params(kp, inc, outc, expand_ratio, kernel_size)

    fwd = jax.jit(functools.partial(mbconv_forward,
                                    expand_ratio=expand_ratio,
                                    kernel_size=kernel_size,
                                    downsize=False, se=True))
    out = jax.block_until_ready(fwd(x, params))
    assert out.shape == (N, outc, H, W), out.shape
    assert bool(jnp.all(jnp.isfinite(out)))
    print("KERNEL_OK")
</pallas_src>

<mosaic_0001>
module attributes {stable_mosaic.version = 11 : i64} {
  func.func @_pw_stats_kernel(%arg0: i32, %arg1: memref<256x128xbf16, #tpu.memory_space<vmem>>, %arg2: memref<128x128xbf16, #tpu.memory_space<vmem>>, %arg3: memref<8x128xf32, #tpu.memory_space<vmem>>) attributes {dimension_semantics = [#tpu.dimension_semantics<parallel>], iteration_bounds = array<i64: 3>, scalar_prefetch = 0 : i64, scratch_operands = 0 : i64, tpu.core_type = #tpu.core_type<tc>, window_params = [{transform_indices = @transform_0, window_bounds = array<i64: 256, 128>}, {pipeline_mode = #tpu.pipeline_mode<synchronous>, transform_indices = @transform_1, window_bounds = array<i64: 128, 128>}, {transform_indices = @transform_2, window_bounds = array<i64: 8, 128>}]} {
    %c0 = arith.constant 0 : index
    %c0_0 = arith.constant 0 : index
    %0 = vector.load %arg1[%c0, %c0_0] : memref<256x128xbf16, #tpu.memory_space<vmem>>, vector<256x128xbf16>
    %c0_1 = arith.constant 0 : index
    %c0_2 = arith.constant 0 : index
    %1 = vector.load %arg2[%c0_1, %c0_2] : memref<128x128xbf16, #tpu.memory_space<vmem>>, vector<128x128xbf16>
    %cst = arith.constant dense<0.000000e+00> : vector<256x128xf32>
    %2 = tpu.matmul %0, %1, %cst {dimension_numbers = #tpu.dot_dimension_numbers<[1], [0], [0], [1], [0, 0, 1, 1], [], []>} : vector<256x128xbf16>, vector<128x128xbf16>, vector<256x128xf32> -> vector<256x128xf32>
    %cst_3 = arith.constant dense<0.000000e+00> : vector<128xf32>
    %3 = vector.multi_reduction <add>, %2, %cst_3 [0] : vector<256x128xf32> to vector<128xf32>
    %4 = vector.shape_cast %3 : vector<128xf32> to vector<1x128xf32>
    %5 = arith.mulf %2, %2 : vector<256x128xf32>
    %cst_4 = arith.constant dense<0.000000e+00> : vector<128xf32>
    %6 = vector.multi_reduction <add>, %5, %cst_4 [0] : vector<256x128xf32> to vector<128xf32>
    %7 = vector.shape_cast %6 : vector<128xf32> to vector<1x128xf32>
    %8 = tpu.iota {dimensions = array<i32: 0>} : vector<8x128xi32>
    %c0_i32 = arith.constant 0 : i32
    %9 = vector.broadcast %c0_i32 : i32 to vector<8x128xi32>
    %10 = arith.cmpi eq, %8, %9 : vector<8x128xi32>
    %11 = vector.shape_cast %4 : vector<1x128xf32> to vector<1x128xf32>
    %12 = vector.broadcast %11 : vector<1x128xf32> to vector<8x128xf32>
    %c1_i32 = arith.constant 1 : i32
    %13 = vector.broadcast %c1_i32 : i32 to vector<8x128xi32>
    %14 = arith.cmpi eq, %8, %13 : vector<8x128xi32>
    %15 = vector.shape_cast %7 : vector<1x128xf32> to vector<1x128xf32>
    %16 = vector.broadcast %15 : vector<1x128xf32> to vector<8x128xf32>
    %cst_5 = arith.constant 0.000000e+00 : f32
    %17 = vector.broadcast %cst_5 : f32 to vector<8x128xf32>
    %18 = arith.select %14, %16, %17 : vector<8x128xi1>, vector<8x128xf32>
    %19 = arith.select %10, %12, %18 : vector<8x128xi1>, vector<8x128xf32>
    %c0_6 = arith.constant 0 : index
    %c0_7 = arith.constant 0 : index
    %20 = vector.load %arg3[%c0_6, %c0_7] : memref<8x128xf32, #tpu.memory_space<vmem>>, vector<8x128xf32>
    tpu.vector_store %arg3[%c0_6, %c0_7], %19 {strides = array<i32>} : memref<8x128xf32, #tpu.memory_space<vmem>>, vector<8x128xf32>,
    return
  }
  func.func @transform_0(%arg0: i32) -> (i32, i32) {
    %c0_i32 = arith.constant 0 : i32
    %c0_i32_0 = arith.constant 0 : i32
    return %arg0, %c0_i32 : i32, i32
  }
  func.func @transform_1(%arg0: i32) -> (i32, i32) {
    %c0_i32 = arith.constant 0 : i32
    %c0_i32_0 = arith.constant 0 : i32
    %c0_i32_1 = arith.constant 0 : i32
    return %c0_i32, %c0_i32_0 : i32, i32
  }
  func.func @transform_2(%arg0: i32) -> (i32, i32) {
    %c0_i32 = arith.constant 0 : i32
    %c0_i32_0 = arith.constant 0 : i32
    return %arg0, %c0_i32 : i32, i32
  }
}

module attributes {stable_mosaic.version = 11 : i64} {
  func.func @_fused_conv_se_kernel(%arg0: i32, %arg1: memref<1x18x18x128xbf16, #tpu.memory_space<vmem>>, %arg2: memref<128x128xbf16, #tpu.memory_space<vmem>>, %arg3: memref<1x128xf32, #tpu.memory_space<vmem>>, %arg4: memref<1x128xf32, #tpu.memory_space<vmem>>, %arg5: memref<3x3x128x128xbf16, #tpu.memory_space<vmem>>, %arg6: memref<1x128xf32, #tpu.memory_space<vmem>>, %arg7: memref<128x128xf32, #tpu.memory_space<vmem>>, %arg8: memref<1x128xf32, #tpu.memory_space<vmem>>, %arg9: memref<128x128xf32, #tpu.memory_space<vmem>>, %arg10: memref<1x128xf32, #tpu.memory_space<vmem>>, %arg11: memref<1x16x16x128xbf16, #tpu.memory_space<vmem>>) attributes {dimension_semantics = [#tpu.dimension_semantics<parallel>], iteration_bounds = array<i64: 2>, scalar_prefetch = 0 : i64, scratch_operands = 0 : i64, tpu.core_type = #tpu.core_type<tc>, window_params = [{transform_indices = @transform_0, window_bounds = array<i64: 1, 18, 18, 128>}, {pipeline_mode = #tpu.pipeline_mode<synchronous>, transform_indices = @transform_1, window_bounds = array<i64: 128, 128>}, {pipeline_mode = #tpu.pipeline_mode<synchronous>, transform_indices = @transform_2, window_bounds = array<i64: 1, 128>}, {pipeline_mode = #tpu.pipeline_mode<synchronous>, transform_indices = @transform_3, window_bounds = array<i64: 1, 128>}, {pipeline_mode = #tpu.pipeline_mode<synchronous>, transform_indices = @transform_4, window_bounds = array<i64: 3, 3, 128, 128>}, {pipeline_mode = #tpu.pipeline_mode<synchronous>, transform_indices = @transform_5, window_bounds = array<i64: 1, 128>}, {pipeline_mode = #tpu.pipeline_mode<synchronous>, transform_indices = @transform_6, window_bounds = array<i64: 128, 128>}, {pipeline_mode = #tpu.pipeline_mode<synchronous>, transform_indices = @transform_7, window_bounds = array<i64: 1, 128>}, {pipeline_mode = #tpu.pipeline_mode<synchronous>, transform_indices = @transform_8, window_bounds = array<i64: 128, 128>}, {pipeline_mode = #tpu.pipeline_mode<synchronous>, transform_indices = @transform_9, window_bounds = array<i64: 1, 128>}, {transform_indices = @transform_10, window_bounds = array<i64: 1, 16, 16, 128>}]} {
    %c0 = arith.constant 0 : index
    %c0_0 = arith.constant 0 : index
    %c0_1 = arith.constant 0 : index
    %c0_2 = arith.constant 0 : index
    %0 = vector.load %arg1[%c0, %c0_0, %c0_1, %c0_2] : memref<1x18x18x128xbf16, #tpu.memory_space<vmem>>, vector<1x18x18x128xbf16>
    %1 = vector.shape_cast %0 : vector<1x18x18x128xbf16> to vector<18x18x128xbf16>
    %2 = vector.shape_cast %1 : vector<18x18x128xbf16> to vector<324x128xbf16>
    %c0_3 = arith.constant 0 : index
    %c0_4 = arith.constant 0 : index
    %3 = vector.load %arg2[%c0_3, %c0_4] : memref<128x128xbf16, #tpu.memory_space<vmem>>, vector<128x128xbf16>
    %cst = arith.constant dense<0.000000e+00> : vector<324x128xf32>
    %4 = tpu.matmul %2, %3, %cst {dimension_numbers = #tpu.dot_dimension_numbers<[1], [0], [0], [1], [0, 0, 1, 1], [], []>} : vector<324x128xbf16>, vector<128x128xbf16>, vector<324x128xf32> -> vector<324x128xf32>
    %c0_5 = arith.constant 0 : index
    %c0_6 = arith.constant 0 : index
    %5 = vector.load %arg3[%c0_5, %c0_6] : memref<1x128xf32, #tpu.memory_space<vmem>>, vector<1x128xf32>
    %6 = vector.broadcast %5 : vector<1x128xf32> to vector<324x128xf32>
    %7 = arith.mulf %4, %6 : vector<324x128xf32>
    %c0_7 = arith.constant 0 : index
    %c0_8 = arith.constant 0 : index
    %8 = vector.load %arg4[%c0_7, %c0_8] : memref<1x128xf32, #tpu.memory_space<vmem>>, vector<1x128xf32>
    %9 = vector.broadcast %8 : vector<1x128xf32> to vector<324x128xf32>
    %10 = arith.addf %7, %9 : vector<324x128xf32>
    %11 = arith.negf %10 : vector<324x128xf32>
    %12 = math.exp %11 : vector<324x128xf32>
    %cst_9 = arith.constant 1.000000e+00 : f32
    %13 = vector.broadcast %cst_9 : f32 to vector<324x128xf32>
    %14 = arith.addf %13, %12 : vector<324x128xf32>
    %15 = arith.divf %13, %14 : vector<324x128xf32>
    %16 = arith.mulf %10, %15 : vector<324x128xf32>
    %17 = vector.shape_cast %16 : vector<324x128xf32> to vector<18x18x128xf32>
    %18 = tpu.iota {dimensions = array<i32: 0>} : vector<18x18x128xi32>
    %19 = tpu.iota {dimensions = array<i32: 1>} : vector<18x18x128xi32>
    %c1_i32 = arith.constant 1 : i32
    %20 = vector.broadcast %c1_i32 : i32 to vector<18x18x128xi32>
    %21 = arith.cmpi sge, %18, %20 : vector<18x18x128xi32>
    %c17_i32 = arith.constant 17 : i32
    %22 = vector.broadcast %c17_i32 : i32 to vector<18x18x128xi32>
    %23 = arith.cmpi slt, %18, %22 : vector<18x18x128xi32>
    %24 = arith.andi %21, %23 : vector<18x18x128xi1>
    %c1_i32_10 = arith.constant 1 : i32
    %25 = vector.broadcast %c1_i32_10 : i32 to vector<18x18x128xi32>
    %26 = arith.cmpi sge, %19, %25 : vector<18x18x128xi32>
    %27 = arith.andi %24, %26 : vector<18x18x128xi1>
    %c17_i32_11 = arith.constant 17 : i32
    %28 = vector.broadcast %c17_i32_11 : i32 to vector<18x18x128xi32>
    %29 = arith.cmpi slt, %19, %28 : vector<18x18x128xi32>
    %30 = arith.andi %27, %29 : vector<18x18x128xi1>
    %cst_12 = arith.constant 0.000000e+00 : f32
    %31 = vector.broadcast %cst_12 : f32 to vector<18x18x128xf32>
    %32 = arith.select %30, %17, %31 : vector<18x18x128xi1>, vector<18x18x128xf32>
    %33 = arith.truncf %32 : vector<18x18x128xf32> to vector<18x18x128xbf16>
    %cst_13 = arith.constant 0.000000e+00 : f32
    %34 = vector.broadcast %cst_13 : f32 to vector<256x128xf32>
    %35 = vector.extract_strided_slice %33 {offsets = [0, 0, 0], sizes = [16, 16, 128], strides = [1, 1, 1]} : vector<18x18x128xbf16> to vector<16x16x128xbf16>
    %36 = vector.shape_cast %35 : vector<16x16x128xbf16> to vector<256x128xbf16>
    %c0_14 = arith.constant 0 : index
    %c0_15 = arith.constant 0 : index
    %c0_16 = arith.constant 0 : index
    %c0_17 = arith.constant 0 : index
    %37 = vector.load %arg5[%c0_14, %c0_15, %c0_16, %c0_17] : memref<3x3x128x128xbf16, #tpu.memory_space<vmem>>, vector<1x1x128x128xbf16>
    %38 = vector.shape_cast %37 : vector<1x1x128x128xbf16> to vector<128x128xbf16>
    %cst_18 = arith.constant dense<0.000000e+00> : vector<256x128xf32>
    %39 = tpu.matmul %36, %38, %cst_18 {dimension_numbers = #tpu.dot_dimension_numbers<[1], [0], [0], [1], [0, 0, 1, 1], [], []>} : vector<256x128xbf16>, vector<128x128xbf16>, vector<256x128xf32> -> vector<256x128xf32>
    %40 = arith.addf %34, %39 : vector<256x128xf32>
    %41 = vector.extract_strided_slice %33 {offsets = [0, 1, 0], sizes = [16, 16, 128], strides = [1, 1, 1]} : vector<18x18x128xbf16> to vector<16x16x128xbf16>
    %42 = vector.shape_cast %41 : vector<16x16x128xbf16> to vector<256x128xbf16>
    %c0_19 = arith.constant 0 : index
    %c1 = arith.constant 1 : index
    %c0_20 = arith.constant 0 : index
    %c0_21 = arith.constant 0 : index
    %43 = vector.load %arg5[%c0_19, %c1, %c0_20, %c0_21] : memref<3x3x128x128xbf16, #tpu.memory_space<vmem>>, vector<1x1x128x128xbf16>
    %44 = vector.shape_cast %43 : vector<1x1x128x128xbf16> to vector<128x128xbf16>
    %cst_22 = arith.constant dense<0.000000e+00> : vector<256x128xf32>
    %45 = tpu.matmul %42, %44, %cst_22 {dimension_numbers = #tpu.dot_dimension_numbers<[1], [0], [0], [1], [0, 0, 1, 1], [], []>} : vector<256x128xbf16>, vector<128x128xbf16>, vector<256x128xf32> -> vector<256x128xf32>
    %46 = arith.addf %40, %45 : vector<256x128xf32>
    %47 = vector.extract_strided_slice %33 {offsets = [0, 2, 0], sizes = [16, 16, 128], strides = [1, 1, 1]} : vector<18x18x128xbf16> to vector<16x16x128xbf16>
    %48 = vector.shape_cast %47 : vector<16x16x128xbf16> to vector<256x128xbf16>
    %c0_23 = arith.constant 0 : index
    %c2 = arith.constant 2 : index
    %c0_24 = arith.constant 0 : index
    %c0_25 = arith.constant 0 : index
    %49 = vector.load %arg5[%c0_23, %c2, %c0_24, %c0_25] : memref<3x3x128x128xbf16, #tpu.memory_space<vmem>>, vector<1x1x128x128xbf16>
    %50 = vector.shape_cast %49 : vector<1x1x128x128xbf16> to vector<128x128xbf16>
    %cst_26 = arith.constant dense<0.000000e+00> : vector<256x128xf32>
    %51 = tpu.matmul %48, %50, %cst_26 {dimension_numbers = #tpu.dot_dimension_numbers<[1], [0], [0], [1], [0, 0, 1, 1], [], []>} : vector<256x128xbf16>, vector<128x128xbf16>, vector<256x128xf32> -> vector<256x128xf32>
    %52 = arith.addf %46, %51 : vector<256x128xf32>
    %53 = vector.extract_strided_slice %33 {offsets = [1, 0, 0], sizes = [16, 16, 128], strides = [1, 1, 1]} : vector<18x18x128xbf16> to vector<16x16x128xbf16>
    %54 = vector.shape_cast %53 : vector<16x16x128xbf16> to vector<256x128xbf16>
    %c1_27 = arith.constant 1 : index
    %c0_28 = arith.constant 0 : index
    %c0_29 = arith.constant 0 : index
    %c0_30 = arith.constant 0 : index
    %55 = vector.load %arg5[%c1_27, %c0_28, %c0_29, %c0_30] : memref<3x3x128x128xbf16, #tpu.memory_space<vmem>>, vector<1x1x128x128xbf16>
    %56 = vector.shape_cast %55 : vector<1x1x128x128xbf16> to vector<128x128xbf16>
    %cst_31 = arith.constant dense<0.000000e+00> : vector<256x128xf32>
    %57 = tpu.matmul %54, %56, %cst_31 {dimension_numbers = #tpu.dot_dimension_numbers<[1], [0], [0], [1], [0, 0, 1, 1], [], []>} : vector<256x128xbf16>, vector<128x128xbf16>, vector<256x128xf32> -> vector<256x128xf32>
    %58 = arith.addf %52, %57 : vector<256x128xf32>
    %59 = vector.extract_strided_slice %33 {offsets = [1, 1, 0], sizes = [16, 16, 128], strides = [1, 1, 1]} : vector<18x18x128xbf16> to vector<16x16x128xbf16>
    %60 = vector.shape_cast %59 : vector<16x16x128xbf16> to vector<256x128xbf16>
    %c1_32 = arith.constant 1 : index
    %c1_33 = arith.constant 1 : index
    %c0_34 = arith.constant 0 : index
    %c0_35 = arith.constant 0 : index
    %61 = vector.load %arg5[%c1_32, %c1_33, %c0_34, %c0_35] : memref<3x3x128x128xbf16, #tpu.memory_space<vmem>>, vector<1x1x128x128xbf16>
    %62 = vector.shape_cast %61 : vector<1x1x128x128xbf16> to vector<128x128xbf16>
    %cst_36 = arith.constant dense<0.000000e+00> : vector<256x128xf32>
    %63 = tpu.matmul %60, %62, %cst_36 {dimension_numbers = #tpu.dot_dimension_numbers<[1], [0], [0], [1], [0, 0, 1, 1], [], []>} : vector<256x128xbf16>, vector<128x128xbf16>, vector<256x128xf32> -> vector<256x128xf32>
    %64 = arith.addf %58, %63 : vector<256x128xf32>
    %65 = vector.extract_strided_slice %33 {offsets = [1, 2, 0], sizes = [16, 16, 128], strides = [1, 1, 1]} : vector<18x18x128xbf16> to vector<16x16x128xbf16>
    %66 = vector.shape_cast %65 : vector<16x16x128xbf16> to vector<256x128xbf16>
    %c1_37 = arith.constant 1 : index
    %c2_38 = arith.constant 2 : index
    %c0_39 = arith.constant 0 : index
    %c0_40 = arith.constant 0 : index
    %67 = vector.load %arg5[%c1_37, %c2_38, %c0_39, %c0_40] : memref<3x3x128x128xbf16, #tpu.memory_space<vmem>>, vector<1x1x128x128xbf16>
    %68 = vector.shape_cast %67 : vector<1x1x128x128xbf16> to vector<128x128xbf16>
    %cst_41 = arith.constant dense<0.000000e+00> : vector<256x128xf32>
    %69 = tpu.matmul %66, %68, %cst_41 {dimension_numbers = #tpu.dot_dimension_numbers<[1], [0], [0], [1], [0, 0, 1, 1], [], []>} : vector<256x128xbf16>, vector<128x128xbf16>, vector<256x128xf32> -> vector<256x128xf32>
    %70 = arith.addf %64, %69 : vector<256x128xf32>
    %71 = vector.extract_strided_slice %33 {offsets = [2, 0, 0], sizes = [16, 16, 128], strides = [1, 1, 1]} : vector<18x18x128xbf16> to vector<16x16x128xbf16>
    %72 = vector.shape_cast %71 : vector<16x16x128xbf16> to vector<256x128xbf16>
    %c2_42 = arith.constant 2 : index
    %c0_43 = arith.constant 0 : index
    %c0_44 = arith.constant 0 : index
    %c0_45 = arith.constant 0 : index
    %73 = vector.load %arg5[%c2_42, %c0_43, %c0_44, %c0_45] : memref<3x3x128x128xbf16, #tpu.memory_space<vmem>>, vector<1x1x128x128xbf16>
    %74 = vector.shape_cast %73 : vector<1x1x128x128xbf16> to vector<128x128xbf16>
    %cst_46 = arith.constant dense<0.000000e+00> : vector<256x128xf32>
    %75 = tpu.matmul %72, %74, %cst_46 {dimension_numbers = #tpu.dot_dimension_numbers<[1], [0], [0], [1], [0, 0, 1, 1], [], []>} : vector<256x128xbf16>, vector<128x128xbf16>, vector<256x128xf32> -> vector<256x128xf32>
    %76 = arith.addf %70, %75 : vector<256x128xf32>
    %77 = vector.extract_strided_slice %33 {offsets = [2, 1, 0], sizes = [16, 16, 128], strides = [1, 1, 1]} : vector<18x18x128xbf16> to vector<16x16x128xbf16>
    %78 = vector.shape_cast %77 : vector<16x16x128xbf16> to vector<256x128xbf16>
    %c2_47 = arith.constant 2 : index
    %c1_48 = arith.constant 1 : index
    %c0_49 = arith.constant 0 : index
    %c0_50 = arith.constant 0 : index
    %79 = vector.load %arg5[%c2_47, %c1_48, %c0_49, %c0_50] : memref<3x3x128x128xbf16, #tpu.memory_space<vmem>>, vector<1x1x128x128xbf16>
    %80 = vector.shape_cast %79 : vector<1x1x128x128xbf16> to vector<128x128xbf16>
    %cst_51 = arith.constant dense<0.000000e+00> : vector<256x128xf32>
    %81 = tpu.matmul %78, %80, %cst_51 {dimension_numbers = #tpu.dot_dimension_numbers<[1], [0], [0], [1], [0, 0, 1, 1], [], []>} : vector<256x128xbf16>, vector<128x128xbf16>, vector<256x128xf32> -> vector<256x128xf32>
    %82 = arith.addf %76, %81 : vector<256x128xf32>
    %83 = vector.extract_strided_slice %33 {offsets = [2, 2, 0], sizes = [16, 16, 128], strides = [1, 1, 1]} : vector<18x18x128xbf16> to vector<16x16x128xbf16>
    %84 = vector.shape_cast %83 : vector<16x16x128xbf16> to vector<256x128xbf16>
    %c2_52 = arith.constant 2 : index
    %c2_53 = arith.constant 2 : index
    %c0_54 = arith.constant 0 : index
    %c0_55 = arith.constant 0 : index
    %85 = vector.load %arg5[%c2_52, %c2_53, %c0_54, %c0_55] : memref<3x3x128x128xbf16, #tpu.memory_space<vmem>>, vector<1x1x128x128xbf16>
    %86 = vector.shape_cast %85 : vector<1x1x128x128xbf16> to vector<128x128xbf16>
    %cst_56 = arith.constant dense<0.000000e+00> : vector<256x128xf32>
    %87 = tpu.matmul %84, %86, %cst_56 {dimension_numbers = #tpu.dot_dimension_numbers<[1], [0], [0], [1], [0, 0, 1, 1], [], []>} : vector<256x128xbf16>, vector<128x128xbf16>, vector<256x128xf32> -> vector<256x128xf32>
    %88 = arith.addf %82, %87 : vector<256x128xf32>
    %c0_57 = arith.constant 0 : index
    %c0_58 = arith.constant 0 : index
    %89 = vector.load %arg6[%c0_57, %c0_58] : memref<1x128xf32, #tpu.memory_space<vmem>>, vector<1x128xf32>
    %90 = vector.broadcast %89 : vector<1x128xf32> to vector<256x128xf32>
    %91 = arith.addf %88, %90 : vector<256x128xf32>
    %cst_59 = arith.constant dense<0.000000e+00> : vector<128xf32>
    %92 = vector.multi_reduction <add>, %91, %cst_59 [0] : vector<256x128xf32> to vector<128xf32>
    %93 = vector.shape_cast %92 : vector<128xf32> to vector<1x128xf32>
    %cst_60 = arith.constant 2.560000e+02 : f32
    %94 = vector.broadcast %cst_60 : f32 to vector<1x128xf32>
    %95 = arith.divf %93, %94 : vector<1x128xf32>
    %c0_61 = arith.constant 0 : index
    %c0_62 = arith.constant 0 : index
    %96 = vector.load %arg7[%c0_61, %c0_62] : memref<128x128xf32, #tpu.memory_space<vmem>>, vector<128x128xf32>
    %cst_63 = arith.constant dense<0.000000e+00> : vector<1x128xf32>
    %97 = tpu.matmul %95, %96, %cst_63 {dimension_numbers = #tpu.dot_dimension_numbers<[1], [0], [0], [1], [0, 0, 1, 1], [], []>} : vector<1x128xf32>, vector<128x128xf32>, vector<1x128xf32> -> vector<1x128xf32>
    %c0_64 = arith.constant 0 : index
    %c0_65 = arith.constant 0 : index
    %98 = vector.load %arg8[%c0_64, %c0_65] : memref<1x128xf32, #tpu.memory_space<vmem>>, vector<1x128xf32>
    %99 = arith.addf %97, %98 : vector<1x128xf32>
    %cst_66 = arith.constant 0.000000e+00 : f32
    %100 = vector.broadcast %cst_66 : f32 to vector<1x128xf32>
    %101 = arith.maximumf %99, %100 : vector<1x128xf32>
    %c0_67 = arith.constant 0 : index
    %c0_68 = arith.constant 0 : index
    %102 = vector.load %arg9[%c0_67, %c0_68] : memref<128x128xf32, #tpu.memory_space<vmem>>, vector<128x128xf32>
    %cst_69 = arith.constant dense<0.000000e+00> : vector<1x128xf32>
    %103 = tpu.matmul %101, %102, %cst_69 {dimension_numbers = #tpu.dot_dimension_numbers<[1], [0], [0], [1], [0, 0, 1, 1], [], []>} : vector<1x128xf32>, vector<128x128xf32>, vector<1x128xf32> -> vector<1x128xf32>
    %c0_70 = arith.constant 0 : index
    %c0_71 = arith.constant 0 : index
    %104 = vector.load %arg10[%c0_70, %c0_71] : memref<1x128xf32, #tpu.memory_space<vmem>>, vector<1x128xf32>
    %105 = arith.addf %103, %104 : vector<1x128xf32>
    %106 = arith.negf %105 : vector<1x128xf32>
    %107 = math.exp %106 : vector<1x128xf32>
    %cst_72 = arith.constant 1.000000e+00 : f32
    %108 = vector.broadcast %cst_72 : f32 to vector<1x128xf32>
    %109 = arith.addf %108, %107 : vector<1x128xf32>
    %110 = arith.divf %108, %109 : vector<1x128xf32>
    %111 = vector.broadcast %110 : vector<1x128xf32> to vector<256x128xf32>
    %112 = arith.mulf %91, %111 : vector<256x128xf32>
    %113 = vector.shape_cast %112 : vector<256x128xf32> to vector<16x16x128xf32>
    %114 = arith.truncf %113 : vector<16x16x128xf32> to vector<16x16x128xbf16>
    %c0_73 = arith.constant 0 : index
    %c0_74 = arith.constant 0 : index
    %c0_75 = arith.constant 0 : index
    %c0_76 = arith.constant 0 : index
    %115 = vector.load %arg11[%c0_73, %c0_74, %c0_75, %c0_76] : memref<1x16x16x128xbf16, #tpu.memory_space<vmem>>, vector<1x16x16x128xbf16>
    %116 = vector.shape_cast %115 : vector<1x16x16x128xbf16> to vector<16x16x128xbf16>
    %117 = vector.shape_cast %114 : vector<16x16x128xbf16> to vector<1x16x16x128xbf16>
    tpu.vector_store %arg11[%c0_73, %c0_74, %c0_75, %c0_76], %117 {strides = array<i32>} : memref<1x16x16x128xbf16, #tpu.memory_space<vmem>>, vector<1x16x16x128xbf16>,
    return
  }
  func.func @transform_0(%arg0: i32) -> (i32, i32, i32, i32) {
    %c0_i32 = arith.constant 0 : i32
    %c0_i32_0 = arith.constant 0 : i32
    %c0_i32_1 = arith.constant 0 : i32
    %c0_i32_2 = arith.constant 0 : i32
    return %arg0, %c0_i32, %c0_i32_0, %c0_i32_1 : i32, i32, i32, i32
  }
  func.func @transform_1(%arg0: i32) -> (i32, i32) {
    %c0_i32 = arith.constant 0 : i32
    %c0_i32_0 = arith.constant 0 : i32
    %c0_i32_1 = arith.constant 0 : i32
    return %c0_i32, %c0_i32_0 : i32, i32
  }
  func.func @transform_2(%arg0: i32) -> (i32, i32) {
    %c0_i32 = arith.constant 0 : i32
    %c0_i32_0 = arith.constant 0 : i32
    %c0_i32_1 = arith.constant 0 : i32
    return %c0_i32, %c0_i32_0 : i32, i32
  }
  func.func @transform_3(%arg0: i32) -> (i32, i32) {
    %c0_i32 = arith.constant 0 : i32
    %c0_i32_0 = arith.constant 0 : i32
    %c0_i32_1 = arith.constant 0 : i32
    return %c0_i32, %c0_i32_0 : i32, i32
  }
  func.func @transform_4(%arg0: i32) -> (i32, i32, i32, i32) {
    %c0_i32 = arith.constant 0 : i32
    %c0_i32_0 = arith.constant 0 : i32
    %c0_i32_1 = arith.constant 0 : i32
    %c0_i32_2 = arith.constant 0 : i32
    %c0_i32_3 = arith.constant 0 : i32
    return %c0_i32, %c0_i32_0, %c0_i32_1, %c0_i32_2 : i32, i32, i32, i32
  }
  func.func @transform_5(%arg0: i32) -> (i32, i32) {
    %c0_i32 = arith.constant 0 : i32
    %c0_i32_0 = arith.constant 0 : i32
    %c0_i32_1 = arith.constant 0 : i32
    return %c0_i32, %c0_i32_0 : i32, i32
  }
  func.func @transform_6(%arg0: i32) -> (i32, i32) {
    %c0_i32 = arith.constant 0 : i32
    %c0_i32_0 = arith.constant 0 : i32
    %c0_i32_1 = arith.constant 0 : i32
    return %c0_i32, %c0_i32_0 : i32, i32
  }
  func.func @transform_7(%arg0: i32) -> (i32, i32) {
    %c0_i32 = arith.constant 0 : i32
    %c0_i32_0 = arith.constant 0 : i32
    %c0_i32_1 = arith.constant 0 : i32
    return %c0_i32, %c0_i32_0 : i32, i32
  }
  func.func @transform_8(%arg0: i32) -> (i32, i32) {
    %c0_i32 = arith.constant 0 : i32
    %c0_i32_0 = arith.constant 0 : i32
    %c0_i32_1 = arith.constant 0 : i32
    return %c0_i32, %c0_i32_0 : i32, i32
  }
  func.func @transform_9(%arg0: i32) -> (i32, i32) {
    %c0_i32 = arith.constant 0 : i32
    %c0_i32_0 = arith.constant 0 : i32
    %c0_i32_1 = arith.constant 0 : i32
    return %c0_i32, %c0_i32_0 : i32, i32
  }
  func.func @transform_10(%arg0: i32) -> (i32, i32, i32, i32) {
    %c0_i32 = arith.constant 0 : i32
    %c0_i32_0 = arith.constant 0 : i32
    %c0_i32_1 = arith.constant 0 : i32
    %c0_i32_2 = arith.constant 0 : i32
    return %arg0, %c0_i32, %c0_i32_0, %c0_i32_1 : i32, i32, i32, i32
  }
}

module attributes {stable_mosaic.version = 11 : i64} {
  func.func @_pw_stats_kernel(%arg0: i32, %arg1: memref<256x128xbf16, #tpu.memory_space<vmem>>, %arg2: memref<128x128xbf16, #tpu.memory_space<vmem>>, %arg3: memref<8x128xf32, #tpu.memory_space<vmem>>) attributes {dimension_semantics = [#tpu.dimension_semantics<parallel>], iteration_bounds = array<i64: 2>, scalar_prefetch = 0 : i64, scratch_operands = 0 : i64, tpu.core_type = #tpu.core_type<tc>, window_params = [{transform_indices = @transform_0, window_bounds = array<i64: 256, 128>}, {pipeline_mode = #tpu.pipeline_mode<synchronous>, transform_indices = @transform_1, window_bounds = array<i64: 128, 128>}, {transform_indices = @transform_2, window_bounds = array<i64: 8, 128>}]} {
    %c0 = arith.constant 0 : index
    %c0_0 = arith.constant 0 : index
    %0 = vector.load %arg1[%c0, %c0_0] : memref<256x128xbf16, #tpu.memory_space<vmem>>, vector<256x128xbf16>
    %c0_1 = arith.constant 0 : index
    %c0_2 = arith.constant 0 : index
    %1 = vector.load %arg2[%c0_1, %c0_2] : memref<128x128xbf16, #tpu.memory_space<vmem>>, vector<128x128xbf16>
    %cst = arith.constant dense<0.000000e+00> : vector<256x128xf32>
    %2 = tpu.matmul %0, %1, %cst {dimension_numbers = #tpu.dot_dimension_numbers<[1], [0], [0], [1], [0, 0, 1, 1], [], []>} : vector<256x128xbf16>, vector<128x128xbf16>, vector<256x128xf32> -> vector<256x128xf32>
    %cst_3 = arith.constant dense<0.000000e+00> : vector<128xf32>
    %3 = vector.multi_reduction <add>, %2, %cst_3 [0] : vector<256x128xf32> to vector<128xf32>
    %4 = vector.shape_cast %3 : vector<128xf32> to vector<1x128xf32>
    %5 = arith.mulf %2, %2 : vector<256x128xf32>
    %cst_4 = arith.constant dense<0.000000e+00> : vector<128xf32>
    %6 = vector.multi_reduction <add>, %5, %cst_4 [0] : vector<256x128xf32> to vector<128xf32>
    %7 = vector.shape_cast %6 : vector<128xf32> to vector<1x128xf32>
    %8 = tpu.iota {dimensions = array<i32: 0>} : vector<8x128xi32>
    %c0_i32 = arith.constant 0 : i32
    %9 = vector.broadcast %c0_i32 : i32 to vector<8x128xi32>
    %10 = arith.cmpi eq, %8, %9 : vector<8x128xi32>
    %11 = vector.shape_cast %4 : vector<1x128xf32> to vector<1x128xf32>
    %12 = vector.broadcast %11 : vector<1x128xf32> to vector<8x128xf32>
    %c1_i32 = arith.constant 1 : i32
    %13 = vector.broadcast %c1_i32 : i32 to vector<8x128xi32>
    %14 = arith.cmpi eq, %8, %13 : vector<8x128xi32>
    %15 = vector.shape_cast %7 : vector<1x128xf32> to vector<1x128xf32>
    %16 = vector.broadcast %15 : vector<1x128xf32> to vector<8x128xf32>
    %cst_5 = arith.constant 0.000000e+00 : f32
    %17 = vector.broadcast %cst_5 : f32 to vector<8x128xf32>
    %18 = arith.select %14, %16, %17 : vector<8x128xi1>, vector<8x128xf32>
    %19 = arith.select %10, %12, %18 : vector<8x128xi1>, vector<8x128xf32>
    %c0_6 = arith.constant 0 : index
    %c0_7 = arith.constant 0 : index
    %20 = vector.load %arg3[%c0_6, %c0_7] : memref<8x128xf32, #tpu.memory_space<vmem>>, vector<8x128xf32>
    tpu.vector_store %arg3[%c0_6, %c0_7], %19 {strides = array<i32>} : memref<8x128xf32, #tpu.memory_space<vmem>>, vector<8x128xf32>,
    return
  }
  func.func @transform_0(%arg0: i32) -> (i32, i32) {
    %c0_i32 = arith.constant 0 : i32
    %c0_i32_0 = arith.constant 0 : i32
    return %arg0, %c0_i32 : i32, i32
  }
  func.func @transform_1(%arg0: i32) -> (i32, i32) {
    %c0_i32 = arith.constant 0 : i32
    %c0_i32_0 = arith.constant 0 : i32
    %c0_i32_1 = arith.constant 0 : i32
    return %c0_i32, %c0_i32_0 : i32, i32
  }
  func.func @transform_2(%arg0: i32) -> (i32, i32) {
    %c0_i32 = arith.constant 0 : i32
    %c0_i32_0 = arith.constant 0 : i32
    return %arg0, %c0_i32 : i32, i32
  }
}

module attributes {stable_mosaic.version = 11 : i64} {
  func.func @_pw_apply_res_kernel(%arg0: i32, %arg1: memref<256x128xbf16, #tpu.memory_space<vmem>>, %arg2: memref<128x128xbf16, #tpu.memory_space<vmem>>, %arg3: memref<1x128xf32, #tpu.memory_space<vmem>>, %arg4: memref<1x128xf32, #tpu.memory_space<vmem>>, %arg5: memref<256x128xf32, #tpu.memory_space<vmem>>, %arg6: memref<256x128xf32, #tpu.memory_space<vmem>>) attributes {dimension_semantics = [#tpu.dimension_semantics<parallel>], iteration_bounds = array<i64: 2>, scalar_prefetch = 0 : i64, scratch_operands = 0 : i64, tpu.core_type = #tpu.core_type<tc>, window_params = [{transform_indices = @transform_0, window_bounds = array<i64: 256, 128>}, {pipeline_mode = #tpu.pipeline_mode<synchronous>, transform_indices = @transform_1, window_bounds = array<i64: 128, 128>}, {pipeline_mode = #tpu.pipeline_mode<synchronous>, transform_indices = @transform_2, window_bounds = array<i64: 1, 128>}, {pipeline_mode = #tpu.pipeline_mode<synchronous>, transform_indices = @transform_3, window_bounds = array<i64: 1, 128>}, {transform_indices = @transform_4, window_bounds = array<i64: 256, 128>}, {transform_indices = @transform_5, window_bounds = array<i64: 256, 128>}]} {
    %c0 = arith.constant 0 : index
    %c0_0 = arith.constant 0 : index
    %0 = vector.load %arg1[%c0, %c0_0] : memref<256x128xbf16, #tpu.memory_space<vmem>>, vector<256x128xbf16>
    %c0_1 = arith.constant 0 : index
    %c0_2 = arith.constant 0 : index
    %1 = vector.load %arg2[%c0_1, %c0_2] : memref<128x128xbf16, #tpu.memory_space<vmem>>, vector<128x128xbf16>
    %cst = arith.constant dense<0.000000e+00> : vector<256x128xf32>
    %2 = tpu.matmul %0, %1, %cst {dimension_numbers = #tpu.dot_dimension_numbers<[1], [0], [0], [1], [0, 0, 1, 1], [], []>} : vector<256x128xbf16>, vector<128x128xbf16>, vector<256x128xf32> -> vector<256x128xf32>
    %c0_3 = arith.constant 0 : index
    %c0_4 = arith.constant 0 : index
    %3 = vector.load %arg3[%c0_3, %c0_4] : memref<1x128xf32, #tpu.memory_space<vmem>>, vector<1x128xf32>
    %4 = vector.broadcast %3 : vector<1x128xf32> to vector<256x128xf32>
    %5 = arith.mulf %2, %4 : vector<256x128xf32>
    %c0_5 = arith.constant 0 : index
    %c0_6 = arith.constant 0 : index
    %6 = vector.load %arg4[%c0_5, %c0_6] : memref<1x128xf32, #tpu.memory_space<vmem>>, vector<1x128xf32>
    %7 = vector.broadcast %6 : vector<1x128xf32> to vector<256x128xf32>
    %8 = arith.addf %5, %7 : vector<256x128xf32>
    %c0_7 = arith.constant 0 : index
    %c0_8 = arith.constant 0 : index
    %9 = vector.load %arg5[%c0_7, %c0_8] : memref<256x128xf32, #tpu.memory_space<vmem>>, vector<256x128xf32>
    %10 = arith.addf %8, %9 : vector<256x128xf32>
    %c0_9 = arith.constant 0 : index
    %c0_10 = arith.constant 0 : index
    %11 = vector.load %arg6[%c0_9, %c0_10] : memref<256x128xf32, #tpu.memory_space<vmem>>, vector<256x128xf32>
    tpu.vector_store %arg6[%c0_9, %c0_10], %10 {strides = array<i32>} : memref<256x128xf32, #tpu.memory_space<vmem>>, vector<256x128xf32>,
    return
  }
  func.func @transform_0(%arg0: i32) -> (i32, i32) {
    %c0_i32 = arith.constant 0 : i32
    %c0_i32_0 = arith.constant 0 : i32
    return %arg0, %c0_i32 : i32, i32
  }
  func.func @transform_1(%arg0: i32) -> (i32, i32) {
    %c0_i32 = arith.constant 0 : i32
    %c0_i32_0 = arith.constant 0 : i32
    %c0_i32_1 = arith.constant 0 : i32
    return %c0_i32, %c0_i32_0 : i32, i32
  }
  func.func @transform_2(%arg0: i32) -> (i32, i32) {
    %c0_i32 = arith.constant 0 : i32
    %c0_i32_0 = arith.constant 0 : i32
    %c0_i32_1 = arith.constant 0 : i32
    return %c0_i32, %c0_i32_0 : i32, i32
  }
  func.func @transform_3(%arg0: i32) -> (i32, i32) {
    %c0_i32 = arith.constant 0 : i32
    %c0_i32_0 = arith.constant 0 : i32
    %c0_i32_1 = arith.constant 0 : i32
    return %c0_i32, %c0_i32_0 : i32, i32
  }
  func.func @transform_4(%arg0: i32) -> (i32, i32) {
    %c0_i32 = arith.constant 0 : i32
    %c0_i32_0 = arith.constant 0 : i32
    return %arg0, %c0_i32 : i32, i32
  }
  func.func @transform_5(%arg0: i32) -> (i32, i32) {
    %c0_i32 = arith.constant 0 : i32
    %c0_i32_0 = arith.constant 0 : i32
    return %arg0, %c0_i32 : i32, i32
  }
}

</mosaic_0001>

<bundles_post_ra>
// kernel: mbconv_forward.4
= control target key start
LH: loop header
LB: loop body
LE: loop exit
PB: predicated region body
PF: predicated region fallthrough
CT: control target
= control target key end

     0   :  { %s776_s9 = smov 0   ;;  %s875_s0 = inlined_call_operand.vmem [shape: bf16[768,128], index: 0, kind: input, shape index: {}]   ;;  %s876_s1 = inlined_call_operand.vmem [shape: bf16[128,128], index: 1, kind: input, shape index: {}]   ;;  %s877_s2 = inlined_call_operand.vmem [shape: f32[24,128], index: 2, kind: output, shape index: {}]  }
   0x1 LB: > { %s782_s10 = sadd.s32 4294967295, %s759_s9   ;;  %p595_p0 = scmp.ge.s32.totalorder %s759_s9, 1  ;;  %s759_s9 = sphi %s776_s9, %s12_s9  }
   0x2   : > { %p113_p1 = scmp.lt.s32.totalorder %s759_s9, 4 }
   0x4   : > { %p114_p2 = pnand %p595_p0, %p113_p1 }
   0x5   : > { %s596_s19 = sshll.u32 (!%p114_p2), %s782_s10, 5  ;;  %p140_p4 = scmp.lt.s32.totalorder (!%p114_p2), %s782_s10, 2 }
   0x6   : > { %117 = sbr.rel (%p114_p2) target bundleno = 292 (0x124), region = 28  ;;  %p135_p3 = scmp.lt.s32.totalorder (!%p114_p2), %s596_s19, 95 }
   0xb   : > { %v720_v0 = vld [vmem:[%s876_s1 + $0x38] sm:$0xff]  ;;  %v719_v1 = vld [vmem:[%s876_s1 + $0x30] sm:$0xff]  ;;  %v718_v2 = vld [vmem:[%s876_s1 + $0x28] sm:$0xff]  ;;  %s879_s19 = smov (!%p135_p3, %s596_s19), 95  ;;  %s881_s10 = smov (!%p140_p4, %s782_s10), 2 }
   0xc   : > { %336 = vmatpush.bf16.msra.mxu0 %v720_v0  ;;  %721 = vmatpush.bf16.msra.mxu1 %v720_v0  ;;  %v717_v3 = vld [vmem:[%s876_s1 + $0x20] sm:$0xff]  ;;  %v716_v4 = vld [vmem:[%s876_s1 + $0x18] sm:$0xff]  ;;  %v715_v5 = vld [vmem:[%s876_s1 + $0x10] sm:$0xff]  ;;  %s597_s26 = sshll.u32 %s879_s19, 2  ;;  %s598_s4 = sshll.u32 %s881_s10, 3 }
   0xd   : > { %722 = vmatpush.bf16.msra.mxu2 %v720_v0  ;;  %723 = vmatpush.bf16.msra.mxu3 %v720_v0  ;;  %v714_v6 = vld [vmem:[%s876_s1 + $0x8] sm:$0xff]  ;;  %v713_v7 = vld [vmem:[%s876_s1] sm:$0xff]  ;;  %s814_s3 = scalar_lea.vmem %s875_s0, %s597_s26  ;;  %s143_s7 = scalar_lea.vmem %s877_s2, %s598_s4 }
   0xe   : > { %v697_v8 = vld [vmem:[%s814_s3] sm:$0xff]  ;;  %v698_v12 = vld [vmem:[%s814_s3 + $0x8] sm:$0xff]  ;;  %v699_v16 = vld [vmem:[%s814_s3 + $0x10] sm:$0xff] }
   0xf   : > { %v701_v9 = vld [vmem:[%s814_s3 + $0x20] sm:$0xff]  ;;  %v702_v13 = vld [vmem:[%s814_s3 + $0x28] sm:$0xff]  ;;  %v703_v17 = vld [vmem:[%s814_s3 + $0x30] sm:$0xff] }
  0x10   : > { %337 = vmatpush.bf16.msra.mxu0 %v719_v1  ;;  %724 = vmatpush.bf16.msra.mxu1 %v719_v1  ;;  %v705_v10 = vld [vmem:[%s814_s3 + $0x40] sm:$0xff]  ;;  %v706_v14 = vld [vmem:[%s814_s3 + $0x48] sm:$0xff]  ;;  %v707_v18 = vld [vmem:[%s814_s3 + $0x50] sm:$0xff] }
  0x11   : > { %725 = vmatpush.bf16.msra.mxu2 %v719_v1  ;;  %726 = vmatpush.bf16.msra.mxu3 %v719_v1  ;;  %v709_v11 = vld [vmem:[%s814_s3 + $0x60] sm:$0xff]  ;;  %v710_v15 = vld [vmem:[%s814_s3 + $0x68] sm:$0xff]  ;;  %v711_v19 = vld [vmem:[%s814_s3 + $0x70] sm:$0xff] }
  0x12   : > { %v700_v20 = vld [vmem:[%s814_s3 + $0x18] sm:$0xff] }
  0x13   : > { %v704_v21 = vld [vmem:[%s814_s3 + $0x38] sm:$0xff] }
  0x14   : > { %338 = vmatpush.bf16.msra.mxu0 %v718_v2  ;;  %727 = vmatpush.bf16.msra.mxu1 %v718_v2  ;;  %v708_v22 = vld [vmem:[%s814_s3 + $0x58] sm:$0xff] }
  0x15   : > { %728 = vmatpush.bf16.msra.mxu2 %v718_v2  ;;  %729 = vmatpush.bf16.msra.mxu3 %v718_v2  ;;  %v712_v23 = vld [vmem:[%s814_s3 + $0x78] sm:$0xff] }
  0x18   : > { %339 = vmatpush.bf16.msra.mxu0 %v717_v3  ;;  %730 = vmatpush.bf16.msra.mxu1 %v717_v3 }
  0x19   : > { %731 = vmatpush.bf16.msra.mxu2 %v717_v3  ;;  %732 = vmatpush.bf16.msra.mxu3 %v717_v3 }
  0x1c   : > { %340 = vmatpush.bf16.msra.mxu0 %v716_v4  ;;  %733 = vmatpush.bf16.msra.mxu1 %v716_v4 }
  0x1d   : > { %734 = vmatpush.bf16.msra.mxu2 %v716_v4  ;;  %735 = vmatpush.bf16.msra.mxu3 %v716_v4 }
  0x20   : > { %341 = vmatpush.bf16.msra.mxu0 %v715_v5  ;;  %736 = vmatpush.bf16.msra.mxu1 %v715_v5 }
  0x21   : > { %737 = vmatpush.bf16.msra.mxu2 %v715_v5  ;;  %738 = vmatpush.bf16.msra.mxu3 %v715_v5 }
  0x24   : > { %342 = vmatpush.bf16.msra.mxu0 %v714_v6  ;;  %739 = vmatpush.bf16.msra.mxu1 %v714_v6 }
  0x25   : > { %740 = vmatpush.bf16.msra.mxu2 %v714_v6  ;;  %741 = vmatpush.bf16.msra.mxu3 %v714_v6 }
  0x28   : > { %343 = vmatpush.bf16.msra.mxu0 %v713_v7  ;;  %742 = vmatpush.bf16.msra.mxu1 %v713_v7 }
  0x29   : > { %743 = vmatpush.bf16.msra.mxu2 %v713_v7  ;;  %744 = vmatpush.bf16.msra.mxu3 %v713_v7 }
  0x2b   : > { %344 = vmatmul.bf16.vlgmr.msra.gmra.mxu0 %v697_v8  ;;  %364 = vmatmul.bf16.vlgmr.msra.gmra.mxu1 %v701_v9 }
  0x2c   : > { %384 = vmatmul.bf16.vlgmr.msra.gmra.mxu2 %v705_v10  ;;  %404 = vmatmul.bf16.vlgmr.msra.gmra.mxu3 %v709_v11 }
  0x3b   : > { %349 = vmatmul.bf16.gmra.mxu0 %v698_v12  ;;  %369 = vmatmul.bf16.gmra.mxu1 %v702_v13 }
  0x3c   : > { %389 = vmatmul.bf16.gmra.mxu2 %v706_v14  ;;  %409 = vmatmul.bf16.gmra.mxu3 %v710_v15 }
  0x4b   : > { %354 = vmatmul.bf16.gmra.mxu0 %v699_v16  ;;  %374 = vmatmul.bf16.gmra.mxu1 %v703_v17 }
  0x4c   : > { %394 = vmatmul.bf16.gmra.mxu2 %v707_v18  ;;  %414 = vmatmul.bf16.gmra.mxu3 %v711_v19 }
  0x5b   : > { %359 = vmatmul.bf16.gmra.mxu0 %v700_v20  ;;  %379 = vmatmul.bf16.gmra.mxu1 %v704_v21 }
  0x5c   : > { %399 = vmatmul.bf16.gmra.mxu2 %v708_v22  ;;  %419 = vmatmul.bf16.gmra.mxu3 %v712_v23 }
  0xa8   : > { %v345_v24 = vpop.f32.mrf.mxu0  ;;  %v365_v25 = vpop.f32.mrf.mxu1 }
  0xa9   : > { %v462_v41 = vmul.f32 %v345_v24, %v345_v24  ;;  %v470_v3 = vmul.f32 %v365_v25, %v365_v25 }
  0xaf   : > { %v832_v29 = vpop.f32.mrf.mxu2  ;;  %v836_v35 = vpop.f32.mrf.mxu3 }
  0xb0   : > { %v347_v26 = vpop.f32.mrf.mxu0  ;;  %v367_v27 = vpop.f32.mrf.mxu1 }
  0xb1   : > { %v463_v40 = vmul.f32 %v347_v26, %v347_v26  ;;  %v425_v42 = vadd.f32 %v347_v26, %v345_v24  ;;  %v471_v7 = vmul.f32 %v367_v27, %v367_v27 }
  0xb3   : > { %v494_v45 = vadd.f32 %v463_v40, %v462_v41 }
  0xb7   : > { %v834_v32 = vpop.f32.mrf.mxu2  ;;  %v840_v39 = vpop.f32.mrf.mxu3 }
  0xb8   : > { %v350_v28 = vpop.f32.mrf.mxu0  ;;  %v370_v30 = vpop.f32.mrf.mxu1 }
  0xb9   : > { %v464_v43 = vmul.f32 %v350_v28, %v350_v28  ;;  %v426_v46 = vadd.f32 %v425_v42, %v350_v28  ;;  %v472_v11 = vmul.f32 %v370_v30, %v370_v30 }
  0xbb   : > { %v495_v49 = vadd.f32 %v494_v45, %v464_v43 }
  0xbf   : > { %v838_v36 = vpop.f32.mrf.mxu2  ;;  %v844_v56 = vpop.f32.mrf.mxu3 }
  0xc0   : > { %v352_v31 = vpop.f32.mrf.mxu0  ;;  %v372_v33 = vpop.f32.mrf.mxu1  ;;  %v480_v45 = vmul.f32 %v838_v36, %v838_v36 }
  0xc1   : > { %v465_v47 = vmul.f32 %v352_v31, %v352_v31  ;;  %v427_v50 = vadd.f32 %v426_v46, %v352_v31  ;;  %v473_v14 = vmul.f32 %v372_v33, %v372_v33 }
  0xc3   : > { %v496_v53 = vadd.f32 %v495_v49, %v465_v47 }
  0xc7   : > { %v842_v44 = vpop.f32.mrf.mxu2  ;;  %v412_v10 = vpop.f32.mrf.mxu3 }
  0xc8   : > { %v355_v34 = vpop.f32.mrf.mxu0  ;;  %v375_v38 = vpop.f32.mrf.mxu1 }
  0xc9   : > { %v466_v51 = vmul.f32 %v355_v34, %v355_v34  ;;  %v428_v54 = vadd.f32 %v427_v50, %v355_v34  ;;  %v474_v18 = vmul.f32 %v375_v38, %v375_v38 }
  0xcb   : > { %v497_v57 = vadd.f32 %v496_v53, %v466_v51 }
  0xcf   : > { %v395_v63 = vpop.f32.mrf.mxu2 }
  0xd0   : > { %v357_v37 = vpop.f32.mrf.mxu0  ;;  %v377_v52 = vpop.f32.mrf.mxu1  ;;  %v482_v51 = vmul.f32 %v395_v63, %v395_v63 }
  0xd1   : > { %v467_v55 = vmul.f32 %v357_v37, %v357_v37  ;;  %v429_v58 = vadd.f32 %v428_v54, %v357_v37  ;;  %v475_v21 = vmul.f32 %v377_v52, %v377_v52 }
  0xd3   : > { %v498_v60 = vadd.f32 %v497_v57, %v467_v55 }
  0xd7   : > { %v397_v17 = vpop.f32.mrf.mxu2 }
  0xd8   : > { %v360_v48 = vpop.f32.mrf.mxu0  ;;  %v380_v6 = vpop.f32.mrf.mxu1  ;;  %v483_v55 = vmul.f32 %v397_v17, %v397_v17 }
  0xd9   : > { %v468_v59 = vmul.f32 %v360_v48, %v360_v48  ;;  %v430_v61 = vadd.f32 %v429_v58, %v360_v48  ;;  %v476_v26 = vmul.f32 %v380_v6, %v380_v6  ;;  %v481_v48 = vmul.f32 %v842_v44, %v842_v44 }
  0xdb   : > { %v499_v0 = vadd.f32 %v498_v60, %v468_v59 }
  0xdf   : > { %v400_v41 = vpop.f32.mrf.mxu2 }
  0xe0   : > { %v362_v62 = vpop.f32.mrf.mxu0  ;;  %v382_v24 = vpop.f32.mrf.mxu1  ;;  %v484_v60 = vmul.f32 %v400_v41, %v400_v41 }
  0xe1   : > { %v431_v1 = vadd.f32 %v430_v61, %v362_v62  ;;  %v469_v2 = vmul.f32 %v362_v62, %v362_v62  ;;  %v477_v37 = vmul.f32 %v382_v24, %v382_v24 }
  0xe3   : > { %v432_v4 = vadd.f32 %v431_v1, %v365_v25  ;;  %v500_v5 = vadd.f32 %v499_v0, %v469_v2  ;;  %v486_v0 = vmul.f32 %v836_v35, %v836_v35 }
  0xe5   : > { %v433_v8 = vadd.f32 %v432_v4, %v367_v27  ;;  %v501_v9 = vadd.f32 %v500_v5, %v470_v3  ;;  %v415_v27 = vpop.f32.mrf.mxu3  ;;  %v488_v5 = vmul.f32 %v844_v56, %v844_v56 }
  0xe7   : > { %v434_v12 = vadd.f32 %v433_v8, %v370_v30  ;;  %v502_v13 = vadd.f32 %v501_v9, %v471_v7  ;;  %v478_v30 = vmul.f32 %v832_v29, %v832_v29  ;;  %v402_v57 = vpop.f32.mrf.mxu2  ;;  %v489_v8 = vmul.f32 %v412_v10, %v412_v10 }
  0xe8   : > { %v485_v62 = vmul.f32 %v402_v57, %v402_v57 }
  0xe9   : > { %v503_v15 = vadd.f32 %v502_v13, %v472_v11  ;;  %v435_v16 = vadd.f32 %v434_v12, %v372_v33  ;;  %v490_v12 = vmul.f32 %v415_v27, %v415_v27 }
  0xeb   : > { %v436_v19 = vadd.f32 %v435_v16, %v375_v38  ;;  %v504_v20 = vadd.f32 %v503_v15, %v473_v14  ;;  %v479_v38 = vmul.f32 %v834_v32, %v834_v32 }
  0xed   : > { %v437_v22 = vadd.f32 %v436_v19, %v377_v52  ;;  %v505_v23 = vadd.f32 %v504_v20, %v474_v18  ;;  %v417_v50 = vpop.f32.mrf.mxu3 }
  0xee   : > { %v491_v15 = vmul.f32 %v417_v50, %v417_v50 }
  0xef   : > { %v438_v25 = vadd.f32 %v437_v22, %v380_v6  ;;  %v506_v28 = vadd.f32 %v505_v23, %v475_v21 }
  0xf1   : > { %v507_v31 = vadd.f32 %v506_v28, %v476_v26  ;;  %v439_v34 = vadd.f32 %v438_v25, %v382_v24  ;;  %v531_v25 = vlaneseq }
  0xf3   : > { %v440_v33 = vadd.f32 %v439_v34, %v832_v29  ;;  %v508_v40 = vadd.f32 %v507_v31, %v477_v37  ;;  %v532_v34 = vshrl.u32 %v531_v25, 7 }
  0xf5   : > { %v441_v42 = vadd.f32 %v440_v33, %v834_v32  ;;  %v509_v43 = vadd.f32 %v508_v40, %v478_v30  ;;  %v420_v2 = vpop.f32.mrf.mxu3  ;;  %vm534_vm0 = vcmp.eq.s32.totalorder %v532_v34, 1  ;;  %vm533_vm1 = vcmp.eq.s32.totalorder %v532_v34, 0 }
  0xf6   : > { %v492_v19 = vmul.f32 %v420_v2, %v420_v2 }
  0xf7   : > { %v442_v46 = vadd.f32 %v441_v42, %v838_v36  ;;  %v510_v47 = vadd.f32 %v509_v43, %v479_v38 }
  0xf9   : > { %v511_v49 = vadd.f32 %v510_v47, %v480_v45  ;;  %v443_v29 = vadd.f32 %v442_v46, %v842_v44 }
  0xfb   : > { %v444_v52 = vadd.f32 %v443_v29, %v395_v63  ;;  %v512_v53 = vadd.f32 %v511_v49, %v481_v48  ;;  %v487_v63 = vmul.f32 %v840_v39, %v840_v39 }
  0xfd   : > { %v445_v54 = vadd.f32 %v444_v52, %v397_v17  ;;  %v513_v32 = vadd.f32 %v512_v53, %v482_v51  ;;  %v422_v17 = vpop.f32.mrf.mxu3 }
  0xfe   : > { %v493_v22 = vmul.f32 %v422_v17, %v422_v17 }
  0xff   : > { %v514_v58 = vadd.f32 %v513_v32, %v483_v55  ;;  %v446_v59 = vadd.f32 %v445_v54, %v400_v41 }
 0x101   : > { %v515_v61 = vadd.f32 %v514_v58, %v484_v60  ;;  %v447_v36 = vadd.f32 %v446_v59, %v402_v57 }
 0x103   : > { %v448_v1 = vadd.f32 %v447_v36, %v836_v35  ;;  %v516_v44 = vadd.f32 %v515_v61, %v485_v62 }
 0x105   : > { %v449_v3 = vadd.f32 %v448_v1, %v840_v39  ;;  %v517_v4 = vadd.f32 %v516_v44, %v486_v0 }
 0x107   : > { %v450_v6 = vadd.f32 %v449_v3, %v844_v56  ;;  %v518_v7 = vadd.f32 %v517_v4, %v487_v63 }
 0x109   : > { %v519_v9 = vadd.f32 %v518_v7, %v488_v5  ;;  %v451_v11 = vadd.f32 %v450_v6, %v412_v10 }
 0x10b   : > { %v452_v35 = vadd.f32 %v451_v11, %v415_v27  ;;  %v520_v13 = vadd.f32 %v519_v9, %v489_v8 }
 0x10d   : > { %v453_v14 = vadd.f32 %v452_v35, %v417_v50  ;;  %v521_v16 = vadd.f32 %v520_v13, %v490_v12 }
 0x10f   : > { %v522_v39 = vadd.f32 %v521_v16, %v491_v15  ;;  %v454_v18 = vadd.f32 %v453_v14, %v420_v2 }
 0x111   : > { %v523_v20 = vadd.f32 %v522_v39, %v492_v19  ;;  %v455_v21 = vadd.f32 %v454_v18, %v422_v17 }
 0x113   : > { %v456_v56 = vrot.slane %v455_v21, 4  ;;  %v524_v23 = vadd.f32 %v523_v20, %v493_v22 }
 0x115   : > { %v457_v24 = vadd.f32 %v456_v56, %v455_v21  ;;  %v525_v10 = vrot.slane %v524_v23, 4 }
 0x117   : > { %v458_v26 = vrot.slane %v457_v24, 2  ;;  %v526_v28 = vadd.f32 %v525_v10, %v524_v23 }
 0x119   : > { %v459_v27 = vadd.f32 %v458_v26, %v457_v24  ;;  %v527_v31 = vrot.slane %v526_v28, 2 }
 0x11b   : > { %v528_v37 = vadd.f32 %v527_v31, %v526_v28  ;;  %v460_v30 = vrot.slane %v459_v27, 1 }
 0x11d   : > { %v529_v33 = vrot.slane %v528_v37, 1  ;;  %v461_v41 = vadd.f32 %v460_v30, %v459_v27 }
 0x11f   : > { %v530_v40 = vadd.f32 %v529_v33, %v528_v37 }
 0x121   : > { %v535_v38 = vsel %vm534_vm0, %v530_v40, 0.0 }
 0x122   : > { %v536_v42 = vsel %vm533_vm1, %v461_v41, %v535_v38 }
 0x123   : > { %537 = vst [vmem:[%s143_s7] sm:$0xff] %v536_v42 }
 0x124 PF: > { %s12_s9 = sadd.s32 1, %s759_s9  }
 0x125   : > { %p9_p5 = scmp.ge.s32.totalorder %s12_s9, 5  }
 0x127   :  { %11 = sbr.rel (!%p9_p5) target bundleno = 1 (0x1), region = 58 }

// kernel: mbconv_forward.6
= control target key start
LH: loop header
LB: loop body
LE: loop exit
PB: predicated region body
PF: predicated region fallthrough
CT: control target
= control target key end

     0   :  { %s776_s9 = smov 0   ;;  %s875_s0 = inlined_call_operand.vmem [shape: bf16[512,128], index: 0, kind: input, shape index: {}]   ;;  %s876_s1 = inlined_call_operand.vmem [shape: bf16[128,128], index: 1, kind: input, shape index: {}]   ;;  %s877_s2 = inlined_call_operand.vmem [shape: f32[16,128], index: 2, kind: output, shape index: {}]  }
   0x1 LB: > { %s782_s10 = sadd.s32 4294967295, %s759_s9   ;;  %p595_p0 = scmp.ge.s32.totalorder %s759_s9, 1  ;;  %s759_s9 = sphi %s776_s9, %s12_s9  }
   0x2   : > { %p113_p1 = scmp.lt.s32.totalorder %s759_s9, 3 }
   0x4   : > { %p114_p2 = pnand %p595_p0, %p113_p1 }
   0x5   : > { %s596_s19 = sshll.u32 (!%p114_p2), %s782_s10, 5  ;;  %p140_p4 = scmp.lt.s32.totalorder (!%p114_p2), %s782_s10, 1 }
   0x6   : > { %117 = sbr.rel (%p114_p2) target bundleno = 292 (0x124), region = 28  ;;  %p135_p3 = scmp.lt.s32.totalorder (!%p114_p2), %s596_s19, 63 }
   0xb   : > { %v720_v0 = vld [vmem:[%s876_s1 + $0x38] sm:$0xff]  ;;  %v719_v1 = vld [vmem:[%s876_s1 + $0x30] sm:$0xff]  ;;  %v718_v2 = vld [vmem:[%s876_s1 + $0x28] sm:$0xff]  ;;  %s879_s19 = smov (!%p135_p3, %s596_s19), 63  ;;  %s881_s10 = smov (!%p140_p4, %s782_s10), 1 }
   0xc   : > { %336 = vmatpush.bf16.msra.mxu0 %v720_v0  ;;  %721 = vmatpush.bf16.msra.mxu1 %v720_v0  ;;  %v717_v3 = vld [vmem:[%s876_s1 + $0x20] sm:$0xff]  ;;  %v716_v4 = vld [vmem:[%s876_s1 + $0x18] sm:$0xff]  ;;  %v715_v5 = vld [vmem:[%s876_s1 + $0x10] sm:$0xff]  ;;  %s597_s26 = sshll.u32 %s879_s19, 2  ;;  %s598_s4 = sshll.u32 %s881_s10, 3 }
   0xd   : > { %722 = vmatpush.bf16.msra.mxu2 %v720_v0  ;;  %723 = vmatpush.bf16.msra.mxu3 %v720_v0  ;;  %v714_v6 = vld [vmem:[%s876_s1 + $0x8] sm:$0xff]  ;;  %v713_v7 = vld [vmem:[%s876_s1] sm:$0xff]  ;;  %s814_s3 = scalar_lea.vmem %s875_s0, %s597_s26  ;;  %s143_s7 = scalar_lea.vmem %s877_s2, %s598_s4 }
   0xe   : > { %v697_v8 = vld [vmem:[%s814_s3] sm:$0xff]  ;;  %v698_v12 = vld [vmem:[%s814_s3 + $0x8] sm:$0xff]  ;;  %v699_v16 = vld [vmem:[%s814_s3 + $0x10] sm:$0xff] }
   0xf   : > { %v701_v9 = vld [vmem:[%s814_s3 + $0x20] sm:$0xff]  ;;  %v702_v13 = vld [vmem:[%s814_s3 + $0x28] sm:$0xff]  ;;  %v703_v17 = vld [vmem:[%s814_s3 + $0x30] sm:$0xff] }
  0x10   : > { %337 = vmatpush.bf16.msra.mxu0 %v719_v1  ;;  %724 = vmatpush.bf16.msra.mxu1 %v719_v1  ;;  %v705_v10 = vld [vmem:[%s814_s3 + $0x40] sm:$0xff]  ;;  %v706_v14 = vld [vmem:[%s814_s3 + $0x48] sm:$0xff]  ;;  %v707_v18 = vld [vmem:[%s814_s3 + $0x50] sm:$0xff] }
  0x11   : > { %725 = vmatpush.bf16.msra.mxu2 %v719_v1  ;;  %726 = vmatpush.bf16.msra.mxu3 %v719_v1  ;;  %v709_v11 = vld [vmem:[%s814_s3 + $0x60] sm:$0xff]  ;;  %v710_v15 = vld [vmem:[%s814_s3 + $0x68] sm:$0xff]  ;;  %v711_v19 = vld [vmem:[%s814_s3 + $0x70] sm:$0xff] }
  0x12   : > { %v700_v20 = vld [vmem:[%s814_s3 + $0x18] sm:$0xff] }
  0x13   : > { %v704_v21 = vld [vmem:[%s814_s3 + $0x38] sm:$0xff] }
  0x14   : > { %338 = vmatpush.bf16.msra.mxu0 %v718_v2  ;;  %727 = vmatpush.bf16.msra.mxu1 %v718_v2  ;;  %v708_v22 = vld [vmem:[%s814_s3 + $0x58] sm:$0xff] }
  0x15   : > { %728 = vmatpush.bf16.msra.mxu2 %v718_v2  ;;  %729 = vmatpush.bf16.msra.mxu3 %v718_v2  ;;  %v712_v23 = vld [vmem:[%s814_s3 + $0x78] sm:$0xff] }
  0x18   : > { %339 = vmatpush.bf16.msra.mxu0 %v717_v3  ;;  %730 = vmatpush.bf16.msra.mxu1 %v717_v3 }
  0x19   : > { %731 = vmatpush.bf16.msra.mxu2 %v717_v3  ;;  %732 = vmatpush.bf16.msra.mxu3 %v717_v3 }
  0x1c   : > { %340 = vmatpush.bf16.msra.mxu0 %v716_v4  ;;  %733 = vmatpush.bf16.msra.mxu1 %v716_v4 }
  0x1d   : > { %734 = vmatpush.bf16.msra.mxu2 %v716_v4  ;;  %735 = vmatpush.bf16.msra.mxu3 %v716_v4 }
  0x20   : > { %341 = vmatpush.bf16.msra.mxu0 %v715_v5  ;;  %736 = vmatpush.bf16.msra.mxu1 %v715_v5 }
  0x21   : > { %737 = vmatpush.bf16.msra.mxu2 %v715_v5  ;;  %738 = vmatpush.bf16.msra.mxu3 %v715_v5 }
  0x24   : > { %342 = vmatpush.bf16.msra.mxu0 %v714_v6  ;;  %739 = vmatpush.bf16.msra.mxu1 %v714_v6 }
  0x25   : > { %740 = vmatpush.bf16.msra.mxu2 %v714_v6  ;;  %741 = vmatpush.bf16.msra.mxu3 %v714_v6 }
  0x28   : > { %343 = vmatpush.bf16.msra.mxu0 %v713_v7  ;;  %742 = vmatpush.bf16.msra.mxu1 %v713_v7 }
  0x29   : > { %743 = vmatpush.bf16.msra.mxu2 %v713_v7  ;;  %744 = vmatpush.bf16.msra.mxu3 %v713_v7 }
  0x2b   : > { %344 = vmatmul.bf16.vlgmr.msra.gmra.mxu0 %v697_v8  ;;  %364 = vmatmul.bf16.vlgmr.msra.gmra.mxu1 %v701_v9 }
  0x2c   : > { %384 = vmatmul.bf16.vlgmr.msra.gmra.mxu2 %v705_v10  ;;  %404 = vmatmul.bf16.vlgmr.msra.gmra.mxu3 %v709_v11 }
  0x3b   : > { %349 = vmatmul.bf16.gmra.mxu0 %v698_v12  ;;  %369 = vmatmul.bf16.gmra.mxu1 %v702_v13 }
  0x3c   : > { %389 = vmatmul.bf16.gmra.mxu2 %v706_v14  ;;  %409 = vmatmul.bf16.gmra.mxu3 %v710_v15 }
  0x4b   : > { %354 = vmatmul.bf16.gmra.mxu0 %v699_v16  ;;  %374 = vmatmul.bf16.gmra.mxu1 %v703_v17 }
  0x4c   : > { %394 = vmatmul.bf16.gmra.mxu2 %v707_v18  ;;  %414 = vmatmul.bf16.gmra.mxu3 %v711_v19 }
  0x5b   : > { %359 = vmatmul.bf16.gmra.mxu0 %v700_v20  ;;  %379 = vmatmul.bf16.gmra.mxu1 %v704_v21 }
  0x5c   : > { %399 = vmatmul.bf16.gmra.mxu2 %v708_v22  ;;  %419 = vmatmul.bf16.gmra.mxu3 %v712_v23 }
  0xa8   : > { %v345_v24 = vpop.f32.mrf.mxu0  ;;  %v365_v25 = vpop.f32.mrf.mxu1 }
  0xa9   : > { %v462_v41 = vmul.f32 %v345_v24, %v345_v24  ;;  %v470_v3 = vmul.f32 %v365_v25, %v365_v25 }
  0xaf   : > { %v832_v29 = vpop.f32.mrf.mxu2  ;;  %v836_v35 = vpop.f32.mrf.mxu3 }
  0xb0   : > { %v347_v26 = vpop.f32.mrf.mxu0  ;;  %v367_v27 = vpop.f32.mrf.mxu1 }
  0xb1   : > { %v463_v40 = vmul.f32 %v347_v26, %v347_v26  ;;  %v425_v42 = vadd.f32 %v347_v26, %v345_v24  ;;  %v471_v7 = vmul.f32 %v367_v27, %v367_v27 }
  0xb3   : > { %v494_v45 = vadd.f32 %v463_v40, %v462_v41 }
  0xb7   : > { %v834_v32 = vpop.f32.mrf.mxu2  ;;  %v840_v39 = vpop.f32.mrf.mxu3 }
  0xb8   : > { %v350_v28 = vpop.f32.mrf.mxu0  ;;  %v370_v30 = vpop.f32.mrf.mxu1 }
  0xb9   : > { %v464_v43 = vmul.f32 %v350_v28, %v350_v28  ;;  %v426_v46 = vadd.f32 %v425_v42, %v350_v28  ;;  %v472_v11 = vmul.f32 %v370_v30, %v370_v30 }
  0xbb   : > { %v495_v49 = vadd.f32 %v494_v45, %v464_v43 }
  0xbf   : > { %v838_v36 = vpop.f32.mrf.mxu2  ;;  %v844_v56 = vpop.f32.mrf.mxu3 }
  0xc0   : > { %v352_v31 = vpop.f32.mrf.mxu0  ;;  %v372_v33 = vpop.f32.mrf.mxu1  ;;  %v480_v45 = vmul.f32 %v838_v36, %v838_v36 }
  0xc1   : > { %v465_v47 = vmul.f32 %v352_v31, %v352_v31  ;;  %v427_v50 = vadd.f32 %v426_v46, %v352_v31  ;;  %v473_v14 = vmul.f32 %v372_v33, %v372_v33 }
  0xc3   : > { %v496_v53 = vadd.f32 %v495_v49, %v465_v47 }
  0xc7   : > { %v842_v44 = vpop.f32.mrf.mxu2  ;;  %v412_v10 = vpop.f32.mrf.mxu3 }
  0xc8   : > { %v355_v34 = vpop.f32.mrf.mxu0  ;;  %v375_v38 = vpop.f32.mrf.mxu1 }
  0xc9   : > { %v466_v51 = vmul.f32 %v355_v34, %v355_v34  ;;  %v428_v54 = vadd.f32 %v427_v50, %v355_v34  ;;  %v474_v18 = vmul.f32 %v375_v38, %v375_v38 }
  0xcb   : > { %v497_v57 = vadd.f32 %v496_v53, %v466_v51 }
  0xcf   : > { %v395_v63 = vpop.f32.mrf.mxu2 }
  0xd0   : > { %v357_v37 = vpop.f32.mrf.mxu0  ;;  %v377_v52 = vpop.f32.mrf.mxu1  ;;  %v482_v51 = vmul.f32 %v395_v63, %v395_v63 }
  0xd1   : > { %v467_v55 = vmul.f32 %v357_v37, %v357_v37  ;;  %v429_v58 = vadd.f32 %v428_v54, %v357_v37  ;;  %v475_v21 = vmul.f32 %v377_v52, %v377_v52 }
  0xd3   : > { %v498_v60 = vadd.f32 %v497_v57, %v467_v55 }
  0xd7   : > { %v397_v17 = vpop.f32.mrf.mxu2 }
  0xd8   : > { %v360_v48 = vpop.f32.mrf.mxu0  ;;  %v380_v6 = vpop.f32.mrf.mxu1  ;;  %v483_v55 = vmul.f32 %v397_v17, %v397_v17 }
  0xd9   : > { %v468_v59 = vmul.f32 %v360_v48, %v360_v48  ;;  %v430_v61 = vadd.f32 %v429_v58, %v360_v48  ;;  %v476_v26 = vmul.f32 %v380_v6, %v380_v6  ;;  %v481_v48 = vmul.f32 %v842_v44, %v842_v44 }
  0xdb   : > { %v499_v0 = vadd.f32 %v498_v60, %v468_v59 }
  0xdf   : > { %v400_v41 = vpop.f32.mrf.mxu2 }
  0xe0   : > { %v362_v62 = vpop.f32.mrf.mxu0  ;;  %v382_v24 = vpop.f32.mrf.mxu1  ;;  %v484_v60 = vmul.f32 %v400_v41, %v400_v41 }
  0xe1   : > { %v431_v1 = vadd.f32 %v430_v61, %v362_v62  ;;  %v469_v2 = vmul.f32 %v362_v62, %v362_v62  ;;  %v477_v37 = vmul.f32 %v382_v24, %v382_v24 }
  0xe3   : > { %v432_v4 = vadd.f32 %v431_v1, %v365_v25  ;;  %v500_v5 = vadd.f32 %v499_v0, %v469_v2  ;;  %v486_v0 = vmul.f32 %v836_v35, %v836_v35 }
  0xe5   : > { %v433_v8 = vadd.f32 %v432_v4, %v367_v27  ;;  %v501_v9 = vadd.f32 %v500_v5, %v470_v3  ;;  %v415_v27 = vpop.f32.mrf.mxu3  ;;  %v488_v5 = vmul.f32 %v844_v56, %v844_v56 }
  0xe7   : > { %v434_v12 = vadd.f32 %v433_v8, %v370_v30  ;;  %v502_v13 = vadd.f32 %v501_v9, %v471_v7  ;;  %v478_v30 = vmul.f32 %v832_v29, %v832_v29  ;;  %v402_v57 = vpop.f32.mrf.mxu2  ;;  %v489_v8 = vmul.f32 %v412_v10, %v412_v10 }
  0xe8   : > { %v485_v62 = vmul.f32 %v402_v57, %v402_v57 }
  0xe9   : > { %v503_v15 = vadd.f32 %v502_v13, %v472_v11  ;;  %v435_v16 = vadd.f32 %v434_v12, %v372_v33  ;;  %v490_v12 = vmul.f32 %v415_v27, %v415_v27 }
  0xeb   : > { %v436_v19 = vadd.f32 %v435_v16, %v375_v38  ;;  %v504_v20 = vadd.f32 %v503_v15, %v473_v14  ;;  %v479_v38 = vmul.f32 %v834_v32, %v834_v32 }
  0xed   : > { %v437_v22 = vadd.f32 %v436_v19, %v377_v52  ;;  %v505_v23 = vadd.f32 %v504_v20, %v474_v18  ;;  %v417_v50 = vpop.f32.mrf.mxu3 }
  0xee   : > { %v491_v15 = vmul.f32 %v417_v50, %v417_v50 }
  0xef   : > { %v438_v25 = vadd.f32 %v437_v22, %v380_v6  ;;  %v506_v28 = vadd.f32 %v505_v23, %v475_v21 }
  0xf1   : > { %v507_v31 = vadd.f32 %v506_v28, %v476_v26  ;;  %v439_v34 = vadd.f32 %v438_v25, %v382_v24  ;;  %v531_v25 = vlaneseq }
  0xf3   : > { %v440_v33 = vadd.f32 %v439_v34, %v832_v29  ;;  %v508_v40 = vadd.f32 %v507_v31, %v477_v37  ;;  %v532_v34 = vshrl.u32 %v531_v25, 7 }
  0xf5   : > { %v441_v42 = vadd.f32 %v440_v33, %v834_v32  ;;  %v509_v43 = vadd.f32 %v508_v40, %v478_v30  ;;  %v420_v2 = vpop.f32.mrf.mxu3  ;;  %vm534_vm0 = vcmp.eq.s32.totalorder %v532_v34, 1  ;;  %vm533_vm1 = vcmp.eq.s32.totalorder %v532_v34, 0 }
  0xf6   : > { %v492_v19 = vmul.f32 %v420_v2, %v420_v2 }
  0xf7   : > { %v442_v46 = vadd.f32 %v441_v42, %v838_v36  ;;  %v510_v47 = vadd.f32 %v509_v43, %v479_v38 }
  0xf9   : > { %v511_v49 = vadd.f32 %v510_v47, %v480_v45  ;;  %v443_v29 = vadd.f32 %v442_v46, %v842_v44 }
  0xfb   : > { %v444_v52 = vadd.f32 %v443_v29, %v395_v63  ;;  %v512_v53 = vadd.f32 %v511_v49, %v481_v48  ;;  %v487_v63 = vmul.f32 %v840_v39, %v840_v39 }
  0xfd   : > { %v445_v54 = vadd.f32 %v444_v52, %v397_v17  ;;  %v513_v32 = vadd.f32 %v512_v53, %v482_v51  ;;  %v422_v17 = vpop.f32.mrf.mxu3 }
  0xfe   : > { %v493_v22 = vmul.f32 %v422_v17, %v422_v17 }
  0xff   : > { %v514_v58 = vadd.f32 %v513_v32, %v483_v55  ;;  %v446_v59 = vadd.f32 %v445_v54, %v400_v41 }
 0x101   : > { %v515_v61 = vadd.f32 %v514_v58, %v484_v60  ;;  %v447_v36 = vadd.f32 %v446_v59, %v402_v57 }
 0x103   : > { %v448_v1 = vadd.f32 %v447_v36, %v836_v35  ;;  %v516_v44 = vadd.f32 %v515_v61, %v485_v62 }
 0x105   : > { %v449_v3 = vadd.f32 %v448_v1, %v840_v39  ;;  %v517_v4 = vadd.f32 %v516_v44, %v486_v0 }
 0x107   : > { %v450_v6 = vadd.f32 %v449_v3, %v844_v56  ;;  %v518_v7 = vadd.f32 %v517_v4, %v487_v63 }
 0x109   : > { %v519_v9 = vadd.f32 %v518_v7, %v488_v5  ;;  %v451_v11 = vadd.f32 %v450_v6, %v412_v10 }
 0x10b   : > { %v452_v35 = vadd.f32 %v451_v11, %v415_v27  ;;  %v520_v13 = vadd.f32 %v519_v9, %v489_v8 }
 0x10d   : > { %v453_v14 = vadd.f32 %v452_v35, %v417_v50  ;;  %v521_v16 = vadd.f32 %v520_v13, %v490_v12 }
 0x10f   : > { %v522_v39 = vadd.f32 %v521_v16, %v491_v15  ;;  %v454_v18 = vadd.f32 %v453_v14, %v420_v2 }
 0x111   : > { %v523_v20 = vadd.f32 %v522_v39, %v492_v19  ;;  %v455_v21 = vadd.f32 %v454_v18, %v422_v17 }
 0x113   : > { %v456_v56 = vrot.slane %v455_v21, 4  ;;  %v524_v23 = vadd.f32 %v523_v20, %v493_v22 }
 0x115   : > { %v457_v24 = vadd.f32 %v456_v56, %v455_v21  ;;  %v525_v10 = vrot.slane %v524_v23, 4 }
 0x117   : > { %v458_v26 = vrot.slane %v457_v24, 2  ;;  %v526_v28 = vadd.f32 %v525_v10, %v524_v23 }
 0x119   : > { %v459_v27 = vadd.f32 %v458_v26, %v457_v24  ;;  %v527_v31 = vrot.slane %v526_v28, 2 }
 0x11b   : > { %v528_v37 = vadd.f32 %v527_v31, %v526_v28  ;;  %v460_v30 = vrot.slane %v459_v27, 1 }
 0x11d   : > { %v529_v33 = vrot.slane %v528_v37, 1  ;;  %v461_v41 = vadd.f32 %v460_v30, %v459_v27 }
 0x11f   : > { %v530_v40 = vadd.f32 %v529_v33, %v528_v37 }
 0x121   : > { %v535_v38 = vsel %vm534_vm0, %v530_v40, 0.0 }
 0x122   : > { %v536_v42 = vsel %vm533_vm1, %v461_v41, %v535_v38 }
 0x123   : > { %537 = vst [vmem:[%s143_s7] sm:$0xff] %v536_v42 }
 0x124 PF: > { %s12_s9 = sadd.s32 1, %s759_s9  }
 0x125   : > { %p9_p5 = scmp.ge.s32.totalorder %s12_s9, 4  }
 0x127   :  { %11 = sbr.rel (!%p9_p5) target bundleno = 1 (0x1), region = 58 }

// kernel: mbconv_forward.7
= control target key start
LH: loop header
LB: loop body
LE: loop exit
PB: predicated region body
PF: predicated region fallthrough
CT: control target
= control target key end

     0   :  { %s972_s18 = smov 0   ;;  %s1180_s0 = inlined_call_operand.vmem [shape: bf16[512,128], index: 0, kind: input, shape index: {}]   ;;  %s1181_s1 = inlined_call_operand.vmem [shape: bf16[128,128], index: 1, kind: input, shape index: {}]   ;;  %s1182_s2 = inlined_call_operand.vmem [shape: f32[1,128], index: 2, kind: input, shape index: {}]   ;;  %s1183_s3 = inlined_call_operand.vmem [shape: f32[1,128], index: 3, kind: input, shape index: {}]   ;;  %s1184_s4 = inlined_call_operand.vmem [shape: f32[512,128], index: 4, kind: input, shape index: {}]   ;;  %s1185_s5 = inlined_call_operand.vmem [shape: f32[512,128], index: 5, kind: output, shape index: {}]  }
   0x1 LB: > { %s767_s19 = sadd.s32 4294967295, %s940_s18   ;;  %p771_p0 = scmp.ge.s32.totalorder %s940_s18, 1  ;;  %s940_s18 = sphi %s972_s18, %s15_s18  }
   0x2   : > { %p199_p1 = scmp.lt.s32.totalorder %s940_s18, 3 }
   0x4   : > { %p200_p2 = pnand %p771_p0, %p199_p1 }
   0x5   : > { %s772_s28 = sshll.u32 (!%p200_p2), %s767_s19, 5 }
   0x6   : > { %203 = sbr.rel (%p200_p2) target bundleno = 240 (0xf0), region = 40  ;;  %p233_p3 = scmp.lt.s32.totalorder (!%p200_p2), %s772_s28, 63 }
   0xb   : > { %v899_v0 = vld [vmem:[%s1181_s1 + $0x38] sm:$0xff]  ;;  %v898_v1 = vld [vmem:[%s1181_s1 + $0x30] sm:$0xff]  ;;  %v897_v2 = vld [vmem:[%s1181_s1 + $0x28] sm:$0xff]  ;;  %s1187_s28 = smov (!%p233_p3, %s772_s28), 63 }
   0xc   : > { %442 = vmatpush.bf16.msra.mxu0 %v899_v0  ;;  %900 = vmatpush.bf16.msra.mxu1 %v899_v0  ;;  %v896_v3 = vld [vmem:[%s1181_s1 + $0x20] sm:$0xff]  ;;  %v895_v4 = vld [vmem:[%s1181_s1 + $0x18] sm:$0xff]  ;;  %v894_v5 = vld [vmem:[%s1181_s1 + $0x10] sm:$0xff]  ;;  %s773_s10 = sshll.u32 %s1187_s28, 2  ;;  %s775_s16 = sshll.u32 %s1187_s28, 3 }
   0xd   : > { %901 = vmatpush.bf16.msra.mxu2 %v899_v0  ;;  %902 = vmatpush.bf16.msra.mxu3 %v899_v0  ;;  %v893_v6 = vld [vmem:[%s1181_s1 + $0x8] sm:$0xff]  ;;  %v892_v7 = vld [vmem:[%s1181_s1] sm:$0xff]  ;;  %s1010_s15 = scalar_lea.vmem %s1180_s0, %s773_s10  ;;  %s1037_s22 = scalar_lea.vmem %s1184_s4, %s775_s16 }
   0xe   : > { %v876_v8 = vld [vmem:[%s1010_s15] sm:$0xff]  ;;  %v877_v12 = vld [vmem:[%s1010_s15 + $0x8] sm:$0xff]  ;;  %v878_v16 = vld [vmem:[%s1010_s15 + $0x10] sm:$0xff]  ;;  %s1053_s27 = scalar_lea.vmem %s1185_s5, %s775_s16 }
   0xf   : > { %v880_v9 = vld [vmem:[%s1010_s15 + $0x20] sm:$0xff]  ;;  %v881_v13 = vld [vmem:[%s1010_s15 + $0x28] sm:$0xff]  ;;  %v882_v17 = vld [vmem:[%s1010_s15 + $0x30] sm:$0xff] }
  0x10   : > { %443 = vmatpush.bf16.msra.mxu0 %v898_v1  ;;  %903 = vmatpush.bf16.msra.mxu1 %v898_v1  ;;  %v884_v10 = vld [vmem:[%s1010_s15 + $0x40] sm:$0xff]  ;;  %v885_v14 = vld [vmem:[%s1010_s15 + $0x48] sm:$0xff]  ;;  %v886_v18 = vld [vmem:[%s1010_s15 + $0x50] sm:$0xff] }
  0x11   : > { %904 = vmatpush.bf16.msra.mxu2 %v898_v1  ;;  %905 = vmatpush.bf16.msra.mxu3 %v898_v1  ;;  %v888_v11 = vld [vmem:[%s1010_s15 + $0x60] sm:$0xff]  ;;  %v889_v15 = vld [vmem:[%s1010_s15 + $0x68] sm:$0xff]  ;;  %v890_v19 = vld [vmem:[%s1010_s15 + $0x70] sm:$0xff] }
  0x12   : > { %v879_v20 = vld [vmem:[%s1010_s15 + $0x18] sm:$0xff]  ;;  %v1032_v24 = vld [vmem:[%s1182_s2] ss:$0 sm:$0xff]  ;;  %v604_v48 = vld [vmem:[%s1037_s22 + $0x8] sm:$0xff] }
  0x13   : > { %v883_v21 = vld [vmem:[%s1010_s15 + $0x38] sm:$0xff]  ;;  %v1042_v25 = vld [vmem:[%s1183_s3] ss:$0 sm:$0xff]  ;;  %v612_v49 = vld [vmem:[%s1037_s22 + $0x48] sm:$0xff] }
  0x14   : > { %444 = vmatpush.bf16.msra.mxu0 %v897_v2  ;;  %906 = vmatpush.bf16.msra.mxu1 %v897_v2  ;;  %v887_v22 = vld [vmem:[%s1010_s15 + $0x58] sm:$0xff]  ;;  %v603_v30 = vld [vmem:[%s1037_s22] sm:$0xff]  ;;  %v620_v62 = vld [vmem:[%s1037_s22 + $0x88] sm:$0xff] }
  0x15   : > { %907 = vmatpush.bf16.msra.mxu2 %v897_v2  ;;  %908 = vmatpush.bf16.msra.mxu3 %v897_v2  ;;  %v891_v23 = vld [vmem:[%s1010_s15 + $0x78] sm:$0xff]  ;;  %v611_v31 = vld [vmem:[%s1037_s22 + $0x40] sm:$0xff]  ;;  %v628_v63 = vld [vmem:[%s1037_s22 + $0xc8] sm:$0xff] }
  0x16   : > { %v619_v42 = vld [vmem:[%s1037_s22 + $0x80] sm:$0xff] }
  0x17   : > { %v627_v43 = vld [vmem:[%s1037_s22 + $0xc0] sm:$0xff] }
  0x18   : > { %445 = vmatpush.bf16.msra.mxu0 %v896_v3  ;;  %909 = vmatpush.bf16.msra.mxu1 %v896_v3 }
  0x19   : > { %910 = vmatpush.bf16.msra.mxu2 %v896_v3  ;;  %911 = vmatpush.bf16.msra.mxu3 %v896_v3 }
  0x1c   : > { %446 = vmatpush.bf16.msra.mxu0 %v895_v4  ;;  %912 = vmatpush.bf16.msra.mxu1 %v895_v4 }
  0x1d   : > { %913 = vmatpush.bf16.msra.mxu2 %v895_v4  ;;  %914 = vmatpush.bf16.msra.mxu3 %v895_v4  ;;  %v605_v4 = vld [vmem:[%s1037_s22 + $0x10] sm:$0xff] }
  0x20   : > { %447 = vmatpush.bf16.msra.mxu0 %v894_v5  ;;  %915 = vmatpush.bf16.msra.mxu1 %v894_v5 }
  0x21   : > { %916 = vmatpush.bf16.msra.mxu2 %v894_v5  ;;  %917 = vmatpush.bf16.msra.mxu3 %v894_v5  ;;  %v613_v5 = vld [vmem:[%s1037_s22 + $0x50] sm:$0xff] }
  0x24   : > { %448 = vmatpush.bf16.msra.mxu0 %v893_v6  ;;  %918 = vmatpush.bf16.msra.mxu1 %v893_v6 }
  0x25   : > { %919 = vmatpush.bf16.msra.mxu2 %v893_v6  ;;  %920 = vmatpush.bf16.msra.mxu3 %v893_v6 }
  0x28   : > { %449 = vmatpush.bf16.msra.mxu0 %v892_v7  ;;  %921 = vmatpush.bf16.msra.mxu1 %v892_v7 }
  0x29   : > { %922 = vmatpush.bf16.msra.mxu2 %v892_v7  ;;  %923 = vmatpush.bf16.msra.mxu3 %v892_v7 }
  0x2b   : > { %450 = vmatmul.bf16.vlgmr.msra.gmra.mxu0 %v876_v8  ;;  %470 = vmatmul.bf16.vlgmr.msra.gmra.mxu1 %v880_v9 }
  0x2c   : > { %490 = vmatmul.bf16.vlgmr.msra.gmra.mxu2 %v884_v10  ;;  %510 = vmatmul.bf16.vlgmr.msra.gmra.mxu3 %v888_v11 }
  0x3b   : > { %455 = vmatmul.bf16.gmra.mxu0 %v877_v12  ;;  %475 = vmatmul.bf16.gmra.mxu1 %v881_v13 }
  0x3c   : > { %495 = vmatmul.bf16.gmra.mxu2 %v885_v14  ;;  %515 = vmatmul.bf16.gmra.mxu3 %v889_v15 }
  0x4b   : > { %460 = vmatmul.bf16.gmra.mxu0 %v878_v16  ;;  %480 = vmatmul.bf16.gmra.mxu1 %v882_v17 }
  0x4c   : > { %500 = vmatmul.bf16.gmra.mxu2 %v886_v18  ;;  %520 = vmatmul.bf16.gmra.mxu3 %v890_v19  ;;  %v621_v18 = vld [vmem:[%s1037_s22 + $0x90] sm:$0xff] }
  0x4d   : > { %v629_v19 = vld [vmem:[%s1037_s22 + $0xd0] sm:$0xff] }
  0x5b   : > { %465 = vmatmul.bf16.gmra.mxu0 %v879_v20  ;;  %485 = vmatmul.bf16.gmra.mxu1 %v883_v21 }
  0x5c   : > { %505 = vmatmul.bf16.gmra.mxu2 %v887_v22  ;;  %525 = vmatmul.bf16.gmra.mxu3 %v891_v23 }
  0xa8   : > { %v451_v26 = vpop.f32.mrf.mxu0  ;;  %v471_v27 = vpop.f32.mrf.mxu1 }
  0xa9   : > { %v535_v28 = vmul.f32 %v1032_v24, %v451_v26  ;;  %v543_v29 = vmul.f32 %v1032_v24, %v471_v27  ;;  %v606_v26 = vld [vmem:[%s1037_s22 + $0x18] sm:$0xff] }
  0xaa   : > { %v614_v27 = vld [vmem:[%s1037_s22 + $0x58] sm:$0xff] }
  0xab   : > { %v571_v32 = vadd.f32 %v1042_v25, %v535_v28  ;;  %v579_v33 = vadd.f32 %v1042_v25, %v543_v29 }
  0xad   : > { %v635_v34 = vadd.f32 %v603_v30, %v571_v32  ;;  %v643_v35 = vadd.f32 %v611_v31, %v579_v33 }
  0xaf   : > { %667 = vst [vmem:[%s1053_s27] sm:$0xff] %v635_v34  ;;  %v491_v36 = vpop.f32.mrf.mxu2  ;;  %v511_v37 = vpop.f32.mrf.mxu3 }
  0xb0   : > { %675 = vst [vmem:[%s1053_s27 + $0x40] sm:$0xff] %v643_v35  ;;  %v551_v38 = vmul.f32 %v1032_v24, %v491_v36  ;;  %v559_v39 = vmul.f32 %v1032_v24, %v511_v37  ;;  %v453_v40 = vpop.f32.mrf.mxu0  ;;  %v473_v41 = vpop.f32.mrf.mxu1 }
  0xb1   : > { %v536_v44 = vmul.f32 %v1032_v24, %v453_v40  ;;  %v544_v45 = vmul.f32 %v1032_v24, %v473_v41  ;;  %v622_v40 = vld [vmem:[%s1037_s22 + $0x98] sm:$0xff] }
  0xb2   : > { %v587_v46 = vadd.f32 %v1042_v25, %v551_v38  ;;  %v595_v47 = vadd.f32 %v1042_v25, %v559_v39  ;;  %v630_v41 = vld [vmem:[%s1037_s22 + $0xd8] sm:$0xff] }
  0xb3   : > { %v572_v50 = vadd.f32 %v1042_v25, %v536_v44  ;;  %v580_v51 = vadd.f32 %v1042_v25, %v544_v45 }
  0xb4   : > { %v651_v52 = vadd.f32 %v619_v42, %v587_v46  ;;  %v659_v53 = vadd.f32 %v627_v43, %v595_v47  ;;  %v607_v46 = vld [vmem:[%s1037_s22 + $0x20] sm:$0xff] }
  0xb5   : > { %v636_v54 = vadd.f32 %v604_v48, %v572_v50  ;;  %v644_v55 = vadd.f32 %v612_v49, %v580_v51  ;;  %v615_v47 = vld [vmem:[%s1037_s22 + $0x60] sm:$0xff] }
  0xb6   : > { %683 = vst [vmem:[%s1053_s27 + $0x80] sm:$0xff] %v651_v52 }
  0xb7   : > { %691 = vst [vmem:[%s1053_s27 + $0xc0] sm:$0xff] %v659_v53  ;;  %v493_v56 = vpop.f32.mrf.mxu2  ;;  %v513_v57 = vpop.f32.mrf.mxu3 }
  0xb8   : > { %668 = vst [vmem:[%s1053_s27 + $0x8] sm:$0xff] %v636_v54  ;;  %v552_v58 = vmul.f32 %v1032_v24, %v493_v56  ;;  %v560_v59 = vmul.f32 %v1032_v24, %v513_v57  ;;  %v456_v60 = vpop.f32.mrf.mxu0  ;;  %v476_v61 = vpop.f32.mrf.mxu1 }
  0xb9   : > { %676 = vst [vmem:[%s1053_s27 + $0x48] sm:$0xff] %v644_v55  ;;  %v537_v0 = vmul.f32 %v1032_v24, %v456_v60  ;;  %v545_v1 = vmul.f32 %v1032_v24, %v476_v61  ;;  %v623_v60 = vld [vmem:[%s1037_s22 + $0xa0] sm:$0xff] }
  0xba   : > { %v588_v2 = vadd.f32 %v1042_v25, %v552_v58  ;;  %v596_v3 = vadd.f32 %v1042_v25, %v560_v59  ;;  %v631_v61 = vld [vmem:[%s1037_s22 + $0xe0] sm:$0xff] }
  0xbb   : > { %v573_v6 = vadd.f32 %v1042_v25, %v537_v0  ;;  %v581_v7 = vadd.f32 %v1042_v25, %v545_v1 }
  0xbc   : > { %v652_v8 = vadd.f32 %v620_v62, %v588_v2  ;;  %v660_v9 = vadd.f32 %v628_v63, %v596_v3  ;;  %v608_v2 = vld [vmem:[%s1037_s22 + $0x28] sm:$0xff] }
  0xbd   : > { %v637_v10 = vadd.f32 %v605_v4, %v573_v6  ;;  %v645_v11 = vadd.f32 %v613_v5, %v581_v7  ;;  %v616_v3 = vld [vmem:[%s1037_s22 + $0x68] sm:$0xff] }
  0xbe   : > { %684 = vst [vmem:[%s1053_s27 + $0x88] sm:$0xff] %v652_v8 }
  0xbf   : > { %692 = vst [vmem:[%s1053_s27 + $0xc8] sm:$0xff] %v660_v9  ;;  %v496_v12 = vpop.f32.mrf.mxu2  ;;  %v516_v13 = vpop.f32.mrf.mxu3 }
  0xc0   : > { %669 = vst [vmem:[%s1053_s27 + $0x10] sm:$0xff] %v637_v10  ;;  %v553_v14 = vmul.f32 %v1032_v24, %v496_v12  ;;  %v561_v15 = vmul.f32 %v1032_v24, %v516_v13  ;;  %v458_v16 = vpop.f32.mrf.mxu0  ;;  %v478_v17 = vpop.f32.mrf.mxu1 }
  0xc1   : > { %677 = vst [vmem:[%s1053_s27 + $0x50] sm:$0xff] %v645_v11  ;;  %v538_v20 = vmul.f32 %v1032_v24, %v458_v16  ;;  %v546_v21 = vmul.f32 %v1032_v24, %v478_v17  ;;  %v624_v16 = vld [vmem:[%s1037_s22 + $0xa8] sm:$0xff] }
  0xc2   : > { %v589_v22 = vadd.f32 %v1042_v25, %v553_v14  ;;  %v597_v23 = vadd.f32 %v1042_v25, %v561_v15  ;;  %v632_v17 = vld [vmem:[%s1037_s22 + $0xe8] sm:$0xff] }
  0xc3   : > { %v574_v28 = vadd.f32 %v1042_v25, %v538_v20  ;;  %v582_v29 = vadd.f32 %v1042_v25, %v546_v21 }
  0xc4   : > { %v653_v30 = vadd.f32 %v621_v18, %v589_v22  ;;  %v661_v31 = vadd.f32 %v629_v19, %v597_v23  ;;  %v609_v22 = vld [vmem:[%s1037_s22 + $0x30] sm:$0xff] }
  0xc5   : > { %v638_v32 = vadd.f32 %v606_v26, %v574_v28  ;;  %v646_v33 = vadd.f32 %v614_v27, %v582_v29  ;;  %v617_v23 = vld [vmem:[%s1037_s22 + $0x70] sm:$0xff] }
  0xc6   : > { %685 = vst [vmem:[%s1053_s27 + $0x90] sm:$0xff] %v653_v30 }
  0xc7   : > { %693 = vst [vmem:[%s1053_s27 + $0xd0] sm:$0xff] %v661_v31  ;;  %v498_v34 = vpop.f32.mrf.mxu2  ;;  %v518_v35 = vpop.f32.mrf.mxu3 }
  0xc8   : > { %670 = vst [vmem:[%s1053_s27 + $0x18] sm:$0xff] %v638_v32  ;;  %v554_v36 = vmul.f32 %v1032_v24, %v498_v34  ;;  %v562_v37 = vmul.f32 %v1032_v24, %v518_v35  ;;  %v461_v38 = vpop.f32.mrf.mxu0  ;;  %v481_v39 = vpop.f32.mrf.mxu1 }
  0xc9   : > { %678 = vst [vmem:[%s1053_s27 + $0x58] sm:$0xff] %v646_v33  ;;  %v539_v42 = vmul.f32 %v1032_v24, %v461_v38  ;;  %v547_v43 = vmul.f32 %v1032_v24, %v481_v39  ;;  %v625_v38 = vld [vmem:[%s1037_s22 + $0xb0] sm:$0xff] }
  0xca   : > { %v590_v44 = vadd.f32 %v1042_v25, %v554_v36  ;;  %v598_v45 = vadd.f32 %v1042_v25, %v562_v37  ;;  %v633_v39 = vld [vmem:[%s1037_s22 + $0xf0] sm:$0xff] }
  0xcb   : > { %v575_v48 = vadd.f32 %v1042_v25, %v539_v42  ;;  %v583_v49 = vadd.f32 %v1042_v25, %v547_v43 }
  0xcc   : > { %v654_v50 = vadd.f32 %v622_v40, %v590_v44  ;;  %v662_v51 = vadd.f32 %v630_v41, %v598_v45  ;;  %v610_v44 = vld [vmem:[%s1037_s22 + $0x38] sm:$0xff] }
  0xcd   : > { %v639_v52 = vadd.f32 %v607_v46, %v575_v48  ;;  %v647_v53 = vadd.f32 %v615_v47, %v583_v49  ;;  %v618_v45 = vld [vmem:[%s1037_s22 + $0x78] sm:$0xff] }
  0xce   : > { %686 = vst [vmem:[%s1053_s27 + $0x98] sm:$0xff] %v654_v50 }
  0xcf   : > { %694 = vst [vmem:[%s1053_s27 + $0xd8] sm:$0xff] %v662_v51  ;;  %v501_v54 = vpop.f32.mrf.mxu2  ;;  %v521_v55 = vpop.f32.mrf.mxu3 }
  0xd0   : > { %671 = vst [vmem:[%s1053_s27 + $0x20] sm:$0xff] %v639_v52  ;;  %v555_v56 = vmul.f32 %v1032_v24, %v501_v54  ;;  %v563_v57 = vmul.f32 %v1032_v24, %v521_v55  ;;  %v463_v58 = vpop.f32.mrf.mxu0  ;;  %v483_v59 = vpop.f32.mrf.mxu1 }
  0xd1   : > { %679 = vst [vmem:[%s1053_s27 + $0x60] sm:$0xff] %v647_v53  ;;  %v540_v62 = vmul.f32 %v1032_v24, %v463_v58  ;;  %v548_v63 = vmul.f32 %v1032_v24, %v483_v59 }
  0xd2   : > { %v591_v0 = vadd.f32 %v1042_v25, %v555_v56  ;;  %v599_v1 = vadd.f32 %v1042_v25, %v563_v57  ;;  %v626_v56 = vld [vmem:[%s1037_s22 + $0xb8] sm:$0xff] }
  0xd3   : > { %v576_v4 = vadd.f32 %v1042_v25, %v540_v62  ;;  %v584_v5 = vadd.f32 %v1042_v25, %v548_v63  ;;  %v634_v57 = vld [vmem:[%s1037_s22 + $0xf8] sm:$0xff] }
  0xd4   : > { %v655_v6 = vadd.f32 %v623_v60, %v591_v0  ;;  %v663_v7 = vadd.f32 %v631_v61, %v599_v1 }
  0xd5   : > { %v640_v8 = vadd.f32 %v608_v2, %v576_v4  ;;  %v648_v9 = vadd.f32 %v616_v3, %v584_v5 }
  0xd6   : > { %687 = vst [vmem:[%s1053_s27 + $0xa0] sm:$0xff] %v655_v6 }
  0xd7   : > { %695 = vst [vmem:[%s1053_s27 + $0xe0] sm:$0xff] %v663_v7  ;;  %v503_v10 = vpop.f32.mrf.mxu2  ;;  %v523_v11 = vpop.f32.mrf.mxu3 }
  0xd8   : > { %672 = vst [vmem:[%s1053_s27 + $0x28] sm:$0xff] %v640_v8  ;;  %v556_v12 = vmul.f32 %v1032_v24, %v503_v10  ;;  %v564_v13 = vmul.f32 %v1032_v24, %v523_v11  ;;  %v466_v14 = vpop.f32.mrf.mxu0  ;;  %v486_v15 = vpop.f32.mrf.mxu1 }
  0xd9   : > { %680 = vst [vmem:[%s1053_s27 + $0x68] sm:$0xff] %v648_v9  ;;  %v541_v18 = vmul.f32 %v1032_v24, %v466_v14  ;;  %v549_v19 = vmul.f32 %v1032_v24, %v486_v15 }
  0xda   : > { %v592_v20 = vadd.f32 %v1042_v25, %v556_v12  ;;  %v600_v21 = vadd.f32 %v1042_v25, %v564_v13 }
  0xdb   : > { %v577_v26 = vadd.f32 %v1042_v25, %v541_v18  ;;  %v585_v27 = vadd.f32 %v1042_v25, %v549_v19 }
  0xdc   : > { %v656_v28 = vadd.f32 %v624_v16, %v592_v20  ;;  %v664_v29 = vadd.f32 %v632_v17, %v600_v21 }
  0xdd   : > { %v641_v30 = vadd.f32 %v609_v22, %v577_v26  ;;  %v649_v31 = vadd.f32 %v617_v23, %v585_v27 }
  0xde   : > { %688 = vst [vmem:[%s1053_s27 + $0xa8] sm:$0xff] %v656_v28 }
  0xdf   : > { %696 = vst [vmem:[%s1053_s27 + $0xe8] sm:$0xff] %v664_v29  ;;  %v506_v32 = vpop.f32.mrf.mxu2  ;;  %v526_v33 = vpop.f32.mrf.mxu3 }
  0xe0   : > { %673 = vst [vmem:[%s1053_s27 + $0x30] sm:$0xff] %v641_v30  ;;  %v557_v34 = vmul.f32 %v1032_v24, %v506_v32  ;;  %v565_v35 = vmul.f32 %v1032_v24, %v526_v33  ;;  %v468_v36 = vpop.f32.mrf.mxu0  ;;  %v488_v37 = vpop.f32.mrf.mxu1 }
  0xe1   : > { %681 = vst [vmem:[%s1053_s27 + $0x70] sm:$0xff] %v649_v31  ;;  %v542_v40 = vmul.f32 %v1032_v24, %v468_v36  ;;  %v550_v41 = vmul.f32 %v1032_v24, %v488_v37 }
  0xe2   : > { %v593_v42 = vadd.f32 %v1042_v25, %v557_v34  ;;  %v601_v43 = vadd.f32 %v1042_v25, %v565_v35 }
  0xe3   : > { %v578_v46 = vadd.f32 %v1042_v25, %v542_v40  ;;  %v586_v47 = vadd.f32 %v1042_v25, %v550_v41 }
  0xe4   : > { %v657_v48 = vadd.f32 %v625_v38, %v593_v42  ;;  %v665_v49 = vadd.f32 %v633_v39, %v601_v43 }
  0xe5   : > { %v642_v50 = vadd.f32 %v610_v44, %v578_v46  ;;  %v650_v51 = vadd.f32 %v618_v45, %v586_v47 }
  0xe6   : > { %689 = vst [vmem:[%s1053_s27 + $0xb0] sm:$0xff] %v657_v48 }
  0xe7   : > { %697 = vst [vmem:[%s1053_s27 + $0xf0] sm:$0xff] %v665_v49  ;;  %v508_v52 = vpop.f32.mrf.mxu2  ;;  %v528_v53 = vpop.f32.mrf.mxu3 }
  0xe8   : > { %674 = vst [vmem:[%s1053_s27 + $0x38] sm:$0xff] %v642_v50  ;;  %v558_v54 = vmul.f32 %v1032_v24, %v508_v52  ;;  %v566_v55 = vmul.f32 %v1032_v24, %v528_v53 }
  0xe9   : > { %682 = vst [vmem:[%s1053_s27 + $0x78] sm:$0xff] %v650_v51 }
  0xea   : > { %v594_v58 = vadd.f32 %v1042_v25, %v558_v54  ;;  %v602_v59 = vadd.f32 %v1042_v25, %v566_v55 }
  0xec   : > { %v658_v60 = vadd.f32 %v626_v56, %v594_v58  ;;  %v666_v61 = vadd.f32 %v634_v57, %v602_v59 }
  0xee   : > { %690 = vst [vmem:[%s1053_s27 + $0xb8] sm:$0xff] %v658_v60 }
  0xef   : > { %698 = vst [vmem:[%s1053_s27 + $0xf8] sm:$0xff] %v666_v61 }
  0xf0 PF: > { %s15_s18 = sadd.s32 1, %s940_s18  }
  0xf1   : > { %p12_p4 = scmp.ge.s32.totalorder %s15_s18, 4  }
  0xf3   :  { %14 = sbr.rel (!%p12_p4) target bundleno = 1 (0x1), region = 73 }

// kernel: mbconv_forward.5
= control target key start
LH: loop header
LB: loop body
LE: loop exit
PB: predicated region body
PF: predicated region fallthrough
CT: control target
= control target key end

     0   :  { %s6724_s13 = smov 0   ;;  %s10196_s0 = inlined_call_operand.vmem [shape: bf16[2,18,18,128], index: 0, kind: input, shape index: {}]   ;;  %s10197_s1 = inlined_call_operand.vmem [shape: bf16[128,128], index: 1, kind: input, shape index: {}]   ;;  %s10198_s2 = inlined_call_operand.vmem [shape: f32[1,128], index: 2, kind: input, shape index: {}]   ;;  %s10199_s3 = inlined_call_operand.vmem [shape: f32[1,128], index: 3, kind: input, shape index: {}]   ;;  %s10200_s4 = inlined_call_operand.vmem [shape: bf16[3,3,128,128], index: 4, kind: input, shape index: {}]   ;;  %s10201_s5 = inlined_call_operand.vmem [shape: f32[1,128], index: 5, kind: input, shape index: {}]   ;;  %s10202_s6 = inlined_call_operand.vmem [shape: f32[128,128], index: 6, kind: input, shape index: {}]   ;;  %s10203_s7 = inlined_call_operand.vmem [shape: f32[1,128], index: 7, kind: input, shape index: {}]   ;;  %s10204_s8 = inlined_call_operand.vmem [shape: f32[128,128], index: 8, kind: input, shape index: {}]   ;;  %s10205_s9 = inlined_call_operand.vmem [shape: f32[1,128], index: 9, kind: input, shape index: {}]   ;;  %s10206_s10 = inlined_call_operand.vmem [shape: bf16[2,16,16,128], index: 10, kind: output, shape index: {}]  }
   0x1 LB: > { %s5757_s14 = sadd.s32 4294967295, %s6664_s13   ;;  %p5761_p0 = scmp.ge.s32.totalorder %s6664_s13, 1  ;;  %s6664_s13 = sphi %s6724_s13, %s20_s13  }
   0x2   : > { %p312_p1 = scmp.lt.s32.totalorder %s6664_s13, 3 }
   0x4   : > { %p313_p2 = pnand %p5761_p0, %p312_p1 }
   0x6   : > { %316 = sbr.rel (%p313_p2) target bundleno = 1635 (0x663), region = 60 }
   0xb   : > { %v6283_v0 = vld [vmem:[%s10197_s1 + $0x38] sm:$0xff]  ;;  %p350_p3 = scmp.lt.s32.totalorder %s5757_s14, 1  ;;  %v6282_v1 = vld [vmem:[%s10197_s1 + $0x30] sm:$0xff]  ;;  %v6281_v2 = vld [vmem:[%s10197_s1 + $0x28] sm:$0xff]  ;;  %vm522_vm0 = vcmask 1040384   ;;  %vm526_vm1 = vcmask 1041409  }
   0xc   : > { %1395 = vmatpush.bf16.msra.mxu0 %v6283_v0  ;;  %vm530_vm2 = vcmask 1042434   ;;  %vm534_vm3 = vcmask 1043459   ;;  %v6280_v7 = vld [vmem:[%s10197_s1 + $0x20] sm:$0xff]  ;;  %v6279_v21 = vld [vmem:[%s10197_s1 + $0x18] sm:$0xff]  ;;  %v6278_v26 = vld [vmem:[%s10197_s1 + $0x10] sm:$0xff] }
   0xd   : > { %s10693_s14 = smov (!%p350_p3, %s5757_s14), 1  ;;  %v6277_v31 = vld [vmem:[%s10197_s1 + $0x8] sm:$0xff]  ;;  %v6276_v40 = vld [vmem:[%s10197_s1] sm:$0xff] }
   0xe   : > { %s6467_s19 = smul.u32 216, %s10693_s14  ;;  %s6275_s11 = sshll.u32 %s10693_s14, 7 }
   0xf   : > { %s10153_s14 = scalar_lea.vmem %s10206_s10, %s6275_s11 }
  0x10   : > { %1396 = vmatpush.bf16.msra.mxu0 %v6282_v1  ;;  %s6747_s24 = scalar_lea.vmem %s10196_s0, %s6467_s19 }
  0x11   : > { %v360_v3 = vld [vmem:[%s6747_s24] sm:$0xf]  ;;  %v361_v4 = vld [vmem:[%s6747_s24 + $0x4] sm:$0xf]  ;;  %v363_v23 = vld [vmem:[%s6747_s24 + $0xc] sm:$0xf] }
  0x12   : > { %v468_v5 = vrot.slane %v360_v3, 3  ;;  %v469_v6 = vrot.slane %v361_v4, 3  ;;  %v362_v24 = vld [vmem:[%s6747_s24 + $0x8] sm:$0x1]  ;;  %v471_v25 = vrot.slane %v363_v23, 3 }
  0x13   : > { %v364_v27 = vld [vmem:[%s6747_s24 + $0x10] sm:$0xf]  ;;  %v470_v28 = vrot.slane %v362_v24, 3  ;;  %v366_v46 = vld [vmem:[%s6747_s24 + $0x18] sm:$0xf] }
  0x14   : > { %1397 = vmatpush.bf16.msra.mxu0 %v6281_v2  ;;  %v525_v8 = vsel %vm522_vm0, %v360_v3, %v468_v5  ;;  %v527_v9 = vsel %vm526_vm1, %v360_v3, %v468_v5  ;;  %v531_v10 = vsel %vm530_vm2, %v360_v3, %v468_v5  ;;  %v535_v11 = vsel %vm534_vm3, %v360_v3, %v468_v5  ;;  %v365_v47 = vld [vmem:[%s6747_s24 + $0x14] sm:$0x1]  ;;  %v367_v49 = vld [vmem:[%s6747_s24 + $0x1c] sm:$0xf]  ;;  %v369_v2 = vld [vmem:[%s6747_s24 + $0x24] sm:$0xf] }
  0x15   : > { %v529_v12 = vrot.slane %v527_v9, 1  ;;  %v533_v13 = vrot.slane %v531_v10, 2  ;;  %v537_v14 = vrot.slane %v535_v11, 3  ;;  %v540_v15 = vsel %vm522_vm0, %v361_v4, %v469_v6  ;;  %1028 = vst [vmem:[#allocation1] ss:$9 sm:$0xff] %v525_v8 }
  0x16   : > { %v541_v16 = vsel %vm526_vm1, %v361_v4, %v469_v6  ;;  %v544_v17 = vsel %vm530_vm2, %v361_v4, %v469_v6  ;;  %v547_v18 = vsel %vm534_vm3, %v361_v4, %v469_v6  ;;  %1039 = vst [vmem:[#allocation1 + $0x4] ss:$9 sm:$0xff] %v540_v15  ;;  %v472_v29 = vrot.slane %v364_v27, 3  ;;  %v368_v3 = vld [vmem:[%s6747_s24 + $0x20] sm:$0x1] }
  0x17   : > { %v543_v19 = vrot.slane %v541_v16, 1  ;;  %v546_v20 = vrot.slane %v544_v17, 2  ;;  %1031 = vst [vmem:[#allocation1 + $0x1] ss:$9 sm:$0xff] %v529_v12  ;;  %v549_v22 = vrot.slane %v547_v18, 3  ;;  %v556_v30 = vsel %vm526_vm1, %v363_v23, %v471_v25 }
  0x18   : > { %1398 = vmatpush.bf16.msra.mxu0 %v6280_v7  ;;  %1034 = vst [vmem:[#allocation1 + $0x2] ss:$9 sm:$0xff] %v533_v13  ;;  %v559_v32 = vsel %vm530_vm2, %v363_v23, %v471_v25  ;;  %v552_v33 = vsel %vm522_vm0, %v362_v24, %v470_v28  ;;  %v562_v34 = vsel %vm534_vm3, %v363_v23, %v471_v25  ;;  %v558_v36 = vrot.slane %v556_v30, 1  ;;  %v370_v9 = vld [vmem:[%s6747_s24 + $0x28] sm:$0xf] }
  0x19   : > { %1037 = vst [vmem:[#allocation1 + $0x3] ss:$9 sm:$0xff] %v537_v14  ;;  %v555_v35 = vsel %vm522_vm0, %v363_v23, %v471_v25  ;;  %v561_v38 = vrot.slane %v559_v32, 2  ;;  %v568_v39 = vsel %vm526_vm1, %v364_v27, %v472_v29  ;;  %v564_v41 = vrot.slane %v562_v34, 3  ;;  %v371_v23 = vld [vmem:[%s6747_s24 + $0x2c] sm:$0x1] }
  0x1a   : > { %1042 = vst [vmem:[#allocation1 + $0x5] ss:$9 sm:$0xff] %v543_v19  ;;  %v571_v42 = vsel %vm530_vm2, %v364_v27, %v472_v29  ;;  %v567_v43 = vsel %vm522_vm0, %v364_v27, %v472_v29  ;;  %v570_v44 = vrot.slane %v568_v39, 1  ;;  %v474_v48 = vrot.slane %v366_v46, 3 }
  0x1b   : > { %1045 = vst [vmem:[#allocation1 + $0x6] ss:$9 sm:$0xff] %v546_v20  ;;  %v573_v45 = vrot.slane %v571_v42, 2  ;;  %v574_v50 = vsel %vm534_vm3, %v364_v27, %v472_v29  ;;  %v473_v51 = vrot.slane %v365_v47, 3  ;;  %v475_v52 = vrot.slane %v367_v49, 3 }
  0x1c   : > { %1399 = vmatpush.bf16.msra.mxu0 %v6279_v21  ;;  %1048 = vst [vmem:[#allocation1 + $0x7] ss:$9 sm:$0xff] %v549_v22  ;;  %v576_v53 = vrot.slane %v574_v50, 3  ;;  %v583_v54 = vsel %vm526_vm1, %v366_v46, %v474_v48  ;;  %v586_v55 = vsel %vm530_vm2, %v366_v46, %v474_v48  ;;  %v589_v57 = vsel %vm534_vm3, %v366_v46, %v474_v48  ;;  %v372_v22 = vld [vmem:[%s6747_s24 + $0x30] sm:$0xf] }
  0x1d   : > { %v579_v56 = vsel %vm522_vm0, %v365_v47, %v473_v51  ;;  %v582_v59 = vsel %vm522_vm0, %v366_v46, %v474_v48  ;;  %v585_v60 = vrot.slane %v583_v54, 1  ;;  %v588_v61 = vrot.slane %v586_v55, 2 }
  0x1e   : > { %v595_v62 = vsel %vm526_vm1, %v367_v49, %v475_v52  ;;  %v591_v63 = vrot.slane %v589_v57, 3  ;;  %v594_v0 = vsel %vm522_vm0, %v367_v49, %v475_v52  ;;  %v477_v4 = vrot.slane %v369_v2, 3 }
  0x1f   : > { %v597_v1 = vrot.slane %v595_v62, 1  ;;  %v598_v5 = vsel %vm530_vm2, %v367_v49, %v475_v52  ;;  %v601_v6 = vsel %vm534_vm3, %v367_v49, %v475_v52  ;;  %v476_v7 = vrot.slane %v368_v3, 3 }
  0x20   : > { %1400 = vmatpush.bf16.msra.mxu0 %v6278_v26  ;;  %v600_v8 = vrot.slane %v598_v5, 2  ;;  %v603_v10 = vrot.slane %v601_v6, 3  ;;  %v610_v11 = vsel %vm526_vm1, %v369_v2, %v477_v4  ;;  %v613_v12 = vsel %vm530_vm2, %v369_v2, %v477_v4 }
  0x21   : > { %v606_v14 = vsel %vm522_vm0, %v368_v3, %v476_v7  ;;  %v616_v15 = vsel %vm534_vm3, %v369_v2, %v477_v4  ;;  %v478_v16 = vrot.slane %v370_v9, 3  ;;  %v609_v17 = vsel %vm522_vm0, %v369_v2, %v477_v4 }
  0x22   : > { %v612_v18 = vrot.slane %v610_v11, 1  ;;  %v615_v19 = vrot.slane %v613_v12, 2  ;;  %v618_v20 = vrot.slane %v616_v15, 3  ;;  %v480_v25 = vrot.slane %v372_v22, 3 }
  0x23   : > { %v1049_v37 = vld [vmem:[#allocation1] sm:$0xff]  ;;  %v621_v21 = vsel %vm522_vm0, %v370_v9, %v478_v16  ;;  %v622_v24 = vsel %vm526_vm1, %v370_v9, %v478_v16  ;;  %v625_v26 = vsel %vm530_vm2, %v370_v9, %v478_v16  ;;  %v628_v27 = vsel %vm534_vm3, %v370_v9, %v478_v16 }
  0x24   : > { %1401 = vmatpush.bf16.msra.mxu0 %v6277_v31  ;;  %1050 = vst [vmem:[#allocation1] ss:$9 sm:$0xff] %v552_v33  ;;  %v479_v28 = vrot.slane %v371_v23, 3  ;;  %v624_v29 = vrot.slane %v622_v24, 1  ;;  %v627_v30 = vrot.slane %v625_v26, 2  ;;  %v630_v31 = vrot.slane %v628_v27, 3 }
  0x25   : > { %1051 = vst [vmem:[#allocation1 + $0x1] ss:$9 sm:$0xff] %v555_v35  ;;  %v637_v32 = vsel %vm526_vm1, %v372_v22, %v480_v25  ;;  %v640_v34 = vsel %vm530_vm2, %v372_v22, %v480_v25  ;;  %v381_v24 = vld [vmem:[%s6747_s24 + $0x54] sm:$0xf] }
  0x26   : > { %1053 = vst [vmem:[#allocation1 + $0x2] ss:$9 sm:$0xff] %v558_v36  ;;  %v633_v35 = vsel %vm522_vm0, %v371_v23, %v479_v28  ;;  %v643_v36 = vsel %vm534_vm3, %v372_v22, %v480_v25  ;;  %v642_v39 = vrot.slane %v640_v34, 2 }
  0x27   : > { %1055 = vst [vmem:[#allocation1 + $0x3] ss:$9 sm:$0xff] %v561_v38  ;;  %v639_v38 = vrot.slane %v637_v32, 1  ;;  %v489_v32 = vrot.slane %v381_v24, 3 }
  0x28   : > { %1402 = vmatpush.bf16.msra.mxu0 %v6276_v40  ;;  %1057 = vst [vmem:[#allocation1 + $0x4] ss:$9 sm:$0xff] %v564_v41  ;;  %v373_v40 = vld [vmem:[%s6747_s24 + $0x34] sm:$0xf]  ;;  %v645_v41 = vrot.slane %v643_v36, 3 }
  0x29   : > { %1058 = vst [vmem:[#allocation1 + $0x5] ss:$9 sm:$0xff] %v567_v43  ;;  %v481_v42 = vrot.slane %v373_v40, 3  ;;  %v375_v43 = vld [vmem:[%s6747_s24 + $0x3c] sm:$0xf]  ;;  %v717_v36 = vsel %vm522_vm0, %v381_v24, %v489_v32 }
  0x2a   : > { %1060 = vst [vmem:[#allocation1 + $0x6] ss:$9 sm:$0xff] %v570_v44  ;;  %v374_v44 = vld [vmem:[%s6747_s24 + $0x38] sm:$0x1]  ;;  %v483_v46 = vrot.slane %v375_v43, 3 }
  0x2b   : > { %1403 = vmatmul.bf16.vlgmr.msra.gmra.mxu0 %v1049_v37  ;;  %1062 = vst [vmem:[#allocation1 + $0x7] ss:$9 sm:$0xff] %v573_v45  ;;  %v636_v37 = vsel %vm522_vm0, %v372_v22, %v480_v25  ;;  %v649_v45 = vsel %vm526_vm1, %v373_v40, %v481_v42  ;;  %v652_v47 = vsel %vm530_vm2, %v373_v40, %v481_v42  ;;  %v482_v49 = vrot.slane %v374_v44, 3 }
  0x2c   : > { %v655_v48 = vsel %vm534_vm3, %v373_v40, %v481_v42  ;;  %v648_v50 = vsel %vm522_vm0, %v373_v40, %v481_v42  ;;  %v651_v51 = vrot.slane %v649_v45, 1  ;;  %v654_v52 = vrot.slane %v652_v47, 2 }
  0x2d   : > { %v657_v54 = vrot.slane %v655_v48, 3  ;;  %v664_v55 = vsel %vm526_vm1, %v375_v43, %v483_v46  ;;  %v660_v57 = vsel %vm522_vm0, %v374_v44, %v482_v49  ;;  %v721_v40 = vsel %vm530_vm2, %v381_v24, %v489_v32 }
  0x2e   : > { %v723_v44 = vrot.slane %v721_v40, 2 }
  0x32   : > { %v1063_v58 = vld [vmem:[#allocation1] sm:$0xff] }
  0x33   : > { %1065 = vst [vmem:[#allocation1] ss:$9 sm:$0xff] %v576_v53 }
  0x34   : > { %1066 = vst [vmem:[#allocation1 + $0x1] ss:$9 sm:$0xff] %v579_v56  ;;  %v667_v56 = vsel %vm530_vm2, %v375_v43, %v483_v46 }
  0x35   : > { %1067 = vst [vmem:[#allocation1 + $0x2] ss:$9 sm:$0xff] %v582_v59  ;;  %v666_v59 = vrot.slane %v664_v55, 1  ;;  %v384_v55 = vld [vmem:[%s6747_s24 + $0x60] sm:$0xf] }
  0x36   : > { %1069 = vst [vmem:[#allocation1 + $0x3] ss:$9 sm:$0xff] %v585_v60  ;;  %v669_v60 = vrot.slane %v667_v56, 2 }
  0x37   : > { %1071 = vst [vmem:[#allocation1 + $0x4] ss:$9 sm:$0xff] %v588_v61  ;;  %v376_v61 = vld [vmem:[%s6747_s24 + $0x40] sm:$0xf] }
  0x38   : > { %1073 = vst [vmem:[#allocation1 + $0x5] ss:$9 sm:$0xff] %v591_v63  ;;  %v484_v62 = vrot.slane %v376_v61, 3  ;;  %v378_v63 = vld [vmem:[%s6747_s24 + $0x48] sm:$0xf] }
  0x39   : > { %1074 = vst [vmem:[#allocation1 + $0x6] ss:$9 sm:$0xff] %v594_v0  ;;  %v670_v0 = vsel %vm534_vm3, %v375_v43, %v483_v46  ;;  %v486_v3 = vrot.slane %v378_v63, 3 }
  0x3a   : > { %1076 = vst [vmem:[#allocation1 + $0x7] ss:$9 sm:$0xff] %v597_v1  ;;  %v377_v1 = vld [vmem:[%s6747_s24 + $0x44] sm:$0x1]  ;;  %v676_v2 = vsel %vm526_vm1, %v376_v61, %v484_v62  ;;  %v672_v4 = vrot.slane %v670_v0, 3  ;;  %v679_v5 = vsel %vm530_vm2, %v376_v61, %v484_v62  ;;  %v682_v6 = vsel %vm534_vm3, %v376_v61, %v484_v62 }
  0x3b   : > { %1408 = vmatmul.bf16.gmra.mxu0 %v1063_v58  ;;  %v663_v58 = vsel %vm522_vm0, %v375_v43, %v483_v46  ;;  %v485_v7 = vrot.slane %v377_v1, 3  ;;  %v678_v9 = vrot.slane %v676_v2, 1  ;;  %v681_v11 = vrot.slane %v679_v5, 2  ;;  %v383_v43 = vld [vmem:[%s6747_s24 + $0x5c] sm:$0x1] }
  0x3c   : > { %v684_v12 = vrot.slane %v682_v6, 3  ;;  %v690_v15 = vsel %vm522_vm0, %v378_v63, %v486_v3 }
  0x41   : > { %v1077_v13 = vld [vmem:[#allocation1] sm:$0xff] }
  0x42   : > { %1079 = vst [vmem:[#allocation1] ss:$9 sm:$0xff] %v600_v8  ;;  %v675_v8 = vsel %vm522_vm0, %v376_v61, %v484_v62 }
  0x43   : > { %1081 = vst [vmem:[#allocation1 + $0x1] ss:$9 sm:$0xff] %v603_v10 }
  0x44   : > { %1082 = vst [vmem:[#allocation1 + $0x2] ss:$9 sm:$0xff] %v606_v14  ;;  %v687_v14 = vsel %vm522_vm0, %v377_v1, %v485_v7 }
  0x45   : > { %1083 = vst [vmem:[#allocation1 + $0x3] ss:$9 sm:$0xff] %v609_v17  ;;  %v379_v17 = vld [vmem:[%s6747_s24 + $0x4c] sm:$0xf] }
  0x46   : > { %1085 = vst [vmem:[#allocation1 + $0x4] ss:$9 sm:$0xff] %v612_v18  ;;  %v487_v18 = vrot.slane %v379_v17, 3 }
  0x47   : > { %1087 = vst [vmem:[#allocation1 + $0x5] ss:$9 sm:$0xff] %v615_v19  ;;  %v694_v19 = vsel %vm530_vm2, %v378_v63, %v486_v3 }
  0x48   : > { %1089 = vst [vmem:[#allocation1 + $0x6] ss:$9 sm:$0xff] %v618_v20  ;;  %v697_v20 = vsel %vm534_vm3, %v378_v63, %v486_v3  ;;  %v696_v22 = vrot.slane %v694_v19, 2  ;;  %v703_v23 = vsel %vm526_vm1, %v379_v17, %v487_v18  ;;  %v706_v26 = vsel %vm530_vm2, %v379_v17, %v487_v18 }
  0x49   : > { %1090 = vst [vmem:[#allocation1 + $0x7] ss:$9 sm:$0xff] %v621_v21  ;;  %v380_v21 = vld [vmem:[%s6747_s24 + $0x50] sm:$0x1]  ;;  %v699_v25 = vrot.slane %v697_v20, 3  ;;  %v709_v27 = vsel %vm534_vm3, %v379_v17, %v487_v18 }
  0x4a   : > { %v711_v34 = vrot.slane %v709_v27, 3 }
  0x4b   : > { %1413 = vmatmul.bf16.gmra.mxu0 %v1077_v13  ;;  %v691_v13 = vsel %vm526_vm1, %v378_v63, %v486_v3 }
  0x4c   : > { %v693_v16 = vrot.slane %v691_v13, 1 }
  0x50   : > { %v1091_v33 = vld [vmem:[#allocation1] sm:$0xff] }
  0x51   : > { %1093 = vst [vmem:[#allocation1] ss:$9 sm:$0xff] %v624_v29  ;;  %v488_v29 = vrot.slane %v380_v21, 3 }
  0x52   : > { %1095 = vst [vmem:[#allocation1 + $0x1] ss:$9 sm:$0xff] %v627_v30  ;;  %v702_v30 = vsel %vm522_vm0, %v379_v17, %v487_v18 }
  0x53   : > { %1097 = vst [vmem:[#allocation1 + $0x2] ss:$9 sm:$0xff] %v630_v31  ;;  %v705_v31 = vrot.slane %v703_v23, 1 }
  0x54   : > { %1098 = vst [vmem:[#allocation1 + $0x3] ss:$9 sm:$0xff] %v633_v35  ;;  %v714_v35 = vsel %vm522_vm0, %v380_v21, %v488_v29 }
  0x55   : > { %1099 = vst [vmem:[#allocation1 + $0x4] ss:$9 sm:$0xff] %v636_v37  ;;  %v382_v37 = vld [vmem:[%s6747_s24 + $0x58] sm:$0xf] }
  0x56   : > { %1101 = vst [vmem:[#allocation1 + $0x5] ss:$9 sm:$0xff] %v639_v38  ;;  %v490_v38 = vrot.slane %v382_v37, 3 }
  0x57   : > { %1103 = vst [vmem:[#allocation1 + $0x6] ss:$9 sm:$0xff] %v642_v39  ;;  %v718_v39 = vsel %vm526_vm1, %v381_v24, %v489_v32 }
  0x58   : > { %1105 = vst [vmem:[#allocation1 + $0x7] ss:$9 sm:$0xff] %v645_v41  ;;  %v724_v41 = vsel %vm534_vm3, %v381_v24, %v489_v32  ;;  %v720_v42 = vrot.slane %v718_v39, 1  ;;  %v730_v45 = vsel %vm526_vm1, %v382_v37, %v490_v38  ;;  %v733_v47 = vsel %vm530_vm2, %v382_v37, %v490_v38  ;;  %v389_v32 = vld [vmem:[%s6747_s24 + $0x74] sm:$0x1] }
  0x59   : > { %v726_v46 = vrot.slane %v724_v41, 3  ;;  %v736_v49 = vsel %vm534_vm3, %v382_v37, %v490_v38 }
  0x5b   : > { %1418 = vmatmul.bf16.gmra.mxu0 %v1091_v33  ;;  %v708_v33 = vrot.slane %v706_v26, 2 }
  0x5f   : > { %v1106_v53 = vld [vmem:[#allocation1] sm:$0xff] }
  0x60   : > { %1107 = vst [vmem:[#allocation1] ss:$9 sm:$0xff] %v648_v50  ;;  %v491_v50 = vrot.slane %v383_v43, 3 }
  0x61   : > { %1109 = vst [vmem:[#allocation1 + $0x1] ss:$9 sm:$0xff] %v651_v51  ;;  %v729_v51 = vsel %vm522_vm0, %v382_v37, %v490_v38 }
  0x62   : > { %1111 = vst [vmem:[#allocation1 + $0x2] ss:$9 sm:$0xff] %v654_v52  ;;  %v732_v52 = vrot.slane %v730_v45, 1  ;;  %v741_v56 = vsel %vm522_vm0, %v383_v43, %v491_v50 }
  0x63   : > { %1113 = vst [vmem:[#allocation1 + $0x3] ss:$9 sm:$0xff] %v657_v54  ;;  %v738_v54 = vrot.slane %v736_v49, 3 }
  0x64   : > { %1114 = vst [vmem:[#allocation1 + $0x4] ss:$9 sm:$0xff] %v660_v57  ;;  %v492_v57 = vrot.slane %v384_v55, 3 }
  0x65   : > { %1115 = vst [vmem:[#allocation1 + $0x5] ss:$9 sm:$0xff] %v663_v58  ;;  %v385_v58 = vld [vmem:[%s6747_s24 + $0x64] sm:$0xf] }
  0x66   : > { %1117 = vst [vmem:[#allocation1 + $0x6] ss:$9 sm:$0xff] %v666_v59  ;;  %v493_v59 = vrot.slane %v385_v58, 3  ;;  %v748_v61 = vsel %vm530_vm2, %v384_v55, %v492_v57  ;;  %v751_v62 = vsel %vm534_vm3, %v384_v55, %v492_v57  ;;  %v744_v63 = vsel %vm522_vm0, %v384_v55, %v492_v57 }
  0x67   : > { %1119 = vst [vmem:[#allocation1 + $0x7] ss:$9 sm:$0xff] %v669_v60  ;;  %v745_v60 = vsel %vm526_vm1, %v384_v55, %v492_v57  ;;  %v750_v1 = vrot.slane %v748_v61, 2 }
  0x68   : > { %v747_v0 = vrot.slane %v745_v60, 1  ;;  %v757_v2 = vsel %vm526_vm1, %v385_v58, %v493_v59  ;;  %v760_v5 = vsel %vm530_vm2, %v385_v58, %v493_v59  ;;  %v763_v6 = vsel %vm534_vm3, %v385_v58, %v493_v59 }
  0x69   : > { %v756_v7 = vsel %vm522_vm0, %v385_v58, %v493_v59  ;;  %v394_v58 = vld [vmem:[%s6747_s24 + $0x88] sm:$0xf] }
  0x6b   : > { %1423 = vmatmul.bf16.gmra.mxu0 %v1106_v53  ;;  %v735_v53 = vrot.slane %v733_v47, 2 }
  0x6e   : > { %v1120_v10 = vld [vmem:[#allocation1] sm:$0xff] }
  0x6f   : > { %1122 = vst [vmem:[#allocation1] ss:$9 sm:$0xff] %v672_v4  ;;  %v753_v4 = vrot.slane %v751_v62, 3 }
  0x70   : > { %1123 = vst [vmem:[#allocation1 + $0x1] ss:$9 sm:$0xff] %v675_v8  ;;  %v759_v8 = vrot.slane %v757_v2, 1 }
  0x71   : > { %1125 = vst [vmem:[#allocation1 + $0x2] ss:$9 sm:$0xff] %v678_v9  ;;  %v762_v9 = vrot.slane %v760_v5, 2 }
  0x72   : > { %1127 = vst [vmem:[#allocation1 + $0x3] ss:$9 sm:$0xff] %v681_v11  ;;  %v765_v11 = vrot.slane %v763_v6, 3 }
  0x73   : > { %1129 = vst [vmem:[#allocation1 + $0x4] ss:$9 sm:$0xff] %v684_v12  ;;  %v386_v12 = vld [vmem:[%s6747_s24 + $0x68] sm:$0x1] }
  0x74   : > { %1130 = vst [vmem:[#allocation1 + $0x5] ss:$9 sm:$0xff] %v687_v14  ;;  %v388_v14 = vld [vmem:[%s6747_s24 + $0x70] sm:$0xf] }
  0x75   : > { %1131 = vst [vmem:[#allocation1 + $0x6] ss:$9 sm:$0xff] %v690_v15  ;;  %v494_v15 = vrot.slane %v386_v12, 3 }
  0x76   : > { %1133 = vst [vmem:[#allocation1 + $0x7] ss:$9 sm:$0xff] %v693_v16  ;;  %v496_v16 = vrot.slane %v388_v14, 3 }
  0x77   : > { %v768_v19 = vsel %vm522_vm0, %v386_v12, %v494_v15 }
  0x78   : > { %v784_v24 = vsel %vm526_vm1, %v388_v14, %v496_v16  ;;  %v787_v27 = vsel %vm530_vm2, %v388_v14, %v496_v16 }
  0x79   : > { %v786_v29 = vrot.slane %v784_v24, 1  ;;  %v397_v24 = vld [vmem:[%s6747_s24 + $0x94] sm:$0xf] }
  0x7b   : > { %1428 = vmatmul.bf16.gmra.mxu0 %v1120_v10  ;;  %v387_v10 = vld [vmem:[%s6747_s24 + $0x6c] sm:$0xf] }
  0x7c   : > { %v495_v13 = vrot.slane %v387_v10, 3 }
  0x7d   : > { %v1134_v28 = vld [vmem:[#allocation1] sm:$0xff] }
  0x7e   : > { %1136 = vst [vmem:[#allocation1] ss:$9 sm:$0xff] %v696_v22  ;;  %v772_v17 = vsel %vm526_vm1, %v387_v10, %v495_v13  ;;  %v775_v18 = vsel %vm530_vm2, %v387_v10, %v495_v13  ;;  %v778_v20 = vsel %vm534_vm3, %v387_v10, %v495_v13  ;;  %v771_v21 = vsel %vm522_vm0, %v387_v10, %v495_v13 }
  0x7f   : > { %1138 = vst [vmem:[#allocation1 + $0x1] ss:$9 sm:$0xff] %v699_v25  ;;  %v774_v22 = vrot.slane %v772_v17, 1  ;;  %v777_v23 = vrot.slane %v775_v18, 2  ;;  %v780_v26 = vrot.slane %v778_v20, 3 }
  0x80   : > { %1139 = vst [vmem:[#allocation1 + $0x2] ss:$9 sm:$0xff] %v702_v30  ;;  %v789_v30 = vrot.slane %v787_v27, 2  ;;  %v505_v27 = vrot.slane %v397_v24, 3 }
  0x81   : > { %1141 = vst [vmem:[#allocation1 + $0x3] ss:$9 sm:$0xff] %v705_v31  ;;  %v390_v31 = vld [vmem:[%s6747_s24 + $0x78] sm:$0xf] }
  0x82   : > { %1143 = vst [vmem:[#allocation1 + $0x4] ss:$9 sm:$0xff] %v708_v33  ;;  %v498_v33 = vrot.slane %v390_v31, 3 }
  0x83   : > { %1145 = vst [vmem:[#allocation1 + $0x5] ss:$9 sm:$0xff] %v711_v34  ;;  %v391_v34 = vld [vmem:[%s6747_s24 + $0x7c] sm:$0xf] }
  0x84   : > { %1146 = vst [vmem:[#allocation1 + $0x6] ss:$9 sm:$0xff] %v714_v35  ;;  %v790_v35 = vsel %vm534_vm3, %v388_v14, %v496_v16  ;;  %v499_v37 = vrot.slane %v391_v34, 3  ;;  %v799_v39 = vsel %vm526_vm1, %v390_v31, %v498_v33  ;;  %v802_v40 = vsel %vm530_vm2, %v390_v31, %v498_v33 }
  0x85   : > { %1147 = vst [vmem:[#allocation1 + $0x7] ss:$9 sm:$0xff] %v717_v36  ;;  %v497_v36 = vrot.slane %v389_v32, 3  ;;  %v792_v38 = vrot.slane %v790_v35, 3  ;;  %v798_v43 = vsel %vm522_vm0, %v390_v31, %v498_v33 }
  0x86   : > { %v811_v47 = vsel %vm526_vm1, %v391_v34, %v499_v37  ;;  %v810_v49 = vsel %vm522_vm0, %v391_v34, %v499_v37  ;;  %v817_v55 = vsel %vm534_vm3, %v391_v34, %v499_v37 }
  0x87   : > { %v795_v41 = vsel %vm522_vm0, %v389_v32, %v497_v36  ;;  %v813_v50 = vrot.slane %v811_v47, 1  ;;  %v819_v59 = vrot.slane %v817_v55, 3  ;;  %v864_v36 = vsel %vm522_vm0, %v397_v24, %v505_v27 }
  0x8b   : > { %1433 = vmatmul.bf16.gmra.mxu0 %v1134_v28  ;;  %v783_v28 = vsel %vm522_vm0, %v388_v14, %v496_v16 }
  0x8c   : > { %v1148_v48 = vld [vmem:[#allocation1] sm:$0xff] }
  0x8d   : > { %1150 = vst [vmem:[#allocation1] ss:$9 sm:$0xff] %v720_v42  ;;  %v805_v42 = vsel %vm534_vm3, %v390_v31, %v498_v33  ;;  %v865_v31 = vsel %vm526_vm1, %v397_v24, %v505_v27  ;;  %v868_v33 = vsel %vm530_vm2, %v397_v24, %v505_v27 }
  0x8e   : > { %1152 = vst [vmem:[#allocation1 + $0x1] ss:$9 sm:$0xff] %v723_v44  ;;  %v801_v44 = vrot.slane %v799_v39, 1 }
  0x8f   : > { %1154 = vst [vmem:[#allocation1 + $0x2] ss:$9 sm:$0xff] %v726_v46  ;;  %v804_v46 = vrot.slane %v802_v40, 2 }
  0x90   : > { %1155 = vst [vmem:[#allocation1 + $0x3] ss:$9 sm:$0xff] %v729_v51  ;;  %v393_v51 = vld [vmem:[%s6747_s24 + $0x84] sm:$0xf] }
  0x91   : > { %1157 = vst [vmem:[#allocation1 + $0x4] ss:$9 sm:$0xff] %v732_v52  ;;  %v392_v52 = vld [vmem:[%s6747_s24 + $0x80] sm:$0x1] }
  0x92   : > { %1159 = vst [vmem:[#allocation1 + $0x5] ss:$9 sm:$0xff] %v735_v53  ;;  %v501_v53 = vrot.slane %v393_v51, 3 }
  0x93   : > { %1161 = vst [vmem:[#allocation1 + $0x6] ss:$9 sm:$0xff] %v738_v54  ;;  %v814_v54 = vsel %vm530_vm2, %v391_v34, %v499_v37  ;;  %v871_v34 = vsel %vm534_vm3, %v397_v24, %v505_v27  ;;  %v867_v37 = vrot.slane %v865_v31, 1 }
  0x94   : > { %1162 = vst [vmem:[#allocation1 + $0x7] ss:$9 sm:$0xff] %v741_v56  ;;  %v500_v56 = vrot.slane %v392_v52, 3  ;;  %v816_v57 = vrot.slane %v814_v54, 2  ;;  %v826_v60 = vsel %vm526_vm1, %v393_v51, %v501_v53  ;;  %v829_v61 = vsel %vm530_vm2, %v393_v51, %v501_v53 }
  0x95   : > { %v825_v2 = vsel %vm522_vm0, %v393_v51, %v501_v53  ;;  %v873_v39 = vrot.slane %v871_v34, 3 }
  0x96   : > { %v822_v62 = vsel %vm522_vm0, %v392_v52, %v500_v56  ;;  %v401_v52 = vld [vmem:[%s6747_s24 + $0xa4] sm:$0x1] }
  0x9b   : > { %1438 = vmatmul.bf16.gmra.mxu0 %v1148_v48  ;;  %v1163_v3 = vld [vmem:[#allocation1] sm:$0xff]  ;;  %v807_v48 = vrot.slane %v805_v42, 3 }
  0x9c   : > { %1164 = vst [vmem:[#allocation1] ss:$9 sm:$0xff] %v744_v63  ;;  %v832_v63 = vsel %vm534_vm3, %v393_v51, %v501_v53 }
  0x9d   : > { %1166 = vst [vmem:[#allocation1 + $0x1] ss:$9 sm:$0xff] %v747_v0  ;;  %v834_v5 = vrot.slane %v832_v63, 3 }
  0x9e   : > { %1168 = vst [vmem:[#allocation1 + $0x2] ss:$9 sm:$0xff] %v750_v1  ;;  %v502_v1 = vrot.slane %v394_v58, 3 }
  0x9f   : > { %1170 = vst [vmem:[#allocation1 + $0x3] ss:$9 sm:$0xff] %v753_v4  ;;  %v831_v4 = vrot.slane %v829_v61, 2 }
  0xa0   : > { %1171 = vst [vmem:[#allocation1 + $0x4] ss:$9 sm:$0xff] %v756_v7  ;;  %v837_v6 = vsel %vm522_vm0, %v394_v58, %v502_v1  ;;  %v396_v7 = vld [vmem:[%s6747_s24 + $0x90] sm:$0xf]  ;;  %v844_v12 = vsel %vm534_vm3, %v394_v58, %v502_v1 }
  0xa1   : > { %1173 = vst [vmem:[#allocation1 + $0x5] ss:$9 sm:$0xff] %v759_v8  ;;  %v395_v8 = vld [vmem:[%s6747_s24 + $0x8c] sm:$0x1]  ;;  %v504_v10 = vrot.slane %v396_v7, 3  ;;  %v846_v16 = vrot.slane %v844_v12, 3 }
  0xa2   : > { %1175 = vst [vmem:[#allocation1 + $0x6] ss:$9 sm:$0xff] %v762_v9  ;;  %v838_v9 = vsel %vm526_vm1, %v394_v58, %v502_v1  ;;  %v503_v13 = vrot.slane %v395_v8, 3  ;;  %v405_v12 = vld [vmem:[%s6747_s24 + $0xb4] sm:$0xf] }
  0xa3   : > { %1177 = vst [vmem:[#allocation1 + $0x7] ss:$9 sm:$0xff] %v765_v11  ;;  %v841_v11 = vsel %vm530_vm2, %v394_v58, %v502_v1  ;;  %v840_v14 = vrot.slane %v838_v9, 1  ;;  %v853_v17 = vsel %vm526_vm1, %v396_v7, %v504_v10  ;;  %v856_v18 = vsel %vm530_vm2, %v396_v7, %v504_v10  ;;  %v404_v9 = vld [vmem:[%s6747_s24 + $0xb0] sm:$0x1] }
  0xa4   : > { %v843_v15 = vrot.slane %v841_v11, 2  ;;  %v849_v20 = vsel %vm522_vm0, %v395_v8, %v503_v13  ;;  %v509_v58 = vrot.slane %v401_v52, 3 }
  0xa6   : > { %v903_v1 = vsel %vm522_vm0, %v401_v52, %v509_v58  ;;  %v408_v52 = vld [vmem:[%s6747_s24 + $0xc0] sm:$0xf] }
  0xaa   : > { %v1178_v25 = vld [vmem:[#allocation1] sm:$0xff] }
  0xab   : > { %1443 = vmatmul.bf16.gmra.mxu0 %v1163_v3  ;;  %1179 = vst [vmem:[#allocation1] ss:$9 sm:$0xff] %v768_v19  ;;  %v828_v3 = vrot.slane %v826_v60, 1 }
  0xac   : > { %1180 = vst [vmem:[#allocation1 + $0x1] ss:$9 sm:$0xff] %v771_v21  ;;  %v859_v21 = vsel %vm534_vm3, %v396_v7, %v504_v10 }
  0xad   : > { %1182 = vst [vmem:[#allocation1 + $0x2] ss:$9 sm:$0xff] %v774_v22  ;;  %v852_v22 = vsel %vm522_vm0, %v396_v7, %v504_v10  ;;  %v6946_v7 = vld [vmem:[%s10198_s2] ss:$0 sm:$0xff] }
  0xae   : > { %1184 = vst [vmem:[#allocation1 + $0x3] ss:$9 sm:$0xff] %v777_v23  ;;  %v855_v23 = vrot.slane %v853_v17, 1 }
  0xaf   : > { %1186 = vst [vmem:[#allocation1 + $0x4] ss:$9 sm:$0xff] %v780_v26  ;;  %v861_v26 = vrot.slane %v859_v21, 3 }
  0xb0   : > { %1187 = vst [vmem:[#allocation1 + $0x5] ss:$9 sm:$0xff] %v783_v28  ;;  %v399_v28 = vld [vmem:[%s6747_s24 + $0x9c] sm:$0xf] }
  0xb1   : > { %1189 = vst [vmem:[#allocation1 + $0x6] ss:$9 sm:$0xff] %v786_v29  ;;  %v6915_v29 = vpop.f32.mrf.mxu0  ;;  %v507_v32 = vrot.slane %v399_v28, 3 }
  0xb2   : > { %1191 = vst [vmem:[#allocation1 + $0x7] ss:$9 sm:$0xff] %v789_v30  ;;  %v398_v30 = vld [vmem:[%s6747_s24 + $0x98] sm:$0x1] }
  0xb3   : > { %v506_v35 = vrot.slane %v398_v30, 3  ;;  %v880_v40 = vsel %vm526_vm1, %v399_v28, %v507_v32  ;;  %v883_v42 = vsel %vm530_vm2, %v399_v28, %v507_v32  ;;  %v886_v51 = vsel %vm534_vm3, %v399_v28, %v507_v32 }
  0xb4   : > { %v885_v47 = vrot.slane %v883_v42, 2  ;;  %v888_v55 = vrot.slane %v886_v51, 3 }
  0xb9   : > { %v1192_v45 = vld [vmem:[#allocation1] sm:$0xff] }
  0xba   : > { %1194 = vst [vmem:[#allocation1] ss:$9 sm:$0xff] %v792_v38  ;;  %v870_v38 = vrot.slane %v868_v33, 2 }
  0xbb   : > { %1195 = vst [vmem:[#allocation1 + $0x1] ss:$9 sm:$0xff] %v795_v41  ;;  %1448 = vmatmul.bf16.gmra.mxu0 %v1178_v25  ;;  %v858_v25 = vrot.slane %v856_v18, 2 }
  0xbc   : > { %1196 = vst [vmem:[#allocation1 + $0x2] ss:$9 sm:$0xff] %v798_v43  ;;  %v876_v43 = vsel %vm522_vm0, %v398_v30, %v506_v35  ;;  %v406_v30 = vld [vmem:[%s6747_s24 + $0xb8] sm:$0xf] }
  0xbd   : > { %1198 = vst [vmem:[#allocation1 + $0x3] ss:$9 sm:$0xff] %v801_v44  ;;  %v879_v44 = vsel %vm522_vm0, %v399_v28, %v507_v32  ;;  %v514_v33 = vrot.slane %v406_v30, 3 }
  0xbe   : > { %1200 = vst [vmem:[#allocation1 + $0x4] ss:$9 sm:$0xff] %v804_v46  ;;  %v400_v46 = vld [vmem:[%s6747_s24 + $0xa0] sm:$0xf] }
  0xbf   : > { %1202 = vst [vmem:[#allocation1 + $0x5] ss:$9 sm:$0xff] %v807_v48  ;;  %v1406_v48 = vpop.f32.mrf.mxu0 }
  0xc0   : > { %1203 = vst [vmem:[#allocation1 + $0x6] ss:$9 sm:$0xff] %v810_v49  ;;  %v508_v49 = vrot.slane %v400_v46, 3  ;;  %v1513_v18 = vmul.f32 %v6946_v7, %v1406_v48 }
  0xc1   : > { %1205 = vst [vmem:[#allocation1 + $0x7] ss:$9 sm:$0xff] %v813_v50  ;;  %v402_v50 = vld [vmem:[%s6747_s24 + $0xa8] sm:$0xf] }
  0xc2   : > { %v892_v53 = vsel %vm526_vm1, %v400_v46, %v508_v49  ;;  %v510_v54 = vrot.slane %v402_v50, 3  ;;  %v895_v56 = vsel %vm530_vm2, %v400_v46, %v508_v49 }
  0xc3   : > { %v894_v60 = vrot.slane %v892_v53, 1  ;;  %v897_v61 = vrot.slane %v895_v56, 2 }
  0xc4   : > { %v913_v8 = vsel %vm534_vm3, %v402_v50, %v510_v54 }
  0xc5   : > { %v915_v13 = vrot.slane %v913_v8, 3 }
  0xc8   : > { %v1206_v0 = vld [vmem:[#allocation1] sm:$0xff] }
  0xc9   : > { %1208 = vst [vmem:[#allocation1] ss:$9 sm:$0xff] %v816_v57  ;;  %v898_v57 = vsel %vm534_vm3, %v400_v46, %v508_v49 }
  0xca   : > { %1210 = vst [vmem:[#allocation1 + $0x1] ss:$9 sm:$0xff] %v819_v59  ;;  %v891_v59 = vsel %vm522_vm0, %v400_v46, %v508_v49  ;;  %v900_v63 = vrot.slane %v898_v57, 3 }
  0xcb   : > { %1211 = vst [vmem:[#allocation1 + $0x2] ss:$9 sm:$0xff] %v822_v62  ;;  %1453 = vmatmul.bf16.gmra.mxu0 %v1192_v45  ;;  %v882_v45 = vrot.slane %v880_v40, 1  ;;  %v946_v40 = vsel %vm526_vm1, %v406_v30, %v514_v33 }
  0xcc   : > { %1212 = vst [vmem:[#allocation1 + $0x3] ss:$9 sm:$0xff] %v825_v2  ;;  %v906_v2 = vsel %vm522_vm0, %v402_v50, %v510_v54  ;;  %v948_v48 = vrot.slane %v946_v40, 1 }
  0xcd   : > { %1214 = vst [vmem:[#allocation1 + $0x4] ss:$9 sm:$0xff] %v828_v3 }
  0xce   : > { %1216 = vst [vmem:[#allocation1 + $0x5] ss:$9 sm:$0xff] %v831_v4  ;;  %v403_v4 = vld [vmem:[%s6747_s24 + $0xac] sm:$0xf] }
  0xcf   : > { %1218 = vst [vmem:[#allocation1 + $0x6] ss:$9 sm:$0xff] %v834_v5  ;;  %v511_v5 = vrot.slane %v403_v4, 3 }
  0xd0   : > { %1219 = vst [vmem:[#allocation1 + $0x7] ss:$9 sm:$0xff] %v837_v6  ;;  %v910_v6 = vsel %vm530_vm2, %v402_v50, %v510_v54 }
  0xd1   : > { %v912_v10 = vrot.slane %v910_v6, 2  ;;  %v919_v11 = vsel %vm526_vm1, %v403_v4, %v511_v5  ;;  %v925_v17 = vsel %vm534_vm3, %v403_v4, %v511_v5 }
  0xd2   : > { %v921_v21 = vrot.slane %v919_v11, 1 }
  0xd7   : > { %v1220_v19 = vld [vmem:[#allocation1] sm:$0xff] }
  0xd8   : > { %1222 = vst [vmem:[#allocation1] ss:$9 sm:$0xff] %v840_v14  ;;  %v922_v14 = vsel %vm530_vm2, %v403_v4, %v511_v5 }
  0xd9   : > { %1224 = vst [vmem:[#allocation1 + $0x1] ss:$9 sm:$0xff] %v843_v15  ;;  %v1512_v15 = vmul.f32 %v6946_v7, %v6915_v29  ;;  %v924_v24 = vrot.slane %v922_v14, 2 }
  0xda   : > { %1226 = vst [vmem:[#allocation1 + $0x2] ss:$9 sm:$0xff] %v846_v16  ;;  %v6958_v16 = vld [vmem:[%s10199_s3] ss:$0 sm:$0xff] }
  0xdb   : > { %1227 = vst [vmem:[#allocation1 + $0x3] ss:$9 sm:$0xff] %v849_v20  ;;  %1458 = vmatmul.bf16.gmra.mxu0 %v1206_v0  ;;  %v907_v0 = vsel %vm526_vm1, %v402_v50, %v510_v54  ;;  %v918_v20 = vsel %vm522_vm0, %v403_v4, %v511_v5  ;;  %v6969_v27 = vadd.f32 %v6958_v16, %v1513_v18  ;;  %v1409_v54 = vpop.f32.mrf.mxu0 }
  0xdc   : > { %1228 = vst [vmem:[#allocation1 + $0x4] ss:$9 sm:$0xff] %v852_v22  ;;  %v909_v3 = vrot.slane %v907_v0, 1  ;;  %v1514_v57 = vmul.f32 %v6946_v7, %v1409_v54 }
  0xdd   : > { %1230 = vst [vmem:[#allocation1 + $0x5] ss:$9 sm:$0xff] %v855_v23  ;;  %v513_v23 = vrot.slane %v405_v12, 3  ;;  %v5798_v32 = vmul.f32 -1.442695, %v6969_v27 }
  0xde   : > { %1232 = vst [vmem:[#allocation1 + $0x6] ss:$9 sm:$0xff] %v858_v25  ;;  %v927_v25 = vrot.slane %v925_v17, 3 }
  0xdf   : > { %1234 = vst [vmem:[#allocation1 + $0x7] ss:$9 sm:$0xff] %v861_v26  ;;  %v6966_v26 = vadd.f32 %v6958_v16, %v1512_v15  ;;  %v933_v29 = vsel %vm522_vm0, %v405_v12, %v513_v23  ;;  %v934_v34 = vsel %vm526_vm1, %v405_v12, %v513_v23  ;;  %v937_v35 = vsel %vm530_vm2, %v405_v12, %v513_v23 }
  0xe1   : > { %v5797_v31 = vmul.f32 -1.442695, %v6966_v26 }
  0xe3   : > { %6482 = vpow2.f32 %v5797_v31  ;;  %v1411_v6 = vpop.f32.mrf.mxu0  ;;  %v410_v31 = vld [vmem:[%s6747_s24 + $0xc8] sm:$0x1] }
  0xe4   : > { %6484 = vpow2.f32 %v5798_v32 }
  0xe6   : > { %v6923_v41 = vld [vmem:[#allocation1] sm:$0xff] }
  0xe7   : > { %1236 = vst [vmem:[#allocation1] ss:$9 sm:$0xff] %v864_v36  ;;  %v940_v36 = vsel %vm534_vm3, %v405_v12, %v513_v23 }
  0xe8   : > { %1238 = vst [vmem:[#allocation1 + $0x1] ss:$9 sm:$0xff] %v867_v37  ;;  %v936_v37 = vrot.slane %v934_v34, 1  ;;  %v942_v42 = vrot.slane %v940_v36, 3 }
  0xe9   : > { %1240 = vst [vmem:[#allocation1 + $0x2] ss:$9 sm:$0xff] %v870_v38  ;;  %v407_v38 = vld [vmem:[%s6747_s24 + $0xbc] sm:$0x1]  ;;  %v6483_v49 = vpop.eup %6482 }
  0xea   : > { %1242 = vst [vmem:[#allocation1 + $0x3] ss:$9 sm:$0xff] %v873_v39  ;;  %v939_v39 = vrot.slane %v937_v35, 2  ;;  %v515_v46 = vrot.slane %v407_v38, 3  ;;  %v6485_v51 = vpop.eup %6484 }
  0xeb   : > { %1243 = vst [vmem:[#allocation1 + $0x4] ss:$9 sm:$0xff] %v876_v43  ;;  %1463 = vmatmul.bf16.gmra.mxu0 %v1220_v19  ;;  %v512_v19 = vrot.slane %v404_v9, 3  ;;  %v949_v43 = vsel %vm530_vm2, %v406_v30, %v514_v33  ;;  %v6991_v58 = vadd.f32 1.0, %v6485_v51  ;;  %v1414_v32 = vpop.f32.mrf.mxu0 }
  0xec   : > { %1244 = vst [vmem:[#allocation1 + $0x5] ss:$9 sm:$0xff] %v879_v44  ;;  %v952_v44 = vsel %vm534_vm3, %v406_v30, %v514_v33  ;;  %v951_v50 = vrot.slane %v949_v43, 2  ;;  %v957_v56 = vsel %vm522_vm0, %v407_v38, %v515_v46  ;;  %v1516_v35 = vmul.f32 %v6946_v7, %v1414_v32 }
  0xed   : > { %1246 = vst [vmem:[#allocation1 + $0x6] ss:$9 sm:$0xff] %v882_v45  ;;  %v930_v28 = vsel %vm522_vm0, %v404_v9, %v512_v19  ;;  %v954_v53 = vrot.slane %v952_v44, 3  ;;  %v518_v38 = vrot.slane %v410_v31, 3  ;;  %vm1782_vm4 = vweird.f32 %v6991_v58 }
  0xee   : > { %1248 = vst [vmem:[#allocation1 + $0x7] ss:$9 sm:$0xff] %v885_v47  ;;  %v945_v47 = vsel %vm522_vm0, %v406_v30, %v514_v33  ;;  %v7030_v33 = vld [vmem:[%s6747_s24 + $0xd0] sm:$0xf] }
  0xef   : > { %v7037_v40 = vrot.slane %v7030_v33, 3 }
  0xf5   : > { %v6936_v62 = vld [vmem:[#allocation1] sm:$0xff] }
  0xf6   : > { %1251 = vst [vmem:[#allocation1] ss:$9 sm:$0xff] %v888_v55  ;;  %v6987_v55 = vadd.f32 1.0, %v6483_v49 }
  0xf7   : > { %1252 = vst [vmem:[#allocation1 + $0x1] ss:$9 sm:$0xff] %v891_v59  ;;  %v516_v59 = vrot.slane %v408_v52, 3 }
  0xf8   : > { %1254 = vst [vmem:[#allocation1 + $0x2] ss:$9 sm:$0xff] %v894_v60  ;;  %v409_v60 = vld [vmem:[%s6747_s24 + $0xc4] sm:$0xf]  ;;  %6486 = vrcp.f32 %v6987_v55  ;;  %vm1767_vm10 = vweird.f32 %v6987_v55  ;;  %v1771_v32 = vand.u32 2147483647, %v6987_v55 }
  0xf9   : > { %1256 = vst [vmem:[#allocation1 + $0x3] ss:$9 sm:$0xff] %v897_v61  ;;  %v6995_v61 = vadd.f32 %v6958_v16, %v1514_v57  ;;  %6488 = vrcp.f32 %v6991_v58  ;;  %v517_v0 = vrot.slane %v409_v60, 3  ;;  %v960_v4 = vsel %vm522_vm0, %v408_v52, %v516_v59 }
  0xfa   : > { %1258 = vst [vmem:[#allocation1 + $0x4] ss:$9 sm:$0xff] %v900_v63  ;;  %v1000_v57 = vsel %vm526_vm1, %v7030_v33, %v7037_v40  ;;  %vm1772_vm15 = vcmp.eq.f32.partialorder %v1771_v32, 8.507059e+37 }
  0xfb   : > { %1259 = vst [vmem:[#allocation1 + $0x5] ss:$9 sm:$0xff] %v903_v1  ;;  %v5799_v63 = vmul.f32 -1.442695, %v6995_v61  ;;  %v961_v1 = vsel %vm526_vm1, %v408_v52, %v516_v59  ;;  %1468 = vmatmul.bf16.gmra.mxu0 %v6923_v41  ;;  %v973_v9 = vsel %vm526_vm1, %v409_v60, %v517_v0  ;;  %v979_v17 = vsel %vm534_vm3, %v409_v60, %v517_v0 }
  0xfc   : > { %1260 = vst [vmem:[#allocation1 + $0x6] ss:$9 sm:$0xff] %v906_v2  ;;  %v964_v2 = vsel %vm530_vm2, %v408_v52, %v516_v59  ;;  %v963_v5 = vrot.slane %v961_v1, 1  ;;  %v972_v19 = vsel %vm522_vm0, %v409_v60, %v517_v0  ;;  %v1003_v1 = vsel %vm530_vm2, %v7030_v33, %v7037_v40 }
  0xfd   : > { %1262 = vst [vmem:[#allocation1 + $0x7] ss:$9 sm:$0xff] %v909_v3  ;;  %6490 = vpow2.f32 %v5799_v63  ;;  %v967_v3 = vsel %vm534_vm3, %v408_v52, %v516_v59  ;;  %v966_v8 = vrot.slane %v964_v2, 2  ;;  %v984_v52 = vsel %vm522_vm0, %v410_v31, %v518_v38 }
  0xfe   : > { %v7007_v11 = vpop.eup %6486  ;;  %v969_v12 = vrot.slane %v967_v3, 3  ;;  %v6299_v3 = vld [vmem:[%s10200_s4 + $0x78] sm:$0xff] }
  0xff   : > { %v7012_v15 = vpop.eup %6488  ;;  %v1763_v30 = vmul.f32 %v7007_v11, %v6987_v55  ;;  %3519 = vmatpush.bf16.msra.mxu1 %v6299_v3  ;;  %6451 = vmatpush.bf16.msra.mxu3 %v6299_v3  ;;  %vm1768_vm7 = vweird.f32 %v7007_v11 }
 0x100   : > { %vm1783_vm5 = vweird.f32 %v7012_v15  ;;  %vm7123_vm13 = vmor %vm1767_vm10, %vm1768_vm7  ;;  %vm3004_vm10 = vsmask.f32 7440 }
 0x101   : > { %vm7088_vm8 = vmor %vm1782_vm4, %vm1783_vm5 }
 0x103   : > { %v6491_v18 = vpop.eup %6490 }
 0x104   : > { %v6963_v22 = vld [vmem:[#allocation1] sm:$0xff]  ;;  %v7019_v23 = vadd.f32 1.0, %v6491_v18 }
 0x105   : > { %1265 = vst [vmem:[#allocation1] ss:$9 sm:$0xff] %v912_v10  ;;  %v1515_v10 = vmul.f32 %v6946_v7, %v1411_v6  ;;  %v1786_v6 = vand.u32 2147483647, %v6991_v58 }
 0x106   : > { %1267 = vst [vmem:[#allocation1 + $0x1] ss:$9 sm:$0xff] %v915_v13  ;;  %v976_v13 = vsel %vm530_vm2, %v409_v60, %v517_v0  ;;  %6492 = vrcp.f32 %v7019_v23  ;;  %v1416_v60 = vpop.f32.mrf.mxu0  ;;  %vm1797_vm9 = vweird.f32 %v7019_v23 }
 0x107   : > { %1268 = vst [vmem:[#allocation1 + $0x2] ss:$9 sm:$0xff] %v918_v20  ;;  %v7016_v41 = vadd.f32 %v6958_v16, %v1515_v10  ;;  %v975_v20 = vrot.slane %v973_v9, 1  ;;  %v999_v9 = vsel %vm522_vm0, %v7030_v33, %v7037_v40  ;;  %v1002_v10 = vrot.slane %v1000_v57, 1 }
 0x108   : > { %1270 = vst [vmem:[#allocation1 + $0x3] ss:$9 sm:$0xff] %v921_v21  ;;  %v978_v21 = vrot.slane %v976_v13, 2  ;;  %v1005_v13 = vrot.slane %v1003_v1, 2  ;;  %vm1787_vm12 = vcmp.eq.f32.partialorder %v1786_v6, 8.507059e+37 }
 0x109   : > { %1272 = vst [vmem:[#allocation1 + $0x4] ss:$9 sm:$0xff] %v924_v24  ;;  %v5800_v24 = vmul.f32 -1.442695, %v7016_v41 }
 0x10a   : > { %1274 = vst [vmem:[#allocation1 + $0x5] ss:$9 sm:$0xff] %v927_v25  ;;  %v1778_v25 = vmul.f32 %v7012_v15, %v6991_v58 }
 0x10b   : > { %1275 = vst [vmem:[#allocation1 + $0x6] ss:$9 sm:$0xff] %v930_v28  ;;  %v411_v28 = vld [vmem:[%s6747_s24 + $0xcc] sm:$0xf]  ;;  %6494 = vpow2.f32 %v5800_v24  ;;  %1473 = vmatmul.bf16.gmra.mxu0 %v6936_v62  ;;  %v1801_v24 = vand.u32 2147483647, %v7019_v23 }
 0x10c   : > { %1276 = vst [vmem:[#allocation1 + $0x7] ss:$9 sm:$0xff] %v933_v29  ;;  %v981_v29 = vrot.slane %v979_v17, 3  ;;  %v519_v34 = vrot.slane %v411_v28, 3  ;;  %v1779_v36 = vsub.f32 1.0, %v1778_v25  ;;  %v1803_v25 = vand.u32 2147483648, %v7019_v23 }
 0x10d   : > { %vm1802_vm14 = vcmp.eq.f32.partialorder %v1801_v24, 8.507059e+37 }
 0x10e   : > { %v988_v43 = vsel %vm526_vm1, %v411_v28, %v519_v34  ;;  %v994_v49 = vsel %vm534_vm3, %v411_v28, %v519_v34  ;;  %v987_v54 = vsel %vm522_vm0, %v411_v28, %v519_v34 }
 0x10f   : > { %v996_v0 = vrot.slane %v994_v49, 3 }
 0x113   : > { %v6983_v45 = vld [vmem:[#allocation1] sm:$0xff] }
 0x114   : > { %1279 = vst [vmem:[#allocation1] ss:$9 sm:$0xff] %v936_v37  ;;  %v1764_v37 = vsub.f32 1.0, %v1763_v30 }
 0x115   : > { %1281 = vst [vmem:[#allocation1 + $0x1] ss:$9 sm:$0xff] %v939_v39  ;;  %v7034_v39 = vadd.f32 %v6958_v16, %v1516_v35 }
 0x116   : > { %1283 = vst [vmem:[#allocation1 + $0x2] ss:$9 sm:$0xff] %v942_v42  ;;  %v7039_v42 = vpop.eup %6492  ;;  %v1765_v51 = vmul.f32 %v7007_v11, %v1764_v37 }
 0x117   : > { %1284 = vst [vmem:[#allocation1 + $0x3] ss:$9 sm:$0xff] %v945_v47  ;;  %v5801_v44 = vmul.f32 -1.442695, %v7034_v39  ;;  %v6495_v46 = vpop.eup %6494  ;;  %v1780_v47 = vmul.f32 %v7012_v15, %v1779_v36  ;;  %vm1798_vm6 = vweird.f32 %v7039_v42 }
 0x118   : > { %1286 = vst [vmem:[#allocation1 + $0x4] ss:$9 sm:$0xff] %v948_v48  ;;  %v991_v48 = vsel %vm530_vm2, %v411_v28, %v519_v34  ;;  %v6298_v28 = vld [vmem:[%s10200_s4 + $0x70] sm:$0xff]  ;;  %v1773_v34 = vand.u32 2147483648, %v6987_v55  ;;  %vm7111_vm11 = vmor %vm1797_vm9, %vm1798_vm6  ;;  %v1419_v55 = vpop.f32.mrf.mxu0  ;;  %vm3003_vm9 = vsmask.f32 3328 }
 0x119   : > { %1288 = vst [vmem:[#allocation1 + $0x5] ss:$9 sm:$0xff] %v951_v50  ;;  %v1793_v50 = vmul.f32 %v7039_v42, %v7019_v23  ;;  %6496 = vpow2.f32 %v5801_v44  ;;  %v993_v63 = vrot.slane %v991_v48, 2  ;;  %3520 = vmatpush.bf16.msra.mxu1 %v6298_v28  ;;  %6452 = vmatpush.bf16.msra.mxu3 %v6298_v28  ;;  %v1804_v44 = vor.u32 1.1754944e-38, %v1803_v25 }
 0x11a   : > { %1290 = vst [vmem:[#allocation1 + $0x6] ss:$9 sm:$0xff] %v954_v53  ;;  %v7051_v53 = vadd.f32 1.0, %v6495_v46  ;;  %v1774_v49 = vor.u32 1.1754944e-38, %v1773_v34 }
 0x11b   : > { %1291 = vst [vmem:[#allocation1 + $0x7] ss:$9 sm:$0xff] %v957_v56  ;;  %v990_v56 = vrot.slane %v988_v43, 1  ;;  %v1794_v59 = vsub.f32 1.0, %v1793_v50 }
 0x11c   : > { %6498 = vrcp.f32 %v7051_v53  ;;  %vm1812_vm2 = vweird.f32 %v7051_v53  ;;  %v1816_v1 = vand.u32 2147483647, %v7051_v53 }
 0x11d   : > { %v1795_v62 = vmul.f32 %v7039_v42, %v1794_v59 }
 0x11f   : > { %v1796_v17 = vadd.f32 %v7039_v42, %v1795_v62 }
 0x121   : > { %v1800_v23 = vsel %vm7111_vm11, %v7039_v42, %v1796_v17  ;;  %v6297_v42 = vld [vmem:[%s10200_s4 + $0x68] sm:$0xff] }
 0x122   : > { %v7010_v14 = vld [vmem:[#allocation1] sm:$0xff]  ;;  %v1805_v50 = vsel %vm1802_vm14, %v1804_v44, %v1800_v23  ;;  %3521 = vmatpush.bf16.msra.mxu1 %v6297_v42  ;;  %6453 = vmatpush.bf16.msra.mxu3 %v6297_v42 }
 0x123   : > { %1293 = vst [vmem:[#allocation1] ss:$9 sm:$0xff] %v960_v4  ;;  %v1781_v4 = vadd.f32 %v7012_v15, %v1780_v47  ;;  %v1006_v47 = vsel %vm534_vm3, %v7030_v33, %v7037_v40  ;;  %v6296_v40 = vld [vmem:[%s10200_s4 + $0x60] sm:$0xff]  ;;  %vm1817_vm3 = vcmp.eq.f32.partialorder %v1816_v1, 8.507059e+37 }
 0x124   : > { %1295 = vst [vmem:[#allocation1 + $0x1] ss:$9 sm:$0xff] %v963_v5  ;;  %v1517_v5 = vmul.f32 %v6946_v7, %v1416_v60  ;;  %v6292_v1 = vld [vmem:[%s10200_s4 + $0x40] sm:$0xff] }
 0x125   : > { %1297 = vst [vmem:[#allocation1 + $0x2] ss:$9 sm:$0xff] %v966_v8  ;;  %v1788_v8 = vand.u32 2147483648, %v6991_v58 }
 0x126   : > { %1299 = vst [vmem:[#allocation1 + $0x3] ss:$9 sm:$0xff] %v969_v12  ;;  %v413_v12 = vld [vmem:[%s6747_s24 + $0xd4] sm:$0x1]  ;;  %v7080_v18 = vadd.f32 %v6958_v16, %v1517_v5  ;;  %3522 = vmatpush.bf16.msra.mxu1 %v6296_v40  ;;  %6454 = vmatpush.bf16.msra.mxu3 %v6296_v40  ;;  %v2580_v40 = vlaneseq }
 0x127   : > { %1300 = vst [vmem:[#allocation1 + $0x4] ss:$9 sm:$0xff] %v972_v19  ;;  %v6497_v19 = vpop.eup %6496  ;;  %v1789_v35 = vor.u32 1.1754944e-38, %v1788_v8  ;;  %v521_v43 = vrot.slane %v413_v12, 3  ;;  %v1421_v8 = vpop.f32.mrf.mxu0  ;;  %1478 = vmatmul.bf16.gmra.mxu0 %v6963_v22 }
 0x128   : > { %1302 = vst [vmem:[#allocation1 + $0x5] ss:$9 sm:$0xff] %v975_v20  ;;  %v1766_v20 = vadd.f32 %v7007_v11, %v1765_v51  ;;  %v7101_v58 = vadd.f32 1.0, %v6497_v19  ;;  %v5802_v30 = vmul.f32 -1.442695, %v7080_v18  ;;  %v7104_v31 = vpop.eup %6498  ;;  %v1518_v51 = vmul.f32 %v6946_v7, %v1419_v55 }
 0x129   : > { %1304 = vst [vmem:[#allocation1 + $0x6] ss:$9 sm:$0xff] %v978_v21  ;;  %v1808_v36 = vmul.f32 %v7104_v31, %v7051_v53  ;;  %vm1813_vm1 = vweird.f32 %v7104_v31  ;;  %v1011_v59 = vsel %vm522_vm0, %v413_v12, %v521_v43  ;;  %v1519_v12 = vmul.f32 %v6946_v7, %v1421_v8 }
 0x12a   : > { %1306 = vst [vmem:[#allocation1 + $0x7] ss:$9 sm:$0xff] %v981_v29  ;;  %v1785_v29 = vsel %vm7088_vm8, %v7012_v15, %v1781_v4  ;;  %6500 = vrcp.f32 %v7101_v58  ;;  %v1770_v46 = vsel %vm7123_vm13, %v7007_v11, %v1766_v20  ;;  %v1008_v11 = vrot.slane %v1006_v47, 3  ;;  %vm7167_vm0 = vmor %vm1812_vm2, %vm1813_vm1  ;;  %v6293_v47 = vld [vmem:[%s10200_s4 + $0x48] sm:$0xff] }
 0x12b   : > { %v1790_v38 = vsel %vm1787_vm12, %v1789_v35, %v1785_v29  ;;  %6502 = vpow2.f32 %v5802_v30  ;;  %v1809_v48 = vsub.f32 1.0, %v1808_v36  ;;  %v7143_v33 = vadd.f32 %v6958_v16, %v1518_v51  ;;  %vm7262_vm13 = vmor %vm3003_vm9, %vm3004_vm10 }
 0x12c   : > { %v7190_v24 = vadd.f32 %v6958_v16, %v1519_v12  ;;  %vm1827_vm5 = vweird.f32 %v7101_v58  ;;  %v1831_v32 = vand.u32 2147483647, %v7101_v58  ;;  %v1833_v34 = vand.u32 2147483648, %v7101_v58 }
 0x12d   : > { %v5803_v4 = vmul.f32 -1.442695, %v7143_v33 }
 0x12e   : > { %v5804_v30 = vmul.f32 -1.442695, %v7190_v24  ;;  %vm1832_vm7 = vcmp.eq.f32.partialorder %v1831_v32, 8.507059e+37  ;;  %v1834_v51 = vor.u32 1.1754944e-38, %v1833_v34 }
 0x12f   : > { %6504 = vpow2.f32 %v5803_v4  ;;  %v1424_v43 = vpop.f32.mrf.mxu0 }
 0x130   : > { %v7148_v57 = vpop.eup %6500 }
 0x131   : > { %v7061_v2 = vld [vmem:[#allocation1] sm:$0xff]  ;;  %v1823_v3 = vmul.f32 %v7148_v57, %v7101_v58  ;;  %vm1828_vm4 = vweird.f32 %v7148_v57 }
 0x132   : > { %1308 = vst [vmem:[#allocation1] ss:$9 sm:$0xff] %v984_v52  ;;  %v7138_v52 = vmul.f32 %v1790_v38, %v6969_v27  ;;  %v7152_v27 = vmul.f32 %v1805_v50, %v6995_v61  ;;  %vm7207_vm6 = vmor %vm1827_vm5, %vm1828_vm4 }
 0x133   : > { %1309 = vst [vmem:[#allocation1 + $0x1] ss:$9 sm:$0xff] %v987_v54  ;;  %v1810_v54 = vmul.f32 %v7104_v31, %v1809_v48  ;;  %v6666_v48 = vmov 0  }
 0x134   : > { %1311 = vst [vmem:[#allocation1 + $0x2] ss:$9 sm:$0xff] %v990_v56  ;;  %v1775_v56 = vsel %vm1772_vm15, %v1774_v49, %v1770_v46  ;;  %v2462_v62 = vrot.slane %v7138_v52, 2  ;;  %v2463_v61 = vrot.slane %v7138_v52, 4  ;;  %v2465_v19 = vrot.slane %v7152_v27, 2 }
 0x135   : > { %1313 = vst [vmem:[#allocation1 + $0x3] ss:$9 sm:$0xff] %v993_v63  ;;  %v1811_v60 = vadd.f32 %v7104_v31, %v1810_v54  ;;  %v1818_v63 = vand.u32 2147483648, %v7051_v53  ;;  %v7182_v17 = vmul.f32 %v1775_v56, %v6966_v26  ;;  %v2466_v20 = vrot.slane %v7152_v27, 4 }
 0x136   : > { %1315 = vst [vmem:[#allocation1 + $0x4] ss:$9 sm:$0xff] %v996_v0  ;;  %v6503_v0 = vpop.eup %6502  ;;  %v2467_v26 = vrot.slane %v7152_v27, 6  ;;  %v2464_v28 = vrot.slane %v7138_v52, 6  ;;  %v1520_v46 = vmul.f32 %v6946_v7, %v1424_v43  ;;  %v3009_v49 = vrot.slane %v6666_v48, 4 }
 0x137   : > { %1316 = vst [vmem:[#allocation1 + $0x5] ss:$9 sm:$0xff] %v999_v9  ;;  %v7171_v53 = vadd.f32 1.0, %v6503_v0  ;;  %v1815_v9 = vsel %vm7167_vm0, %v7104_v31, %v1811_v60  ;;  %v1819_v22 = vor.u32 1.1754944e-38, %v1818_v63  ;;  %v6294_v31 = vld [vmem:[%s10200_s4 + $0x50] sm:$0xff]  ;;  %v6505_v35 = vpop.eup %6504  ;;  %v2459_v15 = vrot.slane %v7182_v17, 2  ;;  %v1426_v12 = vpop.f32.mrf.mxu0  ;;  %1483 = vmatmul.bf16.gmra.mxu0 %v6983_v45 }
 0x138   : > { %1318 = vst [vmem:[#allocation1 + $0x6] ss:$9 sm:$0xff] %v1002_v10  ;;  %v1824_v10 = vsub.f32 1.0, %v1823_v3  ;;  %v2460_v37 = vrot.slane %v7182_v17, 4  ;;  %v2461_v58 = vrot.slane %v7182_v17, 6  ;;  %v3012_v50 = vrot.slane %v6666_v48, 5 }
 0x139   : > { %1320 = vst [vmem:[#allocation1 + $0x7] ss:$9 sm:$0xff] %v1005_v13  ;;  %v6295_v13 = vld [vmem:[%s10200_s4 + $0x58] sm:$0xff]  ;;  %6506 = vrcp.f32 %v7171_v53  ;;  %v1820_v25 = vsel %vm1817_vm3, %v1819_v22, %v1815_v9  ;;  %vm1842_vm11 = vweird.f32 %v7171_v53 }
 0x13a   : > { %v1825_v21 = vmul.f32 %v7148_v57, %v1824_v10  ;;  %3523 = vmatpush.bf16.msra.mxu1 %v6295_v13  ;;  %6455 = vmatpush.bf16.msra.mxu3 %v6295_v13  ;;  %v7205_v23 = vmul.f32 %v1820_v25, %v7016_v41  ;;  %6508 = vpow2.f32 %v5804_v30  ;;  %v7218_v41 = vadd.f32 1.0, %v6505_v35 }
 0x13b   : > { %v3013_v3 = vor.u32 %v3012_v50, %v3009_v49  ;;  %v7266_v13 = vshrl.u32 %v2580_v40, 7 }
 0x13c   : > { %v1826_v29 = vadd.f32 %v7148_v57, %v1825_v21  ;;  %6510 = vrcp.f32 %v7218_v41  ;;  %v2468_v54 = vrot.slane %v7205_v23, 2  ;;  %v2469_v63 = vrot.slane %v7205_v23, 4 }
 0x13d   : > { %v2470_v4 = vrot.slane %v7205_v23, 6  ;;  %v1861_v22 = vand.u32 2147483647, %v7218_v41  ;;  %vm1857_vm15 = vweird.f32 %v7218_v41  ;;  %v1521_v21 = vmul.f32 %v6946_v7, %v1426_v12 }
 0x13e   : > { %3524 = vmatpush.bf16.msra.mxu1 %v6294_v31  ;;  %6456 = vmatpush.bf16.msra.mxu3 %v6294_v31  ;;  %v1830_v38 = vsel %vm7207_vm6, %v7148_v57, %v1826_v29  ;;  %vm2584_vm1 = vcmp.ge.s32.totalorder %v7266_v13, 1 }
 0x13f   : > { %v7211_v55 = vpop.eup %6506  ;;  %v1835_v57 = vsel %vm1832_vm7, %v1834_v51, %v1830_v38  ;;  %v7283_v30 = vadd.f32 %v6958_v16, %v1521_v21  ;;  %vm7287_vm0 = vcmp.eq.f32.partialorder %v1861_v22, 8.507059e+37  ;;  %v1429_v49 = vpop.f32.mrf.mxu0 }
 0x140   : > { %v7163_v5 = vld [vmem:[#allocation1] sm:$0xff]  ;;  %v1838_v42 = vmul.f32 %v7211_v55, %v7171_v53  ;;  %vm1843_vm8 = vweird.f32 %v7211_v55  ;;  %v6509_v60 = vpop.eup %6508  ;;  %v7250_v6 = vmul.f32 %v1835_v57, %v7034_v39 }
 0x141   : > { %1323 = vst [vmem:[#allocation1] ss:$9 sm:$0xff] %v1008_v11  ;;  %v1848_v11 = vand.u32 2147483648, %v7171_v53  ;;  %vm7255_vm12 = vmor %vm1842_vm11, %vm1843_vm8 }
 0x142   : > { %1324 = vst [vmem:[#allocation1 + $0x1] ss:$9 sm:$0xff] %v1011_v59  ;;  %v1839_v56 = vsub.f32 1.0, %v1838_v42  ;;  %3525 = vmatpush.bf16.msra.mxu1 %v6293_v47  ;;  %6457 = vmatpush.bf16.msra.mxu3 %v6293_v47  ;;  %v7235_v59 = vadd.f32 %v6958_v16, %v1520_v46  ;;  %v2471_v45 = vrot.slane %v7250_v6, 2  ;;  %v2472_v29 = vrot.slane %v7250_v6, 4 }
 0x143   : > { %2610 = vst [vmem:[#allocation1 + $0x20] ss:$4 sm:$0xff] %v7138_v52  ;;  %v1846_v52 = vand.u32 2147483647, %v7171_v53  ;;  %v6511_v53 = vpop.eup %6510  ;;  %v1849_v10 = vor.u32 1.1754944e-38, %v1848_v11  ;;  %v2473_v32 = vrot.slane %v7250_v6, 6 }
 0x144   : > { %2612 = vst [vmem:[#allocation1 + $0x21] ss:$4 sm:$0xff] %v2462_v62  ;;  %v1840_v0 = vmul.f32 %v7211_v55, %v1839_v56  ;;  %v7245_v62 = vadd.f32 1.0, %v6509_v60  ;;  %vm1858_vm2 = vweird.f32 %v6511_v53 }
 0x145   : > { %2614 = vst [vmem:[#allocation1 + $0x22] ss:$4 sm:$0xff] %v2463_v61  ;;  %v5805_v61 = vmul.f32 -1.442695, %v7235_v59  ;;  %vm1847_vm14 = vcmp.eq.f32.partialorder %v1846_v52, 8.507059e+37  ;;  %vm1859_vm3 = vmor %vm1857_vm15, %vm1858_vm2 }
 0x146   : > { %2621 = vst [vmem:[#allocation1 + $0x20] ss:$4 sm:$0xff] %v2465_v19  ;;  %v1841_v8 = vadd.f32 %v7211_v55, %v1840_v0  ;;  %3526 = vmatpush.bf16.msra.mxu1 %v6292_v1  ;;  %6458 = vmatpush.bf16.msra.mxu3 %v6292_v1  ;;  %6512 = vrcp.f32 %v7245_v62  ;;  %v1853_v19 = vmul.f32 %v6511_v53, %v7218_v41  ;;  %v1876_v46 = vand.u32 2147483647, %v7245_v62 }
 0x147   : > { %2622 = vst [vmem:[#allocation1 + $0x21] ss:$4 sm:$0xff] %v2466_v20  ;;  %6514 = vpow2.f32 %v5805_v61  ;;  %v1863_v20 = vand.u32 2147483648, %v7218_v41  ;;  %vm1872_vm5 = vweird.f32 %v7245_v62  ;;  %v1431_v22 = vpop.f32.mrf.mxu0  ;;  %1488 = vmatmul.bf16.gmra.mxu0 %v7010_v14 }
 0x148   : > { %2623 = vst [vmem:[#allocation1 + $0x22] ss:$4 sm:$0xff] %v2467_v26  ;;  %v1854_v25 = vsub.f32 1.0, %v1853_v19  ;;  %vm1877_vm8 = vcmp.eq.f32.partialorder %v1876_v46, 8.507059e+37 }
 0x149   : > { %v7220_v44 = vld [vmem:[#allocation1] sm:$0xff]  ;;  %2616 = vst [vmem:[#allocation1 + $0x23] ss:$4 sm:$0xff] %v2464_v28 }
 0x14a   : > { %2602 = vst [vmem:[#allocation1] ss:$4 sm:$0xff] %v7182_v17  ;;  %v1845_v17 = vsel %vm7255_vm12, %v7211_v55, %v1841_v8  ;;  %v1855_v34 = vmul.f32 %v6511_v53, %v1854_v25  ;;  %v1864_v55 = vor.u32 1.1754944e-38, %v1863_v20 }
 0x14b   : > { %2604 = vst [vmem:[#allocation1 + $0x1] ss:$4 sm:$0xff] %v2459_v15  ;;  %v1850_v26 = vsel %vm1847_vm14, %v1849_v10, %v1845_v17 }
 0x14c   : > { %2606 = vst [vmem:[#allocation1 + $0x2] ss:$4 sm:$0xff] %v2460_v37  ;;  %v6513_v15 = vpop.eup %6512  ;;  %v2382_v36 = vmul.f32 %v1850_v26, %v7080_v18  ;;  %v5806_v37 = vmul.f32 -1.442695, %v7283_v30  ;;  %v1856_v43 = vadd.f32 %v6511_v53, %v1855_v34  ;;  %v1878_v18 = vand.u32 2147483648, %v7245_v62 }
 0x14d   : > { %2608 = vst [vmem:[#allocation1 + $0x3] ss:$4 sm:$0xff] %v2461_v58  ;;  %v6515_v38 = vpop.eup %6514  ;;  %v1868_v42 = vmul.f32 %v6513_v15, %v7245_v62  ;;  %vm1873_vm4 = vweird.f32 %v6513_v15 }
 0x14e   : > { %2619 = vst [vmem:[#allocation1] ss:$4 sm:$0xff] %v7152_v27  ;;  %v3014_v27 = vrot.slane %v3013_v3, 4  ;;  %v7302_v48 = vadd.f32 1.0, %v6515_v38  ;;  %6516 = vpow2.f32 %v5806_v37  ;;  %v1860_v51 = vsel %vm1859_vm3, %v6511_v53, %v1856_v43  ;;  %vm1874_vm7 = vmor %vm1872_vm5, %vm1873_vm4 }
 0x14f   : > { %2624 = vst [vmem:[#allocation1 + $0x23] ss:$4 sm:$0xff] %v7205_v23  ;;  %v1869_v52 = vsub.f32 1.0, %v1868_v42  ;;  %v2474_v41 = vrot.slane %v2382_v36, 2  ;;  %v2475_v40 = vrot.slane %v2382_v36, 4  ;;  %v1865_v57 = vsel %vm7287_vm0, %v1864_v55, %v1860_v51 }
 0x150   : > { %2626 = vst [vmem:[#allocation1] ss:$4 sm:$0xff] %v2468_v54  ;;  %v3019_v28 = vsel %vm7262_vm13, %v3014_v27, %v3012_v50  ;;  %v7306_v50 = vadd.s32 16, %v7266_v13  ;;  %v1522_v54 = vmul.f32 %v6946_v7, %v1429_v49  ;;  %6518 = vrcp.f32 %v7302_v48 }
 0x151   : > { %2627 = vst [vmem:[#allocation1 + $0x1] ss:$4 sm:$0xff] %v2469_v63  ;;  %v3407_v31 = vunpack.c.l.b16 %v3019_v28  ;;  %v7315_v60 = vmul.f32 %v1865_v57, %v7143_v33  ;;  %v1870_v63 = vmul.f32 %v6513_v15, %v1869_v52  ;;  %v2476_v1 = vrot.slane %v2382_v36, 6 }
 0x152   : > { %2628 = vst [vmem:[#allocation1 + $0x2] ss:$4 sm:$0xff] %v2470_v4  ;;  %v7318_v0 = vadd.f32 %v6958_v16, %v1522_v54  ;;  %v1879_v3 = vor.u32 1.1754944e-38, %v1878_v18  ;;  %vm2595_vm6 = vcmp.lt.s32.totalorder %v7306_v50, 17  ;;  %v1891_v61 = vand.u32 2147483647, %v7302_v48 }
 0x153   : > { %2629 = vst [vmem:[#allocation1 + $0x3] ss:$4 sm:$0xff] %v7250_v6  ;;  %v7293_v58 = vpack.c.b16 %v3407_v31, %v3407_v31  ;;  %v1871_v4 = vadd.f32 %v6513_v15, %v1870_v63  ;;  %v2477_v27 = vrot.slane %v7315_v60, 2  ;;  %v1893_v19 = vand.u32 2147483648, %v7302_v48  ;;  %v1434_v63 = vpop.f32.mrf.mxu0 }
 0x154   : > { %v6517_v8 = vpop.eup %6516  ;;  %v5807_v10 = vmul.f32 -1.442695, %v7318_v0  ;;  %v2478_v28 = vrot.slane %v7315_v60, 4  ;;  %vm1887_vm9 = vweird.f32 %v7302_v48  ;;  %v2479_v31 = vrot.slane %v7315_v60, 6 }
 0x155   : > { %10290 = vst [vmem:[#allocation2_spill] sm:$0xff] %v7293_v58  ;;  %3527 = vmatmul.bf16.vlgmr.msra.gmra.mxu1 %v7293_v58  ;;  %v1875_v62 = vsel %vm1874_vm7, %v6513_v15, %v1871_v4  ;;  %v7327_v53 = vadd.f32 1.0, %v6517_v8  ;;  %vm7343_vm10 = vcmp.eq.f32.partialorder %v1891_v61, 8.507059e+37  ;;  %v1894_v35 = vor.u32 1.1754944e-38, %v1893_v19 }
 0x156   : > { %v2625_v23 = vld.sshfl [vmem:[#allocation1 + $0x20] sm:$0xff pattern:$0x73625140]  ;;  %v6519_v12 = vpop.eup %6518  ;;  %v1880_v17 = vsel %vm1877_vm8, %v1879_v3, %v1875_v62 }
 0x157   : > { %2630 = vst [vmem:[#allocation1 + $0x20] ss:$4 sm:$0xff] %v2471_v45  ;;  %v2882_v47 = vsel %vm2584_vm1, %v2625_v23, 0.0  ;;  %v1883_v45 = vmul.f32 %v6519_v12, %v7302_v48  ;;  %6520 = vrcp.f32 %v7327_v53  ;;  %vm1888_vm11 = vweird.f32 %v6519_v12 }
 0x158   : > { %v7309_v56 = vpack.c.bf16 %v2882_v47, %v2882_v47  ;;  %6522 = vpow2.f32 %v5807_v10  ;;  %v1906_v15 = vand.u32 2147483647, %v7327_v53  ;;  %v1523_v23 = vmul.f32 %v6946_v7, %v1431_v22  ;;  %vm1889_vm12 = vmor %vm1887_vm9, %vm1888_vm11 }
 0x159   : > { %v1908_v46 = vand.u32 2147483648, %v7327_v53  ;;  %vm1902_vm2 = vweird.f32 %v7327_v53 }
 0x15a   : > { %v2631_v11 = vld.sshfl [vmem:[#allocation1] sm:$0xff pattern:$0x73625140]  ;;  %v3031_v6 = vshrl.u32 %v7309_v56, 16  ;;  %v3034_v33 = vshll.u32 %v7309_v56, 16  ;;  %v7355_v47 = vadd.f32 %v6958_v16, %v1523_v23  ;;  %vm7362_vm14 = vcmp.eq.f32.partialorder %v1906_v15, 8.507059e+37 }
 0x15b   : > { %2633 = vst [vmem:[#allocation1] ss:$4 sm:$0xff] %v2472_v29  ;;  %v7333_v21 = vpack.c.bf16 %v2631_v11, %v2631_v11  ;;  %v2384_v29 = vmul.f32 %v1880_v17, %v7190_v24  ;;  %v1524_v17 = vmul.f32 %v6946_v7, %v1434_v63  ;;  %v1436_v23 = vpop.f32.mrf.mxu0  ;;  %1493 = vmatmul.bf16.gmra.mxu0 %v7061_v2 }
 0x15c   : > { %2634 = vst [vmem:[#allocation1 + $0x1] ss:$4 sm:$0xff] %v2473_v32  ;;  %v3033_v26 = vrot.slane %v3031_v6, 4  ;;  %v3036_v25 = vrot.slane %v3034_v33, 5  ;;  %v1884_v32 = vsub.f32 1.0, %v1883_v45  ;;  %v1909_v45 = vor.u32 1.1754944e-38, %v1908_v46 }
 0x15d   : > { %2635 = vst [vmem:[#allocation1 + $0x2] ss:$4 sm:$0xff] %v2382_v36  ;;  %v3040_v37 = vshll.u32 %v7333_v21, 16  ;;  %v3044_v38 = vshrl.u32 %v7333_v21, 16  ;;  %v2480_v43 = vrot.slane %v2384_v29, 2  ;;  %v2481_v42 = vrot.slane %v2384_v29, 4  ;;  %v6521_v18 = vpop.eup %6520 }
 0x15e   : > { %v2632_v9 = vld.sshfl [vmem:[#allocation1 + $0x20] sm:$0xff pattern:$0x73625140]  ;;  %2636 = vst [vmem:[#allocation1 + $0x3] ss:$4 sm:$0xff] %v2474_v41  ;;  %v1885_v24 = vmul.f32 %v6519_v12, %v1884_v32  ;;  %v3037_v55 = vor.u32 %v3036_v25, %v3033_v26  ;;  %v6523_v11 = vpop.eup %6522  ;;  %v2482_v41 = vrot.slane %v2384_v29, 6  ;;  %vm1903_vm15 = vweird.f32 %v6521_v18 }
 0x15f   : > { %2637 = vst [vmem:[#allocation1 + $0x20] ss:$4 sm:$0xff] %v2475_v40  ;;  %v2884_v20 = vsel %vm2595_vm6, %v2632_v9, 0.0  ;;  %v3042_v51 = vrot.slane %v3040_v37, 5  ;;  %v3046_v52 = vrot.slane %v3044_v38, 4  ;;  %v1898_v40 = vmul.f32 %v6521_v18, %v7327_v53  ;;  %vm7382_vm0 = vmor %vm1902_vm2, %vm1903_vm15 }
 0x160   : > { %2638 = vst [vmem:[#allocation1 + $0x21] ss:$4 sm:$0xff] %v2476_v1  ;;  %v7347_v34 = vpack.c.bf16 %v2884_v20, %v2884_v20  ;;  %v1886_v49 = vadd.f32 %v6519_v12, %v1885_v24  ;;  %v7367_v4 = vadd.f32 1.0, %v6523_v11  ;;  %v3038_v61 = vrot.slane %v3037_v55, 4 }
 0x161   : > { %2639 = vst [vmem:[#allocation1 + $0x22] ss:$4 sm:$0xff] %v7315_v60  ;;  %v5808_v60 = vmul.f32 -1.442695, %v7355_v47  ;;  %v3047_v6 = vor.u32 %v3046_v52, %v3042_v51  ;;  %v1899_v33 = vsub.f32 1.0, %v1898_v40  ;;  %v1525_v38 = vmul.f32 %v6946_v7, %v1436_v23 }
 0x162   : > { %2640 = vst [vmem:[#allocation1 + $0x23] ss:$4 sm:$0xff] %v2477_v27  ;;  %v3050_v54 = vshll.u32 %v7347_v34, 16  ;;  %v1890_v3 = vsel %vm1889_vm12, %v6519_v12, %v1886_v49  ;;  %v3043_v10 = vsel %vm7262_vm13, %v3038_v61, %v3042_v51  ;;  %v1921_v2 = vand.u32 2147483647, %v7367_v4 }
 0x163   : > { %v1895_v48 = vsel %vm7343_vm10, %v1894_v35, %v1890_v3  ;;  %6524 = vpow2.f32 %v5808_v60  ;;  %v1900_v62 = vmul.f32 %v6521_v18, %v1899_v33  ;;  %v3048_v12 = vrot.slane %v3047_v6, 4 }
 0x164   : > { %v2385_v9 = vmul.f32 %v1895_v48, %v7235_v59  ;;  %6526 = vrcp.f32 %v7367_v4  ;;  %v3052_v27 = vrot.slane %v3050_v54, 5  ;;  %v1923_v49 = vand.u32 2147483648, %v7367_v4 }
 0x165   : > { %v2641_v36 = vld.sshfl [vmem:[#allocation1] sm:$0xff pattern:$0x73625140]  ;;  %v1901_v59 = vadd.f32 %v6521_v18, %v1900_v62  ;;  %vm1917_vm4 = vweird.f32 %v7367_v4  ;;  %v1439_v62 = vpop.f32.mrf.mxu0  ;;  %vm7432_vm5 = vcmp.eq.f32.partialorder %v1921_v2, 8.507059e+37 }
 0x166   : > { %2643 = vst [vmem:[#allocation1] ss:$4 sm:$0xff] %v2478_v28  ;;  %v2885_v8 = vsel %vm2584_vm1, %v2641_v36, 0.0  ;;  %v2483_v22 = vrot.slane %v2385_v9, 2  ;;  %v2484_v20 = vrot.slane %v2385_v9, 4  ;;  %v3053_v28 = vsel %vm7262_vm13, %v3048_v12, %v3052_v27 }
 0x167   : > { %v7379_v26 = vpack.c.bf16 %v2885_v8, %v2885_v8  ;;  %v2485_v14 = vrot.slane %v2385_v9, 6  ;;  %v1905_v35 = vsel %vm7382_vm0, %v6521_v18, %v1901_v59  ;;  %v3410_v15 = vunpack.c.l.b16 %v3053_v28 }
 0x169   : > { %v2642_v1 = vld.sshfl [vmem:[#allocation1 + $0x20] sm:$0xff pattern:$0x73625140]  ;;  %v6525_v32 = vpop.eup %6524  ;;  %v3055_v18 = vshrl.u32 %v7379_v26, 16  ;;  %v3058_v60 = vshll.u32 %v7379_v26, 16 }
 0x16a   : > { %2645 = vst [vmem:[#allocation1 + $0x20] ss:$4 sm:$0xff] %v2479_v31  ;;  %v7389_v31 = vadd.f32 %v6958_v16, %v1524_v17  ;;  %v7391_v53 = vpack.c.bf16 %v2642_v1, %v2642_v1  ;;  %v6527_v24 = vpop.eup %6526  ;;  %v1910_v16 = vsel %vm7362_vm14, %v1909_v45, %v1905_v35  ;;  %v7400_v55 = vadd.f32 1.0, %v6525_v32 }
 0x16b   : > { %2646 = vst [vmem:[#allocation1 + $0x21] ss:$4 sm:$0xff] %v2384_v29  ;;  %v3409_v29 = vunpack.c.l.b16 %v3043_v10  ;;  %vm1918_vm3 = vweird.f32 %v6527_v24  ;;  %v3057_v57 = vrot.slane %v3055_v18, 4  ;;  %v3060_v8 = vrot.slane %v3058_v60, 5 }
 0x16c   : > { %2647 = vst [vmem:[#allocation1 + $0x22] ss:$4 sm:$0xff] %v2480_v43  ;;  %v5809_v37 = vmul.f32 -1.442695, %v7389_v31  ;;  %v2386_v43 = vmul.f32 %v1910_v16, %v7283_v30  ;;  %6528 = vrcp.f32 %v7400_v55  ;;  %v1936_v52 = vand.u32 2147483647, %v7400_v55  ;;  %vm1919_vm7 = vmor %vm1917_vm4, %vm1918_vm3 }
 0x16d   : > { %v2644_v19 = vld.sshfl [vmem:[#allocation1] sm:$0xff pattern:$0x73625140]  ;;  %2648 = vst [vmem:[#allocation1 + $0x23] ss:$4 sm:$0xff] %v2481_v42  ;;  %v1913_v42 = vmul.f32 %v6527_v24, %v7367_v4  ;;  %v7406_v46 = vpack.c.b16 %v3410_v15, %v3409_v29  ;;  %v1938_v11 = vand.u32 2147483648, %v7400_v55  ;;  %v3061_v45 = vor.u32 %v3060_v8, %v3057_v57  ;;  %v1441_v57 = vpop.f32.mrf.mxu0  ;;  %1498 = vmatmul.bf16.gmra.mxu0 %v7163_v5 }
 0x16e   : > { %2650 = vst [vmem:[#allocation1] ss:$4 sm:$0xff] %v2482_v41  ;;  %v2887_v36 = vsel %vm2595_vm6, %v2644_v19, 0.0  ;;  %6530 = vpow2.f32 %v5809_v37  ;;  %v2486_v30 = vrot.slane %v2386_v43, 2  ;;  %v7420_v41 = vld [vmem:[%s10199_s3] ss:$0 sm:$0xff]  ;;  %vm1932_vm8 = vweird.f32 %v7400_v55 }
 0x16f   : > { %2651 = vst [vmem:[#allocation1 + $0x1] ss:$4 sm:$0xff] %v2385_v9  ;;  %3532 = vmatmul.bf16.gmra.mxu1 %v7406_v46  ;;  %v7414_v7 = vpack.c.bf16 %v2887_v36, %v2887_v36  ;;  %v1914_v54 = vsub.f32 1.0, %v1913_v42  ;;  %v7423_v40 = vadd.f32 %v7420_v41, %v1525_v38  ;;  %v3064_v63 = vshll.u32 %v7391_v53, 16  ;;  %v7439_v19 = vld [vmem:[%s10198_s2] ss:$0 sm:$0xff] }
 0x170   : > { %2652 = vst [vmem:[#allocation1 + $0x2] ss:$4 sm:$0xff] %v2483_v22  ;;  %v3068_v1 = vshrl.u32 %v7391_v53, 16  ;;  %v2487_v3 = vrot.slane %v2386_v43, 4  ;;  %v2488_v61 = vrot.slane %v2386_v43, 6  ;;  %v1526_v4 = vmul.f32 %v7439_v19, %v1439_v62 }
 0x171   : > { %2653 = vst [vmem:[#allocation1 + $0x3] ss:$4 sm:$0xff] %v2484_v20  ;;  %v1915_v6 = vmul.f32 %v6527_v24, %v1914_v54  ;;  %v5810_v48 = vmul.f32 -1.442695, %v7423_v40  ;;  %v7430_v9 = vrot.slane %v3064_v63, 5  ;;  %v1924_v20 = vor.u32 1.1754944e-38, %v1923_v49 }
 0x172   : > { %v3070_v27 = vrot.slane %v3068_v1, 4  ;;  %v6529_v10 = vpop.eup %6528  ;;  %v3074_v32 = vshll.u32 %v7414_v7, 16  ;;  %vm7451_vm9 = vcmp.eq.f32.partialorder %v1936_v52, 8.507059e+37  ;;  %v1939_v23 = vor.u32 1.1754944e-38, %v1938_v11 }
 0x173   : > { %v1916_v12 = vadd.f32 %v6527_v24, %v1915_v6  ;;  %6532 = vpow2.f32 %v5810_v48  ;;  %v1928_v59 = vmul.f32 %v6529_v10, %v7400_v55  ;;  %vm1933_vm10 = vweird.f32 %v6529_v10 }
 0x174   : > { %v2649_v51 = vld.sshfl [vmem:[#allocation1 + $0x20] sm:$0xff pattern:$0x73625140]  ;;  %v6531_v22 = vpop.eup %6530  ;;  %v3071_v25 = vor.u32 %v3070_v27, %v7430_v9  ;;  %vm1934_vm11 = vmor %vm1932_vm8, %vm1933_vm10  ;;  %v1527_v1 = vmul.f32 %v7439_v19, %v1441_v57 }
 0x175   : > { %2654 = vst [vmem:[#allocation1 + $0x20] ss:$4 sm:$0xff] %v2485_v14  ;;  %v1920_v28 = vsel %vm1919_vm7, %v6527_v24, %v1916_v12  ;;  %v7446_v29 = vadd.f32 1.0, %v6531_v22  ;;  %v1929_v35 = vsub.f32 1.0, %v1928_v59  ;;  %v7458_v24 = vadd.f32 %v7420_v41, %v1526_v4 }
 0x176   : > { %v1925_v14 = vsel %vm7432_vm5, %v1924_v20, %v1920_v28  ;;  %v2888_v16 = vsel %vm2584_vm1, %v2649_v51, 0.0  ;;  %v3072_v42 = vrot.slane %v3071_v25, 4  ;;  %v7498_v22 = vadd.f32 %v7420_v41, %v1527_v1 }
 0x177   : > { %v2387_v36 = vmul.f32 %v1925_v14, %v7318_v0  ;;  %6534 = vrcp.f32 %v7446_v29  ;;  %v1930_v38 = vmul.f32 %v6529_v10, %v1929_v35  ;;  %v1951_v54 = vand.u32 2147483647, %v7446_v29 }
 0x178   : > { %v2655_v33 = vld.sshfl [vmem:[#allocation1] sm:$0xff pattern:$0x73625140]  ;;  %v5811_v63 = vmul.f32 -1.442695, %v7458_v24  ;;  %vm1947_vm12 = vweird.f32 %v7446_v29 }
 0x179   : > { %2657 = vst [vmem:[#allocation1] ss:$4 sm:$0xff] %v2386_v43  ;;  %v3062_v43 = vrot.slane %v3061_v45, 4  ;;  %v6533_v18 = vpop.eup %6532  ;;  %v2489_v2 = vrot.slane %v2387_v36, 2  ;;  %v2490_v49 = vrot.slane %v2387_v36, 4  ;;  %v2491_v52 = vrot.slane %v2387_v36, 6 }
 0x17a   : > { %2658 = vst [vmem:[#allocation1 + $0x1] ss:$4 sm:$0xff] %v2486_v30  ;;  %v3076_v30 = vrot.slane %v3074_v32, 5  ;;  %v1931_v0 = vadd.f32 %v6529_v10, %v1930_v38  ;;  %v7463_v11 = vadd.f32 1.0, %v6533_v18  ;;  %v7480_v5 = vpack.c.bf16 %v2655_v33, %v2655_v33 }
 0x17b   : > { %2659 = vst [vmem:[#allocation1 + $0x2] ss:$4 sm:$0xff] %v2487_v3  ;;  %v3067_v51 = vsel %vm7262_vm13, %v3062_v43, %v7430_v9  ;;  %v7476_v3 = vpack.c.bf16 %v2888_v16, %v2888_v16  ;;  %vm7486_vm14 = vcmp.eq.f32.partialorder %v1951_v54, 8.507059e+37  ;;  %v5812_v25 = vmul.f32 -1.442695, %v7498_v22  ;;  %v1444_v16 = vpop.f32.mrf.mxu0 }
 0x17c   : > { %2660 = vst [vmem:[#allocation1 + $0x3] ss:$4 sm:$0xff] %v2488_v61  ;;  %v2656_v37 = vld.sshfl [vmem:[#allocation1 + $0x20] sm:$0xff pattern:$0x73625140]  ;;  %v3077_v60 = vsel %vm7262_vm13, %v3072_v42, %v3076_v30  ;;  %v1935_v61 = vsel %vm1934_vm11, %v6529_v10, %v1931_v0  ;;  %6536 = vrcp.f32 %v7463_v11  ;;  %v3411_v48 = vunpack.c.l.b16 %v3067_v51 }
 0x17d   : > { %2661 = vst [vmem:[#allocation1 + $0x20] ss:$4 sm:$0xff] %v2387_v36  ;;  %v6535_v6 = vpop.eup %6534  ;;  %v1940_v55 = vsel %vm7451_vm9, %v1939_v23, %v1935_v61  ;;  %v3412_v8 = vunpack.c.l.b16 %v3077_v60  ;;  %6538 = vpow2.f32 %v5811_v63  ;;  %v1953_v10 = vand.u32 2147483648, %v7446_v29 }
 0x17e   : > { %2662 = vst [vmem:[#allocation1 + $0x21] ss:$4 sm:$0xff] %v2489_v2  ;;  %v2388_v9 = vmul.f32 %v1940_v55, %v7355_v47  ;;  %v1943_v27 = vmul.f32 %v6535_v6, %v7446_v29  ;;  %v1966_v12 = vand.u32 2147483647, %v7463_v11  ;;  %v1968_v17 = vand.u32 2147483648, %v7463_v11 }
 0x17f   : > { %10301 = vst [vmem:[#allocation3_spill] sm:$0xff] %v7476_v3  ;;  %v7495_v4 = vpack.c.b16 %v3412_v8, %v3411_v48  ;;  %vm1948_vm15 = vweird.f32 %v6535_v6  ;;  %v2890_v59 = vsel %vm2595_vm6, %v2656_v37, 0.0  ;;  %v3079_v28 = vshrl.u32 %v7476_v3, 16 }
 0x180   : > { %2663 = vst [vmem:[#allocation1 + $0x22] ss:$4 sm:$0xff] %v2490_v49  ;;  %v2492_v47 = vrot.slane %v2388_v9, 2  ;;  %v1944_v20 = vsub.f32 1.0, %v1943_v27  ;;  %v2493_v45 = vrot.slane %v2388_v9, 4  ;;  %v3082_v32 = vshll.u32 %v7476_v3, 16  ;;  %vm1949_vm2 = vmor %vm1947_vm12, %vm1948_vm15 }
 0x181   : > { %2664 = vst [vmem:[#allocation1 + $0x23] ss:$4 sm:$0xff] %v2491_v52  ;;  %3537 = vmatmul.bf16.gmra.mxu1 %v7495_v4  ;;  %v2494_v35 = vrot.slane %v2388_v9, 6  ;;  %v3088_v23 = vshll.u32 %v7480_v5, 16  ;;  %v3092_v36 = vshrl.u32 %v7480_v5, 16  ;;  %6540 = vpow2.f32 %v5812_v25 }
 0x182   : > { %v6537_v14 = vpop.eup %6536  ;;  %v1945_v15 = vmul.f32 %v6535_v6, %v1944_v20  ;;  %v7509_v43 = vpack.c.bf16 %v2890_v59, %v2890_v59  ;;  %v3081_v42 = vrot.slane %v3079_v28, 4  ;;  %v3084_v52 = vrot.slane %v3082_v32, 5 }
 0x183   : > { %v7491_v33 = vld.sshfl [vmem:[#allocation1] sm:$0xff pattern:$0x73625140]  ;;  %v6539_v38 = vpop.eup %6538  ;;  %v1958_v37 = vmul.f32 %v6537_v14, %v7463_v11  ;;  %v7515_v30 = vrot.slane %v3088_v23, 5  ;;  %v1954_v0 = vor.u32 1.1754944e-38, %v1953_v10  ;;  %v3094_v51 = vrot.slane %v3092_v36, 4 }
 0x184   : > { %2667 = vst [vmem:[#allocation1] ss:$4 sm:$0xff] %v2388_v9  ;;  %v1946_v2 = vadd.f32 %v6535_v6, %v1945_v15  ;;  %v7513_v49 = vadd.f32 1.0, %v6539_v38  ;;  %v1528_v57 = vmul.f32 %v7439_v19, %v1444_v16  ;;  %vm1962_vm0 = vweird.f32 %v7463_v11  ;;  %v6291_v11 = vld [vmem:[%s10200_s4 + $0x38] sm:$0xff] }
 0x185   : > { %v1959_v54 = vsub.f32 1.0, %v1958_v37  ;;  %vm7522_vm3 = vcmp.eq.f32.partialorder %v1966_v12, 8.507059e+37  ;;  %vm1963_vm4 = vweird.f32 %v6537_v14  ;;  %v3085_v61 = vor.u32 %v3084_v52, %v3081_v42  ;;  %6459 = vmatpush.bf16.msra.mxu2 %v6291_v11  ;;  %3752 = vmatpush.bf16.msrb.mxu0 %v6291_v11 }
 0x186   : > { %v1950_v60 = vsel %vm1949_vm2, %v6535_v6, %v1946_v2  ;;  %6542 = vrcp.f32 %v7513_v49  ;;  %v1969_v48 = vor.u32 1.1754944e-38, %v1968_v17  ;;  %v3095_v6 = vor.u32 %v3094_v51, %v7515_v30  ;;  %vm1964_vm5 = vmor %vm1962_vm0, %vm1963_vm4  ;;  %v1446_v17 = vpop.f32.mrf.mxu0  ;;  %1503 = vmatmul.bf16.gmra.mxu0 %v7220_v44 }
 0x187   : > { %v1955_v29 = vsel %vm7486_vm14, %v1954_v0, %v1950_v60  ;;  %v1960_v1 = vmul.f32 %v6537_v14, %v1959_v54  ;;  %v3098_v8 = vshll.u32 %v7509_v43, 16  ;;  %v6541_v9 = vpop.eup %6540  ;;  %v1981_v12 = vand.u32 2147483647, %v7513_v49 }
 0x188   : > { %v7511_v18 = vld.sshfl [vmem:[#allocation1 + $0x20] sm:$0xff pattern:$0x73625140]  ;;  %v2389_v55 = vmul.f32 %v1955_v29, %v7389_v31  ;;  %v7535_v62 = vadd.f32 %v7420_v41, %v1528_v57  ;;  %v7540_v31 = vadd.f32 1.0, %v6541_v9  ;;  %v3086_v28 = vrot.slane %v3085_v61, 4  ;;  %v6290_v57 = vld [vmem:[%s10200_s4 + $0x30] sm:$0xff] }
 0x189   : > { %2669 = vst [vmem:[#allocation1 + $0x20] ss:$4 sm:$0xff] %v2492_v47  ;;  %v1961_v10 = vadd.f32 %v6537_v14, %v1960_v1  ;;  %v1983_v47 = vand.u32 2147483648, %v7513_v49  ;;  %v3096_v32 = vrot.slane %v3095_v6, 4  ;;  %v3100_v36 = vrot.slane %v3098_v8, 5  ;;  %6460 = vmatpush.bf16.msra.mxu2 %v6290_v57  ;;  %3753 = vmatpush.bf16.msrb.mxu0 %v6290_v57 }
 0x18a   : > { %2670 = vst [vmem:[#allocation1 + $0x21] ss:$4 sm:$0xff] %v2493_v45  ;;  %v2495_v20 = vrot.slane %v2389_v55, 2  ;;  %v2496_v59 = vrot.slane %v2389_v55, 4  ;;  %v2497_v45 = vrot.slane %v2389_v55, 6  ;;  %6544 = vrcp.f32 %v7540_v31 }
 0x18b   : > { %2671 = vst [vmem:[#allocation1 + $0x22] ss:$4 sm:$0xff] %v2494_v35  ;;  %v2668_v27 = vld.sshfl [vmem:[#allocation1] sm:$0xff pattern:$0x73625140]  ;;  %v1965_v25 = vsel %vm1964_vm5, %v6537_v14, %v1961_v10  ;;  %v2891_v44 = vsel %vm2584_vm1, %v7491_v33, 0.0  ;;  %vm1977_vm7 = vweird.f32 %v7513_v49  ;;  %v3091_v38 = vsel %vm7262_vm13, %v3086_v28, %v7515_v30 }
 0x18c   : > { %2672 = vst [vmem:[#allocation1 + $0x23] ss:$4 sm:$0xff] %v2389_v55  ;;  %v5813_v35 = vmul.f32 -1.442695, %v7535_v62  ;;  %v6543_v15 = vpop.eup %6542  ;;  %v1970_v23 = vsel %vm7522_vm3, %v1969_v48, %v1965_v25  ;;  %vm7561_vm8 = vcmp.eq.f32.partialorder %v1981_v12, 8.507059e+37  ;;  %v1984_v42 = vor.u32 1.1754944e-38, %v1983_v47 }
 0x18d   : > { %2674 = vst [vmem:[#allocation1] ss:$4 sm:$0xff] %v2495_v20  ;;  %v7554_v14 = vmul.f32 %v1970_v23, %v7423_v40  ;;  %v1973_v16 = vmul.f32 %v6543_v15, %v7513_v49  ;;  %v3101_v33 = vsel %vm7262_vm13, %v3096_v32, %v3100_v36  ;;  %vm1978_vm9 = vweird.f32 %v6543_v15  ;;  %v6289_v28 = vld [vmem:[%s10200_s4 + $0x28] sm:$0xff] }
 0x18e   : > { %2675 = vst [vmem:[#allocation1 + $0x1] ss:$4 sm:$0xff] %v2496_v59  ;;  %6546 = vpow2.f32 %v5813_v35  ;;  %v1996_v52 = vand.u32 2147483647, %v7540_v31  ;;  %v3413_v30 = vunpack.c.l.b16 %v3091_v38  ;;  %v3414_v0 = vunpack.c.l.b16 %v3101_v33  ;;  %vm1979_vm10 = vmor %vm1977_vm7, %vm1978_vm9  ;;  %6461 = vmatpush.bf16.msra.mxu2 %v6289_v28  ;;  %3754 = vmatpush.bf16.msrb.mxu0 %v6289_v28 }
 0x18f   : > { %2676 = vst [vmem:[#allocation1 + $0x2] ss:$4 sm:$0xff] %v2497_v45  ;;  %v2498_v40 = vrot.slane %v7554_v14, 2  ;;  %v1974_v2 = vsub.f32 1.0, %v1973_v16  ;;  %v1529_v54 = vmul.f32 %v7439_v19, %v1446_v17  ;;  %v2893_v51 = vsel %vm2595_vm6, %v2668_v27, 0.0  ;;  %v1449_v27 = vpop.f32.mrf.mxu0 }
 0x190   : > { %2677 = vst [vmem:[#allocation1 + $0x3] ss:$4 sm:$0xff] %v7554_v14  ;;  %v1998_v29 = vand.u32 2147483648, %v7540_v31  ;;  %v7579_v1 = vpack.c.bf16 %v2891_v44, %v2891_v44  ;;  %v7583_v61 = vpack.c.bf16 %v7511_v18, %v7511_v18  ;;  %v7585_v55 = vpop.eup %6544  ;;  %v2499_v48 = vrot.slane %v7554_v14, 4 }
 0x191   : > { %v1975_v63 = vmul.f32 %v6543_v15, %v1974_v2  ;;  %v2500_v6 = vrot.slane %v7554_v14, 6  ;;  %v7589_v8 = vpack.c.b16 %v3414_v0, %v3413_v30  ;;  %v7592_v9 = vadd.f32 %v7420_v41, %v1529_v54 }
 0x192   : > { %10308 = vst [vmem:[#allocation4_spill] sm:$0xff] %v7579_v1  ;;  %v1988_v18 = vmul.f32 %v7585_v55, %v7540_v31  ;;  %v7596_v12 = vpack.c.bf16 %v2893_v51, %v2893_v51  ;;  %v3103_v47 = vshrl.u32 %v7579_v1, 16  ;;  %v3106_v45 = vshll.u32 %v7579_v1, 16 }
 0x193   : > { %v7576_v60 = vld.sshfl [vmem:[#allocation1 + $0x20] sm:$0xff pattern:$0x73625140]  ;;  %v1976_v10 = vadd.f32 %v6543_v15, %v1975_v63  ;;  %3542 = vmatmul.bf16.gmra.mxu1 %v7589_v8  ;;  %v5814_v59 = vmul.f32 -1.442695, %v7592_v9  ;;  %v3112_v17 = vshll.u32 %v7583_v61, 16  ;;  %vm1993_vm11 = vweird.f32 %v7585_v55 }
 0x194   : > { %2678 = vst [vmem:[#allocation1 + $0x20] ss:$4 sm:$0xff] %v2498_v40  ;;  %v6547_v20 = vpop.eup %6546  ;;  %v3116_v25 = vshrl.u32 %v7583_v61, 16  ;;  %v1989_v35 = vsub.f32 1.0, %v1988_v18  ;;  %v3105_v49 = vrot.slane %v3103_v47, 4  ;;  %v3108_v44 = vrot.slane %v3106_v45, 5 }
 0x195   : > { %10309 = vst [vmem:[#allocation5_spill] sm:$0xff] %v7596_v12  ;;  %v1980_v32 = vsel %vm1979_vm10, %v6543_v15, %v1976_v10  ;;  %v7610_v23 = vadd.f32 1.0, %v6547_v20  ;;  %6548 = vpow2.f32 %v5814_v59  ;;  %v7616_v14 = vrot.slane %v3112_v17, 5  ;;  %v6287_v20 = vld [vmem:[%s10200_s4 + $0x18] sm:$0xff] }
 0x196   : > { %v1985_v11 = vsel %vm7561_vm8, %v1984_v42, %v1980_v32  ;;  %v1990_v15 = vmul.f32 %v7585_v55, %v1989_v35  ;;  %vm1992_vm12 = vweird.f32 %v7540_v31  ;;  %vm7623_vm14 = vcmp.eq.f32.partialorder %v1996_v52, 8.507059e+37  ;;  %v6288_v52 = vld [vmem:[%s10200_s4 + $0x20] sm:$0xff] }
 0x197   : > { %v7612_v36 = vld.sshfl [vmem:[#allocation1] sm:$0xff pattern:$0x73625140]  ;;  %v2391_v16 = vmul.f32 %v1985_v11, %v7458_v24  ;;  %6550 = vrcp.f32 %v7610_v23  ;;  %v3109_v37 = vor.u32 %v3108_v44, %v3105_v49  ;;  %v3118_v42 = vrot.slane %v3116_v25, 4  ;;  %vm1994_vm15 = vmor %vm1992_vm12, %vm1993_vm11  ;;  %v1451_v31 = vpop.f32.mrf.mxu0  ;;  %6462 = vmatpush.bf16.msra.mxu2 %v6288_v52  ;;  %3755 = vmatpush.bf16.msrb.mxu0 %v6288_v52 }
 0x198   : > { %2681 = vst [vmem:[#allocation1] ss:$4 sm:$0xff] %v2499_v48  ;;  %v1991_v24 = vadd.f32 %v7585_v55, %v1990_v15  ;;  %v1999_v0 = vor.u32 1.1754944e-38, %v1998_v29  ;;  %v2011_v54 = vand.u32 2147483647, %v7610_v23  ;;  %v3122_v63 = vshll.u32 %v7596_v12, 16 }
 0x199   : > { %2682 = vst [vmem:[#allocation1 + $0x1] ss:$4 sm:$0xff] %v2500_v6  ;;  %v2501_v40 = vrot.slane %v2391_v16, 2  ;;  %v2502_v2 = vrot.slane %v2391_v16, 4  ;;  %v2503_v30 = vrot.slane %v2391_v16, 6  ;;  %v3119_v51 = vor.u32 %v3118_v42, %v7616_v14 }
 0x19a   : > { %2683 = vst [vmem:[#allocation1 + $0x2] ss:$4 sm:$0xff] %v2391_v16  ;;  %v1995_v57 = vsel %vm1994_vm15, %v7585_v55, %v1991_v24  ;;  %v1530_v48 = vmul.f32 %v7439_v19, %v1449_v27  ;;  %v1531_v6 = vmul.f32 %v7439_v19, %v1451_v31  ;;  %v2013_v18 = vand.u32 2147483648, %v7610_v23  ;;  %v6286_v16 = vld [vmem:[%s10200_s4 + $0x10] sm:$0xff] }
 0x19b   : > { %v2680_v33 = vld.sshfl [vmem:[#allocation1 + $0x20] sm:$0xff pattern:$0x73625140]  ;;  %2684 = vst [vmem:[#allocation1 + $0x3] ss:$4 sm:$0xff] %v2501_v40  ;;  %v6549_v10 = vpop.eup %6548  ;;  %v2000_v29 = vsel %vm7623_vm14, %v1999_v0, %v1995_v57  ;;  %v3110_v47 = vrot.slane %v3109_v37, 4  ;;  %vm2007_vm2 = vweird.f32 %v7610_v23  ;;  %6463 = vmatpush.bf16.msra.mxu2 %v6287_v20  ;;  %3756 = vmatpush.bf16.msrb.mxu0 %v6287_v20  ;;  %v7687_v31 = vpack.c.bf16 %v7612_v36, %v7612_v36 }
 0x19c   : > { %2685 = vst [vmem:[#allocation1 + $0x20] ss:$4 sm:$0xff] %v2502_v2  ;;  %v2894_v55 = vsel %vm2584_vm1, %v7576_v60, 0.0  ;;  %v7647_v59 = vmul.f32 %v2000_v29, %v7498_v22  ;;  %v7650_v45 = vadd.f32 1.0, %v6549_v10  ;;  %v3124_v17 = vrot.slane %v3122_v63, 5 }
 0x19d   : > { %v6551_v27 = vpop.eup %6550  ;;  %2686 = vst [vmem:[#allocation1 + $0x21] ss:$4 sm:$0xff] %v2503_v30  ;;  %v3115_v28 = vsel %vm7262_vm13, %v3110_v47, %v7616_v14  ;;  %v7657_v32 = vadd.f32 %v7420_v41, %v1530_v48  ;;  %v7660_v60 = vadd.f32 %v7420_v41, %v1531_v6  ;;  %v3120_v49 = vrot.slane %v3119_v51, 4  ;;  %v6285_v48 = vld [vmem:[%s10200_s4 + $0x8] sm:$0xff] }
 0x19e   : > { %v2003_v25 = vmul.f32 %v6551_v27, %v7610_v23  ;;  %v2504_v22 = vrot.slane %v7647_v59, 2  ;;  %v2505_v35 = vrot.slane %v7647_v59, 4  ;;  %2687 = vst [vmem:[#allocation1 + $0x22] ss:$4 sm:$0xff] %v7647_v59  ;;  %6552 = vrcp.f32 %v7650_v45 }
 0x19f   : > { %vm7666_vm0 = vcmp.eq.f32.partialorder %v2011_v54, 8.507059e+37  ;;  %v2014_v14 = vor.u32 1.1754944e-38, %v2013_v18  ;;  %v2896_v15 = vsel %vm2595_vm6, %v2680_v33, 0.0  ;;  %v3125_v38 = vsel %vm7262_vm13, %v3120_v49, %v3124_v17  ;;  %v1454_v54 = vpop.f32.mrf.mxu0  ;;  %10315 = vst [vmem:[#allocation7_spill] sm:$0xff] %v7687_v31  ;;  %6464 = vmatpush.bf16.msra.mxu2 %v6286_v16  ;;  %3757 = vmatpush.bf16.msrb.mxu0 %v6286_v16 }
 0x1a0   : > { %v2004_v11 = vsub.f32 1.0, %v2003_v25  ;;  %2688 = vst [vmem:[#allocation1 + $0x23] ss:$4 sm:$0xff] %v2504_v22  ;;  %v5815_v37 = vmul.f32 -1.442695, %v7657_v32  ;;  %v7679_v40 = vpack.c.bf16 %v2894_v55, %v2894_v55  ;;  %vm2008_vm3 = vweird.f32 %v6551_v27 }
 0x1a1   : > { %v5816_v42 = vmul.f32 -1.442695, %v7660_v60  ;;  %v3415_v24 = vunpack.c.l.b16 %v3115_v28  ;;  %v3416_v0 = vunpack.c.l.b16 %v3125_v38  ;;  %v2506_v33 = vrot.slane %v7647_v59, 6  ;;  %vm2009_vm4 = vmor %vm2007_vm2, %vm2008_vm3 }
 0x1a2   : > { %10314 = vst [vmem:[#allocation6_spill] sm:$0xff] %v7679_v40  ;;  %v7681_v2 = vld.sshfl [vmem:[#allocation1] sm:$0xff pattern:$0x73625140]  ;;  %v2005_v30 = vmul.f32 %v6551_v27, %v2004_v11  ;;  %6554 = vpow2.f32 %v5815_v37  ;;  %v1532_v51 = vmul.f32 %v7439_v19, %v1454_v54  ;;  %v3127_v63 = vshrl.u32 %v7679_v40, 16 }
 0x1a3   : > { %2691 = vst [vmem:[#allocation1] ss:$4 sm:$0xff] %v2505_v35  ;;  %v7689_v57 = vpack.c.b16 %v3416_v0, %v3415_v24  ;;  %6556 = vpow2.f32 %v5816_v42  ;;  %v3130_v10 = vshll.u32 %v7679_v40, 16  ;;  %v3136_v29 = vshll.u32 %v7687_v31, 16  ;;  %6465 = vmatpush.bf16.msra.mxu2 %v6285_v48  ;;  %3758 = vmatpush.bf16.msrb.mxu0 %v6285_v48 }
 0x1a4   : > { %v2006_v52 = vadd.f32 %v6551_v27, %v2005_v30  ;;  %v6553_v6 = vpop.eup %6552  ;;  %v7699_v36 = vadd.f32 %v7420_v41, %v1532_v51  ;;  %v3140_v18 = vshrl.u32 %v7687_v31, 16  ;;  %v2026_v55 = vand.u32 2147483647, %v7650_v45 }
 0x1a5   : > { %v2018_v20 = vmul.f32 %v6553_v6, %v7650_v45  ;;  %3547 = vmatmul.bf16.gmra.mxu1 %v7689_v57  ;;  %v3129_v59 = vrot.slane %v3127_v63, 4  ;;  %v7710_v25 = vpack.c.bf16 %v2896_v15, %v2896_v15  ;;  %v3132_v28 = vrot.slane %v3130_v10, 5  ;;  %v6284_v15 = vld [vmem:[%s10200_s4] sm:$0xff] }
 0x1a6   : > { %v2010_v47 = vsel %vm2009_vm4, %v6551_v27, %v2006_v52  ;;  %v5817_v17 = vmul.f32 -1.442695, %v7699_v36  ;;  %vm2023_vm5 = vweird.f32 %v6553_v6  ;;  %v2028_v27 = vand.u32 2147483648, %v7650_v45 }
 0x1a7   : > { %v2015_v23 = vsel %vm7666_vm0, %v2014_v14, %v2010_v47  ;;  %10316 = vst [vmem:[#allocation8_spill] sm:$0xff] %v7710_v25  ;;  %v2690_v22 = vld.sshfl [vmem:[#allocation1 + $0x20] sm:$0xff pattern:$0x73625140]  ;;  %v2019_v49 = vsub.f32 1.0, %v2018_v20  ;;  %v3133_v16 = vor.u32 %v3132_v28, %v3129_v59  ;;  %v3138_v44 = vrot.slane %v3136_v29, 5  ;;  %v1456_v0 = vpop.f32.mrf.mxu0  ;;  %6466 = vmatpush.bf16.msra.mxu2 %v6284_v15  ;;  %3759 = vmatpush.bf16.msrb.mxu0 %v6284_v15 }
 0x1a8   : > { %v2393_v35 = vmul.f32 %v2015_v23, %v7535_v62  ;;  %v6555_v11 = vpop.eup %6554  ;;  %2693 = vst [vmem:[#allocation1 + $0x20] ss:$4 sm:$0xff] %v2506_v33  ;;  %6558 = vpow2.f32 %v5817_v17  ;;  %v3142_v14 = vrot.slane %v3140_v18, 4  ;;  %v3146_v51 = vshll.u32 %v7710_v25, 16 }
 0x1a9   : > { %v6557_v38 = vpop.eup %6556  ;;  %v2020_v24 = vmul.f32 %v6553_v6, %v2019_v49  ;;  %v7719_v54 = vadd.f32 1.0, %v6555_v11  ;;  %vm2022_vm7 = vweird.f32 %v7650_v45  ;;  %vm7725_vm8 = vcmp.eq.f32.partialorder %v2026_v55, 8.507059e+37 }
 0x1aa   : > { %v7717_v37 = vld.sshfl [vmem:[#allocation1] sm:$0xff pattern:$0x73625140]  ;;  %v2507_v62 = vrot.slane %v2393_v35, 2  ;;  %v2508_v42 = vrot.slane %v2393_v35, 4  ;;  %v2509_v30 = vrot.slane %v2393_v35, 6  ;;  %vm2024_vm9 = vmor %vm2022_vm7, %vm2023_vm5  ;;  %v3143_v29 = vor.u32 %v3142_v14, %v3138_v44 }
 0x1ab   : > { %2694 = vst [vmem:[#allocation1 + $0x21] ss:$4 sm:$0xff] %v2393_v35  ;;  %v7721_v33 = vadd.f32 1.0, %v6557_v38  ;;  %v2021_v52 = vadd.f32 %v6553_v6, %v2020_v24  ;;  %v2897_v48 = vsel %vm2584_vm1, %v7681_v2, 0.0  ;;  %v2029_v10 = vor.u32 1.1754944e-38, %v2028_v27 }
 0x1ac   : > { %2695 = vst [vmem:[#allocation1 + $0x22] ss:$4 sm:$0xff] %v2507_v62  ;;  %6560 = vrcp.f32 %v7719_v54  ;;  %v1533_v18 = vmul.f32 %v7439_v19, %v1456_v0  ;;  %v3134_v47 = vrot.slane %v3133_v16, 4  ;;  %v7736_v20 = vpack.c.bf16 %v2690_v22, %v2690_v22 }
 0x1ad   : > { %2696 = vst [vmem:[#allocation1 + $0x23] ss:$4 sm:$0xff] %v2508_v42  ;;  %v2025_v45 = vsel %vm2024_vm9, %v6553_v6, %v2021_v52  ;;  %6562 = vrcp.f32 %v7721_v33  ;;  %v2043_v59 = vand.u32 2147483648, %v7719_v54  ;;  %v3148_v23 = vrot.slane %v3146_v51, 5 }
 0x1ae   : > { %2698 = vst [vmem:[#allocation1] ss:$4 sm:$0xff] %v2509_v30  ;;  %v6559_v55 = vpop.eup %6558  ;;  %v2030_v2 = vsel %vm7725_vm8, %v2029_v10, %v2025_v45  ;;  %v7741_v17 = vpack.c.bf16 %v2897_v48, %v2897_v48  ;;  %v2041_v35 = vand.u32 2147483647, %v7719_v54  ;;  %v2058_v6 = vand.u32 2147483648, %v7721_v33 }
 0x1af   : > { %10319 = vst [vmem:[#allocation9_spill] sm:$0xff] %v7736_v20  ;;  %v2394_v28 = vmul.f32 %v2030_v2, %v7592_v9  ;;  %v7746_v49 = vadd.f32 1.0, %v6559_v55  ;;  %v2056_v22 = vand.u32 2147483647, %v7721_v33  ;;  %v3139_v27 = vsel %vm7262_vm13, %v3134_v47, %v3138_v44  ;;  %v1459_v9 = vpop.f32.mrf.mxu0 }
 0x1b0   : > { %10320 = vst [vmem:[#allocation10_spill] sm:$0xff] %v7741_v17  ;;  %v3144_v11 = vrot.slane %v3143_v29, 4  ;;  %v7752_v16 = vadd.f32 %v7420_v41, %v1533_v18  ;;  %vm2037_vm10 = vweird.f32 %v7719_v54  ;;  %v2044_v42 = vor.u32 1.1754944e-38, %v2043_v59 }
 0x1b1   : > { %v2510_v14 = vrot.slane %v2394_v28, 2  ;;  %v2511_v15 = vrot.slane %v2394_v28, 4  ;;  %v2512_v38 = vrot.slane %v2394_v28, 6  ;;  %2699 = vst [vmem:[#allocation1 + $0x1] ss:$4 sm:$0xff] %v2394_v28  ;;  %6564 = vrcp.f32 %v7746_v49 }
 0x1b2   : > { %v6561_v62 = vpop.eup %6560  ;;  %vm2052_vm11 = vweird.f32 %v7721_v33  ;;  %v3149_v44 = vsel %vm7262_vm13, %v3144_v11, %v3148_v23  ;;  %vm7762_vm12 = vcmp.eq.f32.partialorder %v2041_v35, 8.507059e+37  ;;  %v2059_v52 = vor.u32 1.1754944e-38, %v2058_v6 }
 0x1b3   : > { %v6563_v30 = vpop.eup %6562  ;;  %2700 = vst [vmem:[#allocation1 + $0x2] ss:$4 sm:$0xff] %v2510_v14  ;;  %v2033_v0 = vmul.f32 %v6561_v62, %v7719_v54  ;;  %v3417_v63 = vunpack.c.l.b16 %v3139_v27  ;;  %v3418_v48 = vunpack.c.l.b16 %v3149_v44  ;;  %vm7767_vm14 = vcmp.eq.f32.partialorder %v2056_v22, 8.507059e+37 }
 0x1b4   : > { %v7759_v24 = vld.sshfl [vmem:[#allocation1 + $0x20] sm:$0xff pattern:$0x73625140]  ;;  %2701 = vst [vmem:[#allocation1 + $0x3] ss:$4 sm:$0xff] %v2511_v15  ;;  %v2048_v10 = vmul.f32 %v6563_v30, %v7721_v33  ;;  %v2073_v45 = vand.u32 2147483648, %v7746_v49  ;;  %v3652_v47 = vunpack.c.l.b16 %v7741_v17  ;;  %v3653_v23 = vunpack.c.l.b16 %v7736_v20 }
 0x1b5   : > { %v2071_v18 = vand.u32 2147483647, %v7746_v49  ;;  %2702 = vst [vmem:[#allocation1 + $0x20] ss:$4 sm:$0xff] %v2512_v38  ;;  %v2034_v55 = vsub.f32 1.0, %v2033_v0  ;;  %v7774_v2 = vpack.c.b16 %v3418_v48, %v3417_v63  ;;  %vm2038_vm15 = vweird.f32 %v6561_v62 }
 0x1b6   : > { %v5818_v59 = vmul.f32 -1.442695, %v7752_v16  ;;  %v2049_v28 = vsub.f32 1.0, %v2048_v10  ;;  %vm2067_vm2 = vweird.f32 %v7746_v49  ;;  %v1534_v35 = vmul.f32 %v7439_v19, %v1459_v9  ;;  %vm2039_vm3 = vmor %vm2037_vm10, %vm2038_vm15 }
 0x1b7   : > { %10325 = vst [vmem:[#allocation11_spill] sm:$0xff] %v7774_v2  ;;  %v3151_v6 = vshrl.u32 %v7741_v17, 16  ;;  %v6565_v22 = vpop.eup %6564  ;;  %v2035_v27 = vmul.f32 %v6561_v62, %v2034_v55  ;;  %vm2053_vm0 = vweird.f32 %v6563_v30  ;;  %3552 = vmatmul.bf16.gmra.mxu1 %v7774_v2  ;;  %v7782_v11 = vpack.c.b16 %v3653_v23, %v3652_v47  ;;  %v1461_v10 = vpop.f32.mrf.mxu0 }
 0x1b8   : > { %6566 = vpow2.f32 %v5818_v59  ;;  %v2050_v14 = vmul.f32 %v6563_v30, %v2049_v28  ;;  %v2063_v15 = vmul.f32 %v6565_v22, %v7746_v49  ;;  %v7786_v38 = vadd.f32 %v7420_v41, %v1534_v35  ;;  %vm2054_vm4 = vmor %vm2052_vm11, %vm2053_vm0 }
 0x1b9   : > { %v2899_v9 = vsel %vm2595_vm6, %v7717_v37, 0.0  ;;  %v2036_v44 = vadd.f32 %v6561_v62, %v2035_v27  ;;  %3790 = vmatmul.bf16.vlgmr.msra.gmra.mxu2 %v7782_v11  ;;  %v3153_v0 = vrot.slane %v3151_v6, 4  ;;  %v3154_v63 = vshll.u32 %v7741_v17, 16 }
 0x1ba   : > { %v3160_v48 = vshll.u32 %v7736_v20, 16  ;;  %v2051_v47 = vadd.f32 %v6563_v30, %v2050_v14  ;;  %v2064_v55 = vsub.f32 1.0, %v2063_v15  ;;  %v5819_v59 = vmul.f32 -1.442695, %v7786_v38 }
 0x1bb   : > { %v3164_v23 = vshrl.u32 %v7736_v20, 16  ;;  %v2040_v37 = vsel %vm2039_vm3, %v6561_v62, %v2036_v44  ;;  %vm2068_vm5 = vweird.f32 %v6565_v22  ;;  %v7802_v28 = vpack.c.bf16 %v2899_v9, %v2899_v9  ;;  %v2703_v14 = vld.sshfl [vmem:[#allocation1] sm:$0xff pattern:$0x73625140] }
 0x1bc   : > { %v3156_v35 = vrot.slane %v3154_v63, 5  ;;  %v2045_v6 = vsel %vm7762_vm12, %v2044_v42, %v2040_v37  ;;  %v2055_v54 = vsel %vm2054_vm4, %v6563_v30, %v2051_v47  ;;  %v2065_v27 = vmul.f32 %v6565_v22, %v2064_v55  ;;  %v7809_v17 = vld.sshfl [vmem:[#allocation1 + $0x20] sm:$0xff pattern:$0x73625140]  ;;  %vm2069_vm7 = vmor %vm2067_vm2, %vm2068_vm5 }
 0x1bd   : > { %10326 = vst [vmem:[#allocation12_spill] sm:$0xff] %v7802_v28  ;;  %6568 = vpow2.f32 %v5819_v59  ;;  %v2395_v58 = vmul.f32 %v2045_v6, %v7657_v32  ;;  %v2060_v62 = vsel %vm7767_vm14, %v2059_v52, %v2055_v54  ;;  %v3162_v33 = vrot.slane %v3160_v48, 5 }
 0x1be   : > { %v6567_v15 = vpop.eup %6566  ;;  %v3157_v44 = vor.u32 %v3156_v35, %v3153_v0  ;;  %v2396_v9 = vmul.f32 %v2060_v62, %v7660_v60  ;;  %v2066_v63 = vadd.f32 %v6565_v22, %v2065_v27  ;;  %v3166_v42 = vrot.slane %v3164_v23, 4 }
 0x1bf   : > { %v7812_v20 = vadd.f32 1.0, %v6567_v15  ;;  %v2513_v30 = vrot.slane %v2395_v58, 2  ;;  %vm2072_vm8 = vcmp.eq.f32.partialorder %v2071_v18, 8.507059e+37  ;;  %v2074_v32 = vor.u32 1.1754944e-38, %v2073_v45  ;;  %2705 = vst [vmem:[#allocation1] ss:$4 sm:$0xff] %v2395_v58  ;;  %v1464_v59 = vpop.f32.mrf.mxu0 }
 0x1c0   : > { %v3158_v51 = vrot.slane %v3157_v44, 4  ;;  %v2516_v52 = vrot.slane %v2396_v9, 2  ;;  %v2517_v29 = vrot.slane %v2396_v9, 4  ;;  %v2518_v0 = vrot.slane %v2396_v9, 6  ;;  %2709 = vst [vmem:[#allocation1 + $0x20] ss:$4 sm:$0xff] %v2396_v9 }
 0x1c1   : > { %v2070_v48 = vsel %vm2069_vm7, %v6565_v22, %v2066_v63  ;;  %v2514_v47 = vrot.slane %v2395_v58, 4  ;;  %6570 = vrcp.f32 %v7812_v20  ;;  %v3170_v55 = vshll.u32 %v7802_v28, 16  ;;  %2706 = vst [vmem:[#allocation1 + $0x1] ss:$4 sm:$0xff] %v2513_v30 }
 0x1c2   : > { %v2075_v60 = vsel %vm2072_vm8, %v2074_v32, %v2070_v48  ;;  %v2515_v49 = vrot.slane %v2395_v58, 6  ;;  %2710 = vst [vmem:[#allocation1 + $0x21] ss:$4 sm:$0xff] %v2516_v52  ;;  %v3163_v45 = vsel %vm7262_vm13, %v3158_v51, %v3162_v33  ;;  %v3167_v37 = vor.u32 %v3166_v42, %v3162_v33 }
 0x1c3   : > { %v6569_v23 = vpop.eup %6568  ;;  %v7820_v18 = vmul.f32 %v2075_v60, %v7699_v36  ;;  %2711 = vst [vmem:[#allocation1 + $0x22] ss:$4 sm:$0xff] %v2517_v29  ;;  %v1535_v35 = vmul.f32 %v7439_v19, %v1461_v10  ;;  %v2086_v6 = vand.u32 2147483647, %v7812_v20  ;;  %v2088_v54 = vand.u32 2147483648, %v7812_v20 }
 0x1c4   : > { %v7824_v22 = vadd.f32 1.0, %v6569_v23  ;;  %2712 = vst [vmem:[#allocation1 + $0x23] ss:$4 sm:$0xff] %v2518_v0  ;;  %v3172_v36 = vrot.slane %v3170_v55, 5  ;;  %v3419_v27 = vunpack.c.l.b16 %v3163_v45  ;;  %vm2082_vm9 = vweird.f32 %v7812_v20 }
 0x1c5   : > { %v2519_v58 = vrot.slane %v7820_v18, 2  ;;  %2707 = vst [vmem:[#allocation1 + $0x2] ss:$4 sm:$0xff] %v2514_v47  ;;  %v3168_v15 = vrot.slane %v3167_v37, 4  ;;  %v7833_v62 = vadd.f32 %v7420_v41, %v1535_v35  ;;  %v2900_v10 = vsel %vm2584_vm1, %v7759_v24, 0.0 }
 0x1c6   : > { %6572 = vrcp.f32 %v7824_v22  ;;  %v7838_v44 = vpack.c.bf16 %v2703_v14, %v2703_v14  ;;  %2708 = vst [vmem:[#allocation1 + $0x3] ss:$4 sm:$0xff] %v2515_v49  ;;  %v2520_v9 = vrot.slane %v7820_v18, 4  ;;  %v2521_v63 = vrot.slane %v7820_v18, 6 }
 0x1c7   : > { %v6571_v33 = vpop.eup %6570  ;;  %v7842_v42 = vpack.c.bf16 %v2900_v10, %v2900_v10  ;;  %v1536_v30 = vmul.f32 %v7439_v19, %v1464_v59  ;;  %vm7846_vm10 = vcmp.eq.f32.partialorder %v2086_v6, 8.507059e+37  ;;  %v2089_v52 = vor.u32 1.1754944e-38, %v2088_v54  ;;  %v1466_v60 = vpop.f32.mrf.mxu0 }
 0x1c8   : > { %10327 = vst [vmem:[#allocation13_spill] sm:$0xff] %v7838_v44  ;;  %v2078_v32 = vmul.f32 %v6571_v33, %v7812_v20  ;;  %v3173_v24 = vsel %vm7262_vm13, %v3168_v15, %v3172_v36  ;;  %v5820_v14 = vmul.f32 -1.442695, %v7833_v62  ;;  %v3655_v48 = vunpack.c.l.b16 %v7838_v44 }
 0x1c9   : > { %10328 = vst [vmem:[#allocation14_spill] sm:$0xff] %v7842_v42  ;;  %v3420_v29 = vunpack.c.l.b16 %v3173_v24  ;;  %v3654_v0 = vunpack.c.l.b16 %v7842_v42  ;;  %v7856_v47 = vadd.f32 %v7420_v41, %v1536_v30  ;;  %v2101_v59 = vand.u32 2147483647, %v7824_v22 }
 0x1ca   : > { %v2079_v55 = vsub.f32 1.0, %v2078_v32  ;;  %6574 = vpow2.f32 %v5820_v14  ;;  %v3175_v23 = vshrl.u32 %v7842_v42, 16  ;;  %vm2083_vm11 = vweird.f32 %v6571_v33 }
 0x1cb   : > { %v7860_v45 = vld.sshfl [vmem:[#allocation1 + $0x20] sm:$0xff pattern:$0x73625140]  ;;  %v7862_v37 = vpack.c.b16 %v3420_v29, %v3419_v27  ;;  %v7864_v35 = vpack.c.b16 %v3655_v48, %v3654_v0  ;;  %v5821_v6 = vmul.f32 -1.442695, %v7856_v47  ;;  %v2902_v36 = vsel %vm2595_vm6, %v7809_v17, 0.0  ;;  %vm2084_vm12 = vmor %vm2082_vm9, %vm2083_vm11 }
 0x1cc   : > { %v6573_v49 = vpop.eup %6572  ;;  %2717 = vst [vmem:[#allocation1 + $0x20] ss:$4 sm:$0xff] %v2519_v58  ;;  %v2080_v41 = vmul.f32 %v6571_v33, %v2079_v55  ;;  %v3177_v15 = vrot.slane %v3175_v23, 4  ;;  %v3178_v27 = vshll.u32 %v7842_v42, 16  ;;  %v3184_v10 = vshll.u32 %v7838_v44, 16 }
 0x1cd   : > { %10331 = vst [vmem:[#allocation15_spill] sm:$0xff] %v7862_v37  ;;  %v2093_v54 = vmul.f32 %v6573_v49, %v7824_v22  ;;  %3557 = vmatmul.bf16.gmra.mxu1 %v7862_v37  ;;  %3795 = vmatmul.bf16.gmra.mxu2 %v7864_v35  ;;  %6576 = vpow2.f32 %v5821_v6  ;;  %v3188_v58 = vshrl.u32 %v7838_v44, 16  ;;  %v2103_v24 = vand.u32 2147483648, %v7824_v22  ;;  %v2713_v48 = vld.sshfl [vmem:[#allocation1] sm:$0xff pattern:$0x73625140] }
 0x1ce   : > { %2718 = vst [vmem:[#allocation1 + $0x21] ss:$4 sm:$0xff] %v2520_v9  ;;  %v2081_v30 = vadd.f32 %v6571_v33, %v2080_v41  ;;  %v1537_v17 = vmul.f32 %v7439_v19, %v1466_v60  ;;  %v7881_v9 = vpack.c.bf16 %v2902_v36, %v2902_v36  ;;  %v3180_v14 = vrot.slane %v3178_v27, 5 }
 0x1cf   : > { %2719 = vst [vmem:[#allocation1 + $0x22] ss:$4 sm:$0xff] %v2521_v63  ;;  %v2094_v32 = vsub.f32 1.0, %v2093_v54  ;;  %v3186_v29 = vrot.slane %v3184_v10, 5  ;;  %v3190_v0 = vrot.slane %v3188_v58, 4  ;;  %vm2098_vm14 = vweird.f32 %v6573_v49  ;;  %v1469_v41 = vpop.f32.mrf.mxu0 }
 0x1d0   : > { %10332 = vst [vmem:[#allocation16_spill] sm:$0xff] %v7881_v9  ;;  %v6575_v55 = vpop.eup %6574  ;;  %v2085_v23 = vsel %vm2084_vm12, %v6571_v33, %v2081_v30  ;;  %v7886_v63 = vld [vmem:[%s10199_s3] ss:$0 sm:$0xff]  ;;  %vm2097_vm15 = vweird.f32 %v7824_v22  ;;  %v3181_v33 = vor.u32 %v3180_v14, %v3177_v15  ;;  %vm2102_vm0 = vcmp.eq.f32.partialorder %v2101_v59, 8.507059e+37 }
 0x1d1   : > { %v2095_v6 = vmul.f32 %v6573_v49, %v2094_v32  ;;  %v7889_v19 = vadd.f32 %v7886_v63, %v1537_v17  ;;  %2715 = vst [vmem:[#allocation1] ss:$4 sm:$0xff] %v7820_v18  ;;  %v2090_v20 = vsel %vm7846_vm10, %v2089_v52, %v2085_v23  ;;  %v7895_v60 = vadd.f32 1.0, %v6575_v55  ;;  %vm2099_vm2 = vmor %vm2097_vm15, %vm2098_vm14 }
 0x1d2   : > { %v2398_v54 = vmul.f32 %v2090_v20, %v7752_v16  ;;  %v3191_v27 = vor.u32 %v3190_v0, %v3186_v29  ;;  %v2104_v30 = vor.u32 1.1754944e-38, %v2103_v24  ;;  %v3194_v18 = vshll.u32 %v7881_v9, 16 }
 0x1d3   : > { %v2096_v36 = vadd.f32 %v6573_v49, %v2095_v6  ;;  %v5822_v10 = vmul.f32 -1.442695, %v7889_v19  ;;  %v6577_v58 = vpop.eup %6576  ;;  %6578 = vrcp.f32 %v7895_v60  ;;  %v2116_v52 = vand.u32 2147483647, %v7895_v60 }
 0x1d4   : > { %v2522_v51 = vrot.slane %v2398_v54, 2  ;;  %2720 = vst [vmem:[#allocation1 + $0x23] ss:$4 sm:$0xff] %v2398_v54  ;;  %v2118_v15 = vand.u32 2147483648, %v7895_v60  ;;  %v2523_v16 = vrot.slane %v2398_v54, 4  ;;  %v2524_v32 = vrot.slane %v2398_v54, 6 }
 0x1d5   : > { %v2100_v22 = vsel %vm2099_vm2, %v6573_v49, %v2096_v36  ;;  %v7903_v14 = vadd.f32 1.0, %v6577_v58  ;;  %v3182_v59 = vrot.slane %v3181_v33, 4  ;;  %v3192_v24 = vrot.slane %v3191_v27, 4 }
 0x1d6   : > { %v2105_v17 = vsel %vm2102_vm0, %v2104_v30, %v2100_v22  ;;  %6580 = vpow2.f32 %v5822_v10  ;;  %v3196_v55 = vrot.slane %v3194_v18, 5  ;;  %v2903_v49 = vsel %vm2584_vm1, %v2713_v48, 0.0  ;;  %v7935_v18 = vpop.f32.mrf.mxu1  ;;  %v6315_v22 = vld [vmem:[%s10200_s4 + $0xf8] sm:$0xff] }
 0x1d7   : > { %v7906_v0 = vmul.f32 %v2105_v17, %v7786_v38  ;;  %6582 = vrcp.f32 %v7903_v14  ;;  %v7913_v23 = vpack.c.bf16 %v7860_v45, %v7860_v45  ;;  %vm2112_vm3 = vweird.f32 %v7895_v60  ;;  %v7927_v27 = vpop.f32.mrf.mxu0  ;;  %10336 = vst [vmem:[#allocation18_spill] sm:$0xff] %v7935_v18  ;;  %4293 = vmatpush.bf16.msrb.mxu1 %v6315_v22 }
 0x1d8   : > { %v2716_v6 = vld.sshfl [vmem:[#allocation1] sm:$0xff pattern:$0x73625140]  ;;  %v3187_v38 = vsel %vm7262_vm13, %v3182_v59, %v3186_v29  ;;  %v7921_v54 = vor.u32 1.1754944e-38, %v2118_v15  ;;  %v2133_v48 = vand.u32 2147483648, %v7903_v14  ;;  %v3197_v45 = vsel %vm7262_vm13, %v3192_v24, %v3196_v55 }
 0x1d9   : > { %10333 = vst [vmem:[#allocation17_spill] sm:$0xff] %v7913_v23  ;;  %v2525_v20 = vrot.slane %v7906_v0, 2  ;;  %v7919_v33 = vpop.eup %6578  ;;  %vm7931_vm4 = vcmp.eq.f32.partialorder %v2116_v52, 8.507059e+37  ;;  %v3421_v58 = vunpack.c.l.b16 %v3187_v38  ;;  %v3422_v30 = vunpack.c.l.b16 %v3197_v45  ;;  %v7948_v52 = vld [vmem:[%s10198_s2] ss:$0 sm:$0xff] }
 0x1da   : > { %2722 = vst [vmem:[#allocation1] ss:$4 sm:$0xff] %v2522_v51  ;;  %v2108_v10 = vmul.f32 %v7919_v33, %v7895_v60  ;;  %v7937_v51 = vpack.c.bf16 %v2903_v49, %v2903_v49  ;;  %v1538_v17 = vmul.f32 %v7948_v52, %v1469_v41  ;;  %v2905_v59 = vsel %vm2595_vm6, %v2716_v6, 0.0 }
 0x1db   : > { %2723 = vst [vmem:[#allocation1 + $0x1] ss:$4 sm:$0xff] %v2523_v16  ;;  %v7942_v15 = vld.sshfl [vmem:[#allocation1 + $0x20] sm:$0xff pattern:$0x73625140]  ;;  %v3657_v16 = vunpack.c.l.b16 %v7913_v23  ;;  %vm2127_vm5 = vweird.f32 %v7903_v14  ;;  %v10210_v38 = vmov 0.0|0.0   ;;  %vm2113_vm7 = vweird.f32 %v7919_v33 }
 0x1dc   : > { %10337 = vst [vmem:[#allocation19_spill] sm:$0xff] %v7937_v51  ;;  %v6581_v24 = vpop.eup %6580  ;;  %v2109_v55 = vsub.f32 1.0, %v2108_v10  ;;  %v3656_v49 = vunpack.c.l.b16 %v7937_v51  ;;  %v3640_v45 = vunpack.c.l.b16 %v10210_v38  ;;  %v2526_v41 = vrot.slane %v7906_v0, 4  ;;  %vm2114_vm8 = vmor %vm2112_vm3, %vm2113_vm7 }
 0x1dd   : > { %2724 = vst [vmem:[#allocation1 + $0x2] ss:$4 sm:$0xff] %v2524_v32  ;;  %v7954_v32 = vpack.c.b16 %v3422_v30, %v3421_v58  ;;  %v7958_v36 = vpop.eup %6582  ;;  %v7961_v18 = vadd.f32 1.0, %v6581_v24  ;;  %v7964_v6 = vadd.f32 %v7886_v63, %v1538_v17  ;;  %v6323_v30 = vld [vmem:[%s10200_s4 + $0x138] sm:$0xff]  ;;  %v6314_v17 = vld [vmem:[%s10200_s4 + $0xf0] sm:$0xff]  ;;  %v2527_v24 = vrot.slane %v7906_v0, 6 }
 0x1de   : > { %2726 = vst [vmem:[#allocation1 + $0x20] ss:$4 sm:$0xff] %v2525_v20  ;;  %v3199_v20 = vshrl.u32 %v7937_v51, 16  ;;  %v2110_v10 = vmul.f32 %v7919_v33, %v2109_v55  ;;  %v2123_v58 = vmul.f32 %v7958_v36, %v7903_v14  ;;  %v7976_v22 = vpack.c.b16 %v3657_v16, %v3656_v49  ;;  %4507 = vmatpush.bf16.msrb.mxu2 %v6323_v30 }
 0x1df   : > { %10338 = vst [vmem:[#allocation20_spill] sm:$0xff] %v7954_v32  ;;  %3562 = vmatmul.bf16.gmra.mxu1 %v7954_v32  ;;  %v2134_v55 = vor.u32 1.1754944e-38, %v2133_v48  ;;  %6584 = vrcp.f32 %v7961_v18  ;;  %v7983_v38 = vpack.c.bf16 %v2905_v59, %v2905_v59  ;;  %v5823_v44 = vmul.f32 -1.442695, %v7964_v6  ;;  %v1474_v60 = vpop.f32.mrf.mxu0 }
 0x1e0   : > { %2725 = vst [vmem:[#allocation1 + $0x3] ss:$4 sm:$0xff] %v7906_v0  ;;  %v2111_v42 = vadd.f32 %v7919_v33, %v2110_v10  ;;  %v2124_v9 = vsub.f32 1.0, %v2123_v58  ;;  %v7987_v28 = vpack.c.b16 %v3640_v45, %v3640_v45  ;;  %4294 = vmatpush.bf16.msrb.mxu1 %v6314_v17  ;;  %vm2128_vm9 = vweird.f32 %v7958_v36  ;;  %3800 = vmatmul.bf16.gmra.mxu2 %v7976_v22  ;;  %v6313_v10 = vld [vmem:[%s10200_s4 + $0xe8] sm:$0xff] }
 0x1e1   : > { %10339 = vst [vmem:[#allocation21_spill] sm:$0xff] %v7983_v38  ;;  %v3201_v48 = vrot.slane %v3199_v20, 4  ;;  %v3202_v16 = vshll.u32 %v7937_v51, 16  ;;  %6586 = vpow2.f32 %v5823_v44  ;;  %v3208_v45 = vshll.u32 %v7913_v23, 16  ;;  %vm2129_vm10 = vmor %vm2127_vm5, %vm2128_vm9 }
 0x1e2   : > { %10340 = vst [vmem:[#allocation22_spill] sm:$0xff] %v7987_v28  ;;  %v2115_v59 = vsel %vm2114_vm8, %v7919_v33, %v2111_v42  ;;  %v2125_v49 = vmul.f32 %v7958_v36, %v2124_v9  ;;  %3760 = vmatmul.bf16.vlgmr.msrb.gmra.mxu0 %v7987_v28  ;;  %v3212_v30 = vshrl.u32 %v7913_v23, 16  ;;  %v3218_v42 = vshll.u32 %v7983_v38, 16  ;;  %v8011_v33 = vpop.f32.mrf.mxu1 }
 0x1e3   : > { %v2120_v20 = vsel %vm7931_vm4, %v7921_v54, %v2115_v59  ;;  %v3204_v58 = vrot.slane %v3202_v16, 5  ;;  %10341 = vst [vmem:[#allocation23_spill] sm:$0xff] %v8011_v33  ;;  %v3210_v17 = vrot.slane %v3208_v45, 5  ;;  %v1539_v0 = vmul.f32 %v7948_v52, %v7927_v27 }
 0x1e4   : > { %v2400_v44 = vmul.f32 %v2120_v20, %v7833_v62  ;;  %v2126_v9 = vadd.f32 %v7958_v36, %v2125_v49  ;;  %4295 = vmatpush.bf16.msrb.mxu1 %v6313_v10  ;;  %v3214_v29 = vrot.slane %v3212_v30, 4  ;;  %v1540_v16 = vmul.f32 %v7948_v52, %v1474_v60  ;;  %v6312_v20 = vld [vmem:[%s10200_s4 + $0xe0] sm:$0xff] }
 0x1e5   : > { %v8015_v51 = vpop.eup %6584  ;;  %v8017_v54 = vld.sshfl [vmem:[#allocation1 + $0x20] sm:$0xff pattern:$0x73625140]  ;;  %v3205_v62 = vor.u32 %v3204_v58, %v3201_v48  ;;  %v3642_v59 = vunpack.c.l.b16 %v7309_v56  ;;  %v10342_v10 = vand.u32 2147483647, %v7903_v14  ;;  %vm2142_vm14 = vweird.f32 %v7961_v18 }
 0x1e6   : > { %v2529_v49 = vrot.slane %v2400_v44, 4  ;;  %v2530_v27 = vrot.slane %v2400_v44, 6  ;;  %v2130_v45 = vsel %vm2129_vm10, %v7958_v36, %v2126_v9  ;;  %v2528_v33 = vrot.slane %v2400_v44, 2 }
 0x1e7   : > { %v2727_v28 = vld.sshfl [vmem:[#allocation1] sm:$0xff pattern:$0x73625140]  ;;  %vm2132_vm11 = vcmp.eq.f32.partialorder %v10342_v10, 8.507059e+37  ;;  %v2138_v60 = vmul.f32 %v8015_v51, %v7961_v18  ;;  %v6587_v58 = vpop.eup %6586  ;;  %v3206_v36 = vrot.slane %v3205_v62, 4  ;;  %v3215_v14 = vor.u32 %v3214_v29, %v3210_v17 }
 0x1e8   : > { %2729 = vst [vmem:[#allocation1] ss:$4 sm:$0xff] %v2526_v41  ;;  %v2135_v48 = vsel %vm2132_vm11, %v2134_v55, %v2130_v45  ;;  %v3220_v41 = vrot.slane %v3218_v42, 5  ;;  %v8039_v10 = vadd.f32 1.0, %v6587_v58  ;;  %v8042_v55 = vadd.f32 %v7886_v63, %v1540_v16  ;;  %4296 = vmatpush.bf16.msrb.mxu1 %v6312_v20  ;;  %v6322_v16 = vld [vmem:[%s10200_s4 + $0x130] sm:$0xff] }
 0x1e9   : > { %2730 = vst [vmem:[#allocation1 + $0x1] ss:$4 sm:$0xff] %v2527_v24  ;;  %v8034_v30 = vmul.f32 %v2135_v48, %v7856_v47  ;;  %v8037_v24 = vadd.f32 %v7886_v63, %v1539_v0  ;;  %v2139_v9 = vsub.f32 1.0, %v2138_v60  ;;  %v3643_v42 = vunpack.c.l.b16 %v7333_v21  ;;  %4508 = vmatpush.bf16.msrb.mxu2 %v6322_v16 }
 0x1ea   : > { %2731 = vst [vmem:[#allocation1 + $0x2] ss:$4 sm:$0xff] %v2400_v44  ;;  %v2148_v47 = vand.u32 2147483648, %v7961_v18  ;;  %v3211_v0 = vsel %vm7262_vm13, %v3206_v36, %v3210_v17  ;;  %v3216_v62 = vrot.slane %v3215_v14, 4  ;;  %vm2143_vm12 = vweird.f32 %v8015_v51  ;;  %v6311_v17 = vld [vmem:[%s10200_s4 + $0xd8] sm:$0xff] }
 0x1eb   : > { %2733 = vst [vmem:[#allocation1 + $0x20] ss:$4 sm:$0xff] %v2529_v49  ;;  %v2531_v44 = vrot.slane %v8034_v30, 2  ;;  %v2140_v29 = vmul.f32 %v8015_v51, %v2139_v9  ;;  %6588 = vrcp.f32 %v8039_v10  ;;  %v2906_v49 = vsel %vm2584_vm1, %v7942_v15, 0.0  ;;  %v1476_v15 = vpop.f32.mrf.mxu0  ;;  %vm2144_vm2 = vmor %vm2142_vm14, %vm2143_vm12 }
 0x1ec   : > { %2734 = vst [vmem:[#allocation1 + $0x21] ss:$4 sm:$0xff] %v2530_v27  ;;  %v10343_v27 = vand.u32 2147483647, %v7961_v18  ;;  %v3221_v20 = vsel %vm7262_vm13, %v3216_v62, %v3220_v41  ;;  %v5824_v48 = vmul.f32 -1.442695, %v8037_v24  ;;  %v3423_v60 = vunpack.c.l.b16 %v3211_v0  ;;  %4297 = vmatpush.bf16.msrb.mxu1 %v6311_v17  ;;  %v8076_v14 = vpop.f32.mrf.mxu1 }
 0x1ed   : > { %2735 = vst [vmem:[#allocation1 + $0x22] ss:$4 sm:$0xff] %v8034_v30  ;;  %v3424_v58 = vunpack.c.l.b16 %v3221_v20  ;;  %v5825_v36 = vmul.f32 -1.442695, %v8042_v55  ;;  %v2149_v18 = vor.u32 1.1754944e-38, %v2148_v47  ;;  %v8078_v9 = vpack.c.bf16 %v2906_v49, %v2906_v49 }
 0x1ee   : > { %2732 = vst [vmem:[#allocation1 + $0x3] ss:$4 sm:$0xff] %v2528_v33  ;;  %vm8065_vm15 = vcmp.eq.f32.partialorder %v10343_v27, 8.507059e+37  ;;  %v2141_v33 = vadd.f32 %v8015_v51, %v2140_v29  ;;  %6590 = vpow2.f32 %v5824_v48  ;;  %v8080_v41 = vpack.c.bf16 %v2727_v28, %v2727_v28 }
 0x1ef   : > { %2736 = vst [vmem:[#allocation1 + $0x23] ss:$4 sm:$0xff] %v2531_v44  ;;  %v6310_v44 = vld [vmem:[%s10200_s4 + $0xd0] sm:$0xff]  ;;  %v8086_v62 = vpack.c.b16 %v3424_v58, %v3423_v60  ;;  %6592 = vpow2.f32 %v5825_v36  ;;  %v1541_v29 = vmul.f32 %v7948_v52, %v1476_v15  ;;  %v3658_v16 = vunpack.c.l.b16 %v8078_v9 }
 0x1f0   : > { %10346 = vst [vmem:[#allocation24_spill] sm:$0xff] %v8076_v14  ;;  %v2145_v0 = vsel %vm2144_vm2, %v8015_v51, %v2141_v33  ;;  %v3659_v49 = vunpack.c.l.b16 %v8080_v41  ;;  %v8093_v28 = vpack.c.b16 %v3643_v42, %v3642_v59  ;;  %v2533_v27 = vrot.slane %v8034_v30, 6  ;;  %4298 = vmatpush.bf16.msrb.mxu1 %v6310_v44 }
 0x1f1   : > { %10347 = vst [vmem:[#allocation25_spill] sm:$0xff] %v8078_v9  ;;  %v2150_v47 = vsel %vm8065_vm15, %v2149_v18, %v2145_v0  ;;  %v6589_v17 = vpop.eup %6588  ;;  %3567 = vmatmul.bf16.gmra.mxu1 %v8086_v62  ;;  %v8101_v51 = vadd.f32 %v7886_v63, %v1541_v29  ;;  %v2161_v48 = vand.u32 2147483647, %v8039_v10  ;;  %v3223_v59 = vshrl.u32 %v8078_v9, 16 }
 0x1f2   : > { %10348 = vst [vmem:[#allocation26_spill] sm:$0xff] %v8080_v41  ;;  %v8097_v20 = vmul.f32 %v2150_v47, %v7889_v19  ;;  %v2153_v45 = vmul.f32 %v6589_v17, %v8039_v10  ;;  %v8105_v15 = vpack.c.b16 %v3659_v49, %v3658_v16  ;;  %3765 = vmatmul.bf16.gmra.mxu0 %v8093_v28  ;;  %v3226_v60 = vshll.u32 %v8078_v9, 16 }
 0x1f3   : > { %10349 = vst [vmem:[#allocation27_spill] sm:$0xff] %v8086_v62  ;;  %v5826_v18 = vmul.f32 -1.442695, %v8101_v51  ;;  %v2908_v0 = vsel %vm2595_vm6, %v8017_v54, 0.0  ;;  %vm2158_vm0 = vweird.f32 %v6589_v17  ;;  %v2163_v29 = vand.u32 2147483648, %v8039_v10  ;;  %v1479_v14 = vpop.f32.mrf.mxu0 }
 0x1f4   : > { %v2534_v19 = vrot.slane %v8097_v20, 2  ;;  %v2535_v33 = vrot.slane %v8097_v20, 4  ;;  %v6591_v58 = vpop.eup %6590  ;;  %v2154_v36 = vsub.f32 1.0, %v2153_v45  ;;  %3805 = vmatmul.bf16.gmra.mxu2 %v8105_v15  ;;  %v3232_v16 = vshll.u32 %v8080_v41, 16 }
 0x1f5   : > { %v6593_v44 = vpop.eup %6592  ;;  %v8121_v47 = vadd.f32 1.0, %v6591_v58  ;;  %6594 = vpow2.f32 %v5826_v18  ;;  %v3236_v45 = vshrl.u32 %v8080_v41, 16  ;;  %v8128_v54 = vpack.c.bf16 %v2908_v0, %v2908_v0  ;;  %v8131_v58 = vpop.f32.mrf.mxu1 }
 0x1f6   : > { %v8109_v42 = vld.sshfl [vmem:[#allocation1 + $0x20] sm:$0xff pattern:$0x73625140]  ;;  %v2155_v49 = vmul.f32 %v6589_v17, %v2154_v36  ;;  %v3225_v9 = vrot.slane %v3223_v59, 4  ;;  %v3228_v38 = vrot.slane %v3226_v60, 5  ;;  %vm2157_vm3 = vweird.f32 %v8039_v10  ;;  %10351 = vst [vmem:[#allocation29_spill] sm:$0xff] %v8131_v58 }
 0x1f7   : > { %2741 = vst [vmem:[#allocation1 + $0x20] ss:$4 sm:$0xff] %v2533_v27  ;;  %v8124_v27 = vadd.f32 1.0, %v6593_v44  ;;  %6596 = vrcp.f32 %v8121_v47  ;;  %vm2159_vm4 = vmor %vm2157_vm3, %vm2158_vm0  ;;  %v1542_v36 = vmul.f32 %v7948_v52, %v1479_v14  ;;  %vm2162_vm5 = vcmp.eq.f32.partialorder %v2161_v48, 8.507059e+37 }
 0x1f8   : > { %2742 = vst [vmem:[#allocation1 + $0x21] ss:$4 sm:$0xff] %v8097_v20  ;;  %v2156_v23 = vadd.f32 %v6589_v17, %v2155_v49  ;;  %v3234_v0 = vrot.slane %v3232_v16, 5  ;;  %v3238_v44 = vrot.slane %v3236_v45, 4  ;;  %v3229_v60 = vor.u32 %v3228_v38, %v3225_v9 }
 0x1f9   : > { %2743 = vst [vmem:[#allocation1 + $0x22] ss:$4 sm:$0xff] %v2534_v19  ;;  %6598 = vrcp.f32 %v8124_v27  ;;  %v2164_v19 = vor.u32 1.1754944e-38, %v2163_v29  ;;  %v3242_v49 = vshll.u32 %v8128_v54, 16  ;;  %v2532_v58 = vrot.slane %v8034_v30, 4 }
 0x1fa   : > { %2744 = vst [vmem:[#allocation1 + $0x23] ss:$4 sm:$0xff] %v2535_v33  ;;  %v3645_v33 = vunpack.c.l.b16 %v7391_v53  ;;  %v2160_v18 = vsel %vm2159_vm4, %v6589_v17, %v2156_v23  ;;  %v3644_v29 = vunpack.c.l.b16 %v7379_v26  ;;  %v3239_v17 = vor.u32 %v3238_v44, %v3234_v0 }
 0x1fb   : > { %10350 = vst [vmem:[#allocation28_spill] sm:$0xff] %v8128_v54  ;;  %v2165_v59 = vsel %vm2162_vm5, %v2164_v19, %v2160_v18  ;;  %v6595_v10 = vpop.eup %6594  ;;  %v8149_v48 = vadd.f32 %v7886_v63, %v1542_v36  ;;  %v2176_v16 = vand.u32 2147483647, %v8121_v47  ;;  %v3230_v18 = vrot.slane %v3229_v60, 4  ;;  %v1481_v54 = vpop.f32.mrf.mxu0  ;;  %v6321_v60 = vld [vmem:[%s10200_s4 + $0x128] sm:$0xff] }
 0x1fc   : > { %v8140_v41 = vmul.f32 %v2165_v59, %v7964_v6  ;;  %v8146_v23 = vadd.f32 1.0, %v6595_v10  ;;  %v8157_v45 = vpack.c.b16 %v3645_v33, %v3644_v29  ;;  %v3244_v44 = vrot.slane %v3242_v49, 5  ;;  %v6309_v49 = vld [vmem:[%s10200_s4 + $0xc8] sm:$0xff]  ;;  %4509 = vmatpush.bf16.msrb.mxu2 %v6321_v60 }
 0x1fd   : > { %v8143_v62 = vpop.eup %6596  ;;  %vm2172_vm7 = vweird.f32 %v8121_v47  ;;  %v2178_v59 = vand.u32 2147483648, %v8121_v47  ;;  %v2193_v10 = vand.u32 2147483648, %v8124_v27  ;;  %v3235_v33 = vsel %vm7262_vm13, %v3230_v18, %v3234_v0  ;;  %4299 = vmatpush.bf16.msrb.mxu1 %v6309_v49 }
 0x1fe   : > { %v2539_v30 = vrot.slane %v8140_v41, 6  ;;  %v2168_v6 = vmul.f32 %v8143_v62, %v8121_v47  ;;  %6600 = vrcp.f32 %v8146_v23  ;;  %v8164_v14 = vpop.f32.mrf.mxu1  ;;  %v3240_v29 = vrot.slane %v3239_v17, 4 }
 0x1ff   : > { %v6599_v38 = vpop.eup %6598  ;;  %10352 = vst [vmem:[#allocation30_spill] sm:$0xff] %v8164_v14  ;;  %v5827_v25 = vmul.f32 -1.442695, %v8149_v48  ;;  %v8180_v0 = vpack.c.bf16 %v8109_v42, %v8109_v42  ;;  %vm2187_vm9 = vweird.f32 %v8124_v27  ;;  %v3425_v37 = vunpack.c.l.b16 %v3235_v33 }
 0x200   : > { %v2183_v19 = vmul.f32 %v6599_v38, %v8124_v27  ;;  %v2169_v36 = vsub.f32 1.0, %v2168_v6  ;;  %vm2188_vm8 = vweird.f32 %v6599_v38  ;;  %v2191_v6 = vand.u32 2147483647, %v8124_v27 }
 0x201   : > { %v8151_v9 = vld.sshfl [vmem:[#allocation1 + $0x20] sm:$0xff pattern:$0x73625140]  ;;  %10353 = vst [vmem:[#allocation31_spill] sm:$0xff] %v8180_v0  ;;  %v3245_v18 = vsel %vm7262_vm13, %v3240_v29, %v3244_v44  ;;  %6602 = vpow2.f32 %v5827_v25  ;;  %v2194_v25 = vor.u32 1.1754944e-38, %v2193_v10  ;;  %v3661_v29 = vunpack.c.l.b16 %v8180_v0  ;;  %vm2189_vm11 = vmor %vm2187_vm9, %vm2188_vm8 }
 0x202   : > { %2750 = vst [vmem:[#allocation1 + $0x20] ss:$4 sm:$0xff] %v2539_v30  ;;  %v2184_v32 = vsub.f32 1.0, %v2183_v19  ;;  %v2170_v30 = vmul.f32 %v8143_v62, %v2169_v36  ;;  %3770 = vmatmul.bf16.gmra.mxu0 %v8157_v45  ;;  %v2737_v19 = vld.sshfl [vmem:[#allocation1] sm:$0xff pattern:$0x73625140]  ;;  %v3426_v42 = vunpack.c.l.b16 %v3245_v18  ;;  %v1543_v60 = vmul.f32 %v7948_v52, %v1481_v54 }
 0x203   : > { %v2909_v14 = vsel %vm2584_vm1, %v2737_v19, 0.0  ;;  %2739 = vst [vmem:[#allocation1] ss:$4 sm:$0xff] %v2532_v58  ;;  %v6308_v36 = vld [vmem:[%s10200_s4 + $0xc0] sm:$0xff]  ;;  %vm2173_vm10 = vweird.f32 %v8143_v62  ;;  %vm2192_vm12 = vcmp.eq.f32.partialorder %v2191_v6, 8.507059e+37  ;;  %vm8207_vm14 = vcmp.eq.f32.partialorder %v2176_v16, 8.507059e+37 }
 0x204   : > { %v2185_v17 = vmul.f32 %v6599_v38, %v2184_v32  ;;  %v8190_v12 = vpack.c.bf16 %v2909_v14, %v2909_v14  ;;  %v8192_v32 = vpop.eup %6600  ;;  %v2171_v58 = vadd.f32 %v8143_v62, %v2170_v30  ;;  %v8201_v33 = vpack.c.b16 %v3426_v42, %v3425_v37  ;;  %4300 = vmatpush.bf16.msrb.mxu1 %v6308_v36  ;;  %vm8219_vm15 = vmor %vm2172_vm7, %vm2173_vm10 }
 0x205   : > { %v2198_v27 = vmul.f32 %v8192_v32, %v8146_v23  ;;  %v8205_v10 = vadd.f32 %v7886_v63, %v1543_v60  ;;  %v2179_v30 = vor.u32 1.1754944e-38, %v2178_v59  ;;  %v3646_v36 = vunpack.c.l.b16 %v7476_v3 }
 0x206   : > { %10354 = vst [vmem:[#allocation32_spill] sm:$0xff] %v8190_v12  ;;  %v2186_v44 = vadd.f32 %v6599_v38, %v2185_v17  ;;  %v3660_v49 = vunpack.c.l.b16 %v8190_v12  ;;  %3572 = vmatmul.bf16.gmra.mxu1 %v8201_v33  ;;  %v3247_v17 = vshrl.u32 %v8190_v12, 16  ;;  %v2175_v42 = vsel %vm8219_vm15, %v8143_v62, %v2171_v58 }
 0x207   : > { %10355 = vst [vmem:[#allocation33_spill] sm:$0xff] %v8201_v33  ;;  %v6603_v37 = vpop.eup %6602  ;;  %v5828_v59 = vmul.f32 -1.442695, %v8205_v10  ;;  %v3250_v60 = vshll.u32 %v8190_v12, 16  ;;  %v3647_v33 = vunpack.c.l.b16 %v7480_v5  ;;  %v2206_v12 = vand.u32 2147483647, %v8146_v23 }
 0x208   : > { %v2190_v14 = vsel %vm2189_vm11, %v6599_v38, %v2186_v44  ;;  %v8224_v6 = vpack.c.b16 %v3661_v29, %v3660_v49  ;;  %v2199_v44 = vsub.f32 1.0, %v2198_v27  ;;  %v2537_v38 = vrot.slane %v8140_v41, 2 }
 0x209   : > { %v2195_v19 = vsel %vm2192_vm12, %v2194_v25, %v2190_v14  ;;  %v8213_v18 = vld.sshfl [vmem:[#allocation1 + $0x20] sm:$0xff pattern:$0x73625140]  ;;  %v8231_v25 = vpop.f32.mrf.mxu1  ;;  %v1484_v14 = vpop.f32.mrf.mxu0  ;;  %6604 = vpow2.f32 %v5828_v59  ;;  %v3249_v58 = vrot.slane %v3247_v17, 4  ;;  %v10361_v27 = vrot.slane %v8097_v20, 6 }
 0x20a   : > { %v2405_v16 = vmul.f32 %v2195_v19, %v8042_v55  ;;  %10360 = vst [vmem:[#allocation34_spill] sm:$0xff] %v8231_v25  ;;  %v2740_v47 = vld.sshfl [vmem:[#allocation1] sm:$0xff pattern:$0x73625140]  ;;  %v8235_v19 = vadd.f32 1.0, %v6603_v37  ;;  %3810 = vmatmul.bf16.gmra.mxu2 %v8224_v6  ;;  %v2538_v25 = vrot.slane %v8140_v41, 4  ;;  %v2200_v20 = vmul.f32 %v8192_v32, %v2199_v44 }
 0x20b   : > { %v2911_v62 = vsel %vm2595_vm6, %v2740_v47, 0.0  ;;  %2746 = vst [vmem:[#allocation1] ss:$4 sm:$0xff] %v10361_v27  ;;  %v2208_v37 = vand.u32 2147483648, %v8146_v23  ;;  %v3252_v47 = vrot.slane %v3250_v60, 5  ;;  %v3256_v17 = vshll.u32 %v8180_v0, 16 }
 0x20c   : > { %v2543_v55 = vrot.slane %v2405_v16, 2  ;;  %v2544_v29 = vrot.slane %v2405_v16, 4  ;;  %v2545_v49 = vrot.slane %v2405_v16, 6  ;;  %2757 = vst [vmem:[#allocation1 + $0x20] ss:$4 sm:$0xff] %v2405_v16  ;;  %6606 = vrcp.f32 %v8235_v19 }
 0x20d   : > { %v2180_v16 = vsel %vm8207_vm14, %v2179_v30, %v2175_v42  ;;  %v8249_v59 = vpack.c.bf16 %v2911_v62, %v2911_v62  ;;  %v3253_v27 = vor.u32 %v3252_v47, %v3249_v58  ;;  %v3258_v2 = vrot.slane %v3256_v17, 5  ;;  %2747 = vst [vmem:[#allocation1 + $0x1] ss:$4 sm:$0xff] %v8140_v41 }
 0x20e   : > { %2758 = vst [vmem:[#allocation1 + $0x21] ss:$4 sm:$0xff] %v2543_v55  ;;  %v3260_v55 = vshrl.u32 %v8180_v0, 16  ;;  %v8255_v3 = vpack.c.b16 %v3647_v33, %v3646_v36  ;;  %v8259_v30 = vmul.f32 %v2180_v16, %v8037_v24  ;;  %vm2202_vm2 = vweird.f32 %v8146_v23  ;;  %v6320_v16 = vld [vmem:[%s10200_s4 + $0x120] sm:$0xff] }
 0x20f   : > { %2759 = vst [vmem:[#allocation1 + $0x22] ss:$4 sm:$0xff] %v2544_v29  ;;  %v3266_v60 = vshll.u32 %v8249_v59, 16  ;;  %v1544_v29 = vmul.f32 %v7948_v52, %v1484_v14  ;;  %v6605_v44 = vpop.eup %6604  ;;  %vm2203_vm0 = vweird.f32 %v8192_v32  ;;  %vm8265_vm3 = vcmp.eq.f32.partialorder %v2206_v12, 8.507059e+37  ;;  %4510 = vmatpush.bf16.msrb.mxu2 %v6320_v16 }
 0x210   : > { %10362 = vst [vmem:[#allocation35_spill] sm:$0xff] %v8249_v59  ;;  %v3262_v42 = vrot.slane %v3260_v55, 4  ;;  %v2209_v33 = vor.u32 1.1754944e-38, %v2208_v37  ;;  %v2201_v36 = vadd.f32 %v8192_v32, %v2200_v20  ;;  %v3254_v58 = vrot.slane %v3253_v27, 4  ;;  %v6307_v37 = vld [vmem:[%s10200_s4 + $0xb8] sm:$0xff]  ;;  %vm8299_vm4 = vmor %vm2202_vm2, %vm2203_vm0 }
 0x211   : > { %2760 = vst [vmem:[#allocation1 + $0x23] ss:$4 sm:$0xff] %v2545_v49  ;;  %v8273_v49 = vadd.f32 1.0, %v6605_v44  ;;  %v8280_v62 = vpop.f32.mrf.mxu1  ;;  %v1486_v47 = vpop.f32.mrf.mxu0  ;;  %v2540_v20 = vrot.slane %v8259_v30, 2  ;;  %v2541_v55 = vrot.slane %v8259_v30, 4  ;;  %v3268_v27 = vrot.slane %v3266_v60, 5  ;;  %4101 = vmatpush.bf16.msrb.mxu3 %v6307_v37 }
 0x212   : > { %2748 = vst [vmem:[#allocation1 + $0x2] ss:$4 sm:$0xff] %v2537_v38  ;;  %3775 = vmatmul.bf16.gmra.mxu0 %v8255_v3  ;;  %v8270_v24 = vpop.eup %6606  ;;  %v3263_v14 = vor.u32 %v3262_v42, %v3258_v2  ;;  %v8276_v38 = vadd.f32 %v7886_v63, %v1544_v29  ;;  %v3259_v29 = vsel %vm7262_vm13, %v3254_v58, %v3258_v2  ;;  %v2542_v54 = vrot.slane %v8259_v30, 6 }
 0x213   : > { %2749 = vst [vmem:[#allocation1 + $0x3] ss:$4 sm:$0xff] %v2538_v25  ;;  %v2213_v12 = vmul.f32 %v8270_v24, %v8235_v19  ;;  %v2912_v25 = vsel %vm2584_vm1, %v8151_v9, 0.0  ;;  %6608 = vrcp.f32 %v8273_v49  ;;  %v2205_v60 = vsel %vm8299_vm4, %v8192_v32, %v2201_v36 }
 0x214   : > { %10365 = vst [vmem:[#allocation36_spill] sm:$0xff] %v8280_v62  ;;  %v3264_v44 = vrot.slane %v3263_v14, 4  ;;  %v5829_v17 = vmul.f32 -1.442695, %v8276_v38  ;;  %v8310_v23 = vpack.c.bf16 %v2912_v25, %v2912_v25  ;;  %v1545_v62 = vmul.f32 %v7948_v52, %v1486_v47 }
 0x215   : > { %v2214_v42 = vsub.f32 1.0, %v2213_v12  ;;  %vm2217_vm5 = vweird.f32 %v8235_v19  ;;  %v2221_v14 = vand.u32 2147483647, %v8235_v19  ;;  %v3427_v58 = vunpack.c.l.b16 %v3259_v29 }
 0x216   : > { %10368 = vst [vmem:[#allocation37_spill] sm:$0xff] %v8310_v23  ;;  %4301 = vmatmul.bf16.vlgmr.msrb.gmra.mxu1 %v8093_v28  ;;  %v3269_v2 = vsel %vm7262_vm13, %v3264_v44, %v3268_v27  ;;  %6610 = vpow2.f32 %v5829_v17  ;;  %v8320_v32 = vadd.f32 %v7886_v63, %v1545_v62  ;;  %v2210_v36 = vsel %vm8265_vm3, %v2209_v33, %v2205_v60 }
 0x217   : > { %v2215_v12 = vmul.f32 %v8270_v24, %v2214_v42  ;;  %v3428_v37 = vunpack.c.l.b16 %v3269_v2  ;;  %vm2218_vm7 = vweird.f32 %v8270_v24  ;;  %v3271_v28 = vshrl.u32 %v8310_v23, 16 }
 0x218   : > { %v3662_v27 = vunpack.c.l.b16 %v8310_v23  ;;  %v5830_v62 = vmul.f32 -1.442695, %v8320_v32  ;;  %v3274_v41 = vshll.u32 %v8310_v23, 16  ;;  %v2914_v42 = vsel %vm2595_vm6, %v8213_v18, 0.0  ;;  %vm8357_vm8 = vmor %vm2217_vm5, %vm2218_vm7 }
 0x219   : > { %v8329_v47 = vpop.eup %6608  ;;  %v8331_v17 = vpack.c.b16 %v3428_v37, %v3427_v58  ;;  %v2216_v33 = vadd.f32 %v8270_v24, %v2215_v12  ;;  %v1489_v29 = vpop.f32.mrf.mxu0  ;;  %v2223_v44 = vand.u32 2147483648, %v8235_v19  ;;  %v8346_v2 = vmul.f32 %v2210_v36, %v8101_v51 }
 0x21a   : > { %v2751_v16 = vld.sshfl [vmem:[#allocation1] sm:$0xff pattern:$0x73625140]  ;;  %v2228_v9 = vmul.f32 %v8329_v47, %v8273_v49  ;;  %6612 = vpow2.f32 %v5830_v62  ;;  %v3276_v60 = vrot.slane %v3274_v41, 5  ;;  %v8348_v37 = vpop.f32.mrf.mxu1  ;;  %vm2222_vm9 = vcmp.eq.f32.partialorder %v2221_v14, 8.507059e+37 }
 0x21b   : > { %v8325_v25 = vpack.c.bf16 %v2751_v16, %v2751_v16  ;;  %2753 = vst [vmem:[#allocation1] ss:$4 sm:$0xff] %v8259_v30  ;;  %3577 = vmatmul.bf16.vlgmr.msra.gmra.mxu3 %v8331_v17  ;;  %v2220_v36 = vsel %vm8357_vm8, %v8270_v24, %v2216_v33  ;;  %v10375_v19 = vunpack.c.l.b16 %v7579_v1  ;;  %v10376_v62 = vunpack.c.l.b16 %v7583_v61 }
 0x21c   : > { %10370 = vst [vmem:[#allocation39_spill] sm:$0xff] %v8331_v17  ;;  %v6611_v12 = vpop.eup %6610  ;;  %v2229_v58 = vsub.f32 1.0, %v2228_v9  ;;  %v2224_v9 = vor.u32 1.1754944e-38, %v2223_v44  ;;  %v2547_v24 = vrot.slane %v8346_v2, 4  ;;  %vm2233_vm10 = vweird.f32 %v8329_v47 }
 0x21d   : > { %10369 = vst [vmem:[#allocation38_spill] sm:$0xff] %v8325_v25  ;;  %v3663_v30 = vunpack.c.l.b16 %v8325_v25  ;;  %v3280_v18 = vshll.u32 %v8325_v25, 16  ;;  %v8361_v16 = vadd.f32 1.0, %v6611_v12  ;;  %v3284_v51 = vshrl.u32 %v8325_v25, 16 }
 0x21e   : > { %2754 = vst [vmem:[#allocation1 + $0x1] ss:$4 sm:$0xff] %v2540_v20  ;;  %v3273_v20 = vrot.slane %v3271_v28, 4  ;;  %v8363_v28 = vpack.c.bf16 %v2914_v42, %v2914_v42  ;;  %v8374_v41 = vpack.c.b16 %v10376_v62, %v10375_v19  ;;  %v3650_v42 = vunpack.c.l.b16 %v7679_v40 }
 0x21f   : > { %2755 = vst [vmem:[#allocation1 + $0x2] ss:$4 sm:$0xff] %v2541_v55  ;;  %v8350_v55 = vpack.c.b16 %v3663_v30, %v3662_v27  ;;  %v2230_v30 = vmul.f32 %v8329_v47, %v2229_v58  ;;  %6614 = vrcp.f32 %v8361_v16  ;;  %v2546_v12 = vrot.slane %v8346_v2, 2 }
 0x220   : > { %2756 = vst [vmem:[#allocation1 + $0x3] ss:$4 sm:$0xff] %v2542_v54  ;;  %v3277_v27 = vor.u32 %v3276_v60, %v3273_v20  ;;  %v3282_v14 = vrot.slane %v3280_v18, 5  ;;  %v3286_v33 = vrot.slane %v3284_v51, 4  ;;  %v6613_v20 = vpop.eup %6612  ;;  %v2225_v60 = vsel %vm2222_vm9, %v2224_v9, %v2220_v36  ;;  %v6306_v9 = vld [vmem:[%s10200_s4 + $0xb0] sm:$0xff] }
 0x221   : > { %10371 = vst [vmem:[#allocation40_spill] sm:$0xff] %v8348_v37  ;;  %3815 = vmatmul.bf16.gmra.mxu2 %v8350_v55  ;;  %v2236_v54 = vand.u32 2147483647, %v8273_v49  ;;  %v3290_v44 = vshll.u32 %v8363_v28, 16  ;;  %v1546_v58 = vmul.f32 %v7948_v52, %v1489_v29  ;;  %v2238_v19 = vand.u32 2147483648, %v8273_v49  ;;  %4102 = vmatpush.bf16.msrb.mxu3 %v6306_v9 }
 0x222   : > { %10374 = vst [vmem:[#allocation41_spill] sm:$0xff] %v8363_v28  ;;  %3780 = vmatmul.bf16.gmra.mxu0 %v8374_v41  ;;  %v8386_v62 = vadd.f32 1.0, %v6613_v20  ;;  %v3278_v37 = vrot.slane %v3277_v27, 4  ;;  %v3287_v23 = vor.u32 %v3286_v33, %v3282_v14  ;;  %v2231_v25 = vadd.f32 %v8329_v47, %v2230_v30  ;;  %v8399_v29 = vpop.f32.mrf.mxu1  ;;  %v1491_v33 = vpop.f32.mrf.mxu0  ;;  %v2762_v28 = vld.sshfl [vmem:[#allocation1 + $0x20] sm:$0xff pattern:$0x73625140] }
 0x223   : > { %v8391_v18 = vadd.f32 %v7886_v63, %v1546_v58  ;;  %v3651_v51 = vunpack.c.l.b16 %v7687_v31  ;;  %v8395_v36 = vmul.f32 %v2225_v60, %v8149_v48  ;;  %vm2232_vm11 = vweird.f32 %v8273_v49  ;;  %10377 = vst [vmem:[#allocation42_spill] sm:$0xff] %v8399_v29  ;;  %v6339_v29 = vld [vmem:[%s10200_s4 + $0x1b8] sm:$0xff] }
 0x224   : > { %6616 = vrcp.f32 %v8386_v62  ;;  %v3283_v27 = vsel %vm7262_vm13, %v3278_v37, %v3282_v14  ;;  %v3288_v58 = vrot.slane %v3287_v23, 4  ;;  %v3292_v48 = vrot.slane %v3290_v44, 5  ;;  %vm8417_vm12 = vmor %vm2232_vm11, %vm2233_vm10  ;;  %4897 = vmatpush.bf16.msra.mxu0 %v6339_v29  ;;  %2765 = vst [vmem:[#allocation1 + $0x20] ss:$4 sm:$0xff] %v2546_v12 }
 0x225   : > { %v8406_v20 = vpop.eup %6614  ;;  %v5831_v60 = vmul.f32 -1.442695, %v8391_v18  ;;  %v2548_v37 = vrot.slane %v8346_v2, 6  ;;  %vm8421_vm14 = vcmp.eq.f32.partialorder %v2236_v54, 8.507059e+37  ;;  %v2239_v44 = vor.u32 1.1754944e-38, %v2238_v19 }
 0x226   : > { %4306 = vmatmul.bf16.gmra.mxu1 %v8157_v45  ;;  %v2235_v59 = vsel %vm8417_vm12, %v8329_v47, %v2231_v25  ;;  %v3293_v0 = vsel %vm7262_vm13, %v3288_v58, %v3292_v48  ;;  %v3429_v17 = vunpack.c.l.b16 %v3283_v27  ;;  %v8434_v54 = vpack.c.b16 %v3651_v51, %v3650_v42  ;;  %2766 = vst [vmem:[#allocation1 + $0x21] ss:$4 sm:$0xff] %v2547_v24 }
 0x227   : > { %v2761_v30 = vld.sshfl [vmem:[#allocation1] sm:$0xff pattern:$0x73625140]  ;;  %v3430_v40 = vunpack.c.l.b16 %v3293_v0  ;;  %6618 = vpow2.f32 %v5831_v60  ;;  %v2549_v9 = vrot.slane %v8395_v36, 2  ;;  %v2550_v14 = vrot.slane %v8395_v36, 4 }
 0x228   : > { %v2915_v49 = vsel %vm2584_vm1, %v2761_v30, 0.0  ;;  %v2243_v30 = vmul.f32 %v8406_v20, %v8361_v16  ;;  %2763 = vst [vmem:[#allocation1] ss:$4 sm:$0xff] %v8346_v2  ;;  %v8440_v25 = vpack.c.bf16 %v2762_v28, %v2762_v28  ;;  %v1547_v47 = vmul.f32 %v7948_v52, %v1491_v33 }
 0x229   : > { %v8436_v31 = vpack.c.bf16 %v2915_v49, %v2915_v49  ;;  %v2551_v2 = vrot.slane %v8395_v36, 6  ;;  %v2240_v0 = vsel %vm8421_vm14, %v2239_v44, %v2235_v59  ;;  %v8449_v51 = vpack.c.b16 %v3430_v40, %v3429_v17  ;;  %2767 = vst [vmem:[#allocation1 + $0x22] ss:$4 sm:$0xff] %v2548_v37  ;;  %v6338_v59 = vld [vmem:[%s10200_s4 + $0x1b0] sm:$0xff]  ;;  %v6319_v40 = vld [vmem:[%s10200_s4 + $0x118] sm:$0xff]  ;;  %v6305_v17 = vld [vmem:[%s10200_s4 + $0xa8] sm:$0xff] }
 0x22a   : > { %v2244_v19 = vsub.f32 1.0, %v2243_v30  ;;  %10383 = vst [vmem:[#allocation44_spill] sm:$0xff] %v8440_v25  ;;  %v8443_v27 = vpop.eup %6616  ;;  %vm2248_vm15 = vweird.f32 %v8406_v20  ;;  %v3665_v12 = vunpack.c.l.b16 %v8440_v25  ;;  %v8456_v24 = vadd.f32 %v7886_v63, %v1547_v47  ;;  %4898 = vmatpush.bf16.msra.mxu0 %v6338_v59  ;;  %4511 = vmatpush.bf16.msrb.mxu2 %v6319_v40  ;;  %v6337_v49 = vld [vmem:[%s10200_s4 + $0x1a8] sm:$0xff]  ;;  %v1494_v23 = vpop.f32.mrf.mxu0 }
 0x22b   : > { %10382 = vst [vmem:[#allocation43_spill] sm:$0xff] %v8436_v31  ;;  %v3664_v28 = vunpack.c.l.b16 %v8436_v31  ;;  %v2258_v29 = vmul.f32 %v8443_v27, %v8386_v62  ;;  %3582 = vmatmul.bf16.gmra.mxu3 %v8449_v51  ;;  %v3295_v63 = vshrl.u32 %v8436_v31, 16  ;;  %v3304_v33 = vshll.u32 %v8440_v25, 16  ;;  %v8485_v47 = vpop.f32.mrf.mxu1 }
 0x22c   : > { %v2245_v42 = vmul.f32 %v8406_v20, %v2244_v19  ;;  %10384 = vst [vmem:[#allocation45_spill] sm:$0xff] %v8449_v51  ;;  %v5832_v60 = vmul.f32 -1.442695, %v8456_v24  ;;  %v3308_v37 = vshrl.u32 %v8440_v25, 16  ;;  %v8482_v30 = vmul.f32 %v2240_v0, %v8205_v10  ;;  %4103 = vmatpush.bf16.msrb.mxu3 %v6305_v17 }
 0x22d   : > { %2768 = vst [vmem:[#allocation1 + $0x23] ss:$4 sm:$0xff] %v8395_v36  ;;  %v3298_v36 = vshll.u32 %v8436_v31, 16  ;;  %v8474_v48 = vpack.c.b16 %v3665_v12, %v3664_v28  ;;  %v6619_v44 = vpop.eup %6618  ;;  %v2253_v19 = vand.u32 2147483648, %v8361_v16  ;;  %v3297_v28 = vrot.slane %v3295_v63, 4 }
 0x22e   : > { %v2246_v58 = vadd.f32 %v8406_v20, %v2245_v42  ;;  %10385 = vst [vmem:[#allocation46_spill] sm:$0xff] %v8485_v47  ;;  %vm2247_vm2 = vweird.f32 %v8361_v16  ;;  %v2251_v59 = vand.u32 2147483647, %v8361_v16  ;;  %v8489_v40 = vadd.f32 1.0, %v6619_v44  ;;  %4899 = vmatpush.bf16.msra.mxu0 %v6337_v49  ;;  %v6334_v47 = vld [vmem:[%s10200_s4 + $0x190] sm:$0xff] }
 0x22f   : > { %v2764_v42 = vld.sshfl [vmem:[#allocation1] sm:$0xff pattern:$0x73625140]  ;;  %v3300_v12 = vrot.slane %v3298_v36, 5  ;;  %6620 = vpow2.f32 %v5832_v60  ;;  %vm8494_vm0 = vmor %vm2247_vm2, %vm2248_vm15  ;;  %v2259_v0 = vsub.f32 1.0, %v2258_v29  ;;  %v3306_v63 = vrot.slane %v3304_v33, 5 }
 0x230   : > { %2770 = vst [vmem:[#allocation1] ss:$4 sm:$0xff] %v2549_v9  ;;  %v2917_v17 = vsel %vm2595_vm6, %v2764_v42, 0.0  ;;  %v3310_v36 = vrot.slane %v3308_v37, 4  ;;  %v2250_v16 = vsel %vm8494_vm0, %v8406_v20, %v2246_v58  ;;  %6622 = vrcp.f32 %v8489_v40 }
 0x231   : > { %3820 = vmatmul.bf16.gmra.mxu2 %v8474_v48  ;;  %2771 = vst [vmem:[#allocation1 + $0x1] ss:$4 sm:$0xff] %v2550_v14  ;;  %v3301_v9 = vor.u32 %v3300_v12, %v3297_v28  ;;  %v2254_v60 = vor.u32 1.1754944e-38, %v2253_v19  ;;  %vm2252_vm3 = vcmp.eq.f32.partialorder %v2251_v59, 8.507059e+37  ;;  %v8506_v29 = vpack.c.bf16 %v2917_v17, %v2917_v17  ;;  %v8521_v19 = vld [vmem:[%s10199_s3] ss:$0 sm:$0xff] }
 0x232   : > { %3785 = vmatmul.bf16.gmra.mxu0 %v8434_v54  ;;  %2772 = vst [vmem:[#allocation1 + $0x2] ss:$4 sm:$0xff] %v2551_v2  ;;  %v2260_v14 = vmul.f32 %v8443_v27, %v2259_v0  ;;  %v3311_v37 = vor.u32 %v3310_v36, %v3306_v63  ;;  %v1548_v44 = vmul.f32 %v7948_v52, %v1494_v23  ;;  %vm2262_vm4 = vweird.f32 %v8386_v62  ;;  %v6336_v17 = vld [vmem:[%s10200_s4 + $0x1a0] sm:$0xff]  ;;  %v1496_v36 = vpop.f32.mrf.mxu0 }
 0x233   : > { %2773 = vst [vmem:[#allocation1 + $0x3] ss:$4 sm:$0xff] %v8482_v30  ;;  %v2255_v33 = vsel %vm2252_vm3, %v2254_v60, %v2250_v16  ;;  %v3302_v10 = vrot.slane %v3301_v9, 4  ;;  %v3314_v20 = vshll.u32 %v8506_v29, 16  ;;  %v2268_v2 = vand.u32 2147483648, %v8386_v62  ;;  %4900 = vmatpush.bf16.msra.mxu0 %v6336_v17 }
 0x234   : > { %10388 = vst [vmem:[#allocation47_spill] sm:$0xff] %v8506_v29  ;;  %v8516_v49 = vpop.f32.mrf.mxu1  ;;  %v8524_v52 = vadd.f32 %v8521_v19, %v1548_v44  ;;  %v8529_v28 = vmul.f32 %v2255_v33, %v8276_v38  ;;  %v3312_v59 = vrot.slane %v3311_v37, 4  ;;  %v2261_v16 = vadd.f32 %v8443_v27, %v2260_v14  ;;  %v6335_v14 = vld [vmem:[%s10200_s4 + $0x198] sm:$0xff] }
 0x235   : > { %v6621_v42 = vpop.eup %6620  ;;  %10389 = vst [vmem:[#allocation48_spill] sm:$0xff] %v8516_v49  ;;  %v3307_v12 = vsel %vm7262_vm13, %v3302_v10, %v3306_v63  ;;  %v3316_v0 = vrot.slane %v3314_v20, 5  ;;  %vm2263_vm5 = vweird.f32 %v8443_v27  ;;  %v2552_v38 = vrot.slane %v8482_v30, 2  ;;  %v8553_v10 = vld [vmem:[%s10198_s2] ss:$0 sm:$0xff] }
 0x236   : > { %v8513_v58 = vadd.f32 1.0, %v6621_v42  ;;  %4311 = vmatmul.bf16.gmra.mxu1 %v8255_v3  ;;  %v8526_v23 = vpop.eup %6622  ;;  %v2266_v63 = vand.u32 2147483647, %v8386_v62  ;;  %v5833_v33 = vmul.f32 -1.442695, %v8524_v52  ;;  %v2553_v37 = vrot.slane %v8482_v30, 4  ;;  %vm8562_vm7 = vmor %vm2262_vm4, %vm2263_vm5 }
 0x237   : > { %v2273_v9 = vmul.f32 %v8526_v23, %v8489_v40  ;;  %v3317_v60 = vsel %vm7262_vm13, %v3312_v59, %v3316_v0  ;;  %v3431_v44 = vunpack.c.l.b16 %v3307_v12  ;;  %v1549_v20 = vmul.f32 %v8553_v10, %v1496_v36  ;;  %v6304_v62 = vld [vmem:[%s10200_s4 + $0xa0] sm:$0xff]  ;;  %4901 = vmatpush.bf16.msra.mxu0 %v6335_v14  ;;  %v6318_v14 = vld [vmem:[%s10200_s4 + $0x110] sm:$0xff] }
 0x238   : > { %6624 = vrcp.f32 %v8513_v58  ;;  %v3432_v42 = vunpack.c.l.b16 %v3317_v60  ;;  %v2554_v59 = vrot.slane %v8482_v30, 6  ;;  %v2555_v0 = vrot.slane %v8529_v28, 2  ;;  %4104 = vmatpush.bf16.msrb.mxu3 %v6304_v62  ;;  %4512 = vmatpush.bf16.msrb.mxu2 %v6318_v14 }
 0x239   : > { %v2269_v12 = vor.u32 1.1754944e-38, %v2268_v2  ;;  %6626 = vpow2.f32 %v5833_v33  ;;  %v2265_v60 = vsel %vm8562_vm7, %v8443_v27, %v2261_v16  ;;  %v2274_v49 = vsub.f32 1.0, %v2273_v9  ;;  %v2769_v2 = vld.sshfl [vmem:[#allocation1 + $0x20] sm:$0xff pattern:$0x73625140] }
 0x23a   : > { %v8569_v36 = vpack.c.b16 %v3432_v42, %v3431_v44  ;;  %v8572_v30 = vadd.f32 %v8521_v19, %v1549_v20  ;;  %v2775_v33 = vld.sshfl [vmem:[#allocation1] sm:$0xff pattern:$0x73625140]  ;;  %v2918_v27 = vsel %vm2584_vm1, %v2769_v2, 0.0  ;;  %2774 = vst [vmem:[#allocation1 + $0x20] ss:$4 sm:$0xff] %v2552_v38  ;;  %v8593_v38 = vpop.f32.mrf.mxu0  ;;  %vm2278_vm9 = vweird.f32 %v8526_v23 }
 0x23b   : > { %vm2267_vm8 = vcmp.eq.f32.partialorder %v2266_v63, 8.507059e+37  ;;  %v8586_v44 = vpack.c.bf16 %v2918_v27, %v2918_v27  ;;  %v8588_v42 = vpack.c.bf16 %v2775_v33, %v2775_v33  ;;  %2777 = vst [vmem:[#allocation1] ss:$4 sm:$0xff] %v2553_v37  ;;  %v2275_v33 = vmul.f32 %v8526_v23, %v2274_v49  ;;  %4902 = vmatpush.bf16.msra.mxu0 %v6334_v47 }
 0x23c   : > { %10392 = vst [vmem:[#allocation49_spill] sm:$0xff] %v8569_v36  ;;  %3587 = vmatmul.bf16.gmra.mxu3 %v8569_v36  ;;  %v5834_v9 = vmul.f32 -1.442695, %v8572_v30  ;;  %v2270_v20 = vsel %vm2267_vm8, %v2269_v12, %v2265_v60  ;;  %v8595_v17 = vpop.f32.mrf.mxu1  ;;  %v2557_v49 = vrot.slane %v8529_v28, 6  ;;  %v2283_v14 = vand.u32 2147483648, %v8489_v40  ;;  %v3791_v47 = vpop.f32.mrf.mxu2 }
 0x23d   : > { %10393 = vst [vmem:[#allocation50_spill] sm:$0xff] %v8586_v44  ;;  %v3666_v63 = vunpack.c.l.b16 %v8586_v44  ;;  %v3667_v2 = vunpack.c.l.b16 %v8588_v42  ;;  %v8607_v60 = vmul.f32 %v2270_v20, %v8320_v32  ;;  %v6303_v32 = vld [vmem:[%s10200_s4 + $0x98] sm:$0xff]  ;;  %v3319_v31 = vshrl.u32 %v8586_v44, 16 }
 0x23e   : > { %v8582_v16 = vpop.eup %6624  ;;  %10394 = vst [vmem:[#allocation51_spill] sm:$0xff] %v8588_v42  ;;  %6628 = vpow2.f32 %v5834_v9  ;;  %v2556_v9 = vrot.slane %v8529_v28, 4  ;;  %4105 = vmatpush.bf16.msrb.mxu3 %v6303_v32  ;;  %vm2277_vm10 = vweird.f32 %v8489_v40  ;;  %v2284_v25 = vor.u32 1.1754944e-38, %v2283_v14 }
 0x23f   : > { %2778 = vst [vmem:[#allocation1 + $0x1] ss:$4 sm:$0xff] %v2554_v59  ;;  %v6627_v37 = vpop.eup %6626  ;;  %v2288_v12 = vmul.f32 %v8582_v16, %v8513_v58  ;;  %v6333_v59 = vld [vmem:[%s10200_s4 + $0x188] sm:$0xff]  ;;  %v8611_v27 = vpack.c.b16 %v3667_v2, %v3666_v63  ;;  %vm8638_vm11 = vmor %vm2277_vm10, %vm2278_vm9  ;;  %v3328_v29 = vshll.u32 %v8588_v42, 16  ;;  %vm2293_vm14 = vweird.f32 %v8582_v16 }
 0x240   : > { %10395 = vst [vmem:[#allocation52_spill] sm:$0xff] %v8595_v17  ;;  %v8609_v62 = vadd.f32 1.0, %v6627_v37  ;;  %4903 = vmatpush.bf16.msra.mxu0 %v6333_v59  ;;  %v2558_v37 = vrot.slane %v8607_v60, 2  ;;  %vm2292_vm15 = vweird.f32 %v8513_v58 }
 0x241   : > { %2779 = vst [vmem:[#allocation1 + $0x2] ss:$4 sm:$0xff] %v8529_v28  ;;  %3825 = vmatmul.bf16.gmra.mxu2 %v8611_v27  ;;  %v2289_v20 = vsub.f32 1.0, %v2288_v12  ;;  %v6332_v28 = vld [vmem:[%s10200_s4 + $0x180] sm:$0xff]  ;;  %v2281_v12 = vand.u32 2147483647, %v8489_v40  ;;  %vm8680_vm2 = vmor %vm2292_vm15, %vm2293_vm14 }
 0x242   : > { %2780 = vst [vmem:[#allocation1 + $0x3] ss:$4 sm:$0xff] %v2555_v0  ;;  %6630 = vrcp.f32 %v8609_v62  ;;  %v2276_v0 = vadd.f32 %v8526_v23, %v2275_v33  ;;  %v2776_v63 = vld.sshfl [vmem:[#allocation1 + $0x20] sm:$0xff pattern:$0x73625140]  ;;  %v3322_v33 = vshll.u32 %v8586_v44, 16  ;;  %vm2307_vm3 = vweird.f32 %v8609_v62 }
 0x243   : > { %10396 = vst [vmem:[#allocation53_spill] sm:$0xff] %v8611_v27  ;;  %v2920_v17 = vsel %vm2595_vm6, %v2776_v63, 0.0  ;;  %v2290_v44 = vmul.f32 %v8582_v16, %v2289_v20  ;;  %vm2282_vm12 = vcmp.eq.f32.partialorder %v2281_v12, 8.507059e+37  ;;  %v3332_v20 = vshrl.u32 %v8588_v42, 16 }
 0x244   : > { %v6629_v2 = vpop.eup %6628  ;;  %2781 = vst [vmem:[#allocation1 + $0x20] ss:$4 sm:$0xff] %v2556_v9  ;;  %v2280_v32 = vsel %vm8638_vm11, %v8526_v23, %v2276_v0  ;;  %4904 = vmatpush.bf16.msra.mxu0 %v6332_v28  ;;  %v8647_v40 = vpack.c.bf16 %v2920_v17, %v2920_v17  ;;  %v8650_v9 = vpop.f32.mrf.mxu0  ;;  %v3324_v36 = vrot.slane %v3322_v33, 5  ;;  %v2296_v17 = vand.u32 2147483647, %v8513_v58 }
 0x245   : > { %v8634_v59 = vadd.f32 1.0, %v6629_v2  ;;  %2782 = vst [vmem:[#allocation1 + $0x21] ss:$4 sm:$0xff] %v2557_v49  ;;  %v3321_v49 = vrot.slane %v3319_v31, 4  ;;  %v2285_v23 = vsel %vm2282_vm12, %v2284_v25, %v2280_v32  ;;  %v3330_v28 = vrot.slane %v3328_v29, 5 }
 0x246   : > { %4316 = vmatmul.bf16.gmra.mxu1 %v8374_v41  ;;  %10399 = vst [vmem:[#allocation54_spill] sm:$0xff] %v8647_v40  ;;  %v3338_v33 = vshll.u32 %v8647_v40, 16  ;;  %v8670_v12 = vmul.f32 %v2285_v23, %v8391_v18  ;;  %v2559_v32 = vrot.slane %v8607_v60, 4  ;;  %vm8684_vm0 = vcmp.eq.f32.partialorder %v2296_v17, 8.507059e+37 }
 0x247   : > { %6632 = vrcp.f32 %v8634_v59  ;;  %2783 = vst [vmem:[#allocation1 + $0x22] ss:$4 sm:$0xff] %v8607_v60  ;;  %4905 = vmatmul.bf16.vlgmr.msra.gmra.mxu0 %v8157_v45  ;;  %v3325_v31 = vor.u32 %v3324_v36, %v3321_v49  ;;  %v2298_v45 = vand.u32 2147483648, %v8513_v58  ;;  %vm2322_vm5 = vweird.f32 %v8634_v59 }
 0x248   : > { %v8652_v2 = vpop.eup %6630  ;;  %2784 = vst [vmem:[#allocation1 + $0x23] ss:$4 sm:$0xff] %v2558_v37  ;;  %v8665_v37 = vpop.f32.mrf.mxu2  ;;  %v2562_v17 = vrot.slane %v8670_v12, 4  ;;  %v2328_v18 = vand.u32 2147483648, %v8634_v59  ;;  %vm3857_vm12 = vcmask 1042432   ;;  %vm3858_vm14 = vcmask 1046532  }
 0x249   : > { %v2303_v0 = vmul.f32 %v8652_v2, %v8609_v62  ;;  %10401 = vst [vmem:[#allocation56_spill] sm:$0xff] %v8665_v37  ;;  %v3326_v29 = vrot.slane %v3325_v31, 4  ;;  %v2561_v37 = vrot.slane %v8670_v12, 2  ;;  %v2299_v40 = vor.u32 1.1754944e-38, %v2298_v45  ;;  %vm8852_vm15 = vmor %vm3857_vm12, %vm3858_vm14 }
 0x24a   : > { %v3558_v63 = vpop.f32.mrf.mxu1  ;;  %vm2308_vm4 = vweird.f32 %v8652_v2 }
 0x24b   : > { %v8654_v14 = vadd.f32 %v3791_v47, %v3558_v63  ;;  %v2291_v47 = vadd.f32 %v8582_v16, %v2290_v44  ;;  %v3334_v63 = vrot.slane %v3332_v20, 4  ;;  %v2560_v44 = vrot.slane %v8607_v60, 6  ;;  %v2785_v60 = vld.sshfl [vmem:[#allocation1] sm:$0xff pattern:$0x73625140]  ;;  %vm8725_vm7 = vmor %vm2307_vm3, %vm2308_vm4 }
 0x24c   : > { %v8694_v27 = vpop.f32.mrf.mxu0  ;;  %2787 = vst [vmem:[#allocation1] ss:$4 sm:$0xff] %v2559_v32 }
 0x24d   : > { %10400 = vst [vmem:[#allocation55_spill] sm:$0xff] %v8654_v14  ;;  %v8667_v25 = vpop.eup %6632  ;;  %v2304_v14 = vsub.f32 1.0, %v2303_v0  ;;  %v2295_v58 = vsel %vm8680_vm2, %v8582_v16, %v2291_v47  ;;  %v3335_v23 = vor.u32 %v3334_v63, %v3330_v28  ;;  %v3340_v0 = vrot.slane %v3338_v33, 5 }
 0x24e   : > { %v2318_v36 = vmul.f32 %v8667_v25, %v8634_v59  ;;  %v3331_v16 = vsel %vm7262_vm13, %v3326_v29, %v3330_v28  ;;  %v2300_v31 = vsel %vm8684_vm0, %v2299_v40, %v2295_v58  ;;  %v2921_v33 = vsel %vm2584_vm1, %v2785_v60, 0.0 }
 0x24f   : > { %v2786_v51 = vld.sshfl [vmem:[#allocation1 + $0x20] sm:$0xff pattern:$0x73625140]  ;;  %v2305_v1 = vmul.f32 %v8652_v2, %v2304_v14  ;;  %v3336_v47 = vrot.slane %v3335_v23, 4  ;;  %v2311_v14 = vand.u32 2147483647, %v8609_v62  ;;  %v8712_v63 = vpack.c.bf16 %v2921_v33, %v2921_v33 }
 0x250   : > { %v2319_v42 = vsub.f32 1.0, %v2318_v36  ;;  %v8705_v45 = vpack.c.bf16 %v2786_v51, %v2786_v51  ;;  %2789 = vst [vmem:[#allocation1 + $0x20] ss:$4 sm:$0xff] %v2560_v44  ;;  %v2313_v40 = vand.u32 2147483648, %v8609_v62  ;;  %v3433_v51 = vunpack.c.l.b16 %v3331_v16  ;;  %v3796_v58 = vpop.f32.mrf.mxu2  ;;  %v6302_v33 = vld [vmem:[%s10200_s4 + $0x90] sm:$0xff] }
 0x251   : > { %v3341_v28 = vsel %vm7262_vm13, %v3336_v47, %v3340_v0  ;;  %2790 = vst [vmem:[#allocation1 + $0x21] ss:$4 sm:$0xff] %v8670_v12  ;;  %v2412_v44 = vmul.f32 %v2300_v31, %v8456_v24  ;;  %v2306_v49 = vadd.f32 %v8652_v2, %v2305_v1  ;;  %vm2323_vm8 = vweird.f32 %v8667_v25  ;;  %4106 = vmatpush.bf16.msrb.mxu3 %v6302_v33 }
 0x252   : > { %v8691_v20 = vpop.f32.mrf.mxu1  ;;  %v2320_v32 = vmul.f32 %v8667_v25, %v2319_v42  ;;  %v3434_v36 = vunpack.c.l.b16 %v3341_v28  ;;  %2791 = vst [vmem:[#allocation1 + $0x22] ss:$4 sm:$0xff] %v2561_v37  ;;  %v3668_v1 = vunpack.c.l.b16 %v8712_v63  ;;  %v3669_v24 = vunpack.c.l.b16 %v8705_v45  ;;  %vm8749_vm10 = vmor %vm2322_vm5, %vm2323_vm8 }
 0x253   : > { %10406 = vst [vmem:[#allocation57_spill] sm:$0xff] %v8691_v20  ;;  %v2563_v37 = vrot.slane %v8670_v12, 6  ;;  %v2314_v23 = vor.u32 1.1754944e-38, %v2313_v40  ;;  %v2326_v60 = vand.u32 2147483647, %v8634_v59  ;;  %v2564_v16 = vrot.slane %v2412_v44, 2 }
 0x254   : > { %2792 = vst [vmem:[#allocation1 + $0x23] ss:$4 sm:$0xff] %v2562_v17  ;;  %v8730_v42 = vpack.c.b16 %v3434_v36, %v3433_v51  ;;  %v2321_v0 = vadd.f32 %v8667_v25, %v2320_v32  ;;  %v8738_v62 = vpack.c.b16 %v3669_v24, %v3668_v1  ;;  %v1506_v17 = vpop.f32.mrf.mxu0  ;;  %v2310_v47 = vsel %vm8725_vm7, %v8652_v2, %v2306_v49  ;;  %v6317_v40 = vld [vmem:[%s10200_s4 + $0x108] sm:$0xff]  ;;  %v2788_v51 = vld.sshfl [vmem:[#allocation1] sm:$0xff pattern:$0x73625140] }
 0x255   : > { %vm8743_vm9 = vcmp.eq.f32.partialorder %v2311_v14, 8.507059e+37  ;;  %v2565_v2 = vrot.slane %v2412_v44, 4  ;;  %v2566_v14 = vrot.slane %v2412_v44, 6  ;;  %v2329_v32 = vor.u32 1.1754944e-38, %v2328_v18  ;;  %4513 = vmatpush.bf16.msrb.mxu2 %v6317_v40  ;;  %2794 = vst [vmem:[#allocation1] ss:$4 sm:$0xff] %v2563_v37 }
 0x256   : > { %4321 = vmatmul.bf16.gmra.mxu1 %v8434_v54  ;;  %3592 = vmatmul.bf16.gmra.mxu3 %v8730_v42  ;;  %v2923_v36 = vsel %vm2595_vm6, %v2788_v51, 0.0  ;;  %v3343_v49 = vshrl.u32 %v8712_v63, 16  ;;  %v3346_v29 = vshll.u32 %v8712_v63, 16  ;;  %v2315_v18 = vsel %vm8743_vm9, %v2314_v23, %v2310_v47  ;;  %2795 = vst [vmem:[#allocation1 + $0x1] ss:$4 sm:$0xff] %v2412_v44  ;;  %v6316_v37 = vld [vmem:[%s10200_s4 + $0x100] sm:$0xff] }
 0x257   : > { %4910 = vmatmul.bf16.gmra.mxu0 %v8255_v3  ;;  %3830 = vmatmul.bf16.gmra.mxu2 %v8738_v62  ;;  %v6301_v3 = vld [vmem:[%s10200_s4 + $0x88] sm:$0xff]  ;;  %vm2327_vm11 = vcmp.eq.f32.partialorder %v2326_v60, 8.507059e+37  ;;  %2796 = vst [vmem:[#allocation1 + $0x2] ss:$4 sm:$0xff] %v2564_v16  ;;  %v8775_v17 = vpack.c.bf16 %v2923_v36, %v2923_v36  ;;  %v2413_v31 = vmul.f32 %v2315_v18, %v8524_v52  ;;  %v3352_v47 = vshll.u32 %v8705_v45, 16  ;;  %v6300_v44 = vld [vmem:[%s10200_s4 + $0x80] sm:$0xff] }
 0x258   : > { %v3345_v1 = vrot.slane %v3343_v49, 4  ;;  %v3348_v33 = vrot.slane %v3346_v29, 5  ;;  %2797 = vst [vmem:[#allocation1 + $0x3] ss:$4 sm:$0xff] %v2565_v2  ;;  %4107 = vmatpush.bf16.msrb.mxu3 %v6301_v3 }
 0x259   : > { %4514 = vmatpush.bf16.msrb.mxu2 %v6316_v37  ;;  %v3354_v12 = vrot.slane %v3352_v47, 5  ;;  %v3362_v2 = vshll.u32 %v8775_v17, 16  ;;  %v2568_v36 = vrot.slane %v2413_v31, 4  ;;  %v2569_v29 = vrot.slane %v2413_v31, 6 }
 0x25a   : > { %v3349_v60 = vor.u32 %v3348_v33, %v3345_v1 }
 0x25b   : > { %v2793_v24 = vld.sshfl [vmem:[#allocation1 + $0x20] sm:$0xff pattern:$0x73625140]  ;;  %v3364_v1 = vrot.slane %v3362_v2, 5 }
 0x25c   : > { %v3563_v28 = vpop.f32.mrf.mxu1  ;;  %2798 = vst [vmem:[#allocation1 + $0x20] ss:$4 sm:$0xff] %v2566_v14  ;;  %v2924_v16 = vsel %vm2584_vm1, %v2793_v24, 0.0  ;;  %v3350_v14 = vrot.slane %v3349_v60, 4  ;;  %4108 = vmatpush.bf16.msrb.mxu3 %v6300_v44 }
 0x25d   : > { %v8761_v59 = vadd.f32 %v3796_v58, %v3563_v28  ;;  %v2325_v58 = vsel %vm8749_vm10, %v8667_v25, %v2321_v0  ;;  %v3356_v25 = vshrl.u32 %v8705_v45, 16  ;;  %v8783_v0 = vpop.f32.mrf.mxu2  ;;  %v8795_v51 = vpack.c.bf16 %v2924_v16, %v2924_v16 }
 0x25e   : > { %v2330_v23 = vsel %vm2327_vm11, %v2329_v32, %v2325_v58  ;;  %10414 = vst [vmem:[#allocation59_spill] sm:$0xff] %v8783_v0  ;;  %v2567_v32 = vrot.slane %v2413_v31, 2  ;;  %v3355_v3 = vsel %vm7262_vm13, %v3350_v14, %v3354_v12 }
 0x25f   : > { %10413 = vst [vmem:[#allocation58_spill] sm:$0xff] %v8761_v59  ;;  %v2414_v28 = vmul.f32 %v2330_v23, %v8572_v30  ;;  %v3358_v40 = vrot.slane %v3356_v25, 4  ;;  %v2799_v18 = vld.sshfl [vmem:[#allocation1] sm:$0xff pattern:$0x73625140]  ;;  %v3367_v30 = vshrl.u32 %v8795_v51, 16  ;;  %v3435_v25 = vunpack.c.l.b16 %v3355_v3 }
 0x260   : > { %2801 = vst [vmem:[#allocation1] ss:$4 sm:$0xff] %v2413_v31  ;;  %v8800_v33 = vpack.c.bf16 %v2799_v18, %v2799_v18  ;;  %v3670_v16 = vunpack.c.l.b16 %v8795_v51 }
 0x261   : > { %v3359_v49 = vor.u32 %v3358_v40, %v3354_v12  ;;  %v2570_v58 = vrot.slane %v2414_v28, 2  ;;  %2802 = vst [vmem:[#allocation1 + $0x1] ss:$4 sm:$0xff] %v2567_v32  ;;  %v2571_v23 = vrot.slane %v2414_v28, 4  ;;  %v2572_v47 = vrot.slane %v2414_v28, 6 }
 0x262   : > { %2803 = vst [vmem:[#allocation1 + $0x2] ss:$4 sm:$0xff] %v2568_v36  ;;  %v3671_v31 = vunpack.c.l.b16 %v8800_v33  ;;  %v3370_v36 = vshll.u32 %v8795_v51, 16  ;;  %v3369_v18 = vrot.slane %v3367_v30, 4 }
 0x263   : > { %v3360_v24 = vrot.slane %v3359_v49, 4  ;;  %v2800_v37 = vld.sshfl [vmem:[#allocation1 + $0x20] sm:$0xff pattern:$0x73625140]  ;;  %2804 = vst [vmem:[#allocation1 + $0x3] ss:$4 sm:$0xff] %v2569_v29 }
 0x264   : > { %v8790_v52 = vpop.f32.mrf.mxu1  ;;  %v2926_v44 = vsel %vm2595_vm6, %v2800_v37, 0.0  ;;  %v3376_v49 = vshll.u32 %v8800_v33, 16  ;;  %2805 = vst [vmem:[#allocation1 + $0x20] ss:$4 sm:$0xff] %v2414_v28  ;;  %v8815_v3 = vpack.c.b16 %v3671_v31, %v3670_v16  ;;  %v6331_v28 = vld [vmem:[%s10200_s4 + $0x178] sm:$0xff] }
 0x265   : > { %10415 = vst [vmem:[#allocation60_spill] sm:$0xff] %v8790_v52  ;;  %v3365_v60 = vsel %vm7262_vm13, %v3360_v24, %v3364_v1  ;;  %v3801_v12 = vpop.f32.mrf.mxu2  ;;  %v8809_v2 = vpack.c.bf16 %v2926_v44, %v2926_v44  ;;  %v3380_v1 = vshrl.u32 %v8800_v33, 16  ;;  %4705 = vmatpush.bf16.msra.mxu3 %v6331_v28 }
 0x266   : > { %4326 = vmatmul.bf16.gmra.mxu1 %v7782_v11  ;;  %v3436_v32 = vunpack.c.l.b16 %v3365_v60  ;;  %2806 = vst [vmem:[#allocation1 + $0x21] ss:$4 sm:$0xff] %v2570_v58  ;;  %v3378_v24 = vrot.slane %v3376_v49, 5  ;;  %v6355_v58 = vld [vmem:[%s10200_s4 + $0x238] sm:$0xff] }
 0x267   : > { %4915 = vmatmul.bf16.gmra.mxu0 %v8374_v41  ;;  %v3372_v41 = vrot.slane %v3370_v36, 5  ;;  %2807 = vst [vmem:[#allocation1 + $0x22] ss:$4 sm:$0xff] %v2571_v23  ;;  %3835 = vmatmul.bf16.gmra.mxu2 %v8815_v3  ;;  %v3382_v37 = vrot.slane %v3380_v1, 4  ;;  %v3386_v44 = vshll.u32 %v8809_v2, 16  ;;  %v6347_v23 = vld [vmem:[%s10200_s4 + $0x1f8] sm:$0xff]  ;;  %v8844_v1 = vpop.f32.mrf.mxu0 }
 0x268   : > { %v8818_v29 = vpack.c.b16 %v3436_v32, %v3435_v25  ;;  %2808 = vst [vmem:[#allocation1 + $0x23] ss:$4 sm:$0xff] %v2572_v47  ;;  %5309 = vmatpush.bf16.msra.mxu2 %v6355_v58  ;;  %5111 = vmatpush.bf16.msra.mxu1 %v6347_v23 }
 0x269   : > { %v3373_v30 = vor.u32 %v3372_v41, %v3369_v18  ;;  %v3383_v25 = vor.u32 %v3382_v37, %v3378_v24  ;;  %v3388_v60 = vrot.slane %v3386_v44, 5  ;;  %v10419_v41 = vmov 0.0|0.0  }
 0x26a   : > { %3597 = vmatmul.bf16.gmra.mxu3 %v8818_v29  ;;  %v3862_v37 = vrot.slane %v10419_v41, 5 }
 0x26b   : > { %v3384_v47 = vrot.slane %v3383_v25, 4  ;;  %v3374_v16 = vrot.slane %v3373_v30, 4 }
 0x26c   : > { %v3864_v28 = vrot.slane %v3862_v37, 4 }
 0x26d   : > { %v3389_v31 = vsel %vm7262_vm13, %v3384_v47, %v3388_v60  ;;  %v8837_v32 = vpop.f32.mrf.mxu2 }
 0x26e   : > { %v3568_v40 = vpop.f32.mrf.mxu1  ;;  %10417 = vst [vmem:[#allocation62_spill] sm:$0xff] %v8837_v32 }
 0x26f   : > { %v8811_v14 = vadd.f32 %v3801_v12, %v3568_v40  ;;  %v3379_v12 = vsel %vm7262_vm13, %v3374_v16, %v3378_v24  ;;  %v3438_v40 = vunpack.c.l.b16 %v3389_v31  ;;  %v5918_v24 = vrot.slane %v10419_v41, 9  ;;  %v8861_v25 = vpop.f32.mrf.mxu0  ;;  %v6354_v41 = vld [vmem:[%s10200_s4 + $0x230] sm:$0xff] }
 0x270   : > { %v3437_v36 = vunpack.c.l.b16 %v3379_v12  ;;  %5310 = vmatpush.bf16.msra.mxu2 %v6354_v41 }
 0x271   : > { %10416 = vst [vmem:[#allocation61_spill] sm:$0xff] %v8811_v14  ;;  %v3863_v23 = vsel %vm8852_vm15, %v5918_v24, %v3862_v37  ;;  %v3872_v24 = vrot.slane %v7347_v34, 5  ;;  %v10465_v14 = vld [vmem:[#allocation10_spill] sm:$0xff] }
 0x272   : > { %v8842_v18 = vpack.c.b16 %v3438_v40, %v3437_v36  ;;  %v3989_v47 = vunpack.c.l.b16 %v3863_v23  ;;  %v3869_v40 = vrot.slane %v7333_v21, 5  ;;  %v6330_v36 = vld [vmem:[%s10200_s4 + $0x170] sm:$0xff] }
 0x273   : > { %4706 = vmatpush.bf16.msra.mxu3 %v6330_v36 }
 0x274   : > { %v3871_v21 = vrot.slane %v3869_v40, 4 }
 0x276   : > { %4331 = vmatmul.bf16.gmra.mxu1 %v7864_v35  ;;  %v8839_v49 = vpop.f32.mrf.mxu1  ;;  %v3873_v23 = vsel %vm8852_vm15, %v3871_v21, %v3872_v24  ;;  %v3876_v21 = vrot.slane %v7391_v53, 5 }
 0x277   : > { %10418 = vst [vmem:[#allocation63_spill] sm:$0xff] %v8839_v49  ;;  %4920 = vmatmul.bf16.gmra.mxu0 %v8434_v54  ;;  %4515 = vmatmul.bf16.vlgmr.msrb.gmra.mxu2 %v7406_v46  ;;  %v3806_v44 = vpop.f32.mrf.mxu2  ;;  %v3866_v46 = vsel %vm8852_vm15, %v3864_v28, %v3862_v37  ;;  %v8882_v37 = vpop.f32.mrf.mxu0 }
 0x278   : > { %v3990_v60 = vunpack.c.l.b16 %v3866_v46  ;;  %v3878_v24 = vrot.slane %v3876_v21, 4 }
 0x27a   : > { %3602 = vmatmul.bf16.gmra.mxu3 %v8842_v18  ;;  %v8868_v12 = vpack.c.b16 %v3990_v60, %v3989_v47  ;;  %v3992_v47 = vunpack.c.l.b16 %v3873_v23 }
 0x27c   : > { %10425 = vst [vmem:[#allocation67_spill] sm:$0xff] %v8868_v12 }
 0x27f   : > { %v8865_v31 = vpop.f32.mrf.mxu2  ;;  %v8895_v36 = vpop.f32.mrf.mxu0 }
 0x280   : > { %10424 = vst [vmem:[#allocation66_spill] sm:$0xff] %v8865_v31 }
 0x283   : > { %v3573_v58 = vpop.f32.mrf.mxu1 }
 0x284   : > { %v8850_v30 = vadd.f32 %v3806_v44, %v3573_v58  ;;  %v5919_v58 = vrot.slane %v7309_v56, 9 }
 0x286   : > { %10420 = vst [vmem:[#allocation64_spill] sm:$0xff] %v8850_v30  ;;  %4336 = vmatmul.bf16.gmra.mxu1 %v7976_v22  ;;  %v3870_v46 = vsel %vm8852_vm15, %v5919_v58, %v3869_v40  ;;  %v3879_v58 = vrot.slane %v7414_v7, 5 }
 0x287   : > { %4925 = vmatmul.bf16.gmra.mxu0 %v7782_v11  ;;  %4520 = vmatmul.bf16.gmra.mxu2 %v7495_v4  ;;  %v6346_v11 = vld [vmem:[%s10200_s4 + $0x1f0] sm:$0xff]  ;;  %v3991_v34 = vunpack.c.l.b16 %v3870_v46 }
 0x288   : > { %5112 = vmatpush.bf16.msra.mxu1 %v6346_v11  ;;  %v3880_v46 = vsel %vm8852_vm15, %v3878_v24, %v3879_v58  ;;  %v3883_v24 = vrot.slane %v7480_v5, 5  ;;  %v6345_v58 = vld [vmem:[%s10200_s4 + $0x1e8] sm:$0xff] }
 0x289   : > { %v8900_v32 = vpack.c.b16 %v3992_v47, %v3991_v34  ;;  %v3994_v34 = vunpack.c.l.b16 %v3880_v46  ;;  %v3886_v46 = vrot.slane %v7509_v43, 5 }
 0x28a   : > { %4109 = vmatmul.bf16.vlgmr.msrb.gmra.mxu3 %v8868_v12  ;;  %v3885_v5 = vrot.slane %v3883_v24, 4 }
 0x28b   : > { %v8863_v16 = vpop.f32.mrf.mxu1  ;;  %10429 = vst [vmem:[#allocation71_spill] sm:$0xff] %v8900_v32 }
 0x28c   : > { %10423 = vst [vmem:[#allocation65_spill] sm:$0xff] %v8863_v16  ;;  %5113 = vmatpush.bf16.msra.mxu1 %v6345_v58 }
 0x28d   : > { %v3811_v28 = vpop.f32.mrf.mxu2 }
 0x293   : > { %v8884_v44 = vpop.f32.mrf.mxu1 }
 0x294   : > { %10426 = vst [vmem:[#allocation68_spill] sm:$0xff] %v8884_v44 }
 0x295   : > { %v8898_v41 = vpop.f32.mrf.mxu2 }
 0x296   : > { %4341 = vmatmul.bf16.gmra.mxu1 %v8105_v15  ;;  %10428 = vst [vmem:[#allocation70_spill] sm:$0xff] %v8898_v41 }
 0x297   : > { %4930 = vmatmul.bf16.gmra.mxu0 %v7864_v35  ;;  %4525 = vmatmul.bf16.gmra.mxu2 %v7589_v8  ;;  %v8910_v35 = vpop.f32.mrf.mxu0 }
 0x29a   : > { %4114 = vmatmul.bf16.gmra.mxu3 %v8900_v32  ;;  %v5924_v32 = vrot.slane %v10465_v14, 9 }
 0x29b   : > { %v8893_v60 = vpop.f32.mrf.mxu1 }
 0x29c   : > { %10427 = vst [vmem:[#allocation69_spill] sm:$0xff] %v8893_v60 }
 0x29e   : > { %v3578_v11 = vpop.f32.mrf.mxu3 }
 0x29f   : > { %v8902_v56 = vadd.f32 %v3811_v28, %v3578_v11  ;;  %v5920_v28 = vrot.slane %v7379_v26, 9  ;;  %v8925_v52 = vpop.f32.mrf.mxu0 }
 0x2a1   : > { %10430 = vst [vmem:[#allocation72_spill] sm:$0xff] %v8902_v56  ;;  %v3877_v53 = vsel %vm8852_vm15, %v5920_v28, %v3876_v21  ;;  %v6329_v21 = vld [vmem:[%s10200_s4 + $0x168] sm:$0xff] }
 0x2a2   : > { %v3993_v7 = vunpack.c.l.b16 %v3877_v53  ;;  %4707 = vmatpush.bf16.msra.mxu3 %v6329_v21  ;;  %v1552_v21 = vmul.f32 %v8553_v10, %v8694_v27  ;;  %v1551_v27 = vmul.f32 %v8553_v10, %v8650_v9  ;;  %v10444_v9 = vld [vmem:[#allocation5_spill] sm:$0xff] }
 0x2a3   : > { %v8907_v40 = vpop.f32.mrf.mxu1 }
 0x2a4   : > { %10431 = vst [vmem:[#allocation73_spill] sm:$0xff] %v8907_v40  ;;  %v3816_v47 = vpop.f32.mrf.mxu2  ;;  %v8923_v49 = vpack.c.b16 %v3994_v34, %v3993_v7  ;;  %v3887_v34 = vsel %vm8852_vm15, %v3885_v5, %v3886_v46  ;;  %v1550_v7 = vmul.f32 %v8553_v10, %v8593_v38  ;;  %v8967_v46 = vadd.f32 %v8521_v19, %v1552_v21 }
 0x2a5   : > { %v3996_v58 = vunpack.c.l.b16 %v3887_v34  ;;  %v8981_v21 = vadd.f32 %v8521_v19, %v1551_v27 }
 0x2a6   : > { %v8912_v23 = vpop.f32.mrf.mxu3  ;;  %4346 = vmatmul.bf16.gmra.mxu1 %v8224_v6  ;;  %v8964_v5 = vadd.f32 %v8521_v19, %v1550_v7  ;;  %v3890_v7 = vrot.slane %v7583_v61, 5 }
 0x2a7   : > { %10432 = vst [vmem:[#allocation74_spill] sm:$0xff] %v8912_v23  ;;  %4935 = vmatmul.bf16.gmra.mxu0 %v7976_v22  ;;  %4530 = vmatmul.bf16.gmra.mxu2 %v7689_v57  ;;  %v6353_v22 = vld [vmem:[%s10200_s4 + $0x228] sm:$0xff] }
 0x2a8   : > { %5311 = vmatpush.bf16.msra.mxu2 %v6353_v22  ;;  %v8956_v22 = vpop.f32.mrf.mxu0 }
 0x2aa   : > { %4119 = vmatmul.bf16.gmra.mxu3 %v8923_v49 }
 0x2ab   : > { %v8920_v11 = vpop.f32.mrf.mxu1 }
 0x2ac   : > { %10433 = vst [vmem:[#allocation75_spill] sm:$0xff] %v8920_v11  ;;  %v8941_v28 = vpop.f32.mrf.mxu2  ;;  %v10441_v11 = vld [vmem:[#allocation11_spill] sm:$0xff] }
 0x2ad   : > { %10435 = vst [vmem:[#allocation77_spill] sm:$0xff] %v8941_v28 }
 0x2ae   : > { %v3583_v0 = vpop.f32.mrf.mxu3 }
 0x2af   : > { %v8928_v26 = vadd.f32 %v3816_v47, %v3583_v0  ;;  %v10437_v47 = vld [vmem:[#allocation3_spill] sm:$0xff] }
 0x2b0   : > { %v5921_v53 = vrot.slane %v10437_v47, 9  ;;  %v8985_v10 = vpop.f32.mrf.mxu0 }
 0x2b1   : > { %10434 = vst [vmem:[#allocation76_spill] sm:$0xff] %v8928_v26 }
 0x2b2   : > { %v3884_v43 = vsel %vm8852_vm15, %v5921_v53, %v3883_v24  ;;  %v5835_v24 = vmul.f32 -1.442695, %v8964_v5 }
 0x2b3   : > { %v8943_v0 = vpop.f32.mrf.mxu1  ;;  %v3995_v38 = vunpack.c.l.b16 %v3884_v43 }
 0x2b4   : > { %10436 = vst [vmem:[#allocation78_spill] sm:$0xff] %v8943_v0  ;;  %v3821_v47 = vpop.f32.mrf.mxu2  ;;  %6634 = vpow2.f32 %v5835_v24 }
 0x2b5   : > { %v8971_v0 = vpack.c.b16 %v3996_v58, %v3995_v38  ;;  %v3893_v58 = vrot.slane %v10444_v9, 5 }
 0x2b6   : > { %4351 = vmatmul.bf16.gmra.mxu1 %v8350_v55  ;;  %v8952_v20 = vpop.f32.mrf.mxu3 }
 0x2b7   : > { %10438 = vst [vmem:[#allocation3_spill] sm:$0xff] %v8952_v20  ;;  %4940 = vmatmul.bf16.gmra.mxu0 %v8105_v15  ;;  %4535 = vmatmul.bf16.gmra.mxu2 %v10441_v11  ;;  %v5837_v15 = vmul.f32 -1.442695, %v8967_v46 }
 0x2b8   : > { %10440 = vst [vmem:[#allocation80_spill] sm:$0xff] %v8971_v0  ;;  %v9002_v44 = vpop.f32.mrf.mxu0 }
 0x2b9   : > { %6636 = vpow2.f32 %v5837_v15 }
 0x2ba   : > { %4124 = vmatmul.bf16.gmra.mxu3 %v8971_v0 }
 0x2bb   : > { %v8960_v12 = vpop.f32.mrf.mxu1 }
 0x2bc   : > { %10439 = vst [vmem:[#allocation79_spill] sm:$0xff] %v8960_v12  ;;  %v8988_v38 = vpop.f32.mrf.mxu2  ;;  %v3892_v12 = vrot.slane %v3890_v7, 4 }
 0x2bd   : > { %10445 = vst [vmem:[#allocation5_spill] sm:$0xff] %v8988_v38 }
 0x2be   : > { %v3894_v19 = vsel %vm8852_vm15, %v3892_v12, %v3893_v58  ;;  %v10449_v58 = vld [vmem:[#allocation15_spill] sm:$0xff] }
 0x2bf   : > { %v3588_v53 = vpop.f32.mrf.mxu3  ;;  %v3998_v9 = vunpack.c.l.b16 %v3894_v19 }
 0x2c0   : > { %v8977_v34 = vadd.f32 %v3821_v47, %v3588_v53  ;;  %v5836_v47 = vmul.f32 -1.442695, %v8981_v21  ;;  %v10446_v53 = vld [vmem:[#allocation4_spill] sm:$0xff] }
 0x2c1   : > { %v5922_v61 = vrot.slane %v10446_v53, 9 }
 0x2c2   : > { %10442 = vst [vmem:[#allocation11_spill] sm:$0xff] %v8977_v34  ;;  %6638 = vpow2.f32 %v5836_v47  ;;  %v10454_v34 = vld [vmem:[#allocation53_spill] sm:$0xff] }
 0x2c3   : > { %v8983_v43 = vpop.f32.mrf.mxu1  ;;  %v3891_v27 = vsel %vm8852_vm15, %v5922_v61, %v3890_v7  ;;  %v10450_v7 = vld [vmem:[#allocation7_spill] sm:$0xff] }
 0x2c4   : > { %10443 = vst [vmem:[#allocation81_spill] sm:$0xff] %v8983_v43  ;;  %v6635_v43 = vpop.eup %6634  ;;  %v3997_v40 = vunpack.c.l.b16 %v3891_v27  ;;  %v3826_v53 = vpop.f32.mrf.mxu2  ;;  %v3897_v47 = vrot.slane %v10450_v7, 5  ;;  %v10452_v27 = vld [vmem:[#allocation8_spill] sm:$0xff]  ;;  %v6344_v7 = vld [vmem:[%s10200_s4 + $0x1e0] sm:$0xff] }
 0x2c5   : > { %v6637_v15 = vpop.eup %6636  ;;  %v9000_v60 = vadd.f32 1.0, %v6635_v43  ;;  %5114 = vmatpush.bf16.msra.mxu1 %v6344_v7 }
 0x2c6   : > { %4356 = vmatmul.bf16.gmra.mxu1 %v8474_v48  ;;  %v9004_v38 = vadd.f32 1.0, %v6637_v15  ;;  %v9006_v12 = vpack.c.b16 %v3998_v9, %v3997_v40  ;;  %v3899_v19 = vrot.slane %v3897_v47, 4  ;;  %v3900_v9 = vrot.slane %v10452_v27, 5  ;;  %v6352_v15 = vld [vmem:[%s10200_s4 + $0x220] sm:$0xff] }
 0x2c7   : > { %4945 = vmatmul.bf16.gmra.mxu0 %v8224_v6  ;;  %4540 = vmatmul.bf16.gmra.mxu2 %v10449_v58  ;;  %v6328_v6 = vld [vmem:[%s10200_s4 + $0x160] sm:$0xff]  ;;  %6640 = vrcp.f32 %v9000_v60  ;;  %vm2337_vm2 = vweird.f32 %v9000_v60 }
 0x2c8   : > { %10448 = vst [vmem:[#allocation82_spill] sm:$0xff] %v9006_v12  ;;  %v6639_v61 = vpop.eup %6638  ;;  %6642 = vrcp.f32 %v9004_v38  ;;  %4708 = vmatpush.bf16.msra.mxu3 %v6328_v6  ;;  %5312 = vmatpush.bf16.msra.mxu2 %v6352_v15  ;;  %v3901_v20 = vsel %vm8852_vm15, %v3899_v19, %v3900_v9  ;;  %vm2367_vm3 = vweird.f32 %v9004_v38 }
 0x2c9   : > { %v9018_v40 = vadd.f32 1.0, %v6639_v61  ;;  %v9033_v61 = vpop.f32.mrf.mxu0  ;;  %v4000_v7 = vunpack.c.l.b16 %v3901_v20 }
 0x2ca   : > { %4129 = vmatmul.bf16.gmra.mxu3 %v9006_v12 }
 0x2cb   : > { %v8997_v24 = vpop.f32.mrf.mxu1  ;;  %6644 = vrcp.f32 %v9018_v40  ;;  %vm2352_vm9 = vweird.f32 %v9018_v40 }
 0x2cc   : > { %10447 = vst [vmem:[#allocation4_spill] sm:$0xff] %v8997_v24  ;;  %v9027_v24 = vpop.f32.mrf.mxu3  ;;  %v3828_v27 = vpop.f32.mrf.mxu2 }
 0x2cd   : > { %10453 = vst [vmem:[#allocation7_spill] sm:$0xff] %v9027_v24  ;;  %v9030_v6 = vpop.eup %6640 }
 0x2ce   : > { %v9038_v26 = vpop.eup %6642  ;;  %v2333_v15 = vmul.f32 %v9030_v6, %v9000_v60  ;;  %vm2338_vm0 = vweird.f32 %v9030_v6 }
 0x2cf   : > { %v2363_v23 = vmul.f32 %v9038_v26, %v9004_v38  ;;  %vm2368_vm4 = vweird.f32 %v9038_v26  ;;  %vm9080_vm5 = vmor %vm2337_vm2, %vm2338_vm0 }
 0x2d0   : > { %v2334_v9 = vsub.f32 1.0, %v2333_v15  ;;  %vm9090_vm7 = vmor %vm2367_vm3, %vm2368_vm4 }
 0x2d1   : > { %v9049_v56 = vpop.eup %6644 }
 0x2d2   : > { %v2348_v12 = vmul.f32 %v9049_v56, %v9018_v40  ;;  %vm2353_vm10 = vweird.f32 %v9049_v56 }
 0x2d3   : > { %v9016_v43 = vpop.f32.mrf.mxu1  ;;  %vm9116_vm12 = vmor %vm2352_vm9, %vm2353_vm10 }
 0x2d4   : > { %10451 = vst [vmem:[#allocation15_spill] sm:$0xff] %v9016_v43  ;;  %v10455_v43 = vld [vmem:[#allocation6_spill] sm:$0xff] }
 0x2d5   : > { %v5923_v28 = vrot.slane %v10455_v43, 9 }
 0x2d6   : > { %4361 = vmatmul.bf16.gmra.mxu1 %v10454_v34 }
 0x2d7   : > { %v3898_v24 = vsel %vm8852_vm15, %v5923_v28, %v3897_v47  ;;  %4950 = vmatmul.bf16.gmra.mxu0 %v8350_v55  ;;  %v2364_v28 = vsub.f32 1.0, %v2363_v23  ;;  %v10459_v47 = vld [vmem:[#allocation20_spill] sm:$0xff]  ;;  %v9062_v55 = vpop.f32.mrf.mxu0 }
 0x2d8   : > { %v3999_v43 = vunpack.c.l.b16 %v3898_v24  ;;  %4545 = vmatmul.bf16.gmra.mxu2 %v10459_v47  ;;  %v2335_v24 = vmul.f32 %v9030_v6, %v2334_v9 }
 0x2d9   : > { %v3593_v19 = vpop.f32.mrf.mxu3  ;;  %v2365_v15 = vmul.f32 %v9038_v26, %v2364_v28 }
 0x2da   : > { %v9051_v31 = vpack.c.b16 %v4000_v7, %v3999_v43  ;;  %v9053_v16 = vadd.f32 %v3826_v53, %v3593_v19  ;;  %v9056_v20 = vpop.f32.mrf.mxu2  ;;  %v10461_v7 = vld [vmem:[#allocation12_spill] sm:$0xff]  ;;  %v2341_v19 = vand.u32 2147483647, %v9000_v60  ;;  %v2336_v28 = vadd.f32 %v9030_v6, %v2335_v24 }
 0x2db   : > { %v9044_v41 = vpop.f32.mrf.mxu1  ;;  %v3907_v23 = vrot.slane %v10461_v7, 5  ;;  %v2373_v7 = vand.u32 2147483648, %v9004_v38  ;;  %v6327_v24 = vld [vmem:[%s10200_s4 + $0x158] sm:$0xff] }
 0x2dc   : > { %10456 = vst [vmem:[#allocation8_spill] sm:$0xff] %v9044_v41  ;;  %v10460_v41 = vld [vmem:[#allocation9_spill] sm:$0xff]  ;;  %4134 = vmatmul.bf16.gmra.mxu3 %v9051_v31  ;;  %vm9096_vm8 = vcmp.eq.f32.partialorder %v2341_v19, 8.507059e+37 }
 0x2dd   : > { %10457 = vst [vmem:[#allocation53_spill] sm:$0xff] %v9051_v31  ;;  %v3904_v30 = vrot.slane %v10460_v41, 5  ;;  %v2349_v41 = vsub.f32 1.0, %v2348_v12  ;;  %v2366_v12 = vadd.f32 %v9038_v26, %v2365_v15  ;;  %v2374_v14 = vor.u32 1.1754944e-38, %v2373_v7  ;;  %4709 = vmatpush.bf16.msra.mxu3 %v6327_v24 }
 0x2de   : > { %10458 = vst [vmem:[#allocation6_spill] sm:$0xff] %v9053_v16  ;;  %v2343_v16 = vand.u32 2147483648, %v9000_v60  ;;  %v2371_v60 = vand.u32 2147483647, %v9004_v38 }
 0x2df   : > { %v3906_v53 = vrot.slane %v3904_v30, 4  ;;  %v2350_v59 = vmul.f32 %v9049_v56, %v2349_v41  ;;  %v3905_v38 = vsel %vm8852_vm15, %v5924_v32, %v3904_v30  ;;  %v2358_v41 = vand.u32 2147483648, %v9018_v40 }
 0x2e0   : > { %v2344_v15 = vor.u32 1.1754944e-38, %v2343_v16  ;;  %v2370_v19 = vsel %vm9090_vm7, %v9038_v26, %v2366_v12  ;;  %vm2372_vm11 = vcmp.eq.f32.partialorder %v2371_v60, 8.507059e+37  ;;  %v9111_v16 = vpop.f32.mrf.mxu0  ;;  %v2356_v30 = vand.u32 2147483647, %v9018_v40  ;;  %v10473_v60 = vld [vmem:[#allocation27_spill] sm:$0xff] }
 0x2e1   : > { %v3595_v9 = vpop.f32.mrf.mxu3  ;;  %v3908_v0 = vsel %vm8852_vm15, %v3906_v53, %v3907_v23  ;;  %v2340_v23 = vsel %vm9080_vm5, %v9030_v6, %v2336_v28  ;;  %v2351_v32 = vadd.f32 %v9049_v56, %v2350_v59  ;;  %v2375_v26 = vsel %vm2372_vm11, %v2374_v14, %v2370_v19  ;;  %v10475_v19 = vld [vmem:[#allocation16_spill] sm:$0xff] }
 0x2e2   : > { %v4002_v53 = vunpack.c.l.b16 %v3908_v0  ;;  %v4001_v0 = vunpack.c.l.b16 %v3905_v38  ;;  %v2345_v6 = vsel %vm9096_vm8, %v2344_v15, %v2340_v23  ;;  %v2359_v12 = vor.u32 1.1754944e-38, %v2358_v41 }
 0x2e3   : > { %v9067_v43 = vpop.f32.mrf.mxu1  ;;  %v2355_v40 = vsel %vm9116_vm12, %v9049_v56, %v2351_v32  ;;  %vm2357_vm14 = vcmp.eq.f32.partialorder %v2356_v30, 8.507059e+37  ;;  %v9137_v15 = vmul.f32 %v2375_v26, %v8967_v46  ;;  %v3914_v56 = vrot.slane %v10475_v19, 5  ;;  %v2809_v46 = vld.sshfl [vmem:[#allocation1] sm:$0xff pattern:$0x73625140]  ;;  %v10477_v26 = vld [vmem:[#allocation14_spill] sm:$0xff] }
 0x2e4   : > { %10462 = vst [vmem:[#allocation20_spill] sm:$0xff] %v9067_v43  ;;  %v9078_v43 = vadd.f32 %v3828_v27, %v3595_v9  ;;  %v9094_v27 = vpop.f32.mrf.mxu2  ;;  %v9124_v28 = vpack.c.b16 %v4002_v53, %v4001_v0  ;;  %v2415_v9 = vmul.f32 %v2345_v6, %v8964_v5  ;;  %v2360_v53 = vsel %vm2357_vm14, %v2359_v12, %v2355_v40  ;;  %v2810_v6 = vld.sshfl [vmem:[#allocation1 + $0x20] sm:$0xff pattern:$0x73625140] }
 0x2e5   : > { %v2579_v7 = vrot.slane %v9137_v15, 2  ;;  %v9148_v5 = vmul.f32 %v2360_v53, %v8981_v21  ;;  %v5925_v12 = vrot.slane %v10477_v26, 9  ;;  %v6343_v21 = vld [vmem:[%s10200_s4 + $0x1d8] sm:$0xff]  ;;  %v9167_v19 = vpack.c.bf16 %v2810_v6, %v2810_v6  ;;  %v6342_v26 = vld [vmem:[%s10200_s4 + $0x1d0] sm:$0xff] }
 0x2e6   : > { %4366 = vmatmul.bf16.gmra.mxu1 %v8738_v62  ;;  %v2573_v14 = vrot.slane %v2415_v9, 2  ;;  %v2574_v32 = vrot.slane %v2415_v9, 4  ;;  %v2575_v0 = vrot.slane %v2415_v9, 6  ;;  %2811 = vst [vmem:[#allocation1] ss:$4 sm:$0xff] %v2415_v9  ;;  %v10484_v9 = vld [vmem:[#allocation17_spill] sm:$0xff] }
 0x2e7   : > { %4955 = vmatmul.bf16.gmra.mxu0 %v8474_v48  ;;  %v10474_v48 = vld [vmem:[#allocation13_spill] sm:$0xff]  ;;  %5115 = vmatpush.bf16.msra.mxu1 %v6343_v21  ;;  %2816 = vst [vmem:[#allocation1 + $0x23] ss:$4 sm:$0xff] %v9148_v5 }
 0x2e8   : > { %4550 = vmatmul.bf16.gmra.mxu2 %v10473_v60  ;;  %v3911_v59 = vrot.slane %v10474_v48, 5  ;;  %v9144_v48 = vpop.f32.mrf.mxu0  ;;  %2813 = vst [vmem:[#allocation1 + $0x20] ss:$4 sm:$0xff] %v2573_v14 }
 0x2e9   : > { %10476 = vst [vmem:[#allocation12_spill] sm:$0xff] %v9144_v48 }
 0x2ea   : > { %v3913_v41 = vrot.slane %v3911_v59, 4  ;;  %2814 = vst [vmem:[#allocation1 + $0x21] ss:$4 sm:$0xff] %v2574_v32  ;;  %v3912_v53 = vsel %vm8852_vm15, %v5925_v12, %v3911_v59 }
 0x2eb   : > { %v9120_v31 = vpop.f32.mrf.mxu1  ;;  %2815 = vst [vmem:[#allocation1 + $0x22] ss:$4 sm:$0xff] %v2575_v0  ;;  %v4242_v0 = vunpack.c.l.b16 %v9167_v19  ;;  %5116 = vmatpush.bf16.msra.mxu1 %v6342_v26  ;;  %v6340_v26 = vld [vmem:[%s10200_s4 + $0x1c0] sm:$0xff] }
 0x2ec   : > { %10472 = vst [vmem:[#allocation9_spill] sm:$0xff] %v9120_v31  ;;  %4139 = vmatmul.bf16.gmra.mxu3 %v9124_v28  ;;  %v3836_v38 = vpop.f32.mrf.mxu2  ;;  %v3915_v40 = vsel %vm8852_vm15, %v3913_v41, %v3914_v56 }
 0x2ed   : > { %v3598_v23 = vpop.f32.mrf.mxu3  ;;  %10480 = vst [vmem:[#allocation13_spill] sm:$0xff] %v9167_v19  ;;  %v4004_v13 = vunpack.c.l.b16 %v3915_v40  ;;  %v10482_v40 = vld [vmem:[#allocation33_spill] sm:$0xff] }
 0x2ee   : > { %v9141_v30 = vadd.f32 %v9056_v20, %v3598_v23  ;;  %v2927_v20 = vsel %vm2584_vm1, %v2809_v46, 0.0  ;;  %v6351_v23 = vld [vmem:[%s10200_s4 + $0x218] sm:$0xff]  ;;  %2822 = vst [vmem:[#allocation1 + $0x20] ss:$4 sm:$0xff] %v2579_v7  ;;  %v4003_v46 = vunpack.c.l.b16 %v3912_v53  ;;  %v3918_v7 = vrot.slane %v10484_v9, 5  ;;  %v10485_v53 = vld [vmem:[#allocation21_spill] sm:$0xff] }
 0x2ef   : > { %v9165_v41 = vpack.c.bf16 %v2927_v20, %v2927_v20  ;;  %5313 = vmatpush.bf16.msra.mxu2 %v6351_v23 }
 0x2f0   : > { %v9176_v6 = vpack.c.b16 %v4004_v13, %v4003_v46  ;;  %v9181_v12 = vpop.f32.mrf.mxu0  ;;  %v3921_v13 = vrot.slane %v10485_v53, 5  ;;  %v3920_v46 = vrot.slane %v3918_v7, 4 }
 0x2f1   : > { %10479 = vst [vmem:[#allocation27_spill] sm:$0xff] %v9165_v41  ;;  %v4241_v59 = vunpack.c.l.b16 %v9165_v41 }
 0x2f2   : > { %10481 = vst [vmem:[#allocation16_spill] sm:$0xff] %v9181_v12 }
 0x2f3   : > { %v9153_v24 = vpop.f32.mrf.mxu1  ;;  %v9191_v20 = vpack.c.b16 %v4242_v0, %v4241_v59  ;;  %v3922_v59 = vsel %vm8852_vm15, %v3920_v46, %v3921_v13  ;;  %v10490_v13 = vld [vmem:[#allocation39_spill] sm:$0xff]  ;;  %v10491_v46 = vld [vmem:[#allocation26_spill] sm:$0xff] }
 0x2f4   : > { %10478 = vst [vmem:[#allocation10_spill] sm:$0xff] %v9153_v24  ;;  %v3838_v14 = vpop.f32.mrf.mxu2  ;;  %v4006_v9 = vunpack.c.l.b16 %v3922_v59 }
 0x2f5   : > { %v3600_v56 = vpop.f32.mrf.mxu3 }
 0x2f6   : > { %4371 = vmatmul.bf16.gmra.mxu1 %v8815_v3  ;;  %v9172_v32 = vadd.f32 %v9094_v27, %v3600_v56 }
 0x2f7   : > { %4960 = vmatmul.bf16.gmra.mxu0 %v10454_v34  ;;  %v6341_v34 = vld [vmem:[%s10200_s4 + $0x1c8] sm:$0xff] }
 0x2f8   : > { %4555 = vmatmul.bf16.gmra.mxu2 %v10482_v40  ;;  %5117 = vmatpush.bf16.msra.mxu1 %v6341_v34  ;;  %v9205_v0 = vpop.f32.mrf.mxu0 }
 0x2f9   : > { %10487 = vst [vmem:[#allocation33_spill] sm:$0xff] %v9205_v0  ;;  %v6350_v0 = vld [vmem:[%s10200_s4 + $0x210] sm:$0xff] }
 0x2fa   : > { %5314 = vmatpush.bf16.msra.mxu2 %v6350_v0 }
 0x2fb   : > { %v9188_v27 = vpop.f32.mrf.mxu1 }
 0x2fc   : > { %4144 = vmatmul.bf16.gmra.mxu3 %v9176_v6  ;;  %10483 = vst [vmem:[#allocation14_spill] sm:$0xff] %v9188_v27  ;;  %v9193_v23 = vpop.f32.mrf.mxu2  ;;  %v10486_v27 = vld [vmem:[#allocation19_spill] sm:$0xff]  ;;  %5118 = vmatpush.bf16.msra.mxu1 %v6340_v26  ;;  %v3925_v26 = vrot.slane %v10491_v46, 5 }
 0x2fd   : > { %v3603_v21 = vpop.f32.mrf.mxu3  ;;  %v5926_v24 = vrot.slane %v10486_v27, 9 }
 0x2fe   : > { %v9196_v56 = vadd.f32 %v3836_v38, %v3603_v21 }
 0x2ff   : > { %v3919_v38 = vsel %vm8852_vm15, %v5926_v24, %v3918_v7  ;;  %v6326_v24 = vld [vmem:[%s10200_s4 + $0x150] sm:$0xff]  ;;  %v10492_v7 = vld [vmem:[#allocation18_spill] sm:$0xff] }
 0x300   : > { %v4005_v27 = vunpack.c.l.b16 %v3919_v38  ;;  %v3762_v59 = vadd.f32 %v8844_v1, %v10492_v7  ;;  %4710 = vmatpush.bf16.msra.mxu3 %v6326_v24  ;;  %v3927_v38 = vrot.slane %v3925_v26, 4  ;;  %v10497_v1 = vld [vmem:[#allocation25_spill] sm:$0xff] }
 0x301   : > { %v5927_v7 = vrot.slane %v10497_v1, 9 }
 0x302   : > { %v9216_v12 = vpack.c.b16 %v4006_v9, %v4005_v27  ;;  %v10495_v9 = vld [vmem:[#allocation28_spill] sm:$0xff] }
 0x303   : > { %v9211_v53 = vpop.f32.mrf.mxu1 }
 0x304   : > { %v9209_v34 = vpop.f32.mrf.mxu2  ;;  %10489 = vst [vmem:[#allocation21_spill] sm:$0xff] %v9211_v53 }
 0x305   : > { %10488 = vst [vmem:[#allocation17_spill] sm:$0xff] %v9209_v34  ;;  %v3605_v21 = vpop.f32.mrf.mxu3 }
 0x306   : > { %4376 = vmatmul.bf16.gmra.mxu1 %v9191_v20  ;;  %v9214_v31 = vadd.f32 %v3838_v14, %v3605_v21  ;;  %v3928_v21 = vrot.slane %v10495_v9, 5  ;;  %v10498_v9 = vld [vmem:[#allocation23_spill] sm:$0xff] }
 0x307   : > { %4965 = vmatmul.bf16.gmra.mxu0 %v8738_v62  ;;  %v9228_v62 = vpop.f32.mrf.mxu0 }
 0x308   : > { %4560 = vmatmul.bf16.gmra.mxu2 %v10490_v13  ;;  %10494 = vst [vmem:[#allocation39_spill] sm:$0xff] %v9228_v62  ;;  %v3929_v24 = vsel %vm8852_vm15, %v3927_v38, %v3928_v21  ;;  %v3926_v62 = vsel %vm8852_vm15, %v5927_v7, %v3925_v26  ;;  %v10502_v38 = vld [vmem:[#allocation45_spill] sm:$0xff]  ;;  %v10503_v26 = vld [vmem:[#allocation31_spill] sm:$0xff] }
 0x309   : > { %v4007_v34 = vunpack.c.l.b16 %v3926_v62  ;;  %v3932_v21 = vrot.slane %v10503_v26, 5  ;;  %v10506_v62 = vld [vmem:[#allocation35_spill] sm:$0xff] }
 0x30b   : > { %v9233_v46 = vpop.f32.mrf.mxu1 }
 0x30c   : > { %4149 = vmatmul.bf16.gmra.mxu3 %v9216_v12  ;;  %v9226_v53 = vpop.f32.mrf.mxu2  ;;  %10496 = vst [vmem:[#allocation26_spill] sm:$0xff] %v9233_v46 }
 0x30d   : > { %10493 = vst [vmem:[#allocation19_spill] sm:$0xff] %v9226_v53  ;;  %v4110_v14 = vpop.f32.mrf.mxu3 }
 0x30e   : > { %v9231_v27 = vadd.f32 %v4110_v14, %v3762_v59  ;;  %v3764_v59 = vadd.f32 %v8861_v25, %v10498_v9  ;;  %v4008_v14 = vunpack.c.l.b16 %v3929_v24  ;;  %v10504_v25 = vld [vmem:[#allocation24_spill] sm:$0xff]  ;;  %v3934_v9 = vrot.slane %v3932_v21, 4 }
 0x30f   : > { %v9251_v1 = vpop.f32.mrf.mxu0  ;;  %v3767_v7 = vadd.f32 %v8882_v37, %v10504_v25  ;;  %v10510_v25 = vld [vmem:[#allocation29_spill] sm:$0xff] }
 0x310   : > { %10500 = vst [vmem:[#allocation28_spill] sm:$0xff] %v9251_v1  ;;  %v9253_v48 = vpack.c.b16 %v4008_v14, %v4007_v34  ;;  %v10508_v14 = vld [vmem:[#allocation32_spill] sm:$0xff] }
 0x313   : > { %v9255_v0 = vpop.f32.mrf.mxu1 }
 0x314   : > { %v9246_v46 = vpop.f32.mrf.mxu2  ;;  %10501 = vst [vmem:[#allocation25_spill] sm:$0xff] %v9255_v0  ;;  %v5928_v0 = vrot.slane %v10508_v14, 9 }
 0x315   : > { %10499 = vst [vmem:[#allocation18_spill] sm:$0xff] %v9246_v46 }
 0x316   : > { %5119 = vmatmul.bf16.vlgmr.msra.gmra.mxu1 %v7495_v4  ;;  %v4112_v4 = vpop.f32.mrf.mxu3  ;;  %v3933_v37 = vsel %vm8852_vm15, %v5928_v0, %v3932_v21  ;;  %v10515_v21 = vld [vmem:[#allocation30_spill] sm:$0xff] }
 0x317   : > { %4970 = vmatmul.bf16.gmra.mxu0 %v8815_v3  ;;  %v9249_v53 = vadd.f32 %v4112_v4, %v3764_v59  ;;  %v3935_v59 = vrot.slane %v10506_v62, 5  ;;  %v9268_v34 = vpop.f32.mrf.mxu0  ;;  %v4009_v14 = vunpack.c.l.b16 %v3933_v37 }
 0x318   : > { %4565 = vmatmul.bf16.gmra.mxu2 %v10502_v38  ;;  %10507 = vst [vmem:[#allocation45_spill] sm:$0xff] %v9268_v34 }
 0x319   : > { %v3936_v26 = vsel %vm8852_vm15, %v3934_v9, %v3935_v59  ;;  %v10512_v9 = vld [vmem:[#allocation49_spill] sm:$0xff]  ;;  %v10513_v59 = vld [vmem:[#allocation38_spill] sm:$0xff] }
 0x31a   : > { %v4010_v62 = vunpack.c.l.b16 %v3936_v26 }
 0x31b   : > { %v9273_v1 = vpop.f32.mrf.mxu1 }
 0x31c   : > { %4154 = vmatmul.bf16.gmra.mxu3 %v9253_v48  ;;  %v9262_v24 = vpop.f32.mrf.mxu2  ;;  %10509 = vst [vmem:[#allocation31_spill] sm:$0xff] %v9273_v1  ;;  %v9284_v34 = vpack.c.b16 %v4010_v62, %v4009_v14  ;;  %v3939_v1 = vrot.slane %v10513_v59, 5  ;;  %v10518_v62 = vld [vmem:[#allocation41_spill] sm:$0xff]  ;;  %v6349_v59 = vld [vmem:[%s10200_s4 + $0x208] sm:$0xff] }
 0x31d   : > { %10505 = vst [vmem:[#allocation23_spill] sm:$0xff] %v9262_v24  ;;  %v3769_v24 = vadd.f32 %v8895_v36, %v10510_v25  ;;  %v6325_v36 = vld [vmem:[%s10200_s4 + $0x148] sm:$0xff]  ;;  %5315 = vmatpush.bf16.msra.mxu2 %v6349_v59 }
 0x31e   : > { %v4115_v3 = vpop.f32.mrf.mxu3  ;;  %4711 = vmatpush.bf16.msra.mxu3 %v6325_v36  ;;  %v3941_v25 = vrot.slane %v3939_v1, 4 }
 0x31f   : > { %v9265_v4 = vadd.f32 %v4115_v3, %v3767_v7  ;;  %v9292_v0 = vpop.f32.mrf.mxu0 }
 0x320   : > { %10514 = vst [vmem:[#allocation35_spill] sm:$0xff] %v9292_v0  ;;  %v10520_v0 = vld [vmem:[#allocation37_spill] sm:$0xff] }
 0x323   : > { %v9298_v37 = vpop.f32.mrf.mxu1 }
 0x324   : > { %v9279_v7 = vpop.f32.mrf.mxu2  ;;  %10517 = vst [vmem:[#allocation29_spill] sm:$0xff] %v9298_v37 }
 0x325   : > { %10511 = vst [vmem:[#allocation24_spill] sm:$0xff] %v9279_v7  ;;  %v5929_v7 = vrot.slane %v10520_v0, 9 }
 0x326   : > { %5124 = vmatmul.bf16.gmra.mxu1 %v7589_v8  ;;  %v4117_v3 = vpop.f32.mrf.mxu3 }
 0x327   : > { %4975 = vmatmul.bf16.gmra.mxu0 %v9191_v20  ;;  %v9282_v8 = vadd.f32 %v4117_v3, %v3769_v24  ;;  %v3772_v20 = vadd.f32 %v8910_v35, %v10515_v21  ;;  %v3942_v3 = vrot.slane %v10518_v62, 5  ;;  %v3940_v36 = vsel %vm8852_vm15, %v5929_v7, %v3939_v1  ;;  %v10521_v21 = vld [vmem:[#allocation34_spill] sm:$0xff]  ;;  %v10527_v7 = vld [vmem:[#allocation36_spill] sm:$0xff] }
 0x328   : > { %4570 = vmatmul.bf16.gmra.mxu2 %v10512_v9  ;;  %v3774_v62 = vadd.f32 %v8925_v52, %v10521_v21  ;;  %v4011_v0 = vunpack.c.l.b16 %v3940_v36  ;;  %v10526_v52 = vld [vmem:[#allocation44_spill] sm:$0xff] }
 0x329   : > { %v3943_v35 = vsel %vm8852_vm15, %v3941_v25, %v3942_v3  ;;  %v3946_v1 = vrot.slane %v10526_v52, 5  ;;  %v3777_v3 = vadd.f32 %v8956_v22, %v10527_v7  ;;  %v10532_v7 = vld [vmem:[#allocation40_spill] sm:$0xff] }
 0x32b   : > { %v9321_v46 = vpop.f32.mrf.mxu1  ;;  %v3948_v36 = vrot.slane %v3946_v1, 4 }
 0x32c   : > { %4159 = vmatmul.bf16.gmra.mxu3 %v9284_v34  ;;  %v9296_v24 = vpop.f32.mrf.mxu2  ;;  %10525 = vst [vmem:[#allocation41_spill] sm:$0xff] %v9321_v46  ;;  %v3779_v46 = vadd.f32 %v8985_v10, %v10532_v7  ;;  %v2577_v7 = vrot.slane %v9148_v5, 4 }
 0x32d   : > { %10516 = vst [vmem:[#allocation32_spill] sm:$0xff] %v9296_v24  ;;  %v10524_v24 = vld [vmem:[#allocation22_spill] sm:$0xff] }
 0x32e   : > { %v4120_v26 = vpop.f32.mrf.mxu3 }
 0x32f   : > { %v9301_v14 = vadd.f32 %v4120_v26, %v3772_v20  ;;  %v4012_v20 = vunpack.c.l.b16 %v3943_v35 }
 0x331   : > { %10519 = vst [vmem:[#allocation49_spill] sm:$0xff] %v9301_v14  ;;  %v9323_v25 = vpack.c.b16 %v4012_v20, %v4011_v0  ;;  %v10531_v20 = vld [vmem:[#allocation43_spill] sm:$0xff] }
 0x332   : > { %v5930_v0 = vrot.slane %v10531_v20, 9 }
 0x334   : > { %v9314_v26 = vpop.f32.mrf.mxu2  ;;  %v3947_v22 = vsel %vm8852_vm15, %v5930_v0, %v3946_v1  ;;  %v6324_v1 = vld [vmem:[%s10200_s4 + $0x140] sm:$0xff] }
 0x335   : > { %10522 = vst [vmem:[#allocation38_spill] sm:$0xff] %v9314_v26  ;;  %4712 = vmatpush.bf16.msra.mxu3 %v6324_v1  ;;  %v4415_v1 = vshrl.u32 %v9165_v41, 16 }
 0x336   : > { %5129 = vmatmul.bf16.gmra.mxu1 %v7689_v57  ;;  %v9316_v57 = vpop.f32.mrf.mxu0  ;;  %v4122_v37 = vpop.f32.mrf.mxu3 }
 0x337   : > { %10523 = vst [vmem:[#allocation30_spill] sm:$0xff] %v9316_v57  ;;  %4980 = vmatmul.bf16.gmra.mxu0 %v10524_v24  ;;  %v9319_v14 = vadd.f32 %v4122_v37, %v3774_v62  ;;  %v10529_v24 = vld [vmem:[#allocation47_spill] sm:$0xff]  ;;  %v9336_v62 = vpop.f32.mrf.mxu1  ;;  %v4417_v50 = vrot.slane %v4415_v1, 4 }
 0x338   : > { %4575 = vmatmul.bf16.gmra.mxu2 %v8730_v42  ;;  %v3949_v37 = vrot.slane %v10529_v24, 5  ;;  %10530 = vst [vmem:[#allocation34_spill] sm:$0xff] %v9336_v62  ;;  %v10534_v62 = vld [vmem:[#allocation51_spill] sm:$0xff] }
 0x339   : > { %v3953_v20 = vrot.slane %v10534_v62, 5  ;;  %v2576_v62 = vrot.slane %v9148_v5, 2 }
 0x33a   : > { %v3950_v52 = vsel %vm8852_vm15, %v3948_v36, %v3949_v37  ;;  %v10536_v37 = vld [vmem:[#allocation42_spill] sm:$0xff] }
 0x33b   : > { %v3782_v36 = vadd.f32 %v9002_v44, %v10536_v37  ;;  %v3955_v0 = vrot.slane %v3953_v20, 4  ;;  %v6348_v37 = vld [vmem:[%s10200_s4 + $0x200] sm:$0xff] }
 0x33c   : > { %4164 = vmatmul.bf16.gmra.mxu3 %v9323_v25  ;;  %v9330_v59 = vpop.f32.mrf.mxu2  ;;  %5316 = vmatpush.bf16.msra.mxu2 %v6348_v37 }
 0x33d   : > { %10528 = vst [vmem:[#allocation37_spill] sm:$0xff] %v9330_v59  ;;  %v4014_v59 = vunpack.c.l.b16 %v3950_v52 }
 0x33e   : > { %v4125_v35 = vpop.f32.mrf.mxu3 }
 0x33f   : > { %v9333_v21 = vadd.f32 %v4125_v35, %v3777_v3  ;;  %v9357_v10 = vpop.f32.mrf.mxu1 }
 0x340   : > { %10535 = vst [vmem:[#allocation44_spill] sm:$0xff] %v9357_v10  ;;  %v4418_v10 = vshll.u32 %v9165_v41, 16 }
 0x344   : > { %v9345_v24 = vpop.f32.mrf.mxu2 }
 0x345   : > { %10533 = vst [vmem:[#allocation22_spill] sm:$0xff] %v9345_v24 }
 0x346   : > { %5134 = vmatmul.bf16.gmra.mxu1 %v10441_v11  ;;  %v4127_v3 = vpop.f32.mrf.mxu3  ;;  %v4013_v11 = vunpack.c.l.b16 %v3947_v22 }
 0x347   : > { %v9347_v35 = vadd.f32 %v4127_v3, %v3779_v46  ;;  %v9391_v37 = vpop.f32.mrf.mxu1 }
 0x348   : > { %v9349_v57 = vpack.c.b16 %v4014_v59, %v4013_v11  ;;  %4580 = vmatmul.bf16.gmra.mxu2 %v8818_v29  ;;  %v10538_v59 = vld [vmem:[#allocation54_spill] sm:$0xff]  ;;  %v2578_v11 = vrot.slane %v9148_v5, 6  ;;  %10542 = vst [vmem:[#allocation43_spill] sm:$0xff] %v9391_v37 }
 0x349   : > { %v3956_v52 = vrot.slane %v10538_v59, 5  ;;  %v2812_v59 = vld.sshfl [vmem:[#allocation1] sm:$0xff pattern:$0x73625140] }
 0x34a   : > { %2818 = vst [vmem:[#allocation1] ss:$4 sm:$0xff] %v2576_v62  ;;  %v2929_v5 = vsel %vm2595_vm6, %v2812_v59, 0.0  ;;  %v4420_v62 = vrot.slane %v4418_v10, 5  ;;  %v10543_v10 = vld [vmem:[#allocation48_spill] sm:$0xff] }
 0x34b   : > { %v3957_v44 = vsel %vm8852_vm15, %v3955_v0, %v3956_v52  ;;  %2819 = vst [vmem:[#allocation1 + $0x1] ss:$4 sm:$0xff] %v2577_v7  ;;  %v10541_v0 = vld [vmem:[#allocation46_spill] sm:$0xff]  ;;  %v9386_v41 = vpack.c.bf16 %v2929_v5, %v2929_v5 }
 0x34c   : > { %4169 = vmatmul.bf16.gmra.mxu3 %v9349_v57  ;;  %v9361_v46 = vpop.f32.mrf.mxu2  ;;  %v3784_v52 = vadd.f32 %v9033_v61, %v10541_v0  ;;  %2820 = vst [vmem:[#allocation1 + $0x2] ss:$4 sm:$0xff] %v2578_v11 }
 0x34d   : > { %10537 = vst [vmem:[#allocation36_spill] sm:$0xff] %v9361_v46  ;;  %v10540_v46 = vld [vmem:[#allocation50_spill] sm:$0xff]  ;;  %v4434_v11 = vshll.u32 %v9386_v41, 16 }
 0x34e   : > { %v4130_v22 = vpop.f32.mrf.mxu3  ;;  %v5931_v24 = vrot.slane %v10540_v46, 9  ;;  %2821 = vst [vmem:[#allocation1 + $0x3] ss:$4 sm:$0xff] %v9137_v15  ;;  %v3960_v15 = vrot.slane %v8705_v45, 5 }
 0x34f   : > { %v9366_v3 = vadd.f32 %v4130_v22, %v3782_v36  ;;  %v4428_v36 = vshrl.u32 %v9167_v19, 16 }
 0x350   : > { %v3954_v22 = vsel %vm8852_vm15, %v5931_v24, %v3953_v20  ;;  %v4421_v24 = vor.u32 %v4420_v62, %v4417_v50  ;;  %v9408_v50 = vpop.f32.mrf.mxu1  ;;  %v5932_v62 = vrot.slane %v8712_v63, 9 }
 0x351   : > { %10539 = vst [vmem:[#allocation47_spill] sm:$0xff] %v9366_v3  ;;  %v4016_v3 = vunpack.c.l.b16 %v3957_v44  ;;  %v4015_v61 = vunpack.c.l.b16 %v3954_v22  ;;  %v3787_v44 = vadd.f32 %v9062_v55, %v10543_v10 }
 0x352   : > { %v4422_v5 = vrot.slane %v4421_v24, 4  ;;  %10544 = vst [vmem:[#allocation40_spill] sm:$0xff] %v9408_v50 }
 0x353   : > { %v9395_v0 = vpack.c.b16 %v4016_v3, %v4015_v61 }
 0x354   : > { %v9388_v46 = vpop.f32.mrf.mxu2 }
 0x356   : > { %5139 = vmatmul.bf16.gmra.mxu1 %v10449_v58  ;;  %v4424_v58 = vshll.u32 %v9167_v19, 16  ;;  %v4430_v19 = vrot.slane %v4428_v36, 4  ;;  %v4132_v7 = vpop.f32.mrf.mxu3  ;;  %v4436_v36 = vrot.slane %v4434_v11, 5 }
 0x357   : > { %v9393_v26 = vadd.f32 %v4132_v7, %v3784_v52  ;;  %v3962_v52 = vrot.slane %v3960_v15, 4 }
 0x358   : > { %v4426_v59 = vrot.slane %v4424_v58, 5  ;;  %4585 = vmatmul.bf16.gmra.mxu2 %v8842_v18 }
 0x35a   : > { %v4431_v20 = vor.u32 %v4430_v19, %v4426_v59  ;;  %v3963_v19 = vrot.slane %v8775_v17, 5  ;;  %v4427_v45 = vsel %vm7262_vm13, %v4422_v5, %v4426_v59  ;;  %v3961_v17 = vsel %vm8852_vm15, %v5932_v62, %v3960_v15 }
 0x35b   : > { %v4455_v61 = vunpack.c.l.b16 %v4427_v45  ;;  %v4017_v39 = vunpack.c.l.b16 %v3961_v17  ;;  %v3967_v15 = vrot.slane %v8800_v33, 5 }
 0x35c   : > { %4174 = vmatmul.bf16.gmra.mxu3 %v9395_v0  ;;  %v9403_v1 = vpop.f32.mrf.mxu2  ;;  %v4432_v58 = vrot.slane %v4431_v20, 4  ;;  %v3964_v7 = vsel %vm8852_vm15, %v3962_v52, %v3963_v19  ;;  %v10545_v20 = vld [vmem:[#allocation52_spill] sm:$0xff]  ;;  %v3970_v52 = vrot.slane %v8809_v2, 5  ;;  %v10547_v19 = vld [vmem:[#allocation55_spill] sm:$0xff] }
 0x35d   : > { %v3789_v11 = vadd.f32 %v9111_v16, %v10545_v20 }
 0x35e   : > { %v4437_v55 = vsel %vm7262_vm13, %v4432_v58, %v4436_v36  ;;  %v9430_v58 = vpop.f32.mrf.mxu1 }
 0x35f   : > { %v4135_v3 = vpop.f32.mrf.mxu3  ;;  %v4456_v24 = vunpack.c.l.b16 %v4437_v55  ;;  %10546 = vst [vmem:[#allocation51_spill] sm:$0xff] %v9430_v58  ;;  %v5933_v55 = vrot.slane %v8795_v51, 9 }
 0x360   : > { %v9406_v22 = vadd.f32 %v4135_v3, %v3787_v44  ;;  %v3969_v3 = vrot.slane %v3967_v15, 4 }
 0x361   : > { %v9426_v5 = vpack.c.b16 %v4456_v24, %v4455_v61  ;;  %v3968_v33 = vsel %vm8852_vm15, %v5933_v55, %v3967_v15 }
 0x362   : > { %v3971_v62 = vsel %vm8852_vm15, %v3969_v3, %v3970_v52  ;;  %v4019_v2 = vunpack.c.l.b16 %v3968_v33  ;;  %v10552_v3 = vld [vmem:[#allocation80_spill] sm:$0xff]  ;;  %v10553_v52 = vld [vmem:[#allocation71_spill] sm:$0xff] }
 0x363   : > { %v4020_v17 = vunpack.c.l.b16 %v3971_v62  ;;  %v10554_v62 = vld [vmem:[#allocation61_spill] sm:$0xff] }
 0x364   : > { %v9422_v10 = vpop.f32.mrf.mxu2 }
 0x365   : > { %v9453_v20 = vpack.c.b16 %v4020_v17, %v4019_v2 }
 0x366   : > { %5144 = vmatmul.bf16.gmra.mxu1 %v10459_v47  ;;  %v4018_v47 = vunpack.c.l.b16 %v3964_v7  ;;  %v9445_v7 = vpop.f32.mrf.mxu1 }
 0x367   : > { %v4137_v59 = vpop.f32.mrf.mxu3  ;;  %10548 = vst [vmem:[#allocation42_spill] sm:$0xff] %v9445_v7 }
 0x368   : > { %v9424_v44 = vadd.f32 %v4137_v59, %v3789_v11  ;;  %v9428_v63 = vpack.c.b16 %v4018_v47, %v4017_v39  ;;  %4590 = vmatmul.bf16.gmra.mxu2 %v9426_v5  ;;  %v10550_v47 = vld [vmem:[#allocation58_spill] sm:$0xff] }
 0x36c   : > { %4179 = vmatmul.bf16.gmra.mxu3 %v9428_v63  ;;  %v9435_v16 = vpop.f32.mrf.mxu2 }
 0x36f   : > { %v4140_v36 = vpop.f32.mrf.mxu3 }
 0x370   : > { %v9439_v45 = vadd.f32 %v4140_v36, %v10547_v19 }
 0x374   : > { %v9449_v61 = vpop.f32.mrf.mxu2 }
 0x376   : > { %5149 = vmatmul.bf16.gmra.mxu1 %v10473_v60  ;;  %v9459_v60 = vpop.f32.mrf.mxu1 }
 0x377   : > { %v9451_v24 = vpop.f32.mrf.mxu3  ;;  %10549 = vst [vmem:[#allocation54_spill] sm:$0xff] %v9459_v60  ;;  %v10560_v60 = vld [vmem:[#allocation64_spill] sm:$0xff] }
 0x378   : > { %5317 = vmatmul.bf16.vlgmr.msra.gmra.mxu2 %v8923_v49 }
 0x37c   : > { %4184 = vmatmul.bf16.gmra.mxu3 %v9453_v20  ;;  %v9457_v51 = vpop.f32.mrf.mxu2 }
 0x37e   : > { %v9469_v36 = vpop.f32.mrf.mxu1 }
 0x37f   : > { %v4145_v11 = vpop.f32.mrf.mxu3  ;;  %10551 = vst [vmem:[#allocation50_spill] sm:$0xff] %v9469_v36 }
 0x380   : > { %v9462_v59 = vadd.f32 %v4145_v11, %v10550_v47  ;;  %v10557_v11 = vld [vmem:[#allocation82_spill] sm:$0xff] }
 0x384   : > { %v9465_v39 = vpop.f32.mrf.mxu2 }
 0x386   : > { %5154 = vmatmul.bf16.gmra.mxu1 %v10482_v40  ;;  %v9479_v17 = vpop.f32.mrf.mxu1 }
 0x387   : > { %v9467_v15 = vpop.f32.mrf.mxu3  ;;  %10555 = vst [vmem:[#allocation46_spill] sm:$0xff] %v9479_v17 }
 0x388   : > { %5322 = vmatmul.bf16.gmra.mxu2 %v10552_v3 }
 0x38c   : > { %4713 = vmatmul.bf16.vlgmr.msra.gmra.mxu3 %v10553_v52  ;;  %v9473_v19 = vpop.f32.mrf.mxu2 }
 0x38e   : > { %v9487_v47 = vpop.f32.mrf.mxu1 }
 0x38f   : > { %v4150_v55 = vpop.f32.mrf.mxu3  ;;  %10558 = vst [vmem:[#allocation52_spill] sm:$0xff] %v9487_v47 }
 0x390   : > { %v9476_v33 = vadd.f32 %v4150_v55, %v10554_v62  ;;  %v10562_v62 = vld [vmem:[#allocation66_spill] sm:$0xff] }
 0x394   : > { %v9481_v40 = vpop.f32.mrf.mxu2 }
 0x395   : > { %10556 = vst [vmem:[#allocation48_spill] sm:$0xff] %v9481_v40 }
 0x396   : > { %5159 = vmatmul.bf16.gmra.mxu1 %v10490_v13  ;;  %v10561_v13 = vld [vmem:[#allocation65_spill] sm:$0xff]  ;;  %v9499_v58 = vpop.f32.mrf.mxu1 }
 0x397   : > { %v9483_v2 = vpop.f32.mrf.mxu3  ;;  %v3809_v17 = vadd.f32 %v10562_v62, %v10561_v13  ;;  %10564 = vst [vmem:[#allocation80_spill] sm:$0xff] %v9499_v58  ;;  %v10569_v13 = vld [vmem:[#allocation74_spill] sm:$0xff] }
 0x398   : > { %5327 = vmatmul.bf16.gmra.mxu2 %v10557_v11  ;;  %v10570_v62 = vld [vmem:[#allocation70_spill] sm:$0xff] }
 0x399   : > { %v3814_v58 = vadd.f32 %v10570_v62, %v10569_v13  ;;  %v10575_v13 = vld [vmem:[#allocation3_spill] sm:$0xff]  ;;  %v10576_v62 = vld [vmem:[#allocation77_spill] sm:$0xff] }
 0x39c   : > { %4718 = vmatmul.bf16.gmra.mxu3 %v8923_v49  ;;  %v9489_v52 = vpop.f32.mrf.mxu2  ;;  %v10565_v49 = vld [vmem:[#allocation53_spill] sm:$0xff] }
 0x39d   : > { %10559 = vst [vmem:[#allocation55_spill] sm:$0xff] %v9489_v52 }
 0x39f   : > { %v4155_v36 = vpop.f32.mrf.mxu3 }
 0x3a0   : > { %v9492_v55 = vadd.f32 %v4155_v36, %v10560_v60  ;;  %v10567_v36 = vld [vmem:[#allocation72_spill] sm:$0xff] }
 0x3a4   : > { %v9497_v7 = vpop.f32.mrf.mxu2 }
 0x3a5   : > { %10563 = vst [vmem:[#allocation58_spill] sm:$0xff] %v9497_v7 }
 0x3a6   : > { %5164 = vmatmul.bf16.gmra.mxu1 %v10502_v38  ;;  %v9510_v38 = vpop.f32.mrf.mxu1 }
 0x3a7   : > { %v4157_v50 = vpop.f32.mrf.mxu3  ;;  %10568 = vst [vmem:[#allocation61_spill] sm:$0xff] %v9510_v38 }
 0x3a8   : > { %v9501_v37 = vadd.f32 %v4157_v50, %v3809_v17  ;;  %5332 = vmatmul.bf16.gmra.mxu2 %v10565_v49 }
 0x3ac   : > { %4723 = vmatmul.bf16.gmra.mxu3 %v10552_v3  ;;  %v9505_v47 = vpop.f32.mrf.mxu2 }
 0x3ad   : > { %10566 = vst [vmem:[#allocation71_spill] sm:$0xff] %v9505_v47 }
 0x3ae   : > { %v9519_v40 = vpop.f32.mrf.mxu1 }
 0x3af   : > { %v4160_v60 = vpop.f32.mrf.mxu3 }
 0x3b0   : > { %v9508_v52 = vadd.f32 %v4160_v60, %v10567_v36  ;;  %v10573_v36 = vld [vmem:[#allocation76_spill] sm:$0xff] }
 0x3b4   : > { %v9515_v7 = vpop.f32.mrf.mxu2 }
 0x3b5   : > { %10571 = vst [vmem:[#allocation82_spill] sm:$0xff] %v9515_v7 }
 0x3b6   : > { %5169 = vmatmul.bf16.gmra.mxu1 %v10512_v9  ;;  %v9529_v9 = vpop.f32.mrf.mxu1 }
 0x3b7   : > { %v4162_v50 = vpop.f32.mrf.mxu3 }
 0x3b8   : > { %v9517_v17 = vadd.f32 %v4162_v50, %v3814_v58  ;;  %5337 = vmatmul.bf16.gmra.mxu2 %v9124_v28  ;;  %v3819_v58 = vadd.f32 %v10576_v62, %v10575_v13  ;;  %v10582_v13 = vld [vmem:[#allocation7_spill] sm:$0xff]  ;;  %v10583_v62 = vld [vmem:[#allocation5_spill] sm:$0xff] }
 0x3bc   : > { %4728 = vmatmul.bf16.gmra.mxu3 %v10557_v11  ;;  %v9523_v3 = vpop.f32.mrf.mxu2 }
 0x3bd   : > { %10572 = vst [vmem:[#allocation64_spill] sm:$0xff] %v9523_v3 }
 0x3bf   : > { %v4165_v60 = vpop.f32.mrf.mxu3 }
 0x3c0   : > { %v9526_v38 = vadd.f32 %v4165_v60, %v10573_v36  ;;  %v9541_v60 = vpop.f32.mrf.mxu1 }
 0x3c2   : > { %10574 = vst [vmem:[#allocation65_spill] sm:$0xff] %v9526_v38 }
 0x3c4   : > { %v9533_v50 = vpop.f32.mrf.mxu2 }
 0x3c5   : > { %10577 = vst [vmem:[#allocation66_spill] sm:$0xff] %v9533_v50  ;;  %v3824_v50 = vadd.f32 %v10583_v62, %v10582_v13 }
 0x3c6   : > { %5174 = vmatmul.bf16.gmra.mxu1 %v8730_v42  ;;  %v10580_v42 = vld [vmem:[#allocation11_spill] sm:$0xff] }
 0x3c7   : > { %v4167_v7 = vpop.f32.mrf.mxu3 }
 0x3c8   : > { %v9535_v47 = vadd.f32 %v4167_v7, %v3819_v58  ;;  %5342 = vmatmul.bf16.gmra.mxu2 %v9176_v6 }
 0x3ca   : > { %10578 = vst [vmem:[#allocation53_spill] sm:$0xff] %v9535_v47  ;;  %v9553_v47 = vpop.f32.mrf.mxu1 }
 0x3cc   : > { %4733 = vmatmul.bf16.gmra.mxu3 %v10565_v49  ;;  %v9539_v11 = vpop.f32.mrf.mxu2 }
 0x3cd   : > { %10579 = vst [vmem:[#allocation72_spill] sm:$0xff] %v9539_v11 }
 0x3cf   : > { %v4170_v36 = vpop.f32.mrf.mxu3 }
 0x3d0   : > { %v9544_v3 = vadd.f32 %v4170_v36, %v10580_v42  ;;  %v10587_v42 = vld [vmem:[#allocation6_spill] sm:$0xff] }
 0x3d2   : > { %10581 = vst [vmem:[#allocation74_spill] sm:$0xff] %v9544_v3 }
 0x3d4   : > { %v9549_v38 = vpop.f32.mrf.mxu2 }
 0x3d5   : > { %10584 = vst [vmem:[#allocation70_spill] sm:$0xff] %v9549_v38 }
 0x3d6   : > { %5179 = vmatmul.bf16.gmra.mxu1 %v8818_v29  ;;  %v9563_v29 = vpop.f32.mrf.mxu1 }
 0x3d7   : > { %v4172_v7 = vpop.f32.mrf.mxu3 }
 0x3d8   : > { %v9551_v58 = vadd.f32 %v4172_v7, %v3824_v50  ;;  %5347 = vmatmul.bf16.gmra.mxu2 %v9216_v12 }
 0x3da   : > { %10585 = vst [vmem:[#allocation76_spill] sm:$0xff] %v9551_v58 }
 0x3dc   : > { %4738 = vmatmul.bf16.gmra.mxu3 %v9124_v28  ;;  %v9557_v49 = vpop.f32.mrf.mxu2 }
 0x3dd   : > { %10586 = vst [vmem:[#allocation3_spill] sm:$0xff] %v9557_v49 }
 0x3de   : > { %v9572_v28 = vpop.f32.mrf.mxu1 }
 0x3df   : > { %v4175_v36 = vpop.f32.mrf.mxu3 }
 0x3e0   : > { %v9560_v11 = vadd.f32 %v4175_v36, %v10587_v42 }
 0x3e2   : > { %10588 = vst [vmem:[#allocation77_spill] sm:$0xff] %v9560_v11 }
 0x3e4   : > { %v9565_v13 = vpop.f32.mrf.mxu2 }
 0x3e5   : > { %10589 = vst [vmem:[#allocation11_spill] sm:$0xff] %v9565_v13 }
 0x3e6   : > { %5184 = vmatmul.bf16.gmra.mxu1 %v8842_v18  ;;  %v9582_v13 = vpop.f32.mrf.mxu1 }
 0x3e7   : > { %v4177_v50 = vpop.f32.mrf.mxu3 }
 0x3e8   : > { %v9568_v62 = vadd.f32 %v4177_v50, %v9078_v43  ;;  %5352 = vmatmul.bf16.gmra.mxu2 %v9253_v48 }
 0x3ea   : > { %10590 = vst [vmem:[#allocation7_spill] sm:$0xff] %v9568_v62 }
 0x3ec   : > { %4743 = vmatmul.bf16.gmra.mxu3 %v9176_v6  ;;  %v9574_v7 = vpop.f32.mrf.mxu2 }
 0x3ed   : > { %10591 = vst [vmem:[#allocation5_spill] sm:$0xff] %v9574_v7 }
 0x3ef   : > { %v4180_v36 = vpop.f32.mrf.mxu3 }
 0x3f0   : > { %v9577_v42 = vadd.f32 %v4180_v36, %v9141_v30  ;;  %v9592_v30 = vpop.f32.mrf.mxu1 }
 0x3f2   : > { %10592 = vst [vmem:[#allocation6_spill] sm:$0xff] %v9577_v42  ;;  %v10601_v42 = vld [vmem:[#allocation17_spill] sm:$0xff] }
 0x3f4   : > { %v9580_v18 = vpop.f32.mrf.mxu2 }
 0x3f5   : > { %10593 = vst [vmem:[#allocation83_spill] sm:$0xff] %v9580_v18 }
 0x3f6   : > { %5189 = vmatmul.bf16.gmra.mxu1 %v9426_v5  ;;  %v10596_v5 = vld [vmem:[#allocation2_spill] sm:$0xff] }
 0x3f7   : > { %v4182_v43 = vpop.f32.mrf.mxu3 }
 0x3f8   : > { %v9585_v50 = vadd.f32 %v4182_v43, %v9172_v32  ;;  %5357 = vmatmul.bf16.gmra.mxu2 %v9284_v34  ;;  %v10598_v32 = vld [vmem:[#allocation68_spill] sm:$0xff] }
 0x3f9   : > { %v4382_v43 = vadd.f32 %v10598_v32, %v9231_v27 }
 0x3fa   : > { %10594 = vst [vmem:[#allocation84_spill] sm:$0xff] %v9585_v50 }
 0x3fc   : > { %4748 = vmatmul.bf16.gmra.mxu3 %v9216_v12  ;;  %v5318_v6 = vpop.f32.mrf.mxu2  ;;  %v5526_v12 = vld [vmem:[%s10202_s6 + $0x78] sm:$0xff] }
 0x3fd   : > { %5528 = vmatpush.msrb.mxu3 %v5526_v12 }
 0x3ff   : > { %v4185_v7 = vpop.f32.mrf.mxu3 }
 0x400   : > { %v9590_v49 = vadd.f32 %v4185_v7, %v9196_v56  ;;  %v4596_v56 = vadd.f32 %v9193_v23, %v4382_v43  ;;  %v10603_v43 = vld [vmem:[#allocation16_spill] sm:$0xff] }
 0x402   : > { %10595 = vst [vmem:[#allocation85_spill] sm:$0xff] %v9590_v49 }
 0x404   : > { %v5320_v36 = vpop.f32.mrf.mxu2 }
 0x406   : > { %5194 = vmatmul.bf16.gmra.mxu1 %v10596_v5 }
 0x407   : > { %v4187_v18 = vpop.f32.mrf.mxu3 }
 0x408   : > { %v9596_v38 = vadd.f32 %v4187_v18, %v9214_v31  ;;  %5362 = vmatmul.bf16.gmra.mxu2 %v9323_v25  ;;  %v10599_v31 = vld [vmem:[#allocation69_spill] sm:$0xff] }
 0x409   : > { %v4383_v18 = vadd.f32 %v10599_v31, %v9249_v53  ;;  %v5525_v53 = vld [vmem:[%s10202_s6 + $0x70] sm:$0xff] }
 0x40a   : > { %10597 = vst [vmem:[#allocation2_spill] sm:$0xff] %v9596_v38  ;;  %v10600_v38 = vld [vmem:[#allocation12_spill] sm:$0xff]  ;;  %5529 = vmatpush.msrb.mxu3 %v5525_v53 }
 0x40b   : > { %v4597_v62 = vadd.f32 %v10601_v42, %v4383_v18  ;;  %v9629_v18 = vpop.f32.mrf.mxu0 }
 0x40c   : > { %4753 = vmatmul.bf16.gmra.mxu3 %v9253_v48  ;;  %v5323_v7 = vpop.f32.mrf.mxu2  ;;  %v10602_v48 = vld [vmem:[#allocation73_spill] sm:$0xff] }
 0x40d   : > { %v4384_v23 = vadd.f32 %v10602_v48, %v9265_v4 }
 0x40f   : > { %v4714_v5 = vpop.f32.mrf.mxu3 }
 0x410   : > { %v4794_v49 = vadd.f32 %v4714_v5, %v4596_v56  ;;  %v10606_v56 = vld [vmem:[#allocation33_spill] sm:$0xff] }
 0x412   : > { %v4986_v50 = vadd.f32 %v10600_v38, %v4794_v49  ;;  %v10604_v49 = vld [vmem:[#allocation19_spill] sm:$0xff] }
 0x414   : > { %v5200_v27 = vadd.f32 %v9519_v40, %v4986_v50  ;;  %v5325_v11 = vpop.f32.mrf.mxu2 }
 0x416   : > { %v9610_v32 = vadd.f32 %v5318_v6, %v5200_v27 }
 0x417   : > { %v4716_v12 = vpop.f32.mrf.mxu3 }
 0x418   : > { %v4795_v58 = vadd.f32 %v4716_v12, %v4597_v62  ;;  %5367 = vmatmul.bf16.gmra.mxu2 %v9349_v57  ;;  %v4598_v62 = vadd.f32 %v10604_v49, %v4384_v23  ;;  %v10608_v23 = vld [vmem:[#allocation49_spill] sm:$0xff] }
 0x41a   : > { %v4987_v3 = vadd.f32 %v10603_v43, %v4795_v58  ;;  %v10605_v58 = vld [vmem:[#allocation75_spill] sm:$0xff]  ;;  %v10609_v43 = vld [vmem:[#allocation78_spill] sm:$0xff] }
 0x41b   : > { %v4385_v6 = vadd.f32 %v10605_v58, %v9282_v8  ;;  %v4386_v53 = vadd.f32 %v10609_v43, %v10608_v23 }
 0x41c   : > { %v5201_v40 = vadd.f32 %v9529_v9, %v4987_v3  ;;  %4758 = vmatmul.bf16.gmra.mxu3 %v9284_v34  ;;  %v5328_v42 = vpop.f32.mrf.mxu2  ;;  %v10607_v3 = vld [vmem:[#allocation18_spill] sm:$0xff] }
 0x41d   : > { %v4599_v34 = vadd.f32 %v10607_v3, %v4385_v6  ;;  %v9648_v6 = vpop.f32.mrf.mxu0 }
 0x41e   : > { %v9622_v38 = vadd.f32 %v5320_v36, %v5201_v40  ;;  %v9634_v36 = vpop.f32.mrf.mxu1  ;;  %v10610_v40 = vld [vmem:[#allocation39_spill] sm:$0xff] }
 0x41f   : > { %v4719_v50 = vpop.f32.mrf.mxu3 }
 0x420   : > { %v4796_v4 = vadd.f32 %v4719_v50, %v4598_v62  ;;  %v10611_v62 = vld [vmem:[#allocation23_spill] sm:$0xff] }
 0x421   : > { %v4600_v50 = vadd.f32 %v10611_v62, %v4386_v53 }
 0x422   : > { %v4988_v5 = vadd.f32 %v10606_v56, %v4796_v4 }
 0x424   : > { %v5202_v31 = vadd.f32 %v9541_v60, %v4988_v5  ;;  %v5330_v9 = vpop.f32.mrf.mxu2  ;;  %v5524_v60 = vld [vmem:[%s10202_s6 + $0x68] sm:$0xff] }
 0x425   : > { %5530 = vmatpush.msrb.mxu3 %v5524_v60 }
 0x426   : > { %v9631_v27 = vadd.f32 %v5323_v7, %v5202_v31  ;;  %v9650_v5 = vpop.f32.mrf.mxu1  ;;  %v10612_v31 = vld [vmem:[#allocation79_spill] sm:$0xff] }
 0x427   : > { %v4721_v12 = vpop.f32.mrf.mxu3  ;;  %v4387_v3 = vadd.f32 %v10612_v31, %v9319_v14  ;;  %v5523_v14 = vld [vmem:[%s10202_s6 + $0x60] sm:$0xff] }
 0x428   : > { %v4797_v48 = vadd.f32 %v4721_v12, %v4599_v34  ;;  %5372 = vmatmul.bf16.gmra.mxu2 %v9395_v0  ;;  %v10613_v34 = vld [vmem:[#allocation28_spill] sm:$0xff]  ;;  %5531 = vmatpush.msrb.mxu3 %v5523_v14  ;;  %v10622_v14 = vld [vmem:[#allocation15_spill] sm:$0xff] }
 0x42a   : > { %v4989_v8 = vadd.f32 %v10610_v40, %v4797_v48  ;;  %v9659_v40 = vpop.f32.mrf.mxu0 }
 0x42c   : > { %v5203_v7 = vadd.f32 %v9553_v47, %v4989_v8  ;;  %4763 = vmatmul.bf16.gmra.mxu3 %v9323_v25  ;;  %v5333_v4 = vpop.f32.mrf.mxu2  ;;  %v10614_v25 = vld [vmem:[#allocation24_spill] sm:$0xff]  ;;  %v10615_v8 = vld [vmem:[#allocation81_spill] sm:$0xff] }
 0x42d   : > { %v4388_v60 = vadd.f32 %v10615_v8, %v9333_v21 }
 0x42e   : > { %v9645_v49 = vadd.f32 %v5325_v11, %v5203_v7  ;;  %v4601_v11 = vadd.f32 %v10614_v25, %v4387_v3  ;;  %v10616_v7 = vld [vmem:[#allocation45_spill] sm:$0xff] }
 0x42f   : > { %v4724_v58 = vpop.f32.mrf.mxu3 }
 0x430   : > { %v4798_v56 = vadd.f32 %v4724_v58, %v4600_v50  ;;  %v9667_v50 = vpop.f32.mrf.mxu1  ;;  %v10617_v58 = vld [vmem:[#allocation32_spill] sm:$0xff] }
 0x432   : > { %v4990_v12 = vadd.f32 %v10613_v34, %v4798_v56  ;;  %v4602_v56 = vadd.f32 %v10617_v58, %v4388_v60  ;;  %v10618_v34 = vld [vmem:[#allocation4_spill] sm:$0xff]  ;;  %v10623_v58 = vld [vmem:[#allocation30_spill] sm:$0xff] }
 0x434   : > { %v5204_v47 = vadd.f32 %v9563_v29, %v4990_v12  ;;  %v5335_v23 = vpop.f32.mrf.mxu2  ;;  %v4389_v12 = vadd.f32 %v10618_v34, %v9347_v35 }
 0x436   : > { %v9656_v48 = vadd.f32 %v5328_v42, %v5204_v47  ;;  %v10619_v47 = vld [vmem:[#allocation35_spill] sm:$0xff] }
 0x437   : > { %v4726_v43 = vpop.f32.mrf.mxu3 }
 0x438   : > { %v4799_v53 = vadd.f32 %v4726_v43, %v4601_v11  ;;  %5377 = vmatmul.bf16.gmra.mxu2 %v9428_v63  ;;  %v9678_v11 = vpop.f32.mrf.mxu0 }
 0x43a   : > { %v4991_v62 = vadd.f32 %v10616_v7, %v4799_v53  ;;  %v9681_v53 = vpop.f32.mrf.mxu1 }
 0x43c   : > { %v5205_v29 = vadd.f32 %v9572_v28, %v4991_v62  ;;  %4768 = vmatmul.bf16.gmra.mxu3 %v9349_v57  ;;  %v5338_v21 = vpop.f32.mrf.mxu2  ;;  %v10620_v57 = vld [vmem:[#allocation38_spill] sm:$0xff]  ;;  %v10621_v62 = vld [vmem:[#allocation47_spill] sm:$0xff] }
 0x43e   : > { %v9672_v42 = vadd.f32 %v5330_v9, %v5205_v29  ;;  %v4603_v9 = vadd.f32 %v10620_v57, %v4389_v12  ;;  %v4390_v29 = vadd.f32 %v10622_v14, %v10621_v62 }
 0x43f   : > { %v4729_v31 = vpop.f32.mrf.mxu3 }
 0x440   : > { %v4800_v3 = vadd.f32 %v4729_v31, %v4602_v56  ;;  %v5522_v56 = vld [vmem:[%s10202_s6 + $0x58] sm:$0xff]  ;;  %v10624_v31 = vld [vmem:[#allocation13_spill] sm:$0xff]  ;;  %v9697_v12 = vpop.f32.mrf.mxu0 }
 0x441   : > { %5532 = vmatpush.msrb.mxu3 %v5522_v56 }
 0x442   : > { %v4992_v25 = vadd.f32 %v10619_v47, %v4800_v3  ;;  %v10625_v3 = vld [vmem:[#allocation27_spill] sm:$0xff] }
 0x443   : > { %v6078_v34 = vrot.slane %v10625_v3, 9 }
 0x444   : > { %v5206_v43 = vadd.f32 %v9582_v13, %v4992_v25  ;;  %v5340_v8 = vpop.f32.mrf.mxu2  ;;  %v4631_v13 = vrot.slane %v10624_v31, 5  ;;  %v10626_v25 = vld [vmem:[#allocation37_spill] sm:$0xff] }
 0x446   : > { %v9683_v28 = vadd.f32 %v5333_v4, %v5206_v43  ;;  %v4604_v43 = vadd.f32 %v10626_v25, %v4390_v29 }
 0x447   : > { %v4731_v60 = vpop.f32.mrf.mxu3 }
 0x448   : > { %v4801_v7 = vadd.f32 %v4731_v60, %v4603_v9  ;;  %5382 = vmatmul.bf16.gmra.mxu2 %v9453_v20  ;;  %v4633_v9 = vrot.slane %v4631_v13, 4  ;;  %v4634_v60 = vrot.slane %v9386_v41, 5  ;;  %v10628_v41 = vld [vmem:[#allocation22_spill] sm:$0xff] }
 0x44a   : > { %v4993_v35 = vadd.f32 %v10623_v58, %v4801_v7  ;;  %v5150_v7 = vpop.f32.mrf.mxu1  ;;  %v10627_v58 = vld [vmem:[#allocation8_spill] sm:$0xff] }
 0x44c   : > { %v5207_v4 = vadd.f32 %v9592_v30, %v4993_v35  ;;  %4773 = vmatmul.bf16.gmra.mxu3 %v9395_v0  ;;  %v5343_v57 = vpop.f32.mrf.mxu2  ;;  %v4391_v30 = vadd.f32 %v10627_v58, %v9393_v26  ;;  %v4632_v35 = vsel %vm8852_vm15, %v6078_v34, %v4631_v13 }
 0x44d   : > { %v4653_v56 = vunpack.c.l.b16 %v4632_v35 }
 0x44e   : > { %v9699_v47 = vadd.f32 %v5335_v23, %v5207_v4  ;;  %v4635_v23 = vsel %vm8852_vm15, %v4633_v9, %v4634_v60  ;;  %v4605_v3 = vadd.f32 %v10628_v41, %v4391_v30  ;;  %v10630_v9 = vld [vmem:[#allocation36_spill] sm:$0xff] }
 0x44f   : > { %v4734_v62 = vpop.f32.mrf.mxu3  ;;  %v4654_v31 = vunpack.c.l.b16 %v4635_v23 }
 0x450   : > { %v4802_v14 = vadd.f32 %v4734_v62, %v4604_v43  ;;  %v4938_v62 = vpop.f32.mrf.mxu0 }
 0x452   : > { %v4994_v0 = vadd.f32 %v9629_v18, %v4802_v14  ;;  %v5152_v58 = vpop.f32.mrf.mxu1  ;;  %v4655_v18 = vpack.c.b16 %v4654_v31, %v4653_v56  ;;  %v10629_v14 = vld [vmem:[#allocation20_spill] sm:$0xff] }
 0x453   : > { %v4392_v13 = vadd.f32 %v10629_v14, %v9406_v22 }
 0x454   : > { %v5208_v29 = vadd.f32 %v9634_v36, %v4994_v0  ;;  %v5345_v25 = vpop.f32.mrf.mxu2  ;;  %v5521_v36 = vld [vmem:[%s10202_s6 + $0x50] sm:$0xff] }
 0x455   : > { %5533 = vmatpush.msrb.mxu3 %v5521_v36  ;;  %v4606_v60 = vadd.f32 %v10630_v9, %v4392_v13 }
 0x456   : > { %v9711_v4 = vadd.f32 %v5338_v21, %v5208_v29 }
 0x457   : > { %v4736_v43 = vpop.f32.mrf.mxu3 }
 0x458   : > { %v4803_v26 = vadd.f32 %v4736_v43, %v4605_v3  ;;  %5387 = vmatmul.bf16.gmra.mxu2 %v4655_v18  ;;  %v4941_v22 = vpop.f32.mrf.mxu0  ;;  %v10632_v43 = vld [vmem:[#allocation10_spill] sm:$0xff] }
 0x45a   : > { %v4995_v54 = vadd.f32 %v9648_v6, %v4803_v26  ;;  %v10631_v6 = vld [vmem:[#allocation9_spill] sm:$0xff]  ;;  %v5155_v56 = vpop.f32.mrf.mxu1  ;;  %v4394_v26 = vadd.f32 %v10632_v43, %v9439_v45 }
 0x45b   : > { %v4393_v23 = vadd.f32 %v10631_v6, %v9424_v44  ;;  %v5520_v44 = vld [vmem:[%s10202_s6 + $0x48] sm:$0xff] }
 0x45c   : > { %v5209_v21 = vadd.f32 %v9650_v5, %v4995_v54  ;;  %4778 = vmatmul.bf16.gmra.mxu3 %v9428_v63  ;;  %v5348_v30 = vpop.f32.mrf.mxu2 }
 0x45d   : > { %v4607_v63 = vadd.f32 %v9388_v46, %v4393_v23  ;;  %5534 = vmatpush.msrb.mxu3 %v5520_v44 }
 0x45e   : > { %v9722_v34 = vadd.f32 %v5340_v8, %v5209_v21 }
 0x45f   : > { %v4739_v0 = vpop.f32.mrf.mxu3 }
 0x460   : > { %v4804_v35 = vadd.f32 %v4739_v0, %v4606_v60  ;;  %v4943_v54 = vpop.f32.mrf.mxu0 }
 0x462   : > { %v4996_v29 = vadd.f32 %v9659_v40, %v4804_v35  ;;  %v10633_v40 = vld [vmem:[#allocation67_spill] sm:$0xff]  ;;  %v5157_v36 = vpop.f32.mrf.mxu1  ;;  %v10636_v35 = vld [vmem:[#allocation14_spill] sm:$0xff] }
 0x464   : > { %v5210_v31 = vadd.f32 %v9667_v50, %v4996_v29  ;;  %v5350_v5 = vpop.f32.mrf.mxu2  ;;  %v10634_v50 = vld [vmem:[#allocation57_spill] sm:$0xff] }
 0x466   : > { %v9729_v41 = vadd.f32 %v5343_v57, %v5210_v31  ;;  %v10635_v57 = vld [vmem:[#allocation56_spill] sm:$0xff] }
 0x467   : > { %v4741_v8 = vpop.f32.mrf.mxu3  ;;  %v3794_v13 = vadd.f32 %v10635_v57, %v10634_v50 }
 0x468   : > { %v4805_v3 = vadd.f32 %v4741_v8, %v4607_v63  ;;  %5392 = vmatmul.bf16.gmra.mxu2 %v10633_v40  ;;  %v4946_v31 = vpop.f32.mrf.mxu0 }
 0x469   : > { %v4203_v45 = vadd.f32 %v9451_v24, %v3794_v13 }
 0x46a   : > { %v4997_v14 = vadd.f32 %v9678_v11, %v4805_v3  ;;  %v4608_v11 = vadd.f32 %v9403_v1, %v4394_v26  ;;  %v5160_v8 = vpop.f32.mrf.mxu1  ;;  %v10637_v3 = vld [vmem:[#allocation21_spill] sm:$0xff] }
 0x46b   : > { %v4395_v6 = vadd.f32 %v10636_v35, %v4203_v45  ;;  %v4396_v1 = vadd.f32 %v10637_v3, %v9462_v59  ;;  %v5519_v26 = vld [vmem:[%s10202_s6 + $0x40] sm:$0xff] }
 0x46c   : > { %v5211_v46 = vadd.f32 %v9681_v53, %v4997_v14  ;;  %4783 = vmatmul.bf16.gmra.mxu3 %v9453_v20  ;;  %v5353_v9 = vpop.f32.mrf.mxu2 }
 0x46d   : > { %v4609_v20 = vadd.f32 %v9422_v10, %v4395_v6  ;;  %5535 = vmatpush.msrb.mxu3 %v5519_v26  ;;  %v4610_v40 = vadd.f32 %v9435_v16, %v4396_v1  ;;  %v10641_v6 = vld [vmem:[#allocation25_spill] sm:$0xff] }
 0x46e   : > { %v9744_v21 = vadd.f32 %v5345_v25, %v5211_v46  ;;  %v10640_v46 = vld [vmem:[#allocation26_spill] sm:$0xff]  ;;  %v4398_v16 = vadd.f32 %v10641_v6, %v9476_v33 }
 0x46f   : > { %v4744_v60 = vpop.f32.mrf.mxu3 }
 0x470   : > { %v4806_v0 = vadd.f32 %v4744_v60, %v4608_v11  ;;  %v4948_v59 = vpop.f32.mrf.mxu0  ;;  %v4612_v3 = vadd.f32 %v9457_v51, %v4398_v16  ;;  %v10647_v16 = vld [vmem:[#allocation48_spill] sm:$0xff] }
 0x472   : > { %v4998_v23 = vadd.f32 %v9697_v12, %v4806_v0  ;;  %v10638_v12 = vld [vmem:[#allocation60_spill] sm:$0xff]  ;;  %v5162_v13 = vpop.f32.mrf.mxu1 }
 0x474   : > { %v5212_v29 = vadd.f32 %v5150_v7, %v4998_v23  ;;  %v5355_v53 = vpop.f32.mrf.mxu2  ;;  %v10639_v7 = vld [vmem:[#allocation59_spill] sm:$0xff] }
 0x475   : > { %v3799_v14 = vadd.f32 %v10639_v7, %v10638_v12 }
 0x476   : > { %v9749_v63 = vadd.f32 %v5348_v30, %v5212_v29  ;;  %v5518_v29 = vld [vmem:[%s10202_s6 + $0x38] sm:$0xff] }
 0x477   : > { %v4746_v24 = vpop.f32.mrf.mxu3  ;;  %v4205_v10 = vadd.f32 %v9467_v15, %v3799_v14  ;;  %5536 = vmatpush.msrb.mxu3 %v5518_v29 }
 0x478   : > { %v4807_v25 = vadd.f32 %v4746_v24, %v4609_v20 }
 0x479   : > { %v4397_v45 = vadd.f32 %v10640_v46, %v4205_v10  ;;  %v5517_v46 = vld [vmem:[%s10202_s6 + $0x30] sm:$0xff] }
 0x47a   : > { %v4999_v43 = vadd.f32 %v4938_v62, %v4807_v25  ;;  %v5165_v20 = vpop.f32.mrf.mxu1  ;;  %5537 = vmatpush.msrb.mxu3 %v5517_v46 }
 0x47c   : > { %v5213_v30 = vadd.f32 %v5152_v58, %v4999_v43  ;;  %4788 = vmatmul.bf16.gmra.mxu3 %v4655_v18  ;;  %v5358_v50 = vpop.f32.mrf.mxu2  ;;  %v4611_v58 = vadd.f32 %v9449_v61, %v4397_v45 }
 0x47e   : > { %v9760_v44 = vadd.f32 %v5350_v5, %v5213_v30  ;;  %v4951_v5 = vpop.f32.mrf.mxu0 }
 0x47f   : > { %v4749_v57 = vpop.f32.mrf.mxu3 }
 0x480   : > { %v4808_v62 = vadd.f32 %v4749_v57, %v4610_v40 }
 0x482   : > { %v5000_v11 = vadd.f32 %v4941_v22, %v4808_v62  ;;  %v10642_v22 = vld [vmem:[#allocation63_spill] sm:$0xff]  ;;  %v5167_v30 = vpop.f32.mrf.mxu1 }
 0x484   : > { %v5214_v60 = vadd.f32 %v5155_v56, %v5000_v11  ;;  %v5360_v18 = vpop.f32.mrf.mxu2  ;;  %v10643_v56 = vld [vmem:[#allocation62_spill] sm:$0xff] }
 0x486   : > { %v9764_v0 = vadd.f32 %v5353_v9, %v5214_v60  ;;  %v3804_v9 = vadd.f32 %v10643_v56, %v10642_v22  ;;  %v4953_v7 = vpop.f32.mrf.mxu0 }
 0x487   : > { %v4751_v35 = vpop.f32.mrf.mxu3 }
 0x488   : > { %v4809_v15 = vadd.f32 %v4751_v35, %v4611_v58  ;;  %v4207_v61 = vadd.f32 %v9483_v2, %v3804_v9  ;;  %v10646_v35 = vld [vmem:[#allocation41_spill] sm:$0xff] }
 0x48a   : > { %v5001_v23 = vadd.f32 %v4943_v54, %v4809_v15  ;;  %v10644_v54 = vld [vmem:[#allocation31_spill] sm:$0xff]  ;;  %v5170_v11 = vpop.f32.mrf.mxu1  ;;  %v4401_v15 = vadd.f32 %v10646_v35, %v9501_v37  ;;  %v5516_v37 = vld [vmem:[%s10202_s6 + $0x28] sm:$0xff] }
 0x48b   : > { %v4399_v26 = vadd.f32 %v10644_v54, %v4207_v61  ;;  %5538 = vmatpush.msrb.mxu3 %v5516_v37  ;;  %v10649_v61 = vld [vmem:[#allocation55_spill] sm:$0xff] }
 0x48c   : > { %v5215_v24 = vadd.f32 %v5157_v36, %v5001_v23  ;;  %v5363_v1 = vpop.f32.mrf.mxu2  ;;  %v4615_v23 = vadd.f32 %v10647_v16, %v4401_v15 }
 0x48d   : > { %v4613_v40 = vadd.f32 %v9465_v39, %v4399_v26 }
 0x48e   : > { %v9775_v25 = vadd.f32 %v5355_v53, %v5215_v24  ;;  %v10645_v53 = vld [vmem:[#allocation29_spill] sm:$0xff]  ;;  %v4956_v45 = vpop.f32.mrf.mxu0 }
 0x48f   : > { %v4754_v43 = vpop.f32.mrf.mxu3  ;;  %v4400_v62 = vadd.f32 %v10645_v53, %v9492_v55 }
 0x490   : > { %v4810_v33 = vadd.f32 %v4754_v43, %v4612_v3 }
 0x492   : > { %v5002_v12 = vadd.f32 %v4946_v31, %v4810_v33  ;;  %v9797_v22 = vpop.f32.mrf.mxu1 }
 0x494   : > { %v5216_v14 = vadd.f32 %v5160_v8, %v5002_v12  ;;  %v5365_v57 = vpop.f32.mrf.mxu2 }
 0x496   : > { %v9779_v10 = vadd.f32 %v5358_v50, %v5216_v14  ;;  %v4614_v50 = vadd.f32 %v9473_v19, %v4400_v62  ;;  %v10648_v19 = vld [vmem:[#allocation34_spill] sm:$0xff] }
 0x497   : > { %v4756_v36 = vpop.f32.mrf.mxu3  ;;  %v4402_v56 = vadd.f32 %v10648_v19, %v9508_v52 }
 0x498   : > { %v4811_v2 = vadd.f32 %v4756_v36, %v4613_v40 }
 0x499   : > { %v4616_v3 = vadd.f32 %v10649_v61, %v4402_v56 }
 0x49a   : > { %v5003_v51 = vadd.f32 %v4948_v59, %v4811_v2  ;;  %v9811_v26 = vpop.f32.mrf.mxu1 }
 0x49c   : > { %v5217_v31 = vadd.f32 %v5162_v13, %v5003_v51  ;;  %v5368_v58 = vpop.f32.mrf.mxu2  ;;  %v9795_v13 = vpop.f32.mrf.mxu0 }
 0x49e   : > { %v9787_v8 = vadd.f32 %v5360_v18, %v5217_v31  ;;  %v5514_v31 = vld [vmem:[%s10202_s6 + $0x18] sm:$0xff] }
 0x49f   : > { %v4759_v39 = vpop.f32.mrf.mxu3 }
 0x4a0   : > { %v4812_v60 = vadd.f32 %v4759_v39, %v4614_v50 }
 0x4a2   : > { %v5004_v55 = vadd.f32 %v4951_v5, %v4812_v60  ;;  %v9822_v36 = vpop.f32.mrf.mxu1 }
 0x4a4   : > { %v5218_v59 = vadd.f32 %v5165_v20, %v5004_v55  ;;  %v9804_v5 = vpop.f32.mrf.mxu2  ;;  %v9809_v33 = vpop.f32.mrf.mxu0 }
 0x4a6   : > { %v9792_v6 = vadd.f32 %v5363_v1, %v5218_v59 }
 0x4a7   : > { %v4761_v29 = vpop.f32.mrf.mxu3 }
 0x4a8   : > { %v4813_v18 = vadd.f32 %v4761_v29, %v4615_v23 }
 0x4aa   : > { %v5005_v9 = vadd.f32 %v4953_v7, %v4813_v18  ;;  %v9828_v62 = vpop.f32.mrf.mxu1  ;;  %v5513_v18 = vld [vmem:[%s10202_s6 + $0x10] sm:$0xff] }
 0x4ac   : > { %v5219_v20 = vadd.f32 %v5167_v30, %v5005_v9  ;;  %v9813_v12 = vpop.f32.mrf.mxu2  ;;  %v5515_v30 = vld [vmem:[%s10202_s6 + $0x20] sm:$0xff]  ;;  %v9820_v40 = vpop.f32.mrf.mxu0 }
 0x4ad   : > { %5539 = vmatpush.msrb.mxu3 %v5515_v30 }
 0x4ae   : > { %v9806_v24 = vadd.f32 %v5365_v57, %v5219_v20 }
 0x4af   : > { %v4764_v1 = vpop.f32.mrf.mxu3  ;;  %5540 = vmatpush.msrb.mxu3 %v5514_v31  ;;  %v10655_v31 = vld [vmem:[#allocation65_spill] sm:$0xff] }
 0x4b0   : > { %v4814_v43 = vadd.f32 %v4764_v1, %v4616_v3 }
 0x4b1   : > { %5541 = vmatpush.msrb.mxu3 %v5513_v18 }
 0x4b2   : > { %v5006_v54 = vadd.f32 %v4956_v45, %v4814_v43  ;;  %v9840_v45 = vld [vmem:[%s10201_s5] ss:$0 sm:$0xff]  ;;  %v9850_v60 = vpop.f32.mrf.mxu1  ;;  %v10653_v43 = vld [vmem:[#allocation44_spill] sm:$0xff] }
 0x4b3   : > { %v9858_v35 = vadd.f32 %v9840_v45, %v9631_v27  ;;  %v9871_v16 = vadd.f32 %v9840_v45, %v9656_v48  ;;  %v9878_v23 = vadd.f32 %v9840_v45, %v9672_v42  ;;  %v9895_v42 = vadd.f32 %v9840_v45, %v9699_v47 }
 0x4b4   : > { %v5220_v52 = vadd.f32 %v5170_v11, %v5006_v54  ;;  %v9824_v57 = vpop.f32.mrf.mxu2  ;;  %v9826_v53 = vpop.f32.mrf.mxu0  ;;  %v9846_v11 = vadd.f32 %v9840_v45, %v9622_v38  ;;  %v9866_v38 = vadd.f32 %v9840_v45, %v9645_v49  ;;  %v9883_v49 = vadd.f32 %v9840_v45, %v9683_v28 }
 0x4b5   : > { %v9902_v37 = vadd.f32 %v9840_v45, %v9711_v4  ;;  %v9907_v3 = vadd.f32 %v9840_v45, %v9722_v34  ;;  %v9912_v47 = vadd.f32 %v9840_v45, %v9729_v41  ;;  %v4403_v54 = vadd.f32 %v10653_v43, %v9517_v17  ;;  %v10656_v34 = vld [vmem:[#allocation43_spill] sm:$0xff]  ;;  %v10657_v17 = vld [vmem:[#allocation53_spill] sm:$0xff] }
 0x4b6   : > { %v9815_v7 = vadd.f32 %v5368_v58, %v5220_v52  ;;  %v9854_v58 = vadd.f32 %v9840_v45, %v9610_v32  ;;  %v9919_v4 = vadd.f32 %v9840_v45, %v9744_v21  ;;  %v9930_v41 = vadd.f32 %v9840_v45, %v9749_v63  ;;  %v10662_v63 = vld [vmem:[#allocation71_spill] sm:$0xff] }
 0x4b7   : > { %v4766_v14 = vpop.f32.mrf.mxu3  ;;  %10650 = vst [vmem:[#allocation68_spill] sm:$0xff] %v9902_v37  ;;  %v9940_v43 = vadd.f32 %v9840_v45, %v9760_v44 }
 0x4b8   : > { %v5466_v55 = vadd.f32 %v9846_v11, %v9854_v58  ;;  %10651 = vst [vmem:[#allocation69_spill] sm:$0xff] %v9907_v3 }
 0x4b9   : > { %10652 = vst [vmem:[#allocation12_spill] sm:$0xff] %v9912_v47 }
 0x4ba   : > { %v5467_v59 = vadd.f32 %v5466_v55, %v9858_v35  ;;  %v9890_v19 = vpop.f32.mrf.mxu1  ;;  %10654 = vst [vmem:[#allocation17_spill] sm:$0xff] %v9919_v4  ;;  %v4404_v55 = vadd.f32 %v10656_v34, %v10655_v31  ;;  %v10660_v31 = vld [vmem:[#allocation74_spill] sm:$0xff] }
 0x4bc   : > { %v9832_v46 = vpop.f32.mrf.mxu2  ;;  %v9848_v39 = vpop.f32.mrf.mxu0  ;;  %v5468_v27 = vadd.f32 %v5467_v59, %v9866_v38 }
 0x4be   : > { %v5469_v29 = vadd.f32 %v5468_v27, %v9871_v16 }
 0x4bf   : > { %v4769_v2 = vpop.f32.mrf.mxu3 }
 0x4c0   : > { %v5470_v56 = vadd.f32 %v5469_v29, %v9878_v23  ;;  %v10658_v29 = vld [vmem:[#allocation40_spill] sm:$0xff] }
 0x4c1   : > { %v4405_v18 = vadd.f32 %v10658_v29, %v10657_v17  ;;  %v9951_v17 = vadd.f32 %v9840_v45, %v9764_v0  ;;  %v10663_v29 = vld [vmem:[#allocation82_spill] sm:$0xff]  ;;  %v10667_v0 = vld [vmem:[#allocation64_spill] sm:$0xff] }
 0x4c2   : > { %v5471_v28 = vadd.f32 %v5470_v56, %v9883_v49  ;;  %v9925_v59 = vpop.f32.mrf.mxu1  ;;  %v10659_v56 = vld [vmem:[#allocation58_spill] sm:$0xff] }
 0x4c3   : > { %v4619_v44 = vadd.f32 %v10663_v29, %v4405_v18 }
 0x4c4   : > { %v9860_v15 = vpop.f32.mrf.mxu2  ;;  %v9888_v48 = vpop.f32.mrf.mxu0  ;;  %v5472_v61 = vadd.f32 %v5471_v28, %v9895_v42  ;;  %v4617_v28 = vadd.f32 %v10659_v56, %v4403_v54  ;;  %v5512_v54 = vld [vmem:[%s10202_s6 + $0x8] sm:$0xff]  ;;  %v10664_v56 = vld [vmem:[#allocation76_spill] sm:$0xff] }
 0x4c5   : > { %5542 = vmatpush.msrb.mxu3 %v5512_v54 }
 0x4c6   : > { %v5473_v1 = vadd.f32 %v5472_v61, %v9902_v37 }
 0x4c7   : > { %v9830_v51 = vpop.f32.mrf.mxu3 }
 0x4c8   : > { %v5474_v52 = vadd.f32 %v5473_v1, %v9907_v3  ;;  %v4618_v3 = vadd.f32 %v10662_v63, %v4404_v55 }
 0x4ca   : > { %v5475_v27 = vadd.f32 %v5474_v52, %v9912_v47  ;;  %v10661_v52 = vld [vmem:[#allocation51_spill] sm:$0xff]  ;;  %v4815_v47 = vadd.f32 %v4766_v14, %v4617_v28  ;;  %v9959_v28 = vadd.f32 %v9840_v45, %v9775_v25  ;;  %v9967_v29 = vpop.f32.mrf.mxu1 }
 0x4cb   : > { %v4406_v34 = vadd.f32 %v10661_v52, %v10660_v31  ;;  %v4817_v52 = vadd.f32 %v9830_v51, %v4619_v44  ;;  %v10671_v51 = vld [vmem:[#allocation50_spill] sm:$0xff] }
 0x4cc   : > { %v9897_v9 = vpop.f32.mrf.mxu2  ;;  %v9921_v30 = vpop.f32.mrf.mxu0  ;;  %v5476_v1 = vadd.f32 %v5475_v27, %v9919_v4  ;;  %v4816_v27 = vadd.f32 %v4769_v2, %v4618_v3  ;;  %v10665_v4 = vld [vmem:[#allocation42_spill] sm:$0xff]  ;;  %10666 = vst [vmem:[#allocation73_spill] sm:$0xff] %v9959_v28  ;;  %v10668_v2 = vld [vmem:[#allocation77_spill] sm:$0xff] }
 0x4cd   : > { %v4407_v31 = vadd.f32 %v10665_v4, %v10664_v56  ;;  %v4620_v63 = vadd.f32 %v10667_v0, %v4406_v34  ;;  %v10669_v3 = vld [vmem:[#allocation54_spill] sm:$0xff] }
 0x4ce   : > { %v5477_v37 = vadd.f32 %v5476_v1, %v9930_v41  ;;  %v5007_v1 = vadd.f32 %v9795_v13, %v4815_v47  ;;  %v4408_v18 = vadd.f32 %v10669_v3, %v10668_v2  ;;  %v5008_v25 = vadd.f32 %v9809_v33, %v4816_v27  ;;  %v10670_v47 = vld [vmem:[#allocation7_spill] sm:$0xff]  ;;  %v10672_v34 = vld [vmem:[#allocation66_spill] sm:$0xff] }
 0x4cf   : > { %v9842_v50 = vpop.f32.mrf.mxu3  ;;  %v4409_v44 = vadd.f32 %v10671_v51, %v10670_v47  ;;  %v4621_v56 = vadd.f32 %v10672_v34, %v4407_v31  ;;  %v10673_v33 = vld [vmem:[#allocation6_spill] sm:$0xff]  ;;  %v10675_v47 = vld [vmem:[#allocation72_spill] sm:$0xff] }
 0x4d0   : > { %v5478_v14 = vadd.f32 %v5477_v37, %v9940_v43  ;;  %v9971_v37 = vadd.f32 %v9840_v45, %v9779_v10  ;;  %v4818_v4 = vadd.f32 %v9842_v50, %v4620_v63  ;;  %v5221_v2 = vadd.f32 %v9797_v22, %v5007_v1  ;;  %v10674_v50 = vld [vmem:[#allocation46_spill] sm:$0xff]  ;;  %v10677_v1 = vld [vmem:[#allocation52_spill] sm:$0xff] }
 0x4d1   : > { %v5009_v10 = vadd.f32 %v9820_v40, %v4817_v52  ;;  %v4410_v27 = vadd.f32 %v10674_v50, %v10673_v33  ;;  %v4622_v51 = vadd.f32 %v10675_v47, %v4408_v18  ;;  %v10676_v40 = vld [vmem:[#allocation84_spill] sm:$0xff]  ;;  %v10004_v18 = vadd.f32 %v9840_v45, %v9806_v24 }
 0x4d2   : > { %v5479_v54 = vadd.f32 %v5478_v14, %v9951_v17  ;;  %v9981_v14 = vadd.f32 %v9840_v45, %v9787_v8  ;;  %v5222_v8 = vadd.f32 %v9811_v26, %v5008_v25  ;;  %v5010_v22 = vadd.f32 %v9826_v53, %v4818_v4  ;;  %v10679_v53 = vld [vmem:[#allocation3_spill] sm:$0xff]  ;;  %v10682_v47 = vld [vmem:[#allocation80_spill] sm:$0xff] }
 0x4d3   : > { %v4411_v52 = vadd.f32 %v10677_v1, %v10676_v40  ;;  %v4624_v4 = vadd.f32 %v10679_v53, %v4410_v27 }
 0x4d4   : > { %v9935_v21 = vpop.f32.mrf.mxu2  ;;  %v4976_v55 = vpop.f32.mrf.mxu0  ;;  %v5480_v0 = vadd.f32 %v5479_v54, %v9959_v28  ;;  %v9994_v54 = vadd.f32 %v9840_v45, %v9792_v6  ;;  %v10678_v28 = vld [vmem:[#allocation70_spill] sm:$0xff]  ;;  %v5223_v6 = vadd.f32 %v9822_v36, %v5009_v10  ;;  %v5224_v24 = vadd.f32 %v9828_v62, %v5010_v22 }
 0x4d5   : > { %v4623_v33 = vadd.f32 %v10678_v28, %v4409_v44  ;;  %v10013_v28 = vadd.f32 %v9840_v45, %v9815_v7  ;;  %v5420_v44 = vadd.f32 %v9813_v12, %v5222_v8  ;;  %v10681_v7 = vld [vmem:[#allocation85_spill] sm:$0xff] }
 0x4d6   : > { %v5481_v31 = vadd.f32 %v5480_v0, %v9971_v37  ;;  %v5422_v22 = vadd.f32 %v9832_v46, %v5224_v24 }
 0x4d7   : > { %v9873_v32 = vpop.f32.mrf.mxu3  ;;  %v10033_v8 = vadd.f32 %v9840_v45, %v5420_v44 }
 0x4d8   : > { %v4819_v63 = vadd.f32 %v9873_v32, %v4621_v56  ;;  %v5482_v32 = vadd.f32 %v5481_v31, %v9981_v14  ;;  %v5419_v56 = vadd.f32 %v9804_v5, %v5221_v2  ;;  %v10680_v2 = vld [vmem:[#allocation11_spill] sm:$0xff]  ;;  %v10046_v46 = vadd.f32 %v9840_v45, %v5422_v22 }
 0x4da   : > { %v5011_v26 = vadd.f32 %v9848_v39, %v4819_v63  ;;  %v4625_v39 = vadd.f32 %v10680_v2, %v4411_v52  ;;  %v10021_v27 = vadd.f32 %v9840_v45, %v5419_v56  ;;  %v5421_v63 = vadd.f32 %v9824_v57, %v5223_v6 }
 0x4dc   : > { %v9985_v3 = vpop.f32.mrf.mxu2  ;;  %v4978_v0 = vpop.f32.mrf.mxu0  ;;  %v5225_v12 = vadd.f32 %v9850_v60, %v5011_v26 }
 0x4de   : > { %v5423_v52 = vadd.f32 %v9860_v15, %v5225_v12  ;;  %v10686_v12 = vld [vmem:[#allocation83_spill] sm:$0xff] }
 0x4df   : > { %v4779_v20 = vpop.f32.mrf.mxu3 }
 0x4e0   : > { %v4820_v34 = vadd.f32 %v4779_v20, %v4622_v51  ;;  %v5483_v20 = vadd.f32 %v5482_v32, %v9994_v54  ;;  %v4412_v51 = vadd.f32 %v10682_v47, %v10681_v7  ;;  %v10683_v32 = vld [vmem:[#allocation5_spill] sm:$0xff]  ;;  %v10054_v44 = vadd.f32 %v9840_v45, %v5423_v52 }
 0x4e2   : > { %v5012_v5 = vadd.f32 %v9888_v48, %v4820_v34  ;;  %v5484_v10 = vadd.f32 %v5483_v20, %v10004_v18  ;;  %v5511_v48 = vld [vmem:[%s10202_s6] sm:$0xff]  ;;  %v4626_v56 = vadd.f32 %v10683_v32, %v4412_v51  ;;  %v5559_v32 = vld [vmem:[%s10204_s8 + $0x50] sm:$0xff] }
 0x4e3   : > { %5543 = vmatpush.msrb.mxu3 %v5511_v48  ;;  %v10685_v20 = vld [vmem:[#allocation61_spill] sm:$0xff] }
 0x4e4   : > { %v5390_v57 = vpop.f32.mrf.mxu2  ;;  %v5226_v40 = vadd.f32 %v9890_v19, %v5012_v5  ;;  %v4981_v26 = vpop.f32.mrf.mxu0 }
 0x4e7   : > { %v4781_v61 = vpop.f32.mrf.mxu3 }
 0x4e8   : > { %v4821_v25 = vadd.f32 %v4781_v61, %v4623_v33  ;;  %v5192_v61 = vpop.f32.mrf.mxu1 }
 0x4ea   : > { %v5013_v62 = vadd.f32 %v9921_v30, %v4821_v25  ;;  %v10039_v30 = vadd.f32 %v9840_v45, %v5421_v63  ;;  %v5562_v63 = vld [vmem:[%s10204_s8 + $0x68] sm:$0xff] }
 0x4ec   : > { %v5227_v34 = vadd.f32 %v9925_v59, %v5013_v62  ;;  %v5393_v2 = vpop.f32.mrf.mxu2 }
 0x4ee   : > { %v5425_v24 = vadd.f32 %v9935_v21, %v5227_v34 }
 0x4ef   : > { %v4784_v13 = vpop.f32.mrf.mxu3 }
 0x4f0   : > { %v4822_v36 = vadd.f32 %v4784_v13, %v4624_v4  ;;  %v5485_v13 = vadd.f32 %v5484_v10, %v10013_v28  ;;  %v10684_v4 = vld [vmem:[#allocation2_spill] sm:$0xff]  ;;  %v10073_v47 = vadd.f32 %v9840_v45, %v5425_v24  ;;  %v5556_v24 = vld [vmem:[%s10204_s8 + $0x38] sm:$0xff] }
 0x4f1   : > { %v4413_v15 = vadd.f32 %v10685_v20, %v10684_v4 }
 0x4f2   : > { %v5014_v1 = vadd.f32 %v4976_v55, %v4822_v36  ;;  %v5486_v60 = vadd.f32 %v5485_v13, %v10021_v27  ;;  %v5424_v55 = vadd.f32 %v9897_v9, %v5226_v40  ;;  %v5564_v9 = vld [vmem:[%s10204_s8 + $0x78] sm:$0xff] }
 0x4f3   : > { %5566 = vmatpush.msra.mxu3 %v5564_v9  ;;  %v4627_v62 = vadd.f32 %v10686_v12, %v4413_v15  ;;  %v5557_v15 = vld [vmem:[%s10204_s8 + $0x40] sm:$0xff]  ;;  %v5555_v9 = vld [vmem:[%s10204_s8 + $0x30] sm:$0xff] }
 0x4f4   : > { %v5487_v6 = vadd.f32 %v5486_v60, %v10033_v8  ;;  %v5228_v25 = vadd.f32 %v9967_v29, %v5014_v1  ;;  %v5563_v29 = vld [vmem:[%s10204_s8 + $0x70] sm:$0xff]  ;;  %v5560_v1 = vld [vmem:[%s10204_s8 + $0x58] sm:$0xff] }
 0x4f5   : > { %5567 = vmatpush.msra.mxu3 %v5563_v29 }
 0x4f6   : > { %v5488_v59 = vadd.f32 %v5487_v6, %v10039_v30  ;;  %v5426_v10 = vadd.f32 %v9985_v3, %v5228_v25  ;;  %v5561_v3 = vld [vmem:[%s10204_s8 + $0x60] sm:$0xff]  ;;  %v5395_v25 = vpop.f32.mrf.mxu2 }
 0x4f7   : > { %v4786_v50 = vpop.f32.mrf.mxu3  ;;  %5568 = vmatpush.msra.mxu3 %v5562_v63 }
 0x4f8   : > { %v4823_v31 = vadd.f32 %v4786_v50, %v4625_v39  ;;  %v5489_v36 = vadd.f32 %v5488_v59, %v10046_v46  ;;  %v10065_v39 = vadd.f32 %v9840_v45, %v5424_v55  ;;  %v10081_v13 = vadd.f32 %v9840_v45, %v5426_v10  ;;  %v5558_v55 = vld [vmem:[%s10204_s8 + $0x48] sm:$0xff]  ;;  %v5553_v10 = vld [vmem:[%s10204_s8 + $0x20] sm:$0xff] }
 0x4f9   : > { %5569 = vmatpush.msra.mxu3 %v5561_v3 }
 0x4fa   : > { %v5015_v33 = vadd.f32 %v4978_v0, %v4823_v31  ;;  %v5195_v0 = vpop.f32.mrf.mxu1  ;;  %v5490_v7 = vadd.f32 %v5489_v36, %v10054_v44  ;;  %v5554_v36 = vld [vmem:[%s10204_s8 + $0x28] sm:$0xff] }
 0x4fb   : > { %5570 = vmatpush.msra.mxu3 %v5560_v1 }
 0x4fc   : > { %v5229_v50 = vadd.f32 %v5192_v61, %v5015_v33  ;;  %v6668_v61 = vmov 256.0   ;;  %v5491_v48 = vadd.f32 %v5490_v7, %v10065_v39 }
 0x4fd   : > { %6646 = vrcp.f32 %v6668_v61  ;;  %5571 = vmatpush.msra.mxu3 %v5559_v32  ;;  %v5552_v61 = vld [vmem:[%s10204_s8 + $0x18] sm:$0xff] }
 0x4fe   : > { %v5427_v51 = vadd.f32 %v5390_v57, %v5229_v50  ;;  %v4983_v57 = vpop.f32.mrf.mxu0  ;;  %v5492_v52 = vadd.f32 %v5491_v48, %v10073_v47  ;;  %v5550_v48 = vld [vmem:[%s10204_s8 + $0x8] sm:$0xff] }
 0x4ff   : > { %v4789_v19 = vpop.f32.mrf.mxu3  ;;  %5572 = vmatpush.msra.mxu3 %v5558_v55 }
 0x500   : > { %v4824_v53 = vadd.f32 %v4789_v19, %v4626_v56  ;;  %v10088_v34 = vadd.f32 %v9840_v45, %v5427_v51  ;;  %v5493_v6 = vadd.f32 %v5492_v52, %v10081_v13  ;;  %v5565_v52 = vld [vmem:[%s10205_s9] sm:$0x1] }
 0x501   : > { %5573 = vmatpush.msra.mxu3 %v5557_v15 }
 0x502   : > { %v5016_v5 = vadd.f32 %v4981_v26, %v4824_v53  ;;  %v5197_v56 = vpop.f32.mrf.mxu1  ;;  %v5494_v4 = vadd.f32 %v5493_v6, %v10088_v34 }
 0x503   : > { %v6647_v60 = vpop.eup %6646  ;;  %5574 = vmatpush.msra.mxu3 %v5556_v24 }
 0x504   : > { %v5230_v21 = vadd.f32 %v5195_v0, %v5016_v5  ;;  %v5504_v53 = vmul.f32 256.0, %v6647_v60  ;;  %vm5508_vm13 = vweird.f32 %v6647_v60 }
 0x505   : > { %5575 = vmatpush.msra.mxu3 %v5555_v9 }
 0x506   : > { %v5428_v22 = vadd.f32 %v5393_v2, %v5230_v21  ;;  %v5505_v50 = vsub.f32 1.0, %v5504_v53 }
 0x507   : > { %v4791_v31 = vpop.f32.mrf.mxu3  ;;  %5576 = vmatpush.msra.mxu3 %v5554_v36 }
 0x508   : > { %v4825_v40 = vadd.f32 %v4791_v31, %v4627_v62  ;;  %v10095_v26 = vadd.f32 %v9840_v45, %v5428_v22  ;;  %v5551_v31 = vld [vmem:[%s10204_s8 + $0x10] sm:$0xff]  ;;  %v5549_v22 = vld [vmem:[%s10204_s8] sm:$0xff] }
 0x509   : > { %5577 = vmatpush.msra.mxu3 %v5553_v10 }
 0x50a   : > { %v5017_v33 = vadd.f32 %v4983_v57, %v4825_v40  ;;  %v5495_v59 = vadd.f32 %v5494_v4, %v10095_v26  ;;  %v5527_v40 = vld [vmem:[%s10203_s7] sm:$0x1] }
 0x50b   : > { %5578 = vmatpush.msra.mxu3 %v5552_v61 }
 0x50c   : > { %v5231_v19 = vadd.f32 %v5197_v56, %v5017_v33 }
 0x50d   : > { %5579 = vmatpush.msra.mxu3 %v5551_v31 }
 0x50e   : > { %v5429_v20 = vadd.f32 %v5395_v25, %v5231_v19 }
 0x50f   : > { %5580 = vmatpush.msra.mxu3 %v5550_v48  ;;  %v10691_v48 = vld [vmem:[#allocation73_spill] sm:$0xff] }
 0x510   : > { %v10106_v0 = vadd.f32 %v9840_v45, %v5429_v20  ;;  %v5506_v45 = vmul.f32 %v6647_v60, %v5505_v50 }
 0x511   : > { %5581 = vmatpush.msra.mxu3 %v5549_v22 }
 0x512   : > { %v5496_v5 = vadd.f32 %v5495_v59, %v10106_v0  ;;  %v5507_v63 = vadd.f32 %v6647_v60, %v5506_v45 }
 0x514   : > { %v5497_v29 = vrot.slane %v5496_v5, 4  ;;  %v5509_v12 = vsel %vm5508_vm13, %v6647_v60, %v5507_v63 }
 0x516   : > { %v5498_v2 = vadd.f32 %v5497_v29, %v5496_v5 }
 0x518   : > { %v5499_v21 = vrot.slane %v5498_v2, 2 }
 0x51a   : > { %v5500_v7 = vadd.f32 %v5499_v21, %v5498_v2 }
 0x51c   : > { %v5501_v51 = vrot.slane %v5500_v7, 1 }
 0x51e   : > { %v5502_v62 = vadd.f32 %v5501_v51, %v5500_v7  ;;  %v10687_v7 = vld [vmem:[#allocation68_spill] sm:$0xff] }
 0x520   : > { %v5510_v3 = vmul.f32 %v5509_v12, %v5502_v62  ;;  %v10688_v12 = vld [vmem:[#allocation69_spill] sm:$0xff] }
 0x522   : > { %5544 = vmatmul.f32.vlgmr.msrb.gmra.mxu3 %v5510_v3 }
 0x5a5   : > { %v5545_v1 = vpop.f32.mrf.mxu3 }
 0x5a6   : > { %v5546_v57 = vadd.f32 %v5545_v1, %v5527_v40 }
 0x5a8   : > { %v5548_v60 = vmax.f32 %v5546_v57, 0.0 }
 0x5aa   : > { %5582 = vmatmul.f32.vlgmr.msra.gmra.mxu3 %v5548_v60 }
 0x62d   : > { %v5583_v33 = vpop.f32.mrf.mxu3 }
 0x62e   : > { %v5584_v32 = vadd.f32 %v5583_v33, %v5565_v52 }
 0x630   : > { %v6272_v56 = vmul.f32 -1.442695, %v5584_v32 }
 0x632   : > { %6648 = vpow2.f32 %v6272_v56 }
 0x638   : > { %v6649_v6 = vpop.eup %6648 }
 0x639   : > { %v5589_v19 = vadd.f32 1.0, %v6649_v6 }
 0x63b   : > { %6650 = vrcp.f32 %v5589_v19  ;;  %v5601_v4 = vand.u32 2147483648, %v5589_v19  ;;  %v5599_v15 = vand.u32 2147483647, %v5589_v19  ;;  %vm5595_vm6 = vweird.f32 %v5589_v19 }
 0x63d   : > { %v5602_v24 = vor.u32 1.1754944e-38, %v5601_v4  ;;  %vm5600_vm2 = vcmp.eq.f32.partialorder %v5599_v15, 8.507059e+37 }
 0x641   : > { %v6651_v55 = vpop.eup %6650 }
 0x642   : > { %v5591_v25 = vmul.f32 %v6651_v55, %v5589_v19  ;;  %vm5596_vm1 = vweird.f32 %v6651_v55 }
 0x643   : > { %vm5597_vm15 = vmor %vm5595_vm6, %vm5596_vm1 }
 0x644   : > { %v5592_v53 = vsub.f32 1.0, %v5591_v25 }
 0x646   : > { %v5593_v20 = vmul.f32 %v6651_v55, %v5592_v53 }
 0x648   : > { %v5594_v59 = vadd.f32 %v6651_v55, %v5593_v20 }
 0x64a   : > { %v5598_v50 = vsel %vm5597_vm15, %v6651_v55, %v5594_v59 }
 0x64b   : > { %v5603_v5 = vsel %vm5600_vm2, %v5602_v24, %v5598_v50 }
 0x64c   : > { %v5605_v9 = vperm.slane %v5603_v5, 0 }
 0x64e   : > { %v5606_v29 = vmul.f32 %v5605_v9, %v9854_v58  ;;  %v5607_v36 = vmul.f32 %v5605_v9, %v9846_v11  ;;  %v5608_v45 = vmul.f32 %v5605_v9, %v9858_v35  ;;  %v5609_v2 = vmul.f32 %v5605_v9, %v9866_v38  ;;  %v10689_v11 = vld [vmem:[#allocation12_spill] sm:$0xff]  ;;  %v10690_v35 = vld [vmem:[#allocation17_spill] sm:$0xff] }
 0x64f   : > { %v5610_v10 = vmul.f32 %v5605_v9, %v9871_v16  ;;  %v5611_v21 = vmul.f32 %v5605_v9, %v9878_v23  ;;  %v5612_v61 = vmul.f32 %v5605_v9, %v9883_v49  ;;  %v5613_v63 = vmul.f32 %v5605_v9, %v9895_v42 }
 0x650   : > { %v5614_v51 = vmul.f32 %v5605_v9, %v10687_v7  ;;  %v5615_v62 = vmul.f32 %v5605_v9, %v10688_v12  ;;  %v5616_v58 = vmul.f32 %v5605_v9, %v10689_v11  ;;  %v5617_v38 = vmul.f32 %v5605_v9, %v10690_v35 }
 0x651   : > { %v5618_v16 = vmul.f32 %v5605_v9, %v9930_v41  ;;  %v5619_v23 = vmul.f32 %v5605_v9, %v9940_v43  ;;  %v6359_v49 = vpack.c.bf16 %v5607_v36, %v5606_v29  ;;  %v6364_v42 = vpack.c.bf16 %v5609_v2, %v5608_v45 }
 0x652   : > { %v6369_v3 = vpack.c.bf16 %v5611_v21, %v5610_v10  ;;  %v5620_v31 = vmul.f32 %v5605_v9, %v9951_v17  ;;  %v5621_v22 = vmul.f32 %v5605_v9, %v10691_v48  ;;  %v6374_v40 = vpack.c.bf16 %v5613_v63, %v5612_v61 }
 0x653   : > { %v5622_v1 = vmul.f32 %v5605_v9, %v9971_v37  ;;  %v5623_v57 = vmul.f32 %v5605_v9, %v9981_v14  ;;  %6360 = vst [vmem:[%s10153_s14] sm:$0xff] %v6359_v49   ;;  %v6379_v60 = vpack.c.bf16 %v5615_v62, %v5614_v51  ;;  %v5624_v41 = vmul.f32 %v5605_v9, %v9994_v54 }
 0x654   : > { %v5625_v43 = vmul.f32 %v5605_v9, %v10004_v18  ;;  %6436 = vst [vmem:[%s10153_s14 + $0x8] sm:$0xff] %v6364_v42   ;;  %v6384_v52 = vpack.c.bf16 %v5617_v38, %v5616_v58  ;;  %v5626_v17 = vmul.f32 %v5605_v9, %v10013_v28  ;;  %v5627_v33 = vmul.f32 %v5605_v9, %v10021_v27 }
 0x655   : > { %6437 = vst [vmem:[%s10153_s14 + $0x10] sm:$0xff] %v6369_v3   ;;  %v6389_v32 = vpack.c.bf16 %v5619_v23, %v5618_v16  ;;  %v5628_v37 = vmul.f32 %v5605_v9, %v10033_v8  ;;  %v5629_v14 = vmul.f32 %v5605_v9, %v10039_v30  ;;  %v6394_v56 = vpack.c.bf16 %v5621_v22, %v5620_v31 }
 0x656   : > { %6438 = vst [vmem:[%s10153_s14 + $0x18] sm:$0xff] %v6374_v40   ;;  %v5630_v54 = vmul.f32 %v5605_v9, %v10046_v46  ;;  %v5631_v18 = vmul.f32 %v5605_v9, %v10054_v44  ;;  %v6399_v28 = vpack.c.bf16 %v5623_v57, %v5622_v1  ;;  %v5632_v27 = vmul.f32 %v5605_v9, %v10065_v39 }
 0x657   : > { %6439 = vst [vmem:[%s10153_s14 + $0x20] sm:$0xff] %v6379_v60   ;;  %v5633_v6 = vmul.f32 %v5605_v9, %v10073_v47  ;;  %v6404_v8 = vpack.c.bf16 %v5625_v43, %v5624_v41  ;;  %v5634_v30 = vmul.f32 %v5605_v9, %v10081_v13  ;;  %v5635_v19 = vmul.f32 %v5605_v9, %v10088_v34 }
 0x658   : > { %6440 = vst [vmem:[%s10153_s14 + $0x28] sm:$0xff] %v6384_v52   ;;  %v6409_v46 = vpack.c.bf16 %v5627_v33, %v5626_v17  ;;  %v5636_v44 = vmul.f32 %v5605_v9, %v10095_v26  ;;  %v5637_v39 = vmul.f32 %v5605_v9, %v10106_v0  ;;  %v6414_v55 = vpack.c.bf16 %v5629_v14, %v5628_v37 }
 0x659   : > { %6441 = vst [vmem:[%s10153_s14 + $0x30] sm:$0xff] %v6389_v32   ;;  %v6419_v47 = vpack.c.bf16 %v5631_v18, %v5630_v54  ;;  %v6424_v25 = vpack.c.bf16 %v5633_v6, %v5632_v27  ;;  %v6429_v13 = vpack.c.bf16 %v5635_v19, %v5634_v30 }
 0x65a   : > { %6442 = vst [vmem:[%s10153_s14 + $0x38] sm:$0xff] %v6394_v56   ;;  %v6434_v53 = vpack.c.bf16 %v5637_v39, %v5636_v44 }
 0x65b   : > { %6443 = vst [vmem:[%s10153_s14 + $0x40] sm:$0xff] %v6399_v28  }
 0x65c   : > { %6444 = vst [vmem:[%s10153_s14 + $0x48] sm:$0xff] %v6404_v8  }
 0x65d   : > { %6445 = vst [vmem:[%s10153_s14 + $0x50] sm:$0xff] %v6409_v46  }
 0x65e   : > { %6446 = vst [vmem:[%s10153_s14 + $0x58] sm:$0xff] %v6414_v55  }
 0x65f   : > { %6447 = vst [vmem:[%s10153_s14 + $0x60] sm:$0xff] %v6419_v47  }
 0x660   : > { %6448 = vst [vmem:[%s10153_s14 + $0x68] sm:$0xff] %v6424_v25  }
 0x661   : > { %6449 = vst [vmem:[%s10153_s14 + $0x70] sm:$0xff] %v6429_v13  }
 0x662   : > { %6450 = vst [vmem:[%s10153_s14 + $0x78] sm:$0xff] %v6434_v53  }
 0x663 PF: > { %s20_s13 = sadd.s32 1, %s6664_s13  }
 0x664   : > { %p17_p4 = scmp.ge.s32.totalorder %s20_s13, 4  }
 0x666   :  { %19 = sbr.rel (!%p17_p4) target bundleno = 1 (0x1), region = 112 }

</bundles_post_ra>
